<compile_context>
chip_gen: v7x
topology: tpu7x:2x2x1
jax: 0.10.0
libtpu: 0.0.40
codegen_flags: <defaults>
</compile_context>

<pallas_src>
import jax
import jax.numpy as jnp
from jax.experimental import pallas as pl
from jax.experimental.pallas import tpu as pltpu

H = W = 15
KSIZE = 9
PAD = 4
EPS = 1e-5                 # PyTorch BatchNorm default eps

BM_CONV = 256              # M tile for conv matmuls (multiple of 8)
K_FC = 64 * H * W          # 14400
K_FC_PAD = 14592           # 114 * 128 : small pad that tiles evenly
TK_FC = 2432               # 19 * 128  : 6 K steps for fc1


# --------------------------------------------------------------------------
# Pallas kernels
# --------------------------------------------------------------------------
def _conv_matmul_kernel(x_ref, w_ref, b_ref, o_ref):
    """relu(X @ W + b) for one M block; K is fully resident."""
    acc = jnp.dot(x_ref[...], w_ref[...], preferred_element_type=jnp.float32)
    o_ref[...] = jnp.maximum(acc + b_ref[...], 0.0).astype(o_ref.dtype)


def _fc_fused_kernel(x_ref, w1_ref, b1_ref, w2_ref, b2_ref, o_ref, acc_ref):
    """tanh( relu(X @ W1 + b1) @ w2 + b2 ), K tiled with a VMEM accumulator.

    fc2 (512 -> 1) is computed as an elementwise multiply + lane reduction in
    the final-K epilogue (avoids a 1-lane-wide standalone matmul kernel).
    """
    k = pl.program_id(0)

    @pl.when(k == 0)
    def _():
        acc_ref[...] = jnp.zeros_like(acc_ref)

    acc_ref[...] += jnp.dot(x_ref[...], w1_ref[...],
                            preferred_element_type=jnp.float32)

    @pl.when(k == pl.num_programs(0) - 1)
    def _():
        h = jnp.maximum(acc_ref[...] + b1_ref[...], 0.0)      # fc1 + BN + ReLU
        # Dropout(0.5) is identity in eval mode.
        y = jnp.sum(h * w2_ref[...], axis=1, keepdims=True) + b2_ref[...]
        o_ref[...] = jnp.tanh(y)


# --------------------------------------------------------------------------
# pallas_call wrappers
# --------------------------------------------------------------------------
def conv_matmul(x, w, bias, bm=BM_CONV):
    """x:(M, K) bf16, w:(K, Cout) bf16, bias:(1, Cout) f32 -> (M, Cout) bf16."""
    M, K = x.shape
    Kw, N = w.shape
    assert K == Kw and M % bm == 0
    grid = (M // bm,)
    return pl.pallas_call(
        _conv_matmul_kernel,
        out_shape=jax.ShapeDtypeStruct((M, N), jnp.bfloat16),
        grid_spec=pltpu.PrefetchScalarGridSpec(
            num_scalar_prefetch=0,
            grid=grid,
            in_specs=[
                pl.BlockSpec((bm, K), lambda m: (m, 0)),
                pl.BlockSpec((K, N), lambda m: (0, 0)),
                pl.BlockSpec((1, N), lambda m: (0, 0)),
            ],
            out_specs=pl.BlockSpec((bm, N), lambda m: (m, 0)),
        ),
        compiler_params=pltpu.CompilerParams(
            dimension_semantics=("parallel",)),
    )(x, w, bias)


def fc_fused(x, w1, b1, w2, b2, tk=TK_FC):
    """x:(B, Kp) bf16, w1:(Kp, 512) bf16, b1:(1,512) f32,
    w2:(1,512) f32, b2:(1,1) f32 -> (B, 1) f32."""
    M, K = x.shape
    Kw, N = w1.shape
    assert K == Kw and K % tk == 0
    grid = (K // tk,)
    return pl.pallas_call(
        _fc_fused_kernel,
        out_shape=jax.ShapeDtypeStruct((M, 1), jnp.float32),
        grid_spec=pltpu.PrefetchScalarGridSpec(
            num_scalar_prefetch=0,
            grid=grid,
            in_specs=[
                pl.BlockSpec((M, tk), lambda k: (0, k)),
                pl.BlockSpec((tk, N), lambda k: (k, 0)),
                pl.BlockSpec((1, N), lambda k: (0, 0)),
                pl.BlockSpec((1, N), lambda k: (0, 0)),
                pl.BlockSpec((1, 1), lambda k: (0, 0)),
            ],
            out_specs=pl.BlockSpec((M, 1), lambda k: (0, 0)),
            scratch_shapes=[pltpu.VMEM((M, N), jnp.float32)],
        ),
        compiler_params=pltpu.CompilerParams(
            dimension_semantics=("arbitrary",)),
    )(x, w1, b1, w2, b2)


# --------------------------------------------------------------------------
# Layout glue (pure data movement, XLA side)
# --------------------------------------------------------------------------
def _im2col_nhwc(x_nhwc, ksize, pad):
    """(N, H, W, C) -> (N*H*W, ksize*ksize*C), column order (ky, kx, c)."""
    n, h, w, c = x_nhwc.shape
    xp = jnp.pad(x_nhwc, ((0, 0), (pad, pad), (pad, pad), (0, 0)))
    cols = []
    for dy in range(ksize):
        for dx in range(ksize):
            cols.append(xp[:, dy:dy + h, dx:dx + w, :])
    p = jnp.stack(cols, axis=3)                   # (N, H, W, k*k, C)
    return p.reshape(n * h * w, ksize * ksize * c)


def _round_up(x, m):
    return ((x + m - 1) // m) * m


def _fold_bn(pre_bias, gamma, beta, mean, var):
    scale = gamma / jnp.sqrt(var + EPS)
    bias = beta + (pre_bias - mean) * scale
    return scale, bias


# --------------------------------------------------------------------------
# Parameters: PyTorch-style init, then one-time prep into kernel-ready layout.
# --------------------------------------------------------------------------
def init_params(key):
    ks = jax.random.split(key, 16)

    def rnd(k, shape, s=0.05):
        return jax.random.normal(k, shape, jnp.float32) * s

    p = {}
    p["w1"] = rnd(ks[0], (32, 3, 9, 9))
    p["b1"] = rnd(ks[1], (32,))
    p["bn1_g"] = 1.0 + rnd(ks[2], (32,))
    p["bn1_b"] = rnd(ks[3], (32,))
    p["bn1_m"] = rnd(ks[4], (32,))
    p["bn1_v"] = jnp.abs(1.0 + rnd(ks[5], (32,)))
    p["w2"] = rnd(ks[6], (64, 32, 9, 9), 0.02)
    p["b2"] = rnd(ks[7], (64,))
    p["bn2_g"] = 1.0 + rnd(ks[8], (64,))
    p["bn2_b"] = rnd(ks[9], (64,))
    p["bn2_m"] = rnd(ks[10], (64,))
    p["bn2_v"] = jnp.abs(1.0 + rnd(ks[11], (64,)))
    p["fc1_w"] = rnd(ks[12], (512, K_FC), 0.01)
    p["fc1_b"] = rnd(ks[13], (512,))
    p["bn3_g"] = jnp.ones((512,), jnp.float32)
    p["bn3_b"] = jnp.zeros((512,), jnp.float32)
    p["bn3_m"] = jnp.zeros((512,), jnp.float32)
    p["bn3_v"] = jnp.ones((512,), jnp.float32)
    p["fc2_w"] = rnd(ks[14], (1, 512), 0.05)
    p["fc2_b"] = rnd(ks[15], (1,))
    return p


def prepare_params(p):
    """One-time weight prep: BN folding, NHWC reorder, K pad, bf16 cast."""
    prep = {}

    # conv1 (3 -> 32): column order (ky, kx, c_in), BN scale folded in.
    s1, b1 = _fold_bn(p["b1"], p["bn1_g"], p["bn1_b"], p["bn1_m"], p["bn1_v"])
    w1 = p["w1"].transpose(0, 2, 3, 1).reshape(32, -1)       # (32, 243)
    prep["w1"] = (w1 * s1[:, None]).T.astype(jnp.bfloat16)   # (243, 32)
    prep["b1"] = b1.reshape(1, 32).astype(jnp.float32)

    # conv2 (32 -> 64)
    s2, b2 = _fold_bn(p["b2"], p["bn2_g"], p["bn2_b"], p["bn2_m"], p["bn2_v"])
    w2 = p["w2"].transpose(0, 2, 3, 1).reshape(64, -1)       # (64, 2592)
    prep["w2"] = (w2 * s2[:, None]).T.astype(jnp.bfloat16)   # (2592, 64)
    prep["b2"] = b2.reshape(1, 64).astype(jnp.float32)

    # fc1 (14400 -> 512): rows permuted from (c,h,w) to (h,w,c) order to match
    # NHWC flattening, BN1d scale folded, K padded to a multiple of 128.
    s3, b3 = _fold_bn(p["fc1_b"], p["bn3_g"], p["bn3_b"],
                      p["bn3_m"], p["bn3_v"])
    w3 = p["fc1_w"].reshape(512, 64, H, W).transpose(0, 2, 3, 1)
    w3 = w3.reshape(512, K_FC) * s3[:, None]                 # (512, 14400)
    w3 = jnp.pad(w3.T, ((0, K_FC_PAD - K_FC), (0, 0)))       # (14592, 512)
    prep["fc1_w"] = w3.astype(jnp.bfloat16)
    prep["fc1_b"] = b3.reshape(1, 512).astype(jnp.float32)

    # fc2 (512 -> 1): kept f32, consumed as (1, 512) in the epilogue reduce.
    prep["fc2_w"] = p["fc2_w"].reshape(1, 512).astype(jnp.float32)
    prep["fc2_b"] = p["fc2_b"].reshape(1, 1).astype(jnp.float32)
    return prep


# --------------------------------------------------------------------------
# Forward pass (eval-mode semantics of GobangNet.forward)
# --------------------------------------------------------------------------
def gobang_forward(prep, x):
    n = x.shape[0]
    m = n * H * W
    m_pad = _round_up(m, BM_CONV)

    # NCHW -> NHWC once at the boundary; activations stay NHWC bf16 after.
    xh = x.transpose(0, 2, 3, 1).astype(jnp.bfloat16)        # (N, 15, 15, 3)

    # conv1 + BN + ReLU  (im2col matmul, M tiled / parallel)
    p1 = _im2col_nhwc(xh, KSIZE, PAD)                        # (m, 243)
    p1 = jnp.pad(p1, ((0, m_pad - m), (0, 0)))
    y1 = conv_matmul(p1, prep["w1"], prep["b1"])             # (m_pad, 32) bf16
    y1 = y1[:m].reshape(n, H, W, 32)

    # conv2 + BN + ReLU
    p2 = _im2col_nhwc(y1, KSIZE, PAD)                        # (m, 2592)
    p2 = jnp.pad(p2, ((0, m_pad - m), (0, 0)))
    y2 = conv_matmul(p2, prep["w2"], prep["b2"])             # (m_pad, 64) bf16
    y2 = y2[:m].reshape(n, H * W * 64)                       # NHWC flatten

    # fc1 + BN1d + ReLU + [Dropout=id] + fc2 + tanh, all in one fused kernel.
    xf = jnp.pad(y2, ((0, 0), (0, K_FC_PAD - K_FC)))         # (n, 14592)
    out = fc_fused(xf, prep["fc1_w"], prep["fc1_b"],
                   prep["fc2_w"], prep["fc2_b"])             # (n, 1) f32
    return out


if __name__ == "__main__":
    key = jax.random.PRNGKey(0)
    pkey, xkey = jax.random.split(key)
    params = init_params(pkey)
    prep = prepare_params(params)          # one-time, hoisted out of forward
    # GobangNet implies 3-channel 15x15 boards; use batch=2.
    x = jax.random.normal(xkey, (2, 3, 15, 15), jnp.float32)

    out = jax.jit(gobang_forward)(prep, x)
    out = jax.block_until_ready(out)
    assert out.shape == (2, 1)
    assert bool(jnp.all(jnp.isfinite(out)))
    assert bool(jnp.all(jnp.abs(out) <= 1.0))  # tanh output range
    print("KERNEL_OK")
</pallas_src>

<mosaic_0001>
module attributes {stable_mosaic.version = 11 : i64} {
  func.func @_conv_matmul_kernel(%arg0: i32, %arg1: memref<256x243xbf16, #tpu.memory_space<vmem>>, %arg2: memref<243x32xbf16, #tpu.memory_space<vmem>>, %arg3: memref<1x32xf32, #tpu.memory_space<vmem>>, %arg4: memref<256x32xbf16, #tpu.memory_space<vmem>>) attributes {dimension_semantics = [#tpu.dimension_semantics<parallel>], iteration_bounds = array<i64: 2>, scalar_prefetch = 0 : i64, scratch_operands = 0 : i64, tpu.core_type = #tpu.core_type<tc>, window_params = [{transform_indices = @transform_0, window_bounds = array<i64: 256, 243>}, {pipeline_mode = #tpu.pipeline_mode<synchronous>, transform_indices = @transform_1, window_bounds = array<i64: 243, 32>}, {pipeline_mode = #tpu.pipeline_mode<synchronous>, transform_indices = @transform_2, window_bounds = array<i64: 1, 32>}, {transform_indices = @transform_3, window_bounds = array<i64: 256, 32>}]} {
    %c0 = arith.constant 0 : index
    %c0_0 = arith.constant 0 : index
    %0 = vector.load %arg1[%c0, %c0_0] : memref<256x243xbf16, #tpu.memory_space<vmem>>, vector<256x243xbf16>
    %c0_1 = arith.constant 0 : index
    %c0_2 = arith.constant 0 : index
    %1 = vector.load %arg2[%c0_1, %c0_2] : memref<243x32xbf16, #tpu.memory_space<vmem>>, vector<243x32xbf16>
    %cst = arith.constant dense<0.000000e+00> : vector<256x32xf32>
    %2 = tpu.matmul %0, %1, %cst {dimension_numbers = #tpu.dot_dimension_numbers<[1], [0], [0], [1], [0, 0, 1, 1], [], []>} : vector<256x243xbf16>, vector<243x32xbf16>, vector<256x32xf32> -> vector<256x32xf32>
    %c0_3 = arith.constant 0 : index
    %c0_4 = arith.constant 0 : index
    %3 = vector.load %arg3[%c0_3, %c0_4] : memref<1x32xf32, #tpu.memory_space<vmem>>, vector<1x32xf32>
    %4 = vector.broadcast %3 : vector<1x32xf32> to vector<256x32xf32>
    %5 = arith.addf %2, %4 : vector<256x32xf32>
    %cst_5 = arith.constant 0.000000e+00 : f32
    %6 = vector.broadcast %cst_5 : f32 to vector<256x32xf32>
    %7 = arith.maximumf %5, %6 : vector<256x32xf32>
    %8 = arith.truncf %7 : vector<256x32xf32> to vector<256x32xbf16>
    %c0_6 = arith.constant 0 : index
    %c0_7 = arith.constant 0 : index
    %9 = vector.load %arg4[%c0_6, %c0_7] : memref<256x32xbf16, #tpu.memory_space<vmem>>, vector<256x32xbf16>
    tpu.vector_store %arg4[%c0_6, %c0_7], %8 {strides = array<i32>} : memref<256x32xbf16, #tpu.memory_space<vmem>>, vector<256x32xbf16>,
    return
  }
  func.func @transform_0(%arg0: i32) -> (i32, i32) {
    %c0_i32 = arith.constant 0 : i32
    %c0_i32_0 = arith.constant 0 : i32
    return %arg0, %c0_i32 : i32, i32
  }
  func.func @transform_1(%arg0: i32) -> (i32, i32) {
    %c0_i32 = arith.constant 0 : i32
    %c0_i32_0 = arith.constant 0 : i32
    %c0_i32_1 = arith.constant 0 : i32
    return %c0_i32, %c0_i32_0 : i32, i32
  }
  func.func @transform_2(%arg0: i32) -> (i32, i32) {
    %c0_i32 = arith.constant 0 : i32
    %c0_i32_0 = arith.constant 0 : i32
    %c0_i32_1 = arith.constant 0 : i32
    return %c0_i32, %c0_i32_0 : i32, i32
  }
  func.func @transform_3(%arg0: i32) -> (i32, i32) {
    %c0_i32 = arith.constant 0 : i32
    %c0_i32_0 = arith.constant 0 : i32
    return %arg0, %c0_i32 : i32, i32
  }
}

module attributes {stable_mosaic.version = 11 : i64} {
  func.func @_conv_matmul_kernel(%arg0: i32, %arg1: memref<256x2592xbf16, #tpu.memory_space<vmem>>, %arg2: memref<2592x64xbf16, #tpu.memory_space<vmem>>, %arg3: memref<1x64xf32, #tpu.memory_space<vmem>>, %arg4: memref<256x64xbf16, #tpu.memory_space<vmem>>) attributes {dimension_semantics = [#tpu.dimension_semantics<parallel>], iteration_bounds = array<i64: 2>, scalar_prefetch = 0 : i64, scratch_operands = 0 : i64, tpu.core_type = #tpu.core_type<tc>, window_params = [{transform_indices = @transform_0, window_bounds = array<i64: 256, 2592>}, {pipeline_mode = #tpu.pipeline_mode<synchronous>, transform_indices = @transform_1, window_bounds = array<i64: 2592, 64>}, {pipeline_mode = #tpu.pipeline_mode<synchronous>, transform_indices = @transform_2, window_bounds = array<i64: 1, 64>}, {transform_indices = @transform_3, window_bounds = array<i64: 256, 64>}]} {
    %c0 = arith.constant 0 : index
    %c0_0 = arith.constant 0 : index
    %0 = vector.load %arg1[%c0, %c0_0] : memref<256x2592xbf16, #tpu.memory_space<vmem>>, vector<256x2592xbf16>
    %c0_1 = arith.constant 0 : index
    %c0_2 = arith.constant 0 : index
    %1 = vector.load %arg2[%c0_1, %c0_2] : memref<2592x64xbf16, #tpu.memory_space<vmem>>, vector<2592x64xbf16>
    %cst = arith.constant dense<0.000000e+00> : vector<256x64xf32>
    %2 = tpu.matmul %0, %1, %cst {dimension_numbers = #tpu.dot_dimension_numbers<[1], [0], [0], [1], [0, 0, 1, 1], [], []>} : vector<256x2592xbf16>, vector<2592x64xbf16>, vector<256x64xf32> -> vector<256x64xf32>
    %c0_3 = arith.constant 0 : index
    %c0_4 = arith.constant 0 : index
    %3 = vector.load %arg3[%c0_3, %c0_4] : memref<1x64xf32, #tpu.memory_space<vmem>>, vector<1x64xf32>
    %4 = vector.broadcast %3 : vector<1x64xf32> to vector<256x64xf32>
    %5 = arith.addf %2, %4 : vector<256x64xf32>
    %cst_5 = arith.constant 0.000000e+00 : f32
    %6 = vector.broadcast %cst_5 : f32 to vector<256x64xf32>
    %7 = arith.maximumf %5, %6 : vector<256x64xf32>
    %8 = arith.truncf %7 : vector<256x64xf32> to vector<256x64xbf16>
    %c0_6 = arith.constant 0 : index
    %c0_7 = arith.constant 0 : index
    %9 = vector.load %arg4[%c0_6, %c0_7] : memref<256x64xbf16, #tpu.memory_space<vmem>>, vector<256x64xbf16>
    tpu.vector_store %arg4[%c0_6, %c0_7], %8 {strides = array<i32>} : memref<256x64xbf16, #tpu.memory_space<vmem>>, vector<256x64xbf16>,
    return
  }
  func.func @transform_0(%arg0: i32) -> (i32, i32) {
    %c0_i32 = arith.constant 0 : i32
    %c0_i32_0 = arith.constant 0 : i32
    return %arg0, %c0_i32 : i32, i32
  }
  func.func @transform_1(%arg0: i32) -> (i32, i32) {
    %c0_i32 = arith.constant 0 : i32
    %c0_i32_0 = arith.constant 0 : i32
    %c0_i32_1 = arith.constant 0 : i32
    return %c0_i32, %c0_i32_0 : i32, i32
  }
  func.func @transform_2(%arg0: i32) -> (i32, i32) {
    %c0_i32 = arith.constant 0 : i32
    %c0_i32_0 = arith.constant 0 : i32
    %c0_i32_1 = arith.constant 0 : i32
    return %c0_i32, %c0_i32_0 : i32, i32
  }
  func.func @transform_3(%arg0: i32) -> (i32, i32) {
    %c0_i32 = arith.constant 0 : i32
    %c0_i32_0 = arith.constant 0 : i32
    return %arg0, %c0_i32 : i32, i32
  }
}

module attributes {stable_mosaic.version = 11 : i64} {
  func.func @_fc_fused_kernel(%arg0: i32, %arg1: memref<2x2432xbf16, #tpu.memory_space<vmem>>, %arg2: memref<2432x512xbf16, #tpu.memory_space<vmem>>, %arg3: memref<1x512xf32, #tpu.memory_space<vmem>>, %arg4: memref<1x512xf32, #tpu.memory_space<vmem>>, %arg5: memref<1x1xf32, #tpu.memory_space<vmem>>, %arg6: memref<2x1xf32, #tpu.memory_space<vmem>>, %arg7: memref<2x512xf32, #tpu.memory_space<vmem>>) attributes {dimension_semantics = [#tpu.dimension_semantics<arbitrary>], iteration_bounds = array<i64: 6>, scalar_prefetch = 0 : i64, scratch_operands = 1 : i64, tpu.core_type = #tpu.core_type<tc>, window_params = [{transform_indices = @transform_0, window_bounds = array<i64: 2, 2432>}, {transform_indices = @transform_1, window_bounds = array<i64: 2432, 512>}, {pipeline_mode = #tpu.pipeline_mode<synchronous>, transform_indices = @transform_2, window_bounds = array<i64: 1, 512>}, {pipeline_mode = #tpu.pipeline_mode<synchronous>, transform_indices = @transform_3, window_bounds = array<i64: 1, 512>}, {pipeline_mode = #tpu.pipeline_mode<synchronous>, transform_indices = @transform_4, window_bounds = array<i64: 1, 1>}, {pipeline_mode = #tpu.pipeline_mode<synchronous>, transform_indices = @transform_5, window_bounds = array<i64: 2, 1>}]} {
    %c0_i32 = arith.constant 0 : i32
    %0 = arith.cmpi eq, %arg0, %c0_i32 : i32
    %1 = arith.extui %0 : i1 to i32
    %c0_i32_0 = arith.constant 0 : i32
    %2 = arith.cmpi ne, %1, %c0_i32_0 : i32
    scf.if %2 {
      %cst_9 = arith.constant 0.000000e+00 : f32
      %12 = vector.broadcast %cst_9 : f32 to vector<2x512xf32>
      %c0_10 = arith.constant 0 : index
      %c0_11 = arith.constant 0 : index
      %13 = vector.load %arg7[%c0_10, %c0_11] : memref<2x512xf32, #tpu.memory_space<vmem>>, vector<2x512xf32>
      tpu.vector_store %arg7[%c0_10, %c0_11], %12 {strides = array<i32>} : memref<2x512xf32, #tpu.memory_space<vmem>>, vector<2x512xf32>,
    } else {
    }
    %c0 = arith.constant 0 : index
    %c0_1 = arith.constant 0 : index
    %3 = vector.load %arg7[%c0, %c0_1] : memref<2x512xf32, #tpu.memory_space<vmem>>, vector<2x512xf32>
    %c0_2 = arith.constant 0 : index
    %c0_3 = arith.constant 0 : index
    %4 = vector.load %arg1[%c0_2, %c0_3] : memref<2x2432xbf16, #tpu.memory_space<vmem>>, vector<2x2432xbf16>
    %c0_4 = arith.constant 0 : index
    %c0_5 = arith.constant 0 : index
    %5 = vector.load %arg2[%c0_4, %c0_5] : memref<2432x512xbf16, #tpu.memory_space<vmem>>, vector<2432x512xbf16>
    %cst = arith.constant dense<0.000000e+00> : vector<2x512xf32>
    %6 = tpu.matmul %4, %5, %cst {dimension_numbers = #tpu.dot_dimension_numbers<[1], [0], [0], [1], [0, 0, 1, 1], [], []>} : vector<2x2432xbf16>, vector<2432x512xbf16>, vector<2x512xf32> -> vector<2x512xf32>
    %7 = arith.addf %3, %6 : vector<2x512xf32>
    %c0_6 = arith.constant 0 : index
    %c0_7 = arith.constant 0 : index
    %8 = vector.load %arg7[%c0_6, %c0_7] : memref<2x512xf32, #tpu.memory_space<vmem>>, vector<2x512xf32>
    tpu.vector_store %arg7[%c0_6, %c0_7], %7 {strides = array<i32>} : memref<2x512xf32, #tpu.memory_space<vmem>>, vector<2x512xf32>,
    %c5_i32 = arith.constant 5 : i32
    %9 = arith.cmpi eq, %arg0, %c5_i32 : i32
    %10 = arith.extui %9 : i1 to i32
    %c0_i32_8 = arith.constant 0 : i32
    %11 = arith.cmpi ne, %10, %c0_i32_8 : i32
    scf.if %11 {
      %c0_9 = arith.constant 0 : index
      %c0_10 = arith.constant 0 : index
      %12 = vector.load %arg7[%c0_9, %c0_10] : memref<2x512xf32, #tpu.memory_space<vmem>>, vector<2x512xf32>
      %c0_11 = arith.constant 0 : index
      %c0_12 = arith.constant 0 : index
      %13 = vector.load %arg3[%c0_11, %c0_12] : memref<1x512xf32, #tpu.memory_space<vmem>>, vector<1x512xf32>
      %14 = vector.broadcast %13 : vector<1x512xf32> to vector<2x512xf32>
      %15 = arith.addf %12, %14 : vector<2x512xf32>
      %cst_13 = arith.constant 0.000000e+00 : f32
      %16 = vector.broadcast %cst_13 : f32 to vector<2x512xf32>
      %17 = arith.maximumf %15, %16 : vector<2x512xf32>
      %c0_14 = arith.constant 0 : index
      %c0_15 = arith.constant 0 : index
      %18 = vector.load %arg4[%c0_14, %c0_15] : memref<1x512xf32, #tpu.memory_space<vmem>>, vector<1x512xf32>
      %19 = vector.broadcast %18 : vector<1x512xf32> to vector<2x512xf32>
      %20 = arith.mulf %17, %19 : vector<2x512xf32>
      %cst_16 = arith.constant dense<0.000000e+00> : vector<2xf32>
      %21 = vector.multi_reduction <add>, %20, %cst_16 [1] : vector<2x512xf32> to vector<2xf32>
      %22 = vector.shape_cast %21 : vector<2xf32> to vector<2x1xf32>
      %c0_17 = arith.constant 0 : index
      %c0_18 = arith.constant 0 : index
      %23 = vector.load %arg5[%c0_17, %c0_18] : memref<1x1xf32, #tpu.memory_space<vmem>>, vector<1x1xf32>
      %24 = vector.broadcast %23 : vector<1x1xf32> to vector<2x1xf32>
      %25 = arith.addf %22, %24 : vector<2x1xf32>
      %26 = math.tanh %25 : vector<2x1xf32>
      %c0_19 = arith.constant 0 : index
      %c0_20 = arith.constant 0 : index
      %27 = vector.load %arg6[%c0_19, %c0_20] : memref<2x1xf32, #tpu.memory_space<vmem>>, vector<2x1xf32>
      tpu.vector_store %arg6[%c0_19, %c0_20], %26 {strides = array<i32>} : memref<2x1xf32, #tpu.memory_space<vmem>>, vector<2x1xf32>,
    } else {
    }
    return
  }
  func.func @transform_0(%arg0: i32) -> (i32, i32) {
    %c0_i32 = arith.constant 0 : i32
    %c0_i32_0 = arith.constant 0 : i32
    return %c0_i32, %arg0 : i32, i32
  }
  func.func @transform_1(%arg0: i32) -> (i32, i32) {
    %c0_i32 = arith.constant 0 : i32
    %c0_i32_0 = arith.constant 0 : i32
    return %arg0, %c0_i32 : i32, i32
  }
  func.func @transform_2(%arg0: i32) -> (i32, i32) {
    %c0_i32 = arith.constant 0 : i32
    %c0_i32_0 = arith.constant 0 : i32
    %c0_i32_1 = arith.constant 0 : i32
    return %c0_i32, %c0_i32_0 : i32, i32
  }
  func.func @transform_3(%arg0: i32) -> (i32, i32) {
    %c0_i32 = arith.constant 0 : i32
    %c0_i32_0 = arith.constant 0 : i32
    %c0_i32_1 = arith.constant 0 : i32
    return %c0_i32, %c0_i32_0 : i32, i32
  }
  func.func @transform_4(%arg0: i32) -> (i32, i32) {
    %c0_i32 = arith.constant 0 : i32
    %c0_i32_0 = arith.constant 0 : i32
    %c0_i32_1 = arith.constant 0 : i32
    return %c0_i32, %c0_i32_0 : i32, i32
  }
  func.func @transform_5(%arg0: i32) -> (i32, i32) {
    %c0_i32 = arith.constant 0 : i32
    %c0_i32_0 = arith.constant 0 : i32
    %c0_i32_1 = arith.constant 0 : i32
    return %c0_i32, %c0_i32_0 : i32, i32
  }
}

</mosaic_0001>

<bundles_post_ra>
// kernel: gobang_forward.3
= control target key start
LH: loop header
LB: loop body
LE: loop exit
PB: predicated region body
PF: predicated region fallthrough
CT: control target
= control target key end

     0   :  { %s1323_s12 = smov 0   ;;  %s1545_s0 = inlined_call_operand.vmem [shape: bf16[512,243], index: 0, kind: input, shape index: {}]   ;;  %s1546_s1 = inlined_call_operand.vmem [shape: bf16[243,32], index: 1, kind: input, shape index: {}]   ;;  %s1547_s2 = inlined_call_operand.vmem [shape: f32[1,32], index: 2, kind: input, shape index: {}]   ;;  %s1548_s3 = inlined_call_operand.vmem [shape: bf16[512,32], index: 3, kind: output, shape index: {}]  }
   0x1 LB: > { %s951_s13 = sadd.s32 4294967295, %s1300_s12   ;;  %p955_p0 = scmp.ge.s32.totalorder %s1300_s12, 1  ;;  %s1300_s12 = sphi %s1323_s12, %s13_s12  }
   0x2   : > { %p139_p1 = scmp.lt.s32.totalorder %s1300_s12, 3 }
   0x4   : > { %p140_p2 = pnand %p955_p0, %p139_p1 }
   0x5   : > { %v1230_v0 = vld [vmem:[%s1546_s1 + $0x40] sm:$0xff] (!%p140_p2)   ;;  %v1232_v2 = vld [vmem:[%s1546_s1 + $0x48] sm:$0xff] (!%p140_p2)   ;;  %v1234_v4 = vld [vmem:[%s1546_s1 + $0x50] sm:$0xff] (!%p140_p2)   ;;  %s956_s24 = sshll.u32 (!%p140_p2), %s951_s13, 5  ;;  %vm534_vm0 = vcmask (!%p140_p2), 1040384   ;;  %vm485_vm1 = vcmask (!%p140_p2), 941056  }
   0x6   : > { %143 = sbr.rel (%p140_p2) target bundleno = 318 (0x13e), region = 32  ;;  %v1231_v1 = vld [vmem:[%s1546_s1] sm:$0xff] (!%p140_p2)   ;;  %1093 = vmatprep.subr.bf16.mxu0 (!%p140_p2), %v1230_v0  ;;  %1205 = vmatprep.subr.bf16.mxu1 (!%p140_p2), %v1230_v0  ;;  %v1233_v3 = vld [vmem:[%s1546_s1 + $0x8] sm:$0xff] (!%p140_p2)   ;;  %p165_p3 = scmp.lt.s32.totalorder (!%p140_p2), %s956_s24, 63  ;;  %v1235_v5 = vld [vmem:[%s1546_s1 + $0x10] sm:$0xff] (!%p140_p2)   ;;  %vm535_vm2 = vcmask (!%p140_p2), 1041408  }
   0x7   : > { %1094 = vmatpush3.bf16.msra.mxu0 (!%p140_p2), %v1231_v1  ;;  %1213 = vmatpush3.bf16.msra.mxu1 (!%p140_p2), %v1231_v1  ;;  %v1236_v6 = vld [vmem:[%s1546_s1 + $0x58] sm:$0xff] (!%p140_p2)   ;;  %v1238_v8 = vld [vmem:[%s1546_s1 + $0x60] sm:$0xff] (!%p140_p2)   ;;  %v1240_v10 = vld [vmem:[%s1546_s1 + $0x68] sm:$0xff] (!%p140_p2)   ;;  %v1302_v12 = vmov (!%p140_p2), 65535   ;;  %vm862_vm3 = vcmask (!%p140_p2), 257024  }
   0x8   : > { %1095 = vmatprep.subr.bf16.mxu0 (!%p140_p2), %v1232_v2  ;;  %1206 = vmatprep.subr.bf16.mxu1 (!%p140_p2), %v1232_v2  ;;  %v1237_v7 = vld [vmem:[%s1546_s1 + $0x18] sm:$0xff] (!%p140_p2)   ;;  %v1239_v9 = vld [vmem:[%s1546_s1 + $0x20] sm:$0xff] (!%p140_p2)   ;;  %v536_v13 = vsel (!%p140_p2), %vm534_vm0, 4294967295, %v1302_v12  ;;  %v1241_v15 = vld [vmem:[%s1546_s1 + $0x28] sm:$0xff] (!%p140_p2)  }
   0x9   : > { %v1242_v16 = vld [vmem:[%s1546_s1 + $0x70] sm:$0xff] (!%p140_p2)   ;;  %v1244_v17 = vld [vmem:[%s1546_s1 + $0x78] ss:$0 sps:$4 sm:$0x33] (!%p140_p2)   ;;  %v537_v18 = vsel (!%p140_p2), %vm535_vm2, %v536_v13, 0 }
   0xa   : > { %v1243_v19 = vld [vmem:[%s1546_s1 + $0x30] sm:$0xff] (!%p140_p2)   ;;  %v539_v20 = vand.u32 (!%p140_p2), %v1244_v17, %v537_v18  ;;  %v1245_v21 = vld [vmem:[%s1546_s1 + $0x38] sm:$0xff] (!%p140_p2)   ;;  %v1438_v54 = vld [vmem:[%s1547_s2] ss:$0 sm:$0xff] (!%p140_p2) }
   0xb   : > { %1096 = vmatpush3.bf16.msra.mxu0 (!%p140_p2), %v1233_v3  ;;  %1214 = vmatpush3.bf16.msra.mxu1 (!%p140_p2), %v1233_v3 }
   0xc   : > { %1097 = vmatprep.subr.bf16.mxu0 (!%p140_p2), %v1234_v4  ;;  %1207 = vmatprep.subr.bf16.mxu1 (!%p140_p2), %v1234_v4 }
   0xd   : > { %s1550_s24 = smov (!%p165_p3, %s956_s24), 63 }
   0xe   : > { %s1060_s29 = sshll.u32 %s1550_s24, 3  ;;  %s960_s28 = sshll.u32 %s1550_s24, 2 }
   0xf   : > { %1098 = vmatpush3.bf16.msra.mxu0 %v1235_v5  ;;  %1215 = vmatpush3.bf16.msra.mxu1 %v1235_v5  ;;  %s1364_s9 = scalar_lea.vmem %s1545_s0, %s1060_s29  ;;  %s1448_s4 = scalar_lea.vmem %s1548_s3, %s960_s28 }
  0x10   : > { %1099 = vmatprep.subr.bf16.mxu0 %v1236_v6  ;;  %1208 = vmatprep.subr.bf16.mxu1 %v1236_v6  ;;  %v1248_v11 = vld [vmem:[%s1364_s9 + $0x4] ss:$8 sps:$4 sm:$0xff]   ;;  %v1246_v22 = vld [vmem:[%s1364_s9] ss:$8 sps:$4 sm:$0xff]   ;;  %v1252_v24 = vld [vmem:[%s1364_s9 + $0x14] ss:$8 sps:$4 sm:$0xff]  }
  0x11   : > { %1010 = vmatprep.mubr.msk.bf16.mxu0 %vm485_vm1, %v1248_v11  ;;  %v1251_v14 = vld [vmem:[%s1364_s9 + $0x84] ss:$8 sps:$4 sm:$0xff]   ;;  %v1249_v23 = vld [vmem:[%s1364_s9 + $0x80] ss:$8 sps:$4 sm:$0xff]   ;;  %v1254_v25 = vld [vmem:[%s1364_s9 + $0x94] ss:$8 sps:$4 sm:$0xff]  }
  0x12   : > { %1018 = vmatprep.mubr.msk.bf16.mxu1 %vm485_vm1, %v1251_v14  ;;  %v1256_v26 = vld [vmem:[%s1364_s9 + $0x10] ss:$8 sps:$4 sm:$0xff]   ;;  %v1258_v28 = vld [vmem:[%s1364_s9 + $0x24] ss:$8 sps:$4 sm:$0xff]   ;;  %v1262_v30 = vld [vmem:[%s1364_s9 + $0x20] ss:$8 sps:$4 sm:$0xff]  }
  0x13   : > { %1100 = vmatpush3.bf16.msra.mxu0 %v1237_v7  ;;  %1216 = vmatpush3.bf16.msra.mxu1 %v1237_v7  ;;  %v1257_v27 = vld [vmem:[%s1364_s9 + $0x90] ss:$8 sps:$4 sm:$0xff]   ;;  %v1260_v29 = vld [vmem:[%s1364_s9 + $0xa4] ss:$8 sps:$4 sm:$0xff]   ;;  %v1263_v31 = vld [vmem:[%s1364_s9 + $0xa0] ss:$8 sps:$4 sm:$0xff]  }
  0x14   : > { %1101 = vmatprep.subr.bf16.mxu0 %v1238_v8  ;;  %1209 = vmatprep.subr.bf16.mxu1 %v1238_v8  ;;  %v1264_v32 = vld [vmem:[%s1364_s9 + $0x34] ss:$8 sps:$4 sm:$0xff]   ;;  %v1268_v34 = vld [vmem:[%s1364_s9 + $0x30] ss:$8 sps:$4 sm:$0xff]   ;;  %v1270_v36 = vld [vmem:[%s1364_s9 + $0x44] ss:$8 sps:$4 sm:$0xff]  }
  0x15   : > { %v1266_v33 = vld [vmem:[%s1364_s9 + $0xb4] ss:$8 sps:$4 sm:$0xff]   ;;  %v1269_v35 = vld [vmem:[%s1364_s9 + $0xb0] ss:$8 sps:$4 sm:$0xff]   ;;  %v1272_v37 = vld [vmem:[%s1364_s9 + $0xc4] ss:$8 sps:$4 sm:$0xff]  }
  0x16   : > { %v1274_v38 = vld [vmem:[%s1364_s9 + $0x40] ss:$8 sps:$4 sm:$0xff]   ;;  %v1276_v40 = vld [vmem:[%s1364_s9 + $0x54] ss:$8 sps:$4 sm:$0xff]   ;;  %v1280_v42 = vld [vmem:[%s1364_s9 + $0x50] ss:$8 sps:$4 sm:$0xff]  }
  0x17   : > { %1102 = vmatpush3.bf16.msra.mxu0 %v1239_v9  ;;  %1217 = vmatpush3.bf16.msra.mxu1 %v1239_v9  ;;  %v1275_v39 = vld [vmem:[%s1364_s9 + $0xc0] ss:$8 sps:$4 sm:$0xff]   ;;  %v1278_v41 = vld [vmem:[%s1364_s9 + $0xd4] ss:$8 sps:$4 sm:$0xff]   ;;  %v1281_v43 = vld [vmem:[%s1364_s9 + $0xd0] ss:$8 sps:$4 sm:$0xff]  }
  0x18   : > { %1103 = vmatprep.subr.bf16.mxu0 %v1240_v10  ;;  %1210 = vmatprep.subr.bf16.mxu1 %v1240_v10  ;;  %v1282_v44 = vld [vmem:[%s1364_s9 + $0x64] ss:$8 sps:$4 sm:$0xff]   ;;  %v1286_v46 = vld [vmem:[%s1364_s9 + $0x60] ss:$8 sps:$4 sm:$0xff]   ;;  %v1288_v48 = vld [vmem:[%s1364_s9 + $0x74] ss:$8 sps:$4 sm:$0xff]  }
  0x19   : > { %v1284_v45 = vld [vmem:[%s1364_s9 + $0xe4] ss:$8 sps:$4 sm:$0xff]   ;;  %v1287_v47 = vld [vmem:[%s1364_s9 + $0xe0] ss:$8 sps:$4 sm:$0xff]   ;;  %v1290_v49 = vld [vmem:[%s1364_s9 + $0xf4] ss:$8 sps:$4 sm:$0xff]  }
  0x1a   : > { %v1292_v50 = vld [vmem:[%s1364_s9 + $0x70] ss:$8 sps:$4 sm:$0xff]  }
  0x1b   : > { %1104 = vmatpush3.bf16.msra.mxu0 %v1241_v15  ;;  %1218 = vmatpush3.bf16.msra.mxu1 %v1241_v15  ;;  %v1293_v51 = vld [vmem:[%s1364_s9 + $0xf0] ss:$8 sps:$4 sm:$0xff]  }
  0x1c   : > { %1105 = vmatprep.subr.bf16.mxu0 %v1242_v16  ;;  %1211 = vmatprep.subr.bf16.mxu1 %v1242_v16 }
  0x1f   : > { %1106 = vmatpush3.bf16.msra.mxu0 %v1243_v19  ;;  %1219 = vmatpush3.bf16.msra.mxu1 %v1243_v19 }
  0x20   : > { %1107 = vmatprep.subr.bf16.mxu0 %v539_v20  ;;  %1212 = vmatprep.subr.bf16.mxu1 %v539_v20 }
  0x23   : > { %1108 = vmatpush3.bf16.msra.mxu0 %v1245_v21  ;;  %1220 = vmatpush3.bf16.msra.mxu1 %v1245_v21 }
  0x26   : > { %574 = vmatmul.mubr.bf16.vlgmr.msra.gmra.mrb[0].mxu0 %v1246_v22  ;;  %638 = vmatmul.mubr.bf16.vlgmr.msra.gmra.mrb[0].mxu1 %v1249_v23 }
  0x27   : > { %1011 = vmatprep.mubr.msk.bf16.mxu0 %vm485_vm1, %v1252_v24  ;;  %1019 = vmatprep.mubr.msk.bf16.mxu1 %vm485_vm1, %v1254_v25 }
  0x2e   : > { %582 = vmatmul.mubr.bf16.gmra.mrb[4].mxu0 %v1256_v26  ;;  %646 = vmatmul.mubr.bf16.gmra.mrb[4].mxu1 %v1257_v27 }
  0x2f   : > { %1012 = vmatprep.mubr.msk.bf16.mxu0 %vm485_vm1, %v1258_v28  ;;  %1020 = vmatprep.mubr.msk.bf16.mxu1 %vm485_vm1, %v1260_v29 }
  0x36   : > { %590 = vmatmul.mubr.bf16.gmra.mrb[8].mxu0 %v1262_v30  ;;  %654 = vmatmul.mubr.bf16.gmra.mrb[8].mxu1 %v1263_v31 }
  0x37   : > { %1013 = vmatprep.mubr.msk.bf16.mxu0 %vm485_vm1, %v1264_v32  ;;  %1021 = vmatprep.mubr.msk.bf16.mxu1 %vm485_vm1, %v1266_v33 }
  0x3e   : > { %598 = vmatmul.mubr.bf16.gmra.mrb[12].mxu0 %v1268_v34  ;;  %662 = vmatmul.mubr.bf16.gmra.mrb[12].mxu1 %v1269_v35 }
  0x3f   : > { %1014 = vmatprep.mubr.msk.bf16.mxu0 %vm485_vm1, %v1270_v36  ;;  %1022 = vmatprep.mubr.msk.bf16.mxu1 %vm485_vm1, %v1272_v37 }
  0x46   : > { %606 = vmatmul.mubr.bf16.gmra.mrb[16].mxu0 %v1274_v38  ;;  %670 = vmatmul.mubr.bf16.gmra.mrb[16].mxu1 %v1275_v39 }
  0x47   : > { %1015 = vmatprep.mubr.msk.bf16.mxu0 %vm485_vm1, %v1276_v40  ;;  %1023 = vmatprep.mubr.msk.bf16.mxu1 %vm485_vm1, %v1278_v41 }
  0x4e   : > { %614 = vmatmul.mubr.bf16.gmra.mrb[20].mxu0 %v1280_v42  ;;  %678 = vmatmul.mubr.bf16.gmra.mrb[20].mxu1 %v1281_v43 }
  0x4f   : > { %1016 = vmatprep.mubr.msk.bf16.mxu0 %vm485_vm1, %v1282_v44  ;;  %1024 = vmatprep.mubr.msk.bf16.mxu1 %vm485_vm1, %v1284_v45 }
  0x56   : > { %622 = vmatmul.mubr.bf16.gmra.mrb[24].mxu0 %v1286_v46  ;;  %686 = vmatmul.mubr.bf16.gmra.mrb[24].mxu1 %v1287_v47 }
  0x57   : > { %1017 = vmatprep.mubr.msk.bf16.mxu0 %vm485_vm1, %v1288_v48  ;;  %1025 = vmatprep.mubr.msk.bf16.mxu1 %vm485_vm1, %v1290_v49 }
  0x5e   : > { %630 = vmatmul.mubr.bf16.gmra.mrb[28].mxu0 %v1292_v50  ;;  %694 = vmatmul.mubr.bf16.gmra.mrb[28].mxu1 %v1293_v51 }
  0xf9   : > { %v1109_v52 = vpop.f32.mrb[0].mxu0  ;;  %v1157_v53 = vpop.f32.mrb[0].mxu1 }
  0xfa   : > { %v1110_v55 = vpop.f32.mrb[1].mxu0  ;;  %v1158_v56 = vpop.f32.mrb[1].mxu1 }
  0xfb   : > { %v1111_v57 = vadd.f32 %v1110_v55, %v1109_v52  ;;  %v1159_v58 = vadd.f32 %v1158_v56, %v1157_v53  ;;  %v1112_v59 = vpop.f32.mrb[2].mxu0  ;;  %v1160_v60 = vpop.f32.mrb[2].mxu1 }
  0xfc   : > { %v1113_v61 = vpop.f32.mrb[3].mxu0  ;;  %v1161_v62 = vpop.f32.mrb[3].mxu1 }
  0xfd   : > { %v576_v63 = vadd.f32 %v1111_v57, %v1438_v54  ;;  %v640_v0 = vadd.f32 %v1159_v58, %v1438_v54  ;;  %v1114_v1 = vadd.f32 %v1113_v61, %v1112_v59  ;;  %v1162_v2 = vadd.f32 %v1161_v62, %v1160_v60 }
  0xff   : > { %v702_v3 = vmax.f32 %v576_v63, 0.0  ;;  %v718_v4 = vmax.f32 %v640_v0, 0.0  ;;  %v579_v5 = vadd.f32 %v1114_v1, %v1438_v54  ;;  %v643_v6 = vadd.f32 %v1162_v2, %v1438_v54 }
 0x101   : > { %v1061_v7 = vpack.c.bf16 %v702_v3, %v702_v3  ;;  %v1077_v8 = vpack.c.bf16 %v718_v4, %v718_v4  ;;  %v703_v9 = vmax.f32 %v579_v5, 0.0  ;;  %v719_v10 = vmax.f32 %v643_v6, 0.0  ;;  %v1115_v11 = vpop.f32.mrb[4].mxu0  ;;  %v1163_v12 = vpop.f32.mrb[4].mxu1 }
 0x102   : > { %v1116_v13 = vpop.f32.mrb[5].mxu0  ;;  %v1164_v14 = vpop.f32.mrb[5].mxu1 }
 0x103   : > { %863 = vst.msk [vmem:[%s1448_s4] sm:$0xf] %vm862_vm3, %v1061_v7  ;;  %879 = vst.msk [vmem:[%s1448_s4 + $0x40] sm:$0xf] %vm862_vm3, %v1077_v8  ;;  %v1062_v15 = vpack.c.bf16 %v703_v9, %v703_v9  ;;  %v1078_v16 = vpack.c.bf16 %v719_v10, %v719_v10  ;;  %v1117_v17 = vadd.f32 %v1116_v13, %v1115_v11  ;;  %v1118_v19 = vpop.f32.mrb[6].mxu0  ;;  %v1166_v20 = vpop.f32.mrb[6].mxu1 }
 0x104   : > { %v1165_v18 = vadd.f32 %v1164_v14, %v1163_v12  ;;  %v1119_v21 = vpop.f32.mrb[7].mxu0  ;;  %v1167_v22 = vpop.f32.mrb[7].mxu1 }
 0x105   : > { %864 = vst.msk [vmem:[%s1448_s4 + $0x4] sm:$0xf] %vm862_vm3, %v1062_v15  ;;  %880 = vst.msk [vmem:[%s1448_s4 + $0x44] sm:$0xf] %vm862_vm3, %v1078_v16  ;;  %v584_v23 = vadd.f32 %v1117_v17, %v1438_v54  ;;  %v1120_v25 = vadd.f32 %v1119_v21, %v1118_v19  ;;  %v1168_v26 = vadd.f32 %v1167_v22, %v1166_v20 }
 0x106   : > { %v648_v24 = vadd.f32 %v1165_v18, %v1438_v54 }
 0x107   : > { %v704_v27 = vmax.f32 %v584_v23, 0.0  ;;  %v587_v29 = vadd.f32 %v1120_v25, %v1438_v54  ;;  %v651_v30 = vadd.f32 %v1168_v26, %v1438_v54 }
 0x108   : > { %v720_v28 = vmax.f32 %v648_v24, 0.0 }
 0x109   : > { %v1063_v31 = vpack.c.bf16 %v704_v27, %v704_v27  ;;  %v705_v33 = vmax.f32 %v587_v29, 0.0  ;;  %v721_v34 = vmax.f32 %v651_v30, 0.0  ;;  %v1121_v35 = vpop.f32.mrb[8].mxu0  ;;  %v1169_v36 = vpop.f32.mrb[8].mxu1 }
 0x10a   : > { %v1079_v32 = vpack.c.bf16 %v720_v28, %v720_v28  ;;  %v1122_v37 = vpop.f32.mrb[9].mxu0  ;;  %v1170_v38 = vpop.f32.mrb[9].mxu1 }
 0x10b   : > { %865 = vst.msk [vmem:[%s1448_s4 + $0x8] sm:$0xf] %vm862_vm3, %v1063_v31  ;;  %v1064_v39 = vpack.c.bf16 %v705_v33, %v705_v33  ;;  %v1080_v40 = vpack.c.bf16 %v721_v34, %v721_v34  ;;  %v1123_v41 = vadd.f32 %v1122_v37, %v1121_v35  ;;  %v1171_v42 = vadd.f32 %v1170_v38, %v1169_v36  ;;  %v1124_v43 = vpop.f32.mrb[10].mxu0  ;;  %v1172_v44 = vpop.f32.mrb[10].mxu1 }
 0x10c   : > { %881 = vst.msk [vmem:[%s1448_s4 + $0x48] sm:$0xf] %vm862_vm3, %v1079_v32  ;;  %v1125_v45 = vpop.f32.mrb[11].mxu0  ;;  %v1173_v46 = vpop.f32.mrb[11].mxu1 }
 0x10d   : > { %866 = vst.msk [vmem:[%s1448_s4 + $0xc] sm:$0xf] %vm862_vm3, %v1064_v39  ;;  %882 = vst.msk [vmem:[%s1448_s4 + $0x4c] sm:$0xf] %vm862_vm3, %v1080_v40  ;;  %v592_v47 = vadd.f32 %v1123_v41, %v1438_v54  ;;  %v656_v48 = vadd.f32 %v1171_v42, %v1438_v54  ;;  %v1126_v49 = vadd.f32 %v1125_v45, %v1124_v43 }
 0x10e   : > { %v1174_v50 = vadd.f32 %v1173_v46, %v1172_v44 }
 0x10f   : > { %v706_v51 = vmax.f32 %v592_v47, 0.0  ;;  %v722_v52 = vmax.f32 %v656_v48, 0.0  ;;  %v595_v53 = vadd.f32 %v1126_v49, %v1438_v54 }
 0x110   : > { %v659_v55 = vadd.f32 %v1174_v50, %v1438_v54 }
 0x111   : > { %v1065_v56 = vpack.c.bf16 %v706_v51, %v706_v51  ;;  %v1081_v57 = vpack.c.bf16 %v722_v52, %v722_v52  ;;  %v707_v58 = vmax.f32 %v595_v53, 0.0  ;;  %v1127_v60 = vpop.f32.mrb[12].mxu0  ;;  %v1175_v61 = vpop.f32.mrb[12].mxu1 }
 0x112   : > { %v723_v59 = vmax.f32 %v659_v55, 0.0  ;;  %v1128_v62 = vpop.f32.mrb[13].mxu0  ;;  %v1176_v63 = vpop.f32.mrb[13].mxu1 }
 0x113   : > { %867 = vst.msk [vmem:[%s1448_s4 + $0x10] sm:$0xf] %vm862_vm3, %v1065_v56  ;;  %883 = vst.msk [vmem:[%s1448_s4 + $0x50] sm:$0xf] %vm862_vm3, %v1081_v57  ;;  %v1066_v0 = vpack.c.bf16 %v707_v58, %v707_v58  ;;  %v1129_v2 = vadd.f32 %v1128_v62, %v1127_v60  ;;  %v1177_v3 = vadd.f32 %v1176_v63, %v1175_v61  ;;  %v1130_v4 = vpop.f32.mrb[14].mxu0  ;;  %v1178_v5 = vpop.f32.mrb[14].mxu1 }
 0x114   : > { %v1082_v1 = vpack.c.bf16 %v723_v59, %v723_v59  ;;  %v1131_v6 = vpop.f32.mrb[15].mxu0  ;;  %v1179_v7 = vpop.f32.mrb[15].mxu1 }
 0x115   : > { %868 = vst.msk [vmem:[%s1448_s4 + $0x14] sm:$0xf] %vm862_vm3, %v1066_v0  ;;  %v600_v8 = vadd.f32 %v1129_v2, %v1438_v54  ;;  %v664_v9 = vadd.f32 %v1177_v3, %v1438_v54  ;;  %v1132_v10 = vadd.f32 %v1131_v6, %v1130_v4  ;;  %v1180_v11 = vadd.f32 %v1179_v7, %v1178_v5 }
 0x116   : > { %884 = vst.msk [vmem:[%s1448_s4 + $0x54] sm:$0xf] %vm862_vm3, %v1082_v1 }
 0x117   : > { %v708_v12 = vmax.f32 %v600_v8, 0.0  ;;  %v724_v13 = vmax.f32 %v664_v9, 0.0  ;;  %v603_v14 = vadd.f32 %v1132_v10, %v1438_v54  ;;  %v667_v15 = vadd.f32 %v1180_v11, %v1438_v54 }
 0x119   : > { %v1067_v16 = vpack.c.bf16 %v708_v12, %v708_v12  ;;  %v1083_v17 = vpack.c.bf16 %v724_v13, %v724_v13  ;;  %v709_v18 = vmax.f32 %v603_v14, 0.0  ;;  %v725_v19 = vmax.f32 %v667_v15, 0.0  ;;  %v1133_v20 = vpop.f32.mrb[16].mxu0  ;;  %v1181_v21 = vpop.f32.mrb[16].mxu1 }
 0x11a   : > { %v1134_v22 = vpop.f32.mrb[17].mxu0  ;;  %v1182_v23 = vpop.f32.mrb[17].mxu1 }
 0x11b   : > { %869 = vst.msk [vmem:[%s1448_s4 + $0x18] sm:$0xf] %vm862_vm3, %v1067_v16  ;;  %885 = vst.msk [vmem:[%s1448_s4 + $0x58] sm:$0xf] %vm862_vm3, %v1083_v17  ;;  %v1068_v24 = vpack.c.bf16 %v709_v18, %v709_v18  ;;  %v1084_v25 = vpack.c.bf16 %v725_v19, %v725_v19  ;;  %v1135_v26 = vadd.f32 %v1134_v22, %v1133_v20  ;;  %v1136_v28 = vpop.f32.mrb[18].mxu0  ;;  %v1184_v29 = vpop.f32.mrb[18].mxu1 }
 0x11c   : > { %v1183_v27 = vadd.f32 %v1182_v23, %v1181_v21  ;;  %v1137_v30 = vpop.f32.mrb[19].mxu0  ;;  %v1185_v31 = vpop.f32.mrb[19].mxu1 }
 0x11d   : > { %870 = vst.msk [vmem:[%s1448_s4 + $0x1c] sm:$0xf] %vm862_vm3, %v1068_v24  ;;  %886 = vst.msk [vmem:[%s1448_s4 + $0x5c] sm:$0xf] %vm862_vm3, %v1084_v25  ;;  %v608_v32 = vadd.f32 %v1135_v26, %v1438_v54  ;;  %v1138_v34 = vadd.f32 %v1137_v30, %v1136_v28  ;;  %v1186_v35 = vadd.f32 %v1185_v31, %v1184_v29 }
 0x11e   : > { %v672_v33 = vadd.f32 %v1183_v27, %v1438_v54 }
 0x11f   : > { %v710_v36 = vmax.f32 %v608_v32, 0.0  ;;  %v611_v38 = vadd.f32 %v1138_v34, %v1438_v54  ;;  %v675_v39 = vadd.f32 %v1186_v35, %v1438_v54 }
 0x120   : > { %v726_v37 = vmax.f32 %v672_v33, 0.0 }
 0x121   : > { %v1069_v40 = vpack.c.bf16 %v710_v36, %v710_v36  ;;  %v711_v42 = vmax.f32 %v611_v38, 0.0  ;;  %v727_v43 = vmax.f32 %v675_v39, 0.0  ;;  %v1139_v44 = vpop.f32.mrb[20].mxu0  ;;  %v1187_v45 = vpop.f32.mrb[20].mxu1 }
 0x122   : > { %v1085_v41 = vpack.c.bf16 %v726_v37, %v726_v37  ;;  %v1140_v46 = vpop.f32.mrb[21].mxu0  ;;  %v1188_v47 = vpop.f32.mrb[21].mxu1 }
 0x123   : > { %871 = vst.msk [vmem:[%s1448_s4 + $0x20] sm:$0xf] %vm862_vm3, %v1069_v40  ;;  %v1070_v48 = vpack.c.bf16 %v711_v42, %v711_v42  ;;  %v1086_v49 = vpack.c.bf16 %v727_v43, %v727_v43  ;;  %v1141_v50 = vadd.f32 %v1140_v46, %v1139_v44  ;;  %v1189_v51 = vadd.f32 %v1188_v47, %v1187_v45  ;;  %v1142_v52 = vpop.f32.mrb[22].mxu0  ;;  %v1190_v53 = vpop.f32.mrb[22].mxu1 }
 0x124   : > { %887 = vst.msk [vmem:[%s1448_s4 + $0x60] sm:$0xf] %vm862_vm3, %v1085_v41  ;;  %v1143_v55 = vpop.f32.mrb[23].mxu0  ;;  %v1191_v56 = vpop.f32.mrb[23].mxu1 }
 0x125   : > { %872 = vst.msk [vmem:[%s1448_s4 + $0x24] sm:$0xf] %vm862_vm3, %v1070_v48  ;;  %888 = vst.msk [vmem:[%s1448_s4 + $0x64] sm:$0xf] %vm862_vm3, %v1086_v49  ;;  %v616_v57 = vadd.f32 %v1141_v50, %v1438_v54  ;;  %v680_v58 = vadd.f32 %v1189_v51, %v1438_v54  ;;  %v1144_v59 = vadd.f32 %v1143_v55, %v1142_v52 }
 0x126   : > { %v1192_v60 = vadd.f32 %v1191_v56, %v1190_v53 }
 0x127   : > { %v712_v61 = vmax.f32 %v616_v57, 0.0  ;;  %v728_v62 = vmax.f32 %v680_v58, 0.0  ;;  %v619_v63 = vadd.f32 %v1144_v59, %v1438_v54 }
 0x128   : > { %v683_v0 = vadd.f32 %v1192_v60, %v1438_v54 }
 0x129   : > { %v1071_v1 = vpack.c.bf16 %v712_v61, %v712_v61  ;;  %v1087_v2 = vpack.c.bf16 %v728_v62, %v728_v62  ;;  %v713_v3 = vmax.f32 %v619_v63, 0.0  ;;  %v1145_v5 = vpop.f32.mrb[24].mxu0  ;;  %v1193_v6 = vpop.f32.mrb[24].mxu1 }
 0x12a   : > { %v729_v4 = vmax.f32 %v683_v0, 0.0  ;;  %v1146_v7 = vpop.f32.mrb[25].mxu0  ;;  %v1194_v8 = vpop.f32.mrb[25].mxu1 }
 0x12b   : > { %873 = vst.msk [vmem:[%s1448_s4 + $0x28] sm:$0xf] %vm862_vm3, %v1071_v1  ;;  %889 = vst.msk [vmem:[%s1448_s4 + $0x68] sm:$0xf] %vm862_vm3, %v1087_v2  ;;  %v1072_v9 = vpack.c.bf16 %v713_v3, %v713_v3  ;;  %v1147_v11 = vadd.f32 %v1146_v7, %v1145_v5  ;;  %v1195_v12 = vadd.f32 %v1194_v8, %v1193_v6  ;;  %v1148_v13 = vpop.f32.mrb[26].mxu0  ;;  %v1196_v14 = vpop.f32.mrb[26].mxu1 }
 0x12c   : > { %v1088_v10 = vpack.c.bf16 %v729_v4, %v729_v4  ;;  %v1149_v15 = vpop.f32.mrb[27].mxu0  ;;  %v1197_v16 = vpop.f32.mrb[27].mxu1 }
 0x12d   : > { %874 = vst.msk [vmem:[%s1448_s4 + $0x2c] sm:$0xf] %vm862_vm3, %v1072_v9  ;;  %v624_v17 = vadd.f32 %v1147_v11, %v1438_v54  ;;  %v688_v18 = vadd.f32 %v1195_v12, %v1438_v54  ;;  %v1150_v19 = vadd.f32 %v1149_v15, %v1148_v13  ;;  %v1198_v20 = vadd.f32 %v1197_v16, %v1196_v14 }
 0x12e   : > { %890 = vst.msk [vmem:[%s1448_s4 + $0x6c] sm:$0xf] %vm862_vm3, %v1088_v10 }
 0x12f   : > { %v714_v21 = vmax.f32 %v624_v17, 0.0  ;;  %v730_v22 = vmax.f32 %v688_v18, 0.0  ;;  %v627_v23 = vadd.f32 %v1150_v19, %v1438_v54  ;;  %v691_v24 = vadd.f32 %v1198_v20, %v1438_v54 }
 0x131   : > { %v1073_v25 = vpack.c.bf16 %v714_v21, %v714_v21  ;;  %v1089_v26 = vpack.c.bf16 %v730_v22, %v730_v22  ;;  %v715_v27 = vmax.f32 %v627_v23, 0.0  ;;  %v731_v28 = vmax.f32 %v691_v24, 0.0  ;;  %v1151_v29 = vpop.f32.mrb[28].mxu0  ;;  %v1199_v30 = vpop.f32.mrb[28].mxu1 }
 0x132   : > { %v1152_v31 = vpop.f32.mrb[29].mxu0  ;;  %v1200_v32 = vpop.f32.mrb[29].mxu1 }
 0x133   : > { %875 = vst.msk [vmem:[%s1448_s4 + $0x30] sm:$0xf] %vm862_vm3, %v1073_v25  ;;  %891 = vst.msk [vmem:[%s1448_s4 + $0x70] sm:$0xf] %vm862_vm3, %v1089_v26  ;;  %v1074_v33 = vpack.c.bf16 %v715_v27, %v715_v27  ;;  %v1090_v34 = vpack.c.bf16 %v731_v28, %v731_v28  ;;  %v1153_v35 = vadd.f32 %v1152_v31, %v1151_v29  ;;  %v1154_v37 = vpop.f32.mrb[30].mxu0  ;;  %v1202_v38 = vpop.f32.mrb[30].mxu1 }
 0x134   : > { %v1201_v36 = vadd.f32 %v1200_v32, %v1199_v30  ;;  %v1155_v39 = vpop.f32.mrb[31].mxu0  ;;  %v1203_v40 = vpop.f32.mrb[31].mxu1 }
 0x135   : > { %876 = vst.msk [vmem:[%s1448_s4 + $0x34] sm:$0xf] %vm862_vm3, %v1074_v33  ;;  %892 = vst.msk [vmem:[%s1448_s4 + $0x74] sm:$0xf] %vm862_vm3, %v1090_v34  ;;  %v632_v41 = vadd.f32 %v1153_v35, %v1438_v54  ;;  %v1156_v43 = vadd.f32 %v1155_v39, %v1154_v37  ;;  %v1204_v44 = vadd.f32 %v1203_v40, %v1202_v38 }
 0x136   : > { %v696_v42 = vadd.f32 %v1201_v36, %v1438_v54 }
 0x137   : > { %v716_v45 = vmax.f32 %v632_v41, 0.0  ;;  %v635_v47 = vadd.f32 %v1156_v43, %v1438_v54  ;;  %v699_v48 = vadd.f32 %v1204_v44, %v1438_v54 }
 0x138   : > { %v732_v46 = vmax.f32 %v696_v42, 0.0 }
 0x139   : > { %v1075_v49 = vpack.c.bf16 %v716_v45, %v716_v45  ;;  %v717_v51 = vmax.f32 %v635_v47, 0.0  ;;  %v733_v52 = vmax.f32 %v699_v48, 0.0 }
 0x13a   : > { %v1091_v50 = vpack.c.bf16 %v732_v46, %v732_v46 }
 0x13b   : > { %877 = vst.msk [vmem:[%s1448_s4 + $0x38] sm:$0xf] %vm862_vm3, %v1075_v49  ;;  %v1076_v53 = vpack.c.bf16 %v717_v51, %v717_v51  ;;  %v1092_v55 = vpack.c.bf16 %v733_v52, %v733_v52 }
 0x13c   : > { %893 = vst.msk [vmem:[%s1448_s4 + $0x78] sm:$0xf] %vm862_vm3, %v1091_v50 }
 0x13d   : > { %878 = vst.msk [vmem:[%s1448_s4 + $0x3c] sm:$0xf] %vm862_vm3, %v1076_v53  ;;  %894 = vst.msk [vmem:[%s1448_s4 + $0x7c] sm:$0xf] %vm862_vm3, %v1092_v55 }
 0x13e PF: > { %s13_s12 = sadd.s32 1, %s1300_s12  }
 0x13f   : > { %p10_p4 = scmp.ge.s32.totalorder %s13_s12, 4  }
 0x141   :  { %12 = sbr.rel (!%p10_p4) target bundleno = 1 (0x1), region = 62 }

// kernel: gobang_forward.4
= control target key start
LH: loop header
LB: loop body
LE: loop exit
PB: predicated region body
PF: predicated region fallthrough
CT: control target
= control target key end

     0   :  { %s8058_s12 = smov 0   ;;  %s9961_s0 = inlined_call_operand.vmem [shape: bf16[512,2592], index: 0, kind: input, shape index: {}]   ;;  %s9962_s1 = inlined_call_operand.vmem [shape: bf16[2592,64], index: 1, kind: input, shape index: {}]   ;;  %s9963_s2 = inlined_call_operand.vmem [shape: f32[1,64], index: 2, kind: input, shape index: {}]   ;;  %s9964_s3 = inlined_call_operand.vmem [shape: bf16[512,64], index: 3, kind: output, shape index: {}]  }
   0x1 LB: > { %s5582_s13 = sadd.s32 4294967295, %s8036_s12   ;;  %p5586_p0 = scmp.ge.s32.totalorder %s8036_s12, 1  ;;  %s8036_s12 = sphi %s8058_s12, %s13_s12  }
   0x2   : > { %p139_p1 = scmp.lt.s32.totalorder %s8036_s12, 3 }
   0x4   : > { %p140_p2 = pnand %p5586_p0, %p139_p1 }
   0x5   : > { %v7371_v0 = vld [vmem:[%s9962_s1 + $0x40] sm:$0xff] (!%p140_p2)   ;;  %s5587_s16 = sshll.u32 (!%p140_p2), %s5582_s13, 5  ;;  %v7373_v2 = vld [vmem:[%s9962_s1 + $0x48] sm:$0xff] (!%p140_p2)   ;;  %v7375_v4 = vld [vmem:[%s9962_s1 + $0x50] sm:$0xff] (!%p140_p2)   ;;  %vm3513_vm0 = vcmask (!%p140_p2), 261120   ;;  %vm5493_vm1 = vcmask (!%p140_p2), 519168  }
   0x6   : > { %143 = sbr.rel (%p140_p2) target bundleno = 928 (0x3a0), region = 32  ;;  %v7372_v1 = vld [vmem:[%s9962_s1] sm:$0xff] (!%p140_p2)   ;;  %6172 = vmatprep.subr.bf16.mxu0 (!%p140_p2), %v7371_v0  ;;  %7346 = vmatprep.subr.bf16.mxu1 (!%p140_p2), %v7371_v0  ;;  %p165_p3 = scmp.lt.s32.totalorder (!%p140_p2), %s5587_s16, 63  ;;  %v7374_v3 = vld [vmem:[%s9962_s1 + $0x8] sm:$0xff] (!%p140_p2)   ;;  %v7376_v5 = vld [vmem:[%s9962_s1 + $0x10] sm:$0xff] (!%p140_p2)  }
   0x7   : > { %6173 = vmatpush3.bf16.msra.mxu0 (!%p140_p2), %v7372_v1  ;;  %7354 = vmatpush3.bf16.msra.mxu1 (!%p140_p2), %v7372_v1  ;;  %v7377_v6 = vld [vmem:[%s9962_s1 + $0x58] sm:$0xff] (!%p140_p2)   ;;  %v7379_v8 = vld [vmem:[%s9962_s1 + $0x60] sm:$0xff] (!%p140_p2)   ;;  %v7381_v10 = vld [vmem:[%s9962_s1 + $0x68] sm:$0xff] (!%p140_p2)  }
   0x8   : > { %6174 = vmatprep.subr.bf16.mxu0 (!%p140_p2), %v7373_v2  ;;  %7347 = vmatprep.subr.bf16.mxu1 (!%p140_p2), %v7373_v2  ;;  %v7378_v7 = vld [vmem:[%s9962_s1 + $0x18] sm:$0xff] (!%p140_p2)   ;;  %v7380_v9 = vld [vmem:[%s9962_s1 + $0x20] sm:$0xff] (!%p140_p2)   ;;  %v7382_v13 = vld [vmem:[%s9962_s1 + $0x28] sm:$0xff] (!%p140_p2)  }
   0x9   : > { %v7383_v14 = vld [vmem:[%s9962_s1 + $0x70] sm:$0xff] (!%p140_p2)   ;;  %v7385_v16 = vld [vmem:[%s9962_s1 + $0x78] sm:$0xff] (!%p140_p2)   ;;  %v7393_v18 = vld [vmem:[%s9962_s1 + $0xc0] sm:$0xff] (!%p140_p2)  }
   0xa   : > { %v7384_v15 = vld [vmem:[%s9962_s1 + $0x30] sm:$0xff] (!%p140_p2)   ;;  %v7386_v17 = vld [vmem:[%s9962_s1 + $0x38] sm:$0xff] (!%p140_p2)   ;;  %v7396_v21 = vld [vmem:[%s9962_s1 + $0x140] sm:$0xff] (!%p140_p2)  }
   0xb   : > { %6175 = vmatpush3.bf16.msra.mxu0 (!%p140_p2), %v7374_v3  ;;  %7355 = vmatpush3.bf16.msra.mxu1 (!%p140_p2), %v7374_v3  ;;  %v7394_v22 = vld [vmem:[%s9962_s1 + $0x80] sm:$0xff] (!%p140_p2)   ;;  %v7395_v23 = vld [vmem:[%s9962_s1 + $0xc8] sm:$0xff] (!%p140_p2)   ;;  %v7405_v31 = vld [vmem:[%s9962_s1 + $0xd0] sm:$0xff] (!%p140_p2)  }
   0xc   : > { %6176 = vmatprep.subr.bf16.mxu0 (!%p140_p2), %v7375_v4  ;;  %7348 = vmatprep.subr.bf16.mxu1 (!%p140_p2), %v7375_v4  ;;  %v7398_v24 = vld [vmem:[%s9962_s1 + $0x100] sm:$0xff] (!%p140_p2)   ;;  %v7397_v27 = vld [vmem:[%s9962_s1 + $0x88] sm:$0xff] (!%p140_p2)   ;;  %v7406_v32 = vld [vmem:[%s9962_s1 + $0x90] sm:$0xff] (!%p140_p2)  }
   0xd   : > { %s9966_s16 = smov (!%p165_p3, %s5587_s16), 63  ;;  %v7416_v28 = vld [vmem:[%s9962_s1 + $0x148] sm:$0xff]   ;;  %v7407_v34 = vld [vmem:[%s9962_s1 + $0xd8] sm:$0xff]   ;;  %v7415_v40 = vld [vmem:[%s9962_s1 + $0xe0] sm:$0xff]  }
   0xe   : > { %s7362_s29 = smul.u32 84, %s9966_s16  ;;  %v7418_v33 = vld [vmem:[%s9962_s1 + $0x108] sm:$0xff]   ;;  %v7408_v37 = vld [vmem:[%s9962_s1 + $0x98] sm:$0xff]   ;;  %v7417_v41 = vld [vmem:[%s9962_s1 + $0xa0] sm:$0xff]  }
   0xf   : > { %6177 = vmatpush3.bf16.msra.mxu0 %v7376_v5  ;;  %7356 = vmatpush3.bf16.msra.mxu1 %v7376_v5  ;;  %v7419_v42 = vld [vmem:[%s9962_s1 + $0xe8] sm:$0xff]   ;;  %v7430_v43 = vld [vmem:[%s9962_s1 + $0x150] sm:$0xff]   ;;  %v7429_v52 = vld [vmem:[%s9962_s1 + $0xf8] sm:$0xff]  }
  0x10   : > { %6178 = vmatprep.subr.bf16.mxu0 %v7377_v6  ;;  %7349 = vmatprep.subr.bf16.mxu1 %v7377_v6  ;;  %s8099_s9 = scalar_lea.vmem %s9961_s0, %s7362_s29  ;;  %v7432_v46 = vld [vmem:[%s9962_s1 + $0x110] sm:$0xff]   ;;  %v7420_v47 = vld [vmem:[%s9962_s1 + $0xa8] sm:$0xff]   ;;  %v7447_v55 = vld [vmem:[%s9962_s1 + $0x158] sm:$0xff]  }
  0x11   : > { %v7389_v11 = vld [vmem:[%s8099_s9 + $0x4] ss:$84 sps:$4 sm:$0xff]   ;;  %v7387_v19 = vld [vmem:[%s8099_s9] ss:$84 sps:$4 sm:$0xff]   ;;  %v7403_v29 = vld [vmem:[%s8099_s9 + $0xa8] ss:$84 sps:$4 sm:$0xff]  }
  0x12   : > { %v7392_v12 = vld [vmem:[%s8099_s9 + $0x7e4] ss:$84 sps:$4 sm:$0xff]   ;;  %3594 = vmatprep.mubr.bf16.mxu0 %v7389_v11  ;;  %v7390_v20 = vld [vmem:[%s8099_s9 + $0x7e0] ss:$84 sps:$4 sm:$0xff]   ;;  %v7404_v30 = vld [vmem:[%s8099_s9 + $0x888] ss:$84 sps:$4 sm:$0xff]  }
  0x13   : > { %6179 = vmatpush3.bf16.msra.mxu0 %v7378_v7  ;;  %7357 = vmatpush3.bf16.msra.mxu1 %v7378_v7  ;;  %v7399_v25 = vld [vmem:[%s8099_s9 + $0xac] ss:$84 sps:$4 sm:$0xff]   ;;  %v7409_v35 = vld [vmem:[%s8099_s9 + $0x154] ss:$84 sps:$4 sm:$0xff]   ;;  %v7413_v38 = vld [vmem:[%s8099_s9 + $0x150] ss:$84 sps:$4 sm:$0xff]  }
  0x14   : > { %6180 = vmatprep.subr.bf16.mxu0 %v7379_v8  ;;  %7350 = vmatprep.subr.bf16.mxu1 %v7379_v8  ;;  %v7401_v26 = vld [vmem:[%s8099_s9 + $0x88c] ss:$84 sps:$4 sm:$0xff]   ;;  %v7411_v36 = vld [vmem:[%s8099_s9 + $0x934] ss:$84 sps:$4 sm:$0xff]   ;;  %v7414_v39 = vld [vmem:[%s8099_s9 + $0x930] ss:$84 sps:$4 sm:$0xff]  }
  0x15   : > { %3690 = vmatprep.mubr.bf16.mxu1 %v7392_v12  ;;  %v7421_v44 = vld [vmem:[%s8099_s9 + $0x1fc] ss:$84 sps:$4 sm:$0xff]   ;;  %v7425_v49 = vld [vmem:[%s8099_s9 + $0x1f8] ss:$84 sps:$4 sm:$0xff]   ;;  %v7438_v59 = vld [vmem:[%s8099_s9 + $0x2a0] ss:$84 sps:$4 sm:$0xff]  }
  0x16   : > { %v7423_v45 = vld [vmem:[%s8099_s9 + $0x9dc] ss:$84 sps:$4 sm:$0xff]   ;;  %v7426_v50 = vld [vmem:[%s8099_s9 + $0x9d8] ss:$84 sps:$4 sm:$0xff]   ;;  %v7439_v60 = vld [vmem:[%s9962_s1 + $0x1c0] sm:$0xff]  }
  0x17   : > { %6181 = vmatpush3.bf16.msra.mxu0 %v7380_v9  ;;  %7358 = vmatpush3.bf16.msra.mxu1 %v7380_v9  ;;  %v7427_v48 = vld [vmem:[%s9962_s1 + $0xf0] sm:$0xff]   ;;  %v7433_v53 = vld [vmem:[%s8099_s9 + $0x2a4] ss:$84 sps:$4 sm:$0xff]   ;;  %v7437_v54 = vld [vmem:[%s8099_s9 + $0xc] ss:$84 sps:$4 sm:$0xff]  }
  0x18   : > { %6182 = vmatprep.subr.bf16.mxu0 %v7381_v10  ;;  %7351 = vmatprep.subr.bf16.mxu1 %v7381_v10  ;;  %v7428_v51 = vld [vmem:[%s9962_s1 + $0xb0] sm:$0xff]   ;;  %v7448_v56 = vld [vmem:[%s9962_s1 + $0x118] sm:$0xff]   ;;  %v7440_v61 = vld [vmem:[%s9962_s1 + $0x180] sm:$0xff]  }
  0x19   : > { %v7431_v57 = vld [vmem:[%s9962_s1 + $0xb8] sm:$0xff]   ;;  %v7441_v62 = vld [vmem:[%s8099_s9 + $0x34c] ss:$84 sps:$4 sm:$0xff]   ;;  %v7443_v63 = vld [vmem:[%s8099_s9 + $0xb4] ss:$84 sps:$4 sm:$0xff]  }
  0x1a   : > { %v7435_v58 = vld [vmem:[%s8099_s9 + $0x8] ss:$84 sps:$4 sm:$0xff]   ;;  %v7457_v0 = vld [vmem:[%s9962_s1 + $0x160] sm:$0xff]   ;;  %v7472_v9 = vld [vmem:[%s9962_s1 + $0x1d0] sm:$0xff]  }
  0x1b   : > { %6183 = vmatpush3.bf16.msra.mxu0 %v7382_v13  ;;  %7359 = vmatpush3.bf16.msra.mxu1 %v7382_v13  ;;  %v7455_v1 = vld [vmem:[%s9962_s1 + $0x1c8] sm:$0xff]   ;;  %v7458_v2 = vld [vmem:[%s9962_s1 + $0x120] sm:$0xff]   ;;  %v7451_v7 = vld [vmem:[%s8099_s9 + $0x15c] ss:$84 sps:$4 sm:$0xff]  }
  0x1c   : > { %6184 = vmatprep.subr.bf16.mxu0 %v7383_v14  ;;  %7352 = vmatprep.subr.bf16.mxu1 %v7383_v14  ;;  %v7456_v3 = vld [vmem:[%s9962_s1 + $0x188] sm:$0xff]   ;;  %v7446_v5 = vld [vmem:[%s8099_s9 + $0xb0] ss:$84 sps:$4 sm:$0xff]  }
  0x1d   : > { %v7445_v4 = vld [vmem:[%s8099_s9 + $0x348] ss:$84 sps:$4 sm:$0xff]   ;;  %v7474_v11 = vld [vmem:[%s9962_s1 + $0x190] sm:$0xff]   ;;  %v7454_v13 = vld [vmem:[%s8099_s9 + $0x158] ss:$84 sps:$4 sm:$0xff]  }
  0x1e   : > { %v7449_v6 = vld [vmem:[%s8099_s9 + $0x3f4] ss:$84 sps:$4 sm:$0xff]   ;;  %v7453_v12 = vld [vmem:[%s8099_s9 + $0x3f0] ss:$84 sps:$4 sm:$0xff]  }
  0x1f   : > { %6185 = vmatpush3.bf16.msra.mxu0 %v7384_v15  ;;  %7360 = vmatpush3.bf16.msra.mxu1 %v7384_v15  ;;  %v7471_v8 = vld [vmem:[%s9962_s1 + $0x168] sm:$0xff]   ;;  %v7459_v14 = vld [vmem:[%s8099_s9 + $0x49c] ss:$84 sps:$4 sm:$0xff]  }
  0x20   : > { %6186 = vmatprep.subr.bf16.mxu0 %v7385_v16  ;;  %7353 = vmatprep.subr.bf16.mxu1 %v7385_v16  ;;  %v7473_v10 = vld [vmem:[%s9962_s1 + $0x128] sm:$0xff]   ;;  %v7481_v15 = vld [vmem:[%s9962_s1 + $0x170] sm:$0xff]  }
  0x21   : > { %v7482_v16 = vld [vmem:[%s9962_s1 + $0x130] sm:$0xff]  }
  0x23   : > { %6187 = vmatpush3.bf16.msra.mxu0 %v7386_v17  ;;  %7361 = vmatpush3.bf16.msra.mxu1 %v7386_v17  ;;  %v7461_v17 = vld [vmem:[%s8099_s9 + $0x204] ss:$84 sps:$4 sm:$0xff]  }
  0x24   : > { %6284 = vmatprep.subr.bf16.mxu1 %v7393_v18  ;;  %6396 = vmatprep.subr.bf16.mxu0 %v7396_v21  ;;  %v7489_v18 = vld [vmem:[%s9962_s1 + $0x1d8] sm:$0xff]   ;;  %v7464_v21 = vld [vmem:[%s8099_s9 + $0x200] ss:$84 sps:$4 sm:$0xff]  }
  0x26   : > { %3595 = vmatmul.mubr.bf16.vlgmr.msra.gmra.mrb[0].mxu0 %v7387_v19  ;;  %3691 = vmatmul.mubr.bf16.vlgmr.msra.gmra.mrb[0].mxu1 %v7390_v20  ;;  %v7490_v19 = vld [vmem:[%s9962_s1 + $0x198] sm:$0xff]  }
  0x27   : > { %6285 = vmatpush3.bf16.msra.mxu1 %v7394_v22  ;;  %6397 = vmatpush3.bf16.msra.mxu0 %v7398_v24  ;;  %v7463_v20 = vld [vmem:[%s8099_s9 + $0x498] ss:$84 sps:$4 sm:$0xff]  }
  0x28   : > { %6286 = vmatprep.subr.bf16.mxu1 %v7395_v23  ;;  %3602 = vmatprep.mubr.bf16.mxu0 %v7399_v25  ;;  %v7465_v22 = vld [vmem:[%s8099_s9 + $0x544] ss:$84 sps:$4 sm:$0xff]   ;;  %v7467_v23 = vld [vmem:[%s8099_s9 + $0x2ac] ss:$84 sps:$4 sm:$0xff]  }
  0x29   : > { %3698 = vmatprep.mubr.bf16.mxu1 %v7401_v26  ;;  %6398 = vmatprep.subr.bf16.mxu0 %v7416_v28  ;;  %v7497_v24 = vld [vmem:[%s9962_s1 + $0x178] sm:$0xff]   ;;  %v7505_v26 = vld [vmem:[%s9962_s1 + $0x1e0] sm:$0xff]  }
  0x2a   : > { %v7498_v25 = vld [vmem:[%s9962_s1 + $0x138] sm:$0xff]  }
  0x2b   : > { %6287 = vmatpush3.bf16.msra.mxu1 %v7397_v27  ;;  %6399 = vmatpush3.bf16.msra.mxu0 %v7418_v33  ;;  %v7469_v27 = vld [vmem:[%s8099_s9 + $0x540] ss:$84 sps:$4 sm:$0xff]   ;;  %v7470_v28 = vld [vmem:[%s8099_s9 + $0x2a8] ss:$84 sps:$4 sm:$0xff]  }
  0x2c   : > { %6288 = vmatprep.subr.bf16.mxu1 %v7405_v31  ;;  %6400 = vmatprep.subr.bf16.mxu0 %v7430_v43  ;;  %v7475_v31 = vld [vmem:[%s8099_s9 + $0x5ec] ss:$84 sps:$4 sm:$0xff]   ;;  %v7479_v33 = vld [vmem:[%s8099_s9 + $0x5e8] ss:$84 sps:$4 sm:$0xff]   ;;  %v7537_v43 = vld [vmem:[%s9962_s1 + $0x1f0] sm:$0xff]  }
  0x2e   : > { %3603 = vmatmul.mubr.bf16.gmra.mrb[4].mxu0 %v7403_v29  ;;  %3699 = vmatmul.mubr.bf16.gmra.mrb[4].mxu1 %v7404_v30  ;;  %v7506_v29 = vld [vmem:[%s9962_s1 + $0x1a0] sm:$0xff]  }
  0x2f   : > { %6289 = vmatpush3.bf16.msra.mxu1 %v7406_v32  ;;  %3610 = vmatprep.mubr.bf16.mxu0 %v7409_v35  ;;  %v7507_v30 = vld [vmem:[%s9962_s1 + $0x240] sm:$0xff]   ;;  %v7477_v32 = vld [vmem:[%s8099_s9 + $0x354] ss:$84 sps:$4 sm:$0xff]  }
  0x30   : > { %6290 = vmatprep.subr.bf16.mxu1 %v7407_v34  ;;  %3706 = vmatprep.mubr.bf16.mxu1 %v7411_v36  ;;  %v7480_v34 = vld [vmem:[%s8099_s9 + $0x350] ss:$84 sps:$4 sm:$0xff]   ;;  %v7521_v35 = vld [vmem:[%s9962_s1 + $0x1e8] sm:$0xff]  }
  0x31   : > { %6401 = vmatpush3.bf16.msra.mxu0 %v7432_v46  ;;  %v7522_v36 = vld [vmem:[%s9962_s1 + $0x1a8] sm:$0xff]   ;;  %v7496_v46 = vld [vmem:[%s8099_s9 + $0x4a0] ss:$84 sps:$4 sm:$0xff]  }
  0x32   : > { %6402 = vmatprep.subr.bf16.mxu0 %v7447_v55  ;;  %v7511_v55 = vld [vmem:[%s8099_s9 + $0xbc] ss:$84 sps:$4 sm:$0xff]  }
  0x33   : > { %6291 = vmatpush3.bf16.msra.mxu1 %v7408_v37  ;;  %v7483_v37 = vld [vmem:[%s8099_s9 + $0x694] ss:$84 sps:$4 sm:$0xff]  }
  0x34   : > { %6292 = vmatprep.subr.bf16.mxu1 %v7415_v40  ;;  %v7488_v40 = vld [vmem:[%s8099_s9 + $0x3f8] ss:$84 sps:$4 sm:$0xff]  }
  0x35   : > { %6403 = vmatpush3.bf16.msra.mxu0 %v7448_v56  ;;  %v7523_v56 = vld [vmem:[%s9962_s1 + $0x248] sm:$0xff]  }
  0x36   : > { %3611 = vmatmul.mubr.bf16.gmra.mrb[8].mxu0 %v7413_v38  ;;  %3707 = vmatmul.mubr.bf16.gmra.mrb[8].mxu1 %v7414_v39  ;;  %v7485_v38 = vld [vmem:[%s8099_s9 + $0x3fc] ss:$84 sps:$4 sm:$0xff]  }
  0x37   : > { %6293 = vmatpush3.bf16.msra.mxu1 %v7417_v41  ;;  %3618 = vmatprep.mubr.bf16.mxu0 %v7421_v44  ;;  %v7487_v39 = vld [vmem:[%s8099_s9 + $0x690] ss:$84 sps:$4 sm:$0xff]  }
  0x38   : > { %6294 = vmatprep.subr.bf16.mxu1 %v7419_v42  ;;  %3714 = vmatprep.mubr.bf16.mxu1 %v7423_v45  ;;  %v7491_v41 = vld [vmem:[%s8099_s9 + $0x73c] ss:$84 sps:$4 sm:$0xff]   ;;  %v7493_v42 = vld [vmem:[%s8099_s9 + $0x4a4] ss:$84 sps:$4 sm:$0xff]  }
  0x39   : > { %6404 = vmatprep.subr.bf16.mxu0 %v7457_v0  ;;  %v7538_v44 = vld [vmem:[%s9962_s1 + $0x1b0] sm:$0xff]   ;;  %v7495_v45 = vld [vmem:[%s8099_s9 + $0x738] ss:$84 sps:$4 sm:$0xff]  }
  0x3a   : > { %6405 = vmatpush3.bf16.msra.mxu0 %v7458_v2  ;;  %v7540_v0 = vld [vmem:[%s9962_s1 + $0x210] sm:$0xff]   ;;  %v7519_v2 = vld [vmem:[%s8099_s9 + $0x698] ss:$84 sps:$4 sm:$0xff]  }
  0x3b   : > { %6295 = vmatpush3.bf16.msra.mxu1 %v7420_v47  ;;  %6406 = vmatprep.subr.bf16.mxu0 %v7471_v8  ;;  %v7499_v47 = vld [vmem:[%s8099_s9 + $0x54c] ss:$84 sps:$4 sm:$0xff]  }
  0x3c   : > { %6296 = vmatprep.subr.bf16.mxu1 %v7427_v48  ;;  %v7503_v48 = vld [vmem:[%s8099_s9 + $0x14] ss:$84 sps:$4 sm:$0xff]   ;;  %v7572_v8 = vld [vmem:[%s9962_s1 + $0x220] sm:$0xff]  }
  0x3e   : > { %3619 = vmatmul.mubr.bf16.gmra.mrb[12].mxu0 %v7425_v49  ;;  %3715 = vmatmul.mubr.bf16.gmra.mrb[12].mxu1 %v7426_v50  ;;  %v7553_v49 = vld [vmem:[%s9962_s1 + $0x1f8] sm:$0xff]  }
  0x3f   : > { %6297 = vmatpush3.bf16.msra.mxu1 %v7428_v51  ;;  %3626 = vmatprep.mubr.bf16.mxu0 %v7433_v53  ;;  %v7554_v50 = vld [vmem:[%s9962_s1 + $0x1b8] sm:$0xff]   ;;  %v7501_v51 = vld [vmem:[%s8099_s9 + $0x10] ss:$84 sps:$4 sm:$0xff]  }
  0x40   : > { %6298 = vmatprep.subr.bf16.mxu1 %v7429_v52  ;;  %3755 = vmatprep.mubr.bf16.mxu1 %v7437_v54  ;;  %v7504_v52 = vld [vmem:[%s8099_s9 + $0x548] ss:$84 sps:$4 sm:$0xff]   ;;  %v7508_v53 = vld [vmem:[%s9962_s1 + $0x200] sm:$0xff]  }
  0x41   : > { %6407 = vmatpush3.bf16.msra.mxu0 %v7473_v10  ;;  %v7509_v54 = vld [vmem:[%s8099_s9 + $0x5f4] ss:$84 sps:$4 sm:$0xff]  }
  0x42   : > { %6408 = vmatprep.subr.bf16.mxu0 %v7481_v15  ;;  %v7529_v10 = vld [vmem:[%s8099_s9 + $0x740] ss:$84 sps:$4 sm:$0xff]  }
  0x43   : > { %6299 = vmatpush3.bf16.msra.mxu1 %v7431_v57  ;;  %v7569_v57 = vld [vmem:[%s9962_s1 + $0x2c0] sm:$0xff]   ;;  %v7533_v15 = vld [vmem:[%s8099_s9 + $0x2b4] ss:$84 sps:$4 sm:$0xff]  }
  0x44   : > { %6508 = vmatprep.subr.bf16.mxu1 %v7439_v60  ;;  %v7513_v60 = vld [vmem:[%s8099_s9 + $0x5f0] ss:$84 sps:$4 sm:$0xff]  }
  0x45   : > { %6409 = vmatpush3.bf16.msra.mxu0 %v7482_v16  ;;  %v7604_v16 = vld [vmem:[%s9962_s1 + $0x230] sm:$0xff]  }
  0x46   : > { %3627 = vmatmul.mubr.bf16.gmra.mrb[16].mxu0 %v7438_v59  ;;  %3756 = vmatmul.mubr.bf16.vlgmr.msra.gmra.mrb[16].mxu1 %v7435_v58  ;;  %v7524_v58 = vld [vmem:[%s9962_s1 + $0x208] sm:$0xff]   ;;  %v7539_v59 = vld [vmem:[%s9962_s1 + $0x250] sm:$0xff]  }
  0x47   : > { %6509 = vmatpush3.bf16.msra.mxu1 %v7440_v61  ;;  %3634 = vmatprep.mubr.bf16.mxu0 %v7441_v62  ;;  %v7514_v61 = vld [vmem:[%s8099_s9 + $0xb8] ss:$84 sps:$4 sm:$0xff]   ;;  %v7515_v62 = vld [vmem:[%s8099_s9 + $0x69c] ss:$84 sps:$4 sm:$0xff]  }
  0x48   : > { %3763 = vmatprep.mubr.bf16.mxu1 %v7443_v63  ;;  %6510 = vmatprep.subr.bf16.mxu1 %v7455_v1  ;;  %v7517_v63 = vld [vmem:[%s8099_s9 + $0x164] ss:$84 sps:$4 sm:$0xff]  }
  0x49   : > { %6410 = vmatprep.subr.bf16.mxu0 %v7497_v24  ;;  %v7555_v1 = vld [vmem:[%s9962_s1 + $0x258] sm:$0xff]  }
  0x4a   : > { %6411 = vmatpush3.bf16.msra.mxu0 %v7498_v25  ;;  %v7546_v24 = vld [vmem:[%s8099_s9 + $0x358] ss:$84 sps:$4 sm:$0xff]   ;;  %v7547_v25 = vld [vmem:[%s8099_s9 + $0x93c] ss:$84 sps:$4 sm:$0xff]  }
  0x4b   : > { %6511 = vmatpush3.bf16.msra.mxu1 %v7456_v3  ;;  %6620 = vmatprep.subr.bf16.mxu0 %v7507_v30  ;;  %v7556_v3 = vld [vmem:[%s9962_s1 + $0x218] sm:$0xff]  }
  0x4c   : > { %6512 = vmatprep.subr.bf16.mxu1 %v7472_v9  ;;  %v7587_v9 = vld [vmem:[%s9962_s1 + $0x268] sm:$0xff]   ;;  %v7557_v30 = vld [vmem:[%s8099_s9 + $0x9e4] ss:$84 sps:$4 sm:$0xff]  }
  0x4e   : > { %3635 = vmatmul.mubr.bf16.gmra.mrb[20].mxu0 %v7445_v4  ;;  %3764 = vmatmul.mubr.bf16.gmra.mrb[20].mxu1 %v7446_v5  ;;  %v7571_v4 = vld [vmem:[%s9962_s1 + $0x260] sm:$0xff]  }
  0x4f   : > { %3642 = vmatprep.mubr.bf16.mxu0 %v7449_v6  ;;  %3771 = vmatprep.mubr.bf16.mxu1 %v7451_v7  ;;  %v7520_v5 = vld [vmem:[%s8099_s9 + $0x160] ss:$84 sps:$4 sm:$0xff]   ;;  %v7525_v6 = vld [vmem:[%s8099_s9 + $0x744] ss:$84 sps:$4 sm:$0xff]  }
  0x50   : > { %6513 = vmatpush3.bf16.msra.mxu1 %v7474_v11  ;;  %v7527_v7 = vld [vmem:[%s8099_s9 + $0x20c] ss:$84 sps:$4 sm:$0xff]   ;;  %v7530_v11 = vld [vmem:[%s8099_s9 + $0x208] ss:$84 sps:$4 sm:$0xff]  }
  0x51   : > { %6514 = vmatprep.subr.bf16.mxu1 %v7489_v18  ;;  %v7536_v18 = vld [vmem:[%s8099_s9 + $0x2b0] ss:$84 sps:$4 sm:$0xff]  }
  0x54   : > { %6515 = vmatpush3.bf16.msra.mxu1 %v7490_v19  ;;  %v7541_v19 = vld [vmem:[%s8099_s9 + $0x894] ss:$84 sps:$4 sm:$0xff]  }
  0x55   : > { %6516 = vmatprep.subr.bf16.mxu1 %v7505_v26  ;;  %v7549_v26 = vld [vmem:[%s8099_s9 + $0x404] ss:$84 sps:$4 sm:$0xff]  }
  0x56   : > { %3643 = vmatmul.mubr.bf16.gmra.mrb[24].mxu0 %v7453_v12  ;;  %3772 = vmatmul.mubr.bf16.gmra.mrb[24].mxu1 %v7454_v13  ;;  %v7588_v12 = vld [vmem:[%s9962_s1 + $0x228] sm:$0xff]   ;;  %v7603_v13 = vld [vmem:[%s9962_s1 + $0x270] sm:$0xff]  }
  0x57   : > { %3650 = vmatprep.mubr.bf16.mxu0 %v7459_v14  ;;  %3779 = vmatprep.mubr.bf16.mxu1 %v7461_v17  ;;  %v7531_v14 = vld [vmem:[%s8099_s9 + $0x7ec] ss:$84 sps:$4 sm:$0xff]   ;;  %v7535_v17 = vld [vmem:[%s8099_s9 + $0x7e8] ss:$84 sps:$4 sm:$0xff]  }
  0x58   : > { %6517 = vmatpush3.bf16.msra.mxu1 %v7506_v29  ;;  %v7552_v29 = vld [vmem:[%s8099_s9 + $0x400] ss:$84 sps:$4 sm:$0xff]  }
  0x59   : > { %6518 = vmatprep.subr.bf16.mxu1 %v7521_v35  ;;  %v7567_v35 = vld [vmem:[%s8099_s9 + $0x1c] ss:$84 sps:$4 sm:$0xff]  }
  0x5c   : > { %6519 = vmatpush3.bf16.msra.mxu1 %v7522_v36  ;;  %v7565_v36 = vld [vmem:[%s8099_s9 + $0x18] ss:$84 sps:$4 sm:$0xff]  }
  0x5d   : > { %6520 = vmatprep.subr.bf16.mxu1 %v7537_v43  ;;  %v7601_v43 = vld [vmem:[%s9962_s1 + $0x2d0] sm:$0xff]  }
  0x5e   : > { %3651 = vmatmul.mubr.bf16.gmra.mrb[28].mxu0 %v7463_v20  ;;  %3780 = vmatmul.mubr.bf16.gmra.mrb[28].mxu1 %v7464_v21  ;;  %v7543_v20 = vld [vmem:[%s8099_s9 + $0x35c] ss:$84 sps:$4 sm:$0xff]  }
  0x5f   : > { %3658 = vmatprep.mubr.bf16.mxu0 %v7465_v22  ;;  %3787 = vmatprep.mubr.bf16.mxu1 %v7467_v23  ;;  %v7619_v21 = vld [vmem:[%s9962_s1 + $0x278] sm:$0xff]   ;;  %v7545_v23 = vld [vmem:[%s8099_s9 + $0x890] ss:$84 sps:$4 sm:$0xff]  }
  0x60   : > { %6521 = vmatpush3.bf16.msra.mxu1 %v7538_v44  ;;  %v7620_v22 = vld [vmem:[%s9962_s1 + $0x238] sm:$0xff]  }
  0x61   : > { %6522 = vmatprep.subr.bf16.mxu1 %v7553_v49  ;;  %v7577_v44 = vld [vmem:[%s8099_s9 + $0x5f8] ss:$84 sps:$4 sm:$0xff]  }
  0x62   : > { %v7617_v49 = vld [vmem:[%s9962_s1 + $0x2d8] sm:$0xff]  }
  0x64   : > { %6523 = vmatpush3.bf16.msra.mxu1 %v7554_v50  ;;  %v7583_v50 = vld [vmem:[%s8099_s9 + $0x6a0] ss:$84 sps:$4 sm:$0xff]  }
  0x65   : > { %6732 = vmatprep.subr.bf16.mxu1 %v7569_v57  ;;  %v7649_v57 = vld [vmem:[%s9962_s1 + $0x2e8] sm:$0xff]  }
  0x66   : > { %3659 = vmatmul.mubr.bf16.gmra.mrb[32].mxu0 %v7469_v27  ;;  %3788 = vmatmul.mubr.bf16.gmra.mrb[32].mxu1 %v7470_v28  ;;  %v7635_v27 = vld [vmem:[%s9962_s1 + $0x340] sm:$0xff]   ;;  %v7551_v28 = vld [vmem:[%s8099_s9 + $0x938] ss:$84 sps:$4 sm:$0xff]  }
  0x67   : > { %3666 = vmatprep.mubr.bf16.mxu0 %v7475_v31  ;;  %3795 = vmatprep.mubr.bf16.mxu1 %v7477_v32  ;;  %v7559_v31 = vld [vmem:[%s8099_s9 + $0x4ac] ss:$84 sps:$4 sm:$0xff]  }
  0x68   : > { %v7561_v32 = vld [vmem:[%s8099_s9 + $0x9e0] ss:$84 sps:$4 sm:$0xff]  }
  0x6e   : > { %3667 = vmatmul.mubr.bf16.gmra.mrb[36].mxu0 %v7479_v33  ;;  %3796 = vmatmul.mubr.bf16.gmra.mrb[36].mxu1 %v7480_v34  ;;  %v7562_v33 = vld [vmem:[%s8099_s9 + $0x4a8] ss:$84 sps:$4 sm:$0xff]  }
  0x6f   : > { %3674 = vmatprep.mubr.bf16.mxu0 %v7483_v37  ;;  %3803 = vmatprep.mubr.bf16.mxu1 %v7485_v38  ;;  %v7563_v34 = vld [vmem:[%s8099_s9 + $0x554] ss:$84 sps:$4 sm:$0xff]   ;;  %v7568_v37 = vld [vmem:[%s8099_s9 + $0x550] ss:$84 sps:$4 sm:$0xff]  }
  0x70   : > { %v7570_v38 = vld [vmem:[%s9962_s1 + $0x280] sm:$0xff]  }
  0x76   : > { %3675 = vmatmul.mubr.bf16.gmra.mrb[40].mxu0 %v7487_v39  ;;  %3804 = vmatmul.mubr.bf16.gmra.mrb[40].mxu1 %v7488_v40  ;;  %v7573_v39 = vld [vmem:[%s8099_s9 + $0x5fc] ss:$84 sps:$4 sm:$0xff]   ;;  %v7575_v40 = vld [vmem:[%s8099_s9 + $0xc4] ss:$84 sps:$4 sm:$0xff]  }
  0x77   : > { %3682 = vmatprep.mubr.bf16.mxu0 %v7491_v41  ;;  %3811 = vmatprep.mubr.bf16.mxu1 %v7493_v42  ;;  %v7585_v41 = vld [vmem:[%s9962_s1 + $0x2c8] sm:$0xff]  }
  0x78   : > { %v7586_v42 = vld [vmem:[%s9962_s1 + $0x288] sm:$0xff]  }
  0x7e   : > { %3683 = vmatmul.mubr.bf16.gmra.mrb[44].mxu0 %v7495_v45  ;;  %3812 = vmatmul.mubr.bf16.gmra.mrb[44].mxu1 %v7496_v46  ;;  %v7578_v45 = vld [vmem:[%s8099_s9 + $0xc0] ss:$84 sps:$4 sm:$0xff]   ;;  %v7579_v46 = vld [vmem:[%s8099_s9 + $0x6a4] ss:$84 sps:$4 sm:$0xff]  }
  0x7f   : > { %3819 = vmatprep.mubr.bf16.mxu1 %v7499_v47  ;;  %3916 = vmatprep.mubr.bf16.mxu0 %v7503_v48  ;;  %v7581_v47 = vld [vmem:[%s8099_s9 + $0x16c] ss:$84 sps:$4 sm:$0xff]   ;;  %v7602_v48 = vld [vmem:[%s9962_s1 + $0x290] sm:$0xff]  }
  0x86   : > { %3820 = vmatmul.mubr.bf16.gmra.mrb[48].mxu1 %v7504_v52  ;;  %3917 = vmatmul.mubr.bf16.vlgmr.msra.gmra.mrb[48].mxu0 %v7501_v51  ;;  %v7584_v51 = vld [vmem:[%s8099_s9 + $0x168] ss:$84 sps:$4 sm:$0xff]  }
  0x87   : > { %6621 = vmatpush3.bf16.msra.mxu0 %v7508_v53  ;;  %3827 = vmatprep.mubr.bf16.mxu1 %v7509_v54  ;;  %v7618_v52 = vld [vmem:[%s9962_s1 + $0x298] sm:$0xff]   ;;  %v7633_v53 = vld [vmem:[%s9962_s1 + $0x2e0] sm:$0xff]  }
  0x88   : > { %3924 = vmatprep.mubr.bf16.mxu0 %v7511_v55  ;;  %6622 = vmatprep.subr.bf16.mxu0 %v7523_v56  ;;  %v7589_v54 = vld [vmem:[%s8099_s9 + $0x74c] ss:$84 sps:$4 sm:$0xff]   ;;  %v7591_v55 = vld [vmem:[%s8099_s9 + $0x214] ss:$84 sps:$4 sm:$0xff]  }
  0x89   : > { %v7634_v56 = vld [vmem:[%s9962_s1 + $0x2a0] sm:$0xff]  }
  0x8b   : > { %6623 = vmatpush3.bf16.msra.mxu0 %v7524_v58  ;;  %v7593_v58 = vld [vmem:[%s8099_s9 + $0x748] ss:$84 sps:$4 sm:$0xff]  }
  0x8c   : > { %6624 = vmatprep.subr.bf16.mxu0 %v7539_v59  ;;  %v7594_v59 = vld [vmem:[%s8099_s9 + $0x210] ss:$84 sps:$4 sm:$0xff]  }
  0x8e   : > { %3828 = vmatmul.mubr.bf16.gmra.mrb[52].mxu1 %v7513_v60  ;;  %3925 = vmatmul.mubr.bf16.gmra.mrb[52].mxu0 %v7514_v61  ;;  %v7650_v60 = vld [vmem:[%s9962_s1 + $0x2a8] sm:$0xff]   ;;  %v7665_v61 = vld [vmem:[%s9962_s1 + $0x2f0] sm:$0xff]  }
  0x8f   : > { %3835 = vmatprep.mubr.bf16.mxu1 %v7515_v62  ;;  %3932 = vmatprep.mubr.bf16.mxu0 %v7517_v63  ;;  %v7595_v62 = vld [vmem:[%s8099_s9 + $0x7f4] ss:$84 sps:$4 sm:$0xff]   ;;  %v7597_v63 = vld [vmem:[%s8099_s9 + $0x2bc] ss:$84 sps:$4 sm:$0xff]  }
  0x90   : > { %6625 = vmatpush3.bf16.msra.mxu0 %v7540_v0  ;;  %v7666_v0 = vld [vmem:[%s9962_s1 + $0x2b0] sm:$0xff]  }
  0x91   : > { %6626 = vmatprep.subr.bf16.mxu0 %v7555_v1  ;;  %v7681_v1 = vld [vmem:[%s9962_s1 + $0x2f8] sm:$0xff]  }
  0x94   : > { %6627 = vmatpush3.bf16.msra.mxu0 %v7556_v3  ;;  %v7697_v3 = vld [vmem:[%s9962_s1 + $0x3c0] sm:$0xff]  }
  0x95   : > { %6628 = vmatprep.subr.bf16.mxu0 %v7571_v4  ;;  %v7599_v4 = vld [vmem:[%s8099_s9 + $0x7f0] ss:$84 sps:$4 sm:$0xff]  }
  0x96   : > { %3836 = vmatmul.mubr.bf16.gmra.mrb[56].mxu1 %v7519_v2  ;;  %3933 = vmatmul.mubr.bf16.gmra.mrb[56].mxu0 %v7520_v5  ;;  %v7682_v2 = vld [vmem:[%s9962_s1 + $0x2b8] sm:$0xff]  }
  0x97   : > { %3843 = vmatprep.mubr.bf16.mxu1 %v7525_v6  ;;  %3940 = vmatprep.mubr.bf16.mxu0 %v7527_v7  ;;  %v7600_v5 = vld [vmem:[%s8099_s9 + $0x2b8] ss:$84 sps:$4 sm:$0xff]   ;;  %v7605_v6 = vld [vmem:[%s8099_s9 + $0x89c] ss:$84 sps:$4 sm:$0xff]  }
  0x98   : > { %6629 = vmatpush3.bf16.msra.mxu0 %v7572_v8  ;;  %v7607_v7 = vld [vmem:[%s8099_s9 + $0x364] ss:$84 sps:$4 sm:$0xff]  }
  0x99   : > { %6630 = vmatprep.subr.bf16.mxu0 %v7587_v9  ;;  %v7609_v8 = vld [vmem:[%s8099_s9 + $0x898] ss:$84 sps:$4 sm:$0xff]   ;;  %v7610_v9 = vld [vmem:[%s8099_s9 + $0x360] ss:$84 sps:$4 sm:$0xff]  }
  0x9c   : > { %6631 = vmatpush3.bf16.msra.mxu0 %v7588_v12  ;;  %v7615_v12 = vld [vmem:[%s8099_s9 + $0x940] ss:$84 sps:$4 sm:$0xff]  }
  0x9d   : > { %6632 = vmatprep.subr.bf16.mxu0 %v7603_v13  ;;  %v7616_v13 = vld [vmem:[%s8099_s9 + $0x408] ss:$84 sps:$4 sm:$0xff]  }
  0x9e   : > { %3844 = vmatmul.mubr.bf16.gmra.mrb[60].mxu1 %v7529_v10  ;;  %3941 = vmatmul.mubr.bf16.gmra.mrb[60].mxu0 %v7530_v11  ;;  %v7611_v10 = vld [vmem:[%s8099_s9 + $0x944] ss:$84 sps:$4 sm:$0xff]   ;;  %v7613_v11 = vld [vmem:[%s8099_s9 + $0x40c] ss:$84 sps:$4 sm:$0xff]  }
  0x9f   : > { %3851 = vmatprep.mubr.bf16.mxu1 %v7531_v14  ;;  %3948 = vmatprep.mubr.bf16.mxu0 %v7533_v15  ;;  %v7621_v14 = vld [vmem:[%s8099_s9 + $0x9ec] ss:$84 sps:$4 sm:$0xff]   ;;  %v7623_v15 = vld [vmem:[%s8099_s9 + $0x4b4] ss:$84 sps:$4 sm:$0xff]  }
  0xa0   : > { %6633 = vmatpush3.bf16.msra.mxu0 %v7604_v16  ;;  %v7625_v16 = vld [vmem:[%s8099_s9 + $0x9e8] ss:$84 sps:$4 sm:$0xff]  }
  0xa1   : > { %6634 = vmatprep.subr.bf16.mxu0 %v7619_v21 }
  0xa4   : > { %6635 = vmatpush3.bf16.msra.mxu0 %v7620_v22 }
  0xa5   : > { %6844 = vmatprep.subr.bf16.mxu0 %v7635_v27  ;;  %v7631_v27 = vld [vmem:[%s8099_s9 + $0x24] ss:$84 sps:$4 sm:$0xff]  }
  0xa6   : > { %3852 = vmatmul.mubr.bf16.gmra.mrb[64].mxu1 %v7535_v17  ;;  %3949 = vmatmul.mubr.bf16.gmra.mrb[64].mxu0 %v7536_v18  ;;  %v7626_v17 = vld [vmem:[%s8099_s9 + $0x4b0] ss:$84 sps:$4 sm:$0xff]  }
  0xa7   : > { %3859 = vmatprep.mubr.bf16.mxu1 %v7541_v19  ;;  %3956 = vmatprep.mubr.bf16.mxu0 %v7543_v20 }
  0xae   : > { %3860 = vmatmul.mubr.bf16.gmra.mrb[68].mxu1 %v7545_v23  ;;  %3957 = vmatmul.mubr.bf16.gmra.mrb[68].mxu0 %v7546_v24 }
  0xaf   : > { %3867 = vmatprep.mubr.bf16.mxu1 %v7547_v25  ;;  %3964 = vmatprep.mubr.bf16.mxu0 %v7549_v26  ;;  %v7627_v26 = vld [vmem:[%s8099_s9 + $0x55c] ss:$84 sps:$4 sm:$0xff]  }
  0xb6   : > { %3868 = vmatmul.mubr.bf16.gmra.mrb[72].mxu1 %v7551_v28  ;;  %3965 = vmatmul.mubr.bf16.gmra.mrb[72].mxu0 %v7552_v29 }
  0xb7   : > { %3875 = vmatprep.mubr.bf16.mxu1 %v7557_v30  ;;  %3972 = vmatprep.mubr.bf16.mxu0 %v7559_v31 }
  0xbe   : > { %3876 = vmatmul.mubr.bf16.gmra.mrb[76].mxu1 %v7561_v32  ;;  %3973 = vmatmul.mubr.bf16.gmra.mrb[76].mxu0 %v7562_v33  ;;  %v7629_v32 = vld [vmem:[%s8099_s9 + $0x20] ss:$84 sps:$4 sm:$0xff]   ;;  %v7632_v33 = vld [vmem:[%s8099_s9 + $0x558] ss:$84 sps:$4 sm:$0xff]  }
  0xbf   : > { %3980 = vmatprep.mubr.bf16.mxu0 %v7563_v34  ;;  %4077 = vmatprep.mubr.bf16.mxu1 %v7567_v35 }
  0xc6   : > { %3981 = vmatmul.mubr.bf16.gmra.mrb[80].mxu0 %v7568_v37  ;;  %4078 = vmatmul.mubr.bf16.vlgmr.msra.gmra.mrb[80].mxu1 %v7565_v36 }
  0xc7   : > { %6733 = vmatpush3.bf16.msra.mxu1 %v7570_v38  ;;  %3988 = vmatprep.mubr.bf16.mxu0 %v7573_v39 }
  0xc8   : > { %4085 = vmatprep.mubr.bf16.mxu1 %v7575_v40  ;;  %6734 = vmatprep.subr.bf16.mxu1 %v7585_v41 }
  0xcb   : > { %6735 = vmatpush3.bf16.msra.mxu1 %v7586_v42  ;;  %v7636_v42 = vld [vmem:[%s9962_s1 + $0x300] sm:$0xff]  }
  0xcc   : > { %6736 = vmatprep.subr.bf16.mxu1 %v7601_v43  ;;  %v7637_v43 = vld [vmem:[%s8099_s9 + $0x604] ss:$84 sps:$4 sm:$0xff]  }
  0xce   : > { %3989 = vmatmul.mubr.bf16.gmra.mrb[84].mxu0 %v7577_v44  ;;  %4086 = vmatmul.mubr.bf16.gmra.mrb[84].mxu1 %v7578_v45 }
  0xcf   : > { %3996 = vmatprep.mubr.bf16.mxu0 %v7579_v46  ;;  %4093 = vmatprep.mubr.bf16.mxu1 %v7581_v47  ;;  %v7639_v46 = vld [vmem:[%s8099_s9 + $0xcc] ss:$84 sps:$4 sm:$0xff]  }
  0xd0   : > { %6737 = vmatpush3.bf16.msra.mxu1 %v7602_v48  ;;  %v7651_v47 = vld [vmem:[%s9962_s1 + $0x348] sm:$0xff]  }
  0xd1   : > { %6738 = vmatprep.subr.bf16.mxu1 %v7617_v49 }
  0xd4   : > { %6739 = vmatpush3.bf16.msra.mxu1 %v7618_v52  ;;  %v7641_v52 = vld [vmem:[%s8099_s9 + $0x600] ss:$84 sps:$4 sm:$0xff]  }
  0xd5   : > { %6740 = vmatprep.subr.bf16.mxu1 %v7633_v53  ;;  %v7642_v53 = vld [vmem:[%s8099_s9 + $0xc8] ss:$84 sps:$4 sm:$0xff]  }
  0xd6   : > { %3997 = vmatmul.mubr.bf16.gmra.mrb[88].mxu0 %v7583_v50  ;;  %4094 = vmatmul.mubr.bf16.gmra.mrb[88].mxu1 %v7584_v51  ;;  %v7652_v50 = vld [vmem:[%s9962_s1 + $0x308] sm:$0xff]   ;;  %v7667_v51 = vld [vmem:[%s9962_s1 + $0x350] sm:$0xff]  }
  0xd7   : > { %4004 = vmatprep.mubr.bf16.mxu0 %v7589_v54  ;;  %4101 = vmatprep.mubr.bf16.mxu1 %v7591_v55 }
  0xd8   : > { %6741 = vmatpush3.bf16.msra.mxu1 %v7634_v56 }
  0xd9   : > { %6742 = vmatprep.subr.bf16.mxu1 %v7649_v57 }
  0xdc   : > { %6743 = vmatpush3.bf16.msra.mxu1 %v7650_v60 }
  0xdd   : > { %6744 = vmatprep.subr.bf16.mxu1 %v7665_v61 }
  0xde   : > { %4005 = vmatmul.mubr.bf16.gmra.mrb[92].mxu0 %v7593_v58  ;;  %4102 = vmatmul.mubr.bf16.gmra.mrb[92].mxu1 %v7594_v59 }
  0xdf   : > { %4012 = vmatprep.mubr.bf16.mxu0 %v7595_v62  ;;  %4109 = vmatprep.mubr.bf16.mxu1 %v7597_v63  ;;  %v7643_v62 = vld [vmem:[%s8099_s9 + $0x6ac] ss:$84 sps:$4 sm:$0xff]   ;;  %v7645_v63 = vld [vmem:[%s8099_s9 + $0x174] ss:$84 sps:$4 sm:$0xff]  }
  0xe0   : > { %6745 = vmatpush3.bf16.msra.mxu1 %v7666_v0 }
  0xe1   : > { %6746 = vmatprep.subr.bf16.mxu1 %v7681_v1 }
  0xe4   : > { %6747 = vmatpush3.bf16.msra.mxu1 %v7682_v2  ;;  %v7668_v2 = vld [vmem:[%s9962_s1 + $0x310] sm:$0xff]  }
  0xe5   : > { %6956 = vmatprep.subr.bf16.mxu1 %v7697_v3 }
  0xe6   : > { %4013 = vmatmul.mubr.bf16.gmra.mrb[96].mxu0 %v7599_v4  ;;  %4110 = vmatmul.mubr.bf16.gmra.mrb[96].mxu1 %v7600_v5  ;;  %v7683_v5 = vld [vmem:[%s9962_s1 + $0x358] sm:$0xff]  }
  0xe7   : > { %4020 = vmatprep.mubr.bf16.mxu0 %v7605_v6  ;;  %4117 = vmatprep.mubr.bf16.mxu1 %v7607_v7  ;;  %v7684_v6 = vld [vmem:[%s9962_s1 + $0x318] sm:$0xff]   ;;  %v7699_v7 = vld [vmem:[%s9962_s1 + $0x360] sm:$0xff]  }
  0xee   : > { %4021 = vmatmul.mubr.bf16.gmra.mrb[100].mxu0 %v7609_v8  ;;  %4118 = vmatmul.mubr.bf16.gmra.mrb[100].mxu1 %v7610_v9  ;;  %v7647_v8 = vld [vmem:[%s8099_s9 + $0x6a8] ss:$84 sps:$4 sm:$0xff]   ;;  %v7648_v9 = vld [vmem:[%s8099_s9 + $0x170] ss:$84 sps:$4 sm:$0xff]  }
  0xef   : > { %4028 = vmatprep.mubr.bf16.mxu0 %v7611_v10  ;;  %4125 = vmatprep.mubr.bf16.mxu1 %v7613_v11 }
  0xf6   : > { %4029 = vmatmul.mubr.bf16.gmra.mrb[104].mxu0 %v7615_v12  ;;  %4126 = vmatmul.mubr.bf16.gmra.mrb[104].mxu1 %v7616_v13 }
  0xf7   : > { %4036 = vmatprep.mubr.bf16.mxu0 %v7621_v14  ;;  %4133 = vmatprep.mubr.bf16.mxu1 %v7623_v15 }
  0xf9   : > { %v6260_v18 = vpop.f32.mrb[0].mxu1  ;;  %v6188_v19 = vpop.f32.mrb[0].mxu0 }
  0xfa   : > { %v6261_v20 = vpop.f32.mrb[1].mxu1  ;;  %v6189_v21 = vpop.f32.mrb[1].mxu0 }
  0xfb   : > { %v8480_v22 = vadd.f32 %v6261_v20, %v6260_v18  ;;  %v6263_v23 = vpop.f32.mrb[2].mxu1  ;;  %v8482_v24 = vadd.f32 %v6189_v21, %v6188_v19  ;;  %v6191_v25 = vpop.f32.mrb[2].mxu0  ;;  %v7653_v18 = vld [vmem:[%s8099_s9 + $0x754] ss:$84 sps:$4 sm:$0xff]   ;;  %v7655_v19 = vld [vmem:[%s8099_s9 + $0x21c] ss:$84 sps:$4 sm:$0xff]  }
  0xfc   : > { %v6264_v28 = vpop.f32.mrb[3].mxu1  ;;  %v6192_v29 = vpop.f32.mrb[3].mxu0 }
  0xfd   : > { %v8486_v30 = vadd.f32 %v6264_v28, %v6263_v23  ;;  %v8488_v31 = vadd.f32 %v6192_v29, %v6191_v25  ;;  %v7700_v23 = vld [vmem:[%s9962_s1 + $0x320] sm:$0xff]   ;;  %v7715_v25 = vld [vmem:[%s9962_s1 + $0x368] sm:$0xff]   ;;  %v7731_v29 = vld [vmem:[%s9962_s1 + $0x370] sm:$0xff]  }
  0xfe   : > { %4037 = vmatmul.mubr.bf16.gmra.mrb[108].mxu0 %v7625_v16  ;;  %4134 = vmatmul.mubr.bf16.gmra.mrb[108].mxu1 %v7626_v17  ;;  %v7716_v28 = vld [vmem:[%s9962_s1 + $0x328] sm:$0xff]  }
  0xff   : > { %4141 = vmatprep.mubr.bf16.mxu1 %v7627_v26  ;;  %4238 = vmatprep.mubr.bf16.mxu0 %v7631_v27 }
 0x101   : > { %v6266_v34 = vpop.f32.mrb[4].mxu1  ;;  %v6194_v35 = vpop.f32.mrb[4].mxu0 }
 0x102   : > { %v6267_v36 = vpop.f32.mrb[5].mxu1  ;;  %v6195_v37 = vpop.f32.mrb[5].mxu0 }
 0x103   : > { %v8492_v38 = vadd.f32 %v6267_v36, %v6266_v34  ;;  %v6269_v39 = vpop.f32.mrb[6].mxu1  ;;  %v8494_v40 = vadd.f32 %v6195_v37, %v6194_v35  ;;  %v6197_v41 = vpop.f32.mrb[6].mxu0  ;;  %v7658_v34 = vld [vmem:[%s8099_s9 + $0x218] ss:$84 sps:$4 sm:$0xff]  }
 0x104   : > { %v6270_v44 = vpop.f32.mrb[7].mxu1  ;;  %v6198_v45 = vpop.f32.mrb[7].mxu0 }
 0x105   : > { %v8504_v48 = vadd.f32 %v6270_v44, %v6269_v39  ;;  %v8506_v49 = vadd.f32 %v6198_v45, %v6197_v41 }
 0x106   : > { %4142 = vmatmul.mubr.bf16.gmra.mrb[112].mxu1 %v7632_v33  ;;  %4239 = vmatmul.mubr.bf16.vlgmr.msra.gmra.mrb[112].mxu0 %v7629_v32  ;;  %v8565_v32 = vld [vmem:[%s9963_s2] ss:$0 sm:$0xff]  ;;  %v7657_v33 = vld [vmem:[%s8099_s9 + $0x750] ss:$84 sps:$4 sm:$0xff]  }
 0x107   : > { %6845 = vmatpush3.bf16.msra.mxu0 %v7636_v42  ;;  %4149 = vmatprep.mubr.bf16.mxu1 %v7637_v43  ;;  %v3597_v41 = vadd.f32 %v8482_v24, %v8565_v32 }
 0x108   : > { %4246 = vmatprep.mubr.bf16.mxu0 %v7639_v46  ;;  %6846 = vmatprep.subr.bf16.mxu0 %v7651_v47  ;;  %v7659_v46 = vld [vmem:[%s8099_s9 + $0x7fc] ss:$84 sps:$4 sm:$0xff]   ;;  %v7661_v47 = vld [vmem:[%s8099_s9 + $0x2c4] ss:$84 sps:$4 sm:$0xff]  }
 0x109   : > { %v6272_v54 = vpop.f32.mrb[8].mxu1  ;;  %v6200_v55 = vpop.f32.mrb[8].mxu0 }
 0x10a   : > { %v6273_v56 = vpop.f32.mrb[9].mxu1  ;;  %v6201_v57 = vpop.f32.mrb[9].mxu0 }
 0x10b   : > { %v8516_v58 = vadd.f32 %v6273_v56, %v6272_v54  ;;  %v6275_v59 = vpop.f32.mrb[10].mxu1  ;;  %v8518_v60 = vadd.f32 %v6201_v57, %v6200_v55  ;;  %v6203_v61 = vpop.f32.mrb[10].mxu0  ;;  %6847 = vmatpush3.bf16.msra.mxu0 %v7652_v50  ;;  %v7747_v56 = vld [vmem:[%s9962_s1 + $0x378] sm:$0xff]  }
 0x10c   : > { %v6276_v0 = vpop.f32.mrb[11].mxu1  ;;  %v6204_v1 = vpop.f32.mrb[11].mxu0  ;;  %6848 = vmatprep.subr.bf16.mxu0 %v7667_v51  ;;  %v7748_v57 = vld [vmem:[%s9962_s1 + $0x338] sm:$0xff]  }
 0x10d   : > { %v8525_v3 = vadd.f32 %v6276_v0, %v6275_v59  ;;  %v8527_v4 = vadd.f32 %v6204_v1, %v6203_v61  ;;  %v7663_v61 = vld [vmem:[%s8099_s9 + $0x7f8] ss:$84 sps:$4 sm:$0xff]  }
 0x10e   : > { %4150 = vmatmul.mubr.bf16.gmra.mrb[116].mxu1 %v7641_v52  ;;  %4247 = vmatmul.mubr.bf16.gmra.mrb[116].mxu0 %v7642_v53  ;;  %v7732_v52 = vld [vmem:[%s9962_s1 + $0x330] sm:$0xff]   ;;  %v3600_v53 = vadd.f32 %v8488_v31, %v8565_v32  ;;  %v7763_v31 = vld [vmem:[%s9962_s1 + $0x440] sm:$0xff]  }
 0x10f   : > { %4157 = vmatprep.mubr.bf16.mxu1 %v7643_v62  ;;  %4254 = vmatprep.mubr.bf16.mxu0 %v7645_v63  ;;  %v7664_v62 = vld [vmem:[%s8099_s9 + $0x2c0] ss:$84 sps:$4 sm:$0xff]  }
 0x110   : > { %6849 = vmatpush3.bf16.msra.mxu0 %v7668_v2 }
 0x111   : > { %v6278_v10 = vpop.f32.mrb[12].mxu1  ;;  %v6206_v11 = vpop.f32.mrb[12].mxu0  ;;  %6850 = vmatprep.subr.bf16.mxu0 %v7683_v5  ;;  %v3605_v5 = vadd.f32 %v8494_v40, %v8565_v32 }
 0x112   : > { %v6279_v12 = vpop.f32.mrb[13].mxu1  ;;  %v6207_v13 = vpop.f32.mrb[13].mxu0 }
 0x113   : > { %v8540_v14 = vadd.f32 %v6279_v12, %v6278_v10  ;;  %v6281_v15 = vpop.f32.mrb[14].mxu1  ;;  %v8542_v16 = vadd.f32 %v6207_v13, %v6206_v11  ;;  %v6209_v17 = vpop.f32.mrb[14].mxu0  ;;  %v7669_v10 = vld [vmem:[%s8099_s9 + $0x8a4] ss:$84 sps:$4 sm:$0xff]   ;;  %v7671_v11 = vld [vmem:[%s8099_s9 + $0x36c] ss:$84 sps:$4 sm:$0xff]  }
 0x114   : > { %v6282_v20 = vpop.f32.mrb[15].mxu1  ;;  %v6210_v21 = vpop.f32.mrb[15].mxu0  ;;  %6851 = vmatpush3.bf16.msra.mxu0 %v7684_v6 }
 0x115   : > { %v8552_v26 = vadd.f32 %v6282_v20, %v6281_v15  ;;  %v8554_v27 = vadd.f32 %v6210_v21, %v6209_v17  ;;  %6852 = vmatprep.subr.bf16.mxu0 %v7699_v7  ;;  %v3608_v15 = vadd.f32 %v8506_v49, %v8565_v32  ;;  %v7673_v20 = vld [vmem:[%s8099_s9 + $0x8a0] ss:$84 sps:$4 sm:$0xff]   ;;  %v7674_v21 = vld [vmem:[%s8099_s9 + $0x368] ss:$84 sps:$4 sm:$0xff]  }
 0x116   : > { %4158 = vmatmul.mubr.bf16.gmra.mrb[120].mxu1 %v7647_v8  ;;  %4255 = vmatmul.mubr.bf16.gmra.mrb[120].mxu0 %v7648_v9 }
 0x117   : > { %4165 = vmatprep.mubr.bf16.mxu1 %v7653_v18  ;;  %4262 = vmatprep.mubr.bf16.mxu0 %v7655_v19 }
 0x118   : > { %6853 = vmatpush3.bf16.msra.mxu0 %v7700_v23 }
 0x119   : > { %v6300_v35 = vpop.f32.mrb[16].mxu1  ;;  %v6212_v36 = vpop.f32.mrb[16].mxu0  ;;  %6854 = vmatprep.subr.bf16.mxu0 %v7715_v25 }
 0x11a   : > { %v6301_v37 = vpop.f32.mrb[17].mxu1  ;;  %v6213_v39 = vpop.f32.mrb[17].mxu0 }
 0x11b   : > { %v6302_v42 = vadd.f32 %v6301_v37, %v6300_v35  ;;  %v6303_v43 = vpop.f32.mrb[18].mxu1  ;;  %v8571_v44 = vadd.f32 %v6213_v39, %v6212_v36  ;;  %v6215_v45 = vpop.f32.mrb[18].mxu0  ;;  %v7675_v37 = vld [vmem:[%s8099_s9 + $0x94c] ss:$84 sps:$4 sm:$0xff]   ;;  %v7677_v39 = vld [vmem:[%s8099_s9 + $0x414] ss:$84 sps:$4 sm:$0xff]  }
 0x11c   : > { %v6304_v50 = vpop.f32.mrb[19].mxu1  ;;  %v6216_v51 = vpop.f32.mrb[19].mxu0  ;;  %6855 = vmatpush3.bf16.msra.mxu0 %v7716_v28 }
 0x11d   : > { %v8580_v24 = vadd.f32 %v6302_v42, %v3597_v41  ;;  %v6305_v54 = vadd.f32 %v6304_v50, %v6303_v43  ;;  %v8582_v55 = vadd.f32 %v6216_v51, %v6215_v45  ;;  %6856 = vmatprep.subr.bf16.mxu0 %v7731_v29  ;;  %v3613_v29 = vadd.f32 %v8518_v60, %v8565_v32  ;;  %v7679_v50 = vld [vmem:[%s8099_s9 + $0x948] ss:$84 sps:$4 sm:$0xff]   ;;  %v7680_v51 = vld [vmem:[%s8099_s9 + $0x410] ss:$84 sps:$4 sm:$0xff]  }
 0x11e   : > { %4166 = vmatmul.mubr.bf16.gmra.mrb[124].mxu1 %v7657_v33  ;;  %4263 = vmatmul.mubr.bf16.gmra.mrb[124].mxu0 %v7658_v34  ;;  %v3616_v43 = vadd.f32 %v8527_v4, %v8565_v32  ;;  %v3621_v4 = vadd.f32 %v8542_v16, %v8565_v32 }
 0x11f   : > { %v8590_v59 = vadd.f32 %v6305_v54, %v3600_v53  ;;  %4173 = vmatprep.mubr.bf16.mxu1 %v7659_v46  ;;  %4270 = vmatprep.mubr.bf16.mxu0 %v7661_v47 }
 0x120   : > { %6857 = vmatpush3.bf16.msra.mxu0 %v7732_v52 }
 0x121   : > { %v6306_v63 = vpop.f32.mrb[20].mxu1  ;;  %v6218_v0 = vpop.f32.mrb[20].mxu0  ;;  %6858 = vmatprep.subr.bf16.mxu0 %v7747_v56 }
 0x122   : > { %v6307_v1 = vpop.f32.mrb[21].mxu1  ;;  %v6219_v2 = vpop.f32.mrb[21].mxu0 }
 0x123   : > { %v6308_v6 = vadd.f32 %v6307_v1, %v6306_v63  ;;  %v6309_v7 = vpop.f32.mrb[22].mxu1  ;;  %v8599_v8 = vadd.f32 %v6219_v2, %v6218_v0  ;;  %v6221_v9 = vpop.f32.mrb[22].mxu0  ;;  %v7685_v63 = vld [vmem:[%s8099_s9 + $0x9f4] ss:$84 sps:$4 sm:$0xff]   ;;  %v7687_v0 = vld [vmem:[%s8099_s9 + $0x4bc] ss:$84 sps:$4 sm:$0xff]  }
 0x124   : > { %v6310_v12 = vpop.f32.mrb[23].mxu1  ;;  %v6222_v13 = vpop.f32.mrb[23].mxu0  ;;  %6859 = vmatpush3.bf16.msra.mxu0 %v7748_v57 }
 0x125   : > { %v8605_v17 = vadd.f32 %v6308_v6, %v3605_v5  ;;  %v6311_v18 = vadd.f32 %v6310_v12, %v6309_v7  ;;  %v8607_v19 = vadd.f32 %v6222_v13, %v6221_v9  ;;  %7068 = vmatprep.subr.bf16.mxu0 %v7763_v31  ;;  %v3624_v5 = vadd.f32 %v8554_v27, %v8565_v32 }
 0x126   : > { %4174 = vmatmul.mubr.bf16.gmra.mrb[128].mxu1 %v7663_v61  ;;  %4271 = vmatmul.mubr.bf16.gmra.mrb[128].mxu0 %v7664_v62  ;;  %v3629_v27 = vadd.f32 %v8571_v44, %v8565_v32 }
 0x127   : > { %v8609_v40 = vadd.f32 %v6311_v18, %v3608_v15  ;;  %4181 = vmatprep.mubr.bf16.mxu1 %v7669_v10  ;;  %4278 = vmatprep.mubr.bf16.mxu0 %v7671_v11  ;;  %v7689_v10 = vld [vmem:[%s8099_s9 + $0x9f0] ss:$84 sps:$4 sm:$0xff]   ;;  %v7690_v11 = vld [vmem:[%s8099_s9 + $0x4b8] ss:$84 sps:$4 sm:$0xff]  }
 0x129   : > { %v6312_v23 = vpop.f32.mrb[24].mxu1  ;;  %v6224_v25 = vpop.f32.mrb[24].mxu0 }
 0x12a   : > { %v6313_v28 = vpop.f32.mrb[25].mxu1  ;;  %v6225_v49 = vpop.f32.mrb[25].mxu0 }
 0x12b   : > { %v6314_v33 = vadd.f32 %v6313_v28, %v6312_v23  ;;  %v6315_v34 = vpop.f32.mrb[26].mxu1  ;;  %v8615_v35 = vadd.f32 %v6225_v49, %v6224_v25  ;;  %v6227_v36 = vpop.f32.mrb[26].mxu0  ;;  %v7691_v28 = vld [vmem:[%s8099_s9 + $0x564] ss:$84 sps:$4 sm:$0xff]   ;;  %v7695_v49 = vld [vmem:[%s8099_s9 + $0x2c] ss:$84 sps:$4 sm:$0xff]  }
 0x12c   : > { %v6316_v41 = vpop.f32.mrb[27].mxu1  ;;  %v6228_v42 = vpop.f32.mrb[27].mxu0 }
 0x12d   : > { %v8621_v45 = vadd.f32 %v6314_v33, %v3613_v29  ;;  %v6317_v46 = vadd.f32 %v6316_v41, %v6315_v34  ;;  %v8623_v47 = vadd.f32 %v6228_v42, %v6227_v36  ;;  %v3632_v34 = vadd.f32 %v8582_v55, %v8565_v32  ;;  %v7693_v41 = vld [vmem:[%s8099_s9 + $0x28] ss:$84 sps:$4 sm:$0xff]   ;;  %v7696_v42 = vld [vmem:[%s8099_s9 + $0x560] ss:$84 sps:$4 sm:$0xff]  }
 0x12e   : > { %4182 = vmatmul.mubr.bf16.gmra.mrb[132].mxu1 %v7673_v20  ;;  %4279 = vmatmul.mubr.bf16.gmra.mrb[132].mxu0 %v7674_v21  ;;  %v3637_v55 = vadd.f32 %v8599_v8, %v8565_v32  ;;  %v3640_v8 = vadd.f32 %v8607_v19, %v8565_v32  ;;  %v7729_v19 = vld [vmem:[%s9962_s1 + $0x3d0] sm:$0xff]  }
 0x12f   : > { %v8625_v60 = vadd.f32 %v6317_v46, %v3616_v43  ;;  %4189 = vmatprep.mubr.bf16.mxu1 %v7675_v37  ;;  %4286 = vmatprep.mubr.bf16.mxu0 %v7677_v39 }
 0x131   : > { %v6318_v52 = vpop.f32.mrb[28].mxu1  ;;  %v6230_v53 = vpop.f32.mrb[28].mxu0 }
 0x132   : > { %v6319_v54 = vpop.f32.mrb[29].mxu1  ;;  %v6231_v56 = vpop.f32.mrb[29].mxu0 }
 0x133   : > { %v6320_v57 = vadd.f32 %v6319_v54, %v6318_v52  ;;  %v6321_v31 = vpop.f32.mrb[30].mxu1  ;;  %v8631_v61 = vadd.f32 %v6231_v56, %v6230_v53  ;;  %v6233_v62 = vpop.f32.mrb[30].mxu0 }
 0x134   : > { %v6322_v1 = vpop.f32.mrb[31].mxu1  ;;  %v6234_v2 = vpop.f32.mrb[31].mxu0 }
 0x135   : > { %v8637_v6 = vadd.f32 %v6320_v57, %v3621_v4  ;;  %v6323_v7 = vadd.f32 %v6322_v1, %v6321_v31  ;;  %v8639_v9 = vadd.f32 %v6234_v2, %v6233_v62  ;;  %v7698_v4 = vld [vmem:[%s9962_s1 + $0x380] sm:$0xff]  }
 0x136   : > { %4190 = vmatmul.mubr.bf16.gmra.mrb[136].mxu1 %v7679_v50  ;;  %4287 = vmatmul.mubr.bf16.gmra.mrb[136].mxu0 %v7680_v51  ;;  %v7701_v57 = vld [vmem:[%s8099_s9 + $0x60c] ss:$84 sps:$4 sm:$0xff]  }
 0x137   : > { %v8641_v16 = vadd.f32 %v6323_v7, %v3624_v5  ;;  %4197 = vmatprep.mubr.bf16.mxu1 %v7685_v63  ;;  %4294 = vmatprep.mubr.bf16.mxu0 %v7687_v0  ;;  %v7703_v63 = vld [vmem:[%s8099_s9 + $0xd4] ss:$84 sps:$4 sm:$0xff]  }
 0x138   : > { %v7713_v0 = vld [vmem:[%s9962_s1 + $0x3c8] sm:$0xff]  }
 0x139   : > { %v6324_v12 = vpop.f32.mrb[32].mxu1  ;;  %v6236_v13 = vpop.f32.mrb[32].mxu0 }
 0x13a   : > { %v6325_v15 = vpop.f32.mrb[33].mxu1  ;;  %v6237_v18 = vpop.f32.mrb[33].mxu0 }
 0x13b   : > { %v6326_v20 = vadd.f32 %v6325_v15, %v6324_v12  ;;  %v6327_v21 = vpop.f32.mrb[34].mxu1  ;;  %v8647_v23 = vadd.f32 %v6237_v18, %v6236_v13  ;;  %v6239_v25 = vpop.f32.mrb[34].mxu0  ;;  %v7706_v12 = vld [vmem:[%s8099_s9 + $0xd0] ss:$84 sps:$4 sm:$0xff]  }
 0x13c   : > { %v6328_v29 = vpop.f32.mrb[35].mxu1  ;;  %v6240_v33 = vpop.f32.mrb[35].mxu0 }
 0x13d   : > { %v8653_v36 = vadd.f32 %v6326_v20, %v3629_v27  ;;  %v6329_v37 = vadd.f32 %v6328_v29, %v6327_v21  ;;  %v8655_v39 = vadd.f32 %v6240_v33, %v6239_v25  ;;  %v3645_v20 = vadd.f32 %v8615_v35, %v8565_v32  ;;  %v7707_v29 = vld [vmem:[%s8099_s9 + $0x6b4] ss:$84 sps:$4 sm:$0xff]   ;;  %v7709_v33 = vld [vmem:[%s8099_s9 + $0x17c] ss:$84 sps:$4 sm:$0xff]  }
 0x13e   : > { %4198 = vmatmul.mubr.bf16.gmra.mrb[140].mxu1 %v7689_v10  ;;  %4295 = vmatmul.mubr.bf16.gmra.mrb[140].mxu0 %v7690_v11  ;;  %v7714_v10 = vld [vmem:[%s9962_s1 + $0x388] sm:$0xff]   ;;  %v3648_v35 = vadd.f32 %v8623_v47, %v8565_v32  ;;  %v7761_v47 = vld [vmem:[%s9962_s1 + $0x3e0] sm:$0xff]  }
 0x13f   : > { %v8657_v44 = vadd.f32 %v6329_v37, %v3632_v34  ;;  %4302 = vmatprep.mubr.bf16.mxu0 %v7691_v28  ;;  %4399 = vmatprep.mubr.bf16.mxu1 %v7695_v49  ;;  %v7705_v11 = vld [vmem:[%s8099_s9 + $0x608] ss:$84 sps:$4 sm:$0xff]  }
 0x141   : > { %v6330_v43 = vpop.f32.mrb[36].mxu1  ;;  %v6242_v46 = vpop.f32.mrb[36].mxu0 }
 0x142   : > { %v6331_v50 = vpop.f32.mrb[37].mxu1  ;;  %v6243_v51 = vpop.f32.mrb[37].mxu0 }
 0x143   : > { %v6332_v52 = vadd.f32 %v6331_v50, %v6330_v43  ;;  %v6333_v53 = vpop.f32.mrb[38].mxu1  ;;  %v8663_v54 = vadd.f32 %v6243_v51, %v6242_v46  ;;  %v6245_v56 = vpop.f32.mrb[38].mxu0  ;;  %v7745_v50 = vld [vmem:[%s9962_s1 + $0x3d8] sm:$0xff]  }
 0x144   : > { %v6334_v31 = vpop.f32.mrb[39].mxu1  ;;  %v6246_v62 = vpop.f32.mrb[39].mxu0  ;;  %v7746_v51 = vld [vmem:[%s9962_s1 + $0x398] sm:$0xff]  }
 0x145   : > { %v8675_v1 = vadd.f32 %v6332_v52, %v3637_v55  ;;  %v6335_v2 = vadd.f32 %v6334_v31, %v6333_v53  ;;  %v8677_v5 = vadd.f32 %v6246_v62, %v6245_v56  ;;  %v7711_v52 = vld [vmem:[%s8099_s9 + $0x6b0] ss:$84 sps:$4 sm:$0xff]   ;;  %v7712_v53 = vld [vmem:[%s8099_s9 + $0x178] ss:$84 sps:$4 sm:$0xff]   ;;  %v3653_v62 = vadd.f32 %v8631_v61, %v8565_v32 }
 0x146   : > { %4303 = vmatmul.mubr.bf16.gmra.mrb[144].mxu0 %v7696_v42  ;;  %4400 = vmatmul.mubr.bf16.vlgmr.msra.gmra.mrb[144].mxu1 %v7693_v41  ;;  %v7730_v41 = vld [vmem:[%s9962_s1 + $0x390] sm:$0xff]   ;;  %v7777_v61 = vld [vmem:[%s9962_s1 + $0x3e8] sm:$0xff]  }
 0x147   : > { %v8679_v7 = vadd.f32 %v6335_v2, %v3640_v8  ;;  %6957 = vmatpush3.bf16.msra.mxu1 %v7698_v4  ;;  %4310 = vmatprep.mubr.bf16.mxu0 %v7701_v57 }
 0x148   : > { %4407 = vmatprep.mubr.bf16.mxu1 %v7703_v63  ;;  %6958 = vmatprep.subr.bf16.mxu1 %v7713_v0 }
 0x149   : > { %v6336_v13 = vpop.f32.mrb[40].mxu1  ;;  %v6248_v15 = vpop.f32.mrb[40].mxu0 }
 0x14a   : > { %v6337_v18 = vpop.f32.mrb[41].mxu1  ;;  %v6249_v27 = vpop.f32.mrb[41].mxu0 }
 0x14b   : > { %v6338_v21 = vadd.f32 %v6337_v18, %v6336_v13  ;;  %v6339_v25 = vpop.f32.mrb[42].mxu1  ;;  %v8691_v28 = vadd.f32 %v6249_v27, %v6248_v15  ;;  %v6251_v49 = vpop.f32.mrb[42].mxu0  ;;  %6959 = vmatpush3.bf16.msra.mxu1 %v7714_v10  ;;  %v7717_v10 = vld [vmem:[%s8099_s9 + $0x75c] ss:$84 sps:$4 sm:$0xff]   ;;  %v7762_v13 = vld [vmem:[%s9962_s1 + $0x3a0] sm:$0xff]   ;;  %v3656_v15 = vadd.f32 %v8639_v9, %v8565_v32 }
 0x14c   : > { %v6340_v34 = vpop.f32.mrb[43].mxu1  ;;  %v6252_v37 = vpop.f32.mrb[43].mxu0  ;;  %6960 = vmatprep.subr.bf16.mxu1 %v7729_v19  ;;  %v7719_v19 = vld [vmem:[%s8099_s9 + $0x224] ss:$84 sps:$4 sm:$0xff]   ;;  %v7793_v9 = vld [vmem:[%s9962_s1 + $0x3f0] sm:$0xff]  }
 0x14d   : > { %v8700_v42 = vadd.f32 %v6338_v21, %v3645_v20  ;;  %v6341_v43 = vadd.f32 %v6340_v34, %v6339_v25  ;;  %v8702_v46 = vadd.f32 %v6252_v37, %v6251_v49  ;;  %v7778_v25 = vld [vmem:[%s9962_s1 + $0x3a8] sm:$0xff]  }
 0x14e   : > { %4311 = vmatmul.mubr.bf16.gmra.mrb[148].mxu0 %v7705_v11  ;;  %4408 = vmatmul.mubr.bf16.gmra.mrb[148].mxu1 %v7706_v12  ;;  %v7721_v49 = vld [vmem:[%s8099_s9 + $0x758] ss:$84 sps:$4 sm:$0xff]  }
 0x14f   : > { %v8710_v55 = vadd.f32 %v6341_v43, %v3648_v35  ;;  %4318 = vmatprep.mubr.bf16.mxu0 %v7707_v29  ;;  %4415 = vmatprep.mubr.bf16.mxu1 %v7709_v33  ;;  %v7722_v29 = vld [vmem:[%s8099_s9 + $0x220] ss:$84 sps:$4 sm:$0xff]   ;;  %v3661_v35 = vadd.f32 %v8647_v23, %v8565_v32 }
 0x150   : > { %6961 = vmatpush3.bf16.msra.mxu1 %v7730_v41 }
 0x151   : > { %v6342_v56 = vpop.f32.mrb[44].mxu1  ;;  %v6254_v4 = vpop.f32.mrb[44].mxu0  ;;  %6962 = vmatprep.subr.bf16.mxu1 %v7745_v50 }
 0x152   : > { %v6343_v57 = vpop.f32.mrb[45].mxu1  ;;  %v6255_v31 = vpop.f32.mrb[45].mxu0 }
 0x153   : > { %v6344_v63 = vadd.f32 %v6343_v57, %v6342_v56  ;;  %v6345_v0 = vpop.f32.mrb[46].mxu1  ;;  %v8719_v8 = vadd.f32 %v6255_v31, %v6254_v4  ;;  %v6257_v2 = vpop.f32.mrb[46].mxu0  ;;  %v3664_v56 = vadd.f32 %v8655_v39, %v8565_v32  ;;  %v7794_v31 = vld [vmem:[%s9962_s1 + $0x3b0] sm:$0xff]   ;;  %v7809_v39 = vld [vmem:[%s9962_s1 + $0x3f8] sm:$0xff]  }
 0x154   : > { %v6346_v11 = vpop.f32.mrb[47].mxu1  ;;  %v6258_v12 = vpop.f32.mrb[47].mxu0  ;;  %6963 = vmatpush3.bf16.msra.mxu1 %v7746_v51 }
 0x155   : > { %v8731_v18 = vadd.f32 %v6344_v63, %v3653_v62  ;;  %v6347_v27 = vadd.f32 %v6346_v11, %v6345_v0  ;;  %v8733_v20 = vadd.f32 %v6258_v12, %v6257_v2  ;;  %6964 = vmatprep.subr.bf16.mxu1 %v7761_v47  ;;  %v7810_v2 = vld [vmem:[%s9962_s1 + $0x3b8] sm:$0xff]   ;;  %v7727_v11 = vld [vmem:[%s8099_s9 + $0x800] ss:$84 sps:$4 sm:$0xff]  }
 0x156   : > { %4319 = vmatmul.mubr.bf16.gmra.mrb[152].mxu0 %v7711_v52  ;;  %4416 = vmatmul.mubr.bf16.gmra.mrb[152].mxu1 %v7712_v53  ;;  %v7723_v52 = vld [vmem:[%s8099_s9 + $0x804] ss:$84 sps:$4 sm:$0xff]   ;;  %v7725_v53 = vld [vmem:[%s8099_s9 + $0x2cc] ss:$84 sps:$4 sm:$0xff]   ;;  %v7728_v12 = vld [vmem:[%s8099_s9 + $0x2c8] ss:$84 sps:$4 sm:$0xff]  }
 0x157   : > { %v8735_v21 = vadd.f32 %v6347_v27, %v3656_v15  ;;  %4326 = vmatprep.mubr.bf16.mxu0 %v7717_v10  ;;  %4423 = vmatprep.mubr.bf16.mxu1 %v7719_v19 }
 0x158   : > { %6965 = vmatpush3.bf16.msra.mxu1 %v7762_v13 }
 0x159   : > { %v6348_v33 = vpop.f32.mrb[48].mxu1  ;;  %v6412_v34 = vpop.f32.mrb[48].mxu0  ;;  %6966 = vmatprep.subr.bf16.mxu1 %v7777_v61 }
 0x15a   : > { %v6349_v37 = vpop.f32.mrb[49].mxu1  ;;  %v6413_v41 = vpop.f32.mrb[49].mxu0 }
 0x15b   : > { %v6350_v43 = vadd.f32 %v6349_v37, %v6348_v33  ;;  %v6414_v50 = vadd.f32 %v6413_v41, %v6412_v34  ;;  %v6351_v51 = vpop.f32.mrb[50].mxu1  ;;  %v6415_v47 = vpop.f32.mrb[50].mxu0  ;;  %v7733_v33 = vld [vmem:[%s8099_s9 + $0x8ac] ss:$84 sps:$4 sm:$0xff]   ;;  %v7735_v34 = vld [vmem:[%s8099_s9 + $0x374] ss:$84 sps:$4 sm:$0xff]   ;;  %v3672_v37 = vadd.f32 %v8677_v5, %v8565_v32 }
 0x15c   : > { %v6352_v4 = vpop.f32.mrb[51].mxu1  ;;  %v6416_v57 = vpop.f32.mrb[51].mxu0  ;;  %6967 = vmatpush3.bf16.msra.mxu1 %v7778_v25  ;;  %v3669_v25 = vadd.f32 %v8663_v54, %v8565_v32 }
 0x15d   : > { %v6353_v62 = vadd.f32 %v6352_v4, %v6351_v51  ;;  %v6417_v23 = vadd.f32 %v6416_v57, %v6415_v47  ;;  %v8754_v63 = vadd.f32 %v6350_v43, %v3661_v35  ;;  %v8757_v0 = vadd.f32 %v6414_v50, %v8580_v24  ;;  %6968 = vmatprep.subr.bf16.mxu1 %v7793_v9  ;;  %v7825_v24 = vld [vmem:[%s9962_s1 + $0x4c0] sm:$0xff]  }
 0x15e   : > { %4327 = vmatmul.mubr.bf16.gmra.mrb[156].mxu0 %v7721_v49  ;;  %4424 = vmatmul.mubr.bf16.gmra.mrb[156].mxu1 %v7722_v29 }
 0x15f   : > { %4334 = vmatprep.mubr.bf16.mxu0 %v7723_v52  ;;  %4431 = vmatprep.mubr.bf16.mxu1 %v7725_v53  ;;  %v8765_v10 = vadd.f32 %v6353_v62, %v3664_v56  ;;  %v8768_v19 = vadd.f32 %v6417_v23, %v8590_v59  ;;  %v7737_v52 = vld [vmem:[%s8099_s9 + $0x8a8] ss:$84 sps:$4 sm:$0xff]   ;;  %v7738_v53 = vld [vmem:[%s8099_s9 + $0x370] ss:$84 sps:$4 sm:$0xff]  }
 0x160   : > { %6969 = vmatpush3.bf16.msra.mxu1 %v7794_v31 }
 0x161   : > { %v6354_v13 = vpop.f32.mrb[52].mxu1  ;;  %v6418_v61 = vpop.f32.mrb[52].mxu0  ;;  %6970 = vmatprep.subr.bf16.mxu1 %v7809_v39 }
 0x162   : > { %v6355_v15 = vpop.f32.mrb[53].mxu1  ;;  %v6419_v27 = vpop.f32.mrb[53].mxu0 }
 0x163   : > { %v6356_v9 = vadd.f32 %v6355_v15, %v6354_v13  ;;  %v6420_v49 = vadd.f32 %v6419_v27, %v6418_v61  ;;  %v6357_v59 = vpop.f32.mrb[54].mxu1  ;;  %v6421_v29 = vpop.f32.mrb[54].mxu0 }
 0x164   : > { %v6358_v41 = vpop.f32.mrb[55].mxu1  ;;  %v6422_v35 = vpop.f32.mrb[55].mxu0  ;;  %6971 = vmatpush3.bf16.msra.mxu1 %v7810_v2 }
 0x165   : > { %v6359_v43 = vadd.f32 %v6358_v41, %v6357_v59  ;;  %v6423_v50 = vadd.f32 %v6422_v35, %v6421_v29  ;;  %v8781_v51 = vadd.f32 %v6356_v9, %v3669_v25  ;;  %v8784_v54 = vadd.f32 %v6420_v49, %v8605_v17  ;;  %7180 = vmatprep.subr.bf16.mxu1 %v7825_v24  ;;  %v7739_v24 = vld [vmem:[%s8099_s9 + $0x954] ss:$84 sps:$4 sm:$0xff]  }
 0x166   : > { %4335 = vmatmul.mubr.bf16.gmra.mrb[160].mxu0 %v7727_v11  ;;  %4432 = vmatmul.mubr.bf16.gmra.mrb[160].mxu1 %v7728_v12  ;;  %v3677_v17 = vadd.f32 %v8691_v28, %v8565_v32  ;;  %v7741_v11 = vld [vmem:[%s8099_s9 + $0x41c] ss:$84 sps:$4 sm:$0xff]   ;;  %v3680_v12 = vadd.f32 %v8702_v46, %v8565_v32 }
 0x167   : > { %4342 = vmatprep.mubr.bf16.mxu0 %v7733_v33  ;;  %4439 = vmatprep.mubr.bf16.mxu1 %v7735_v34  ;;  %v8786_v47 = vadd.f32 %v6359_v43, %v3672_v37  ;;  %v8789_v5 = vadd.f32 %v6423_v50, %v8609_v40  ;;  %v7743_v33 = vld [vmem:[%s8099_s9 + $0x950] ss:$84 sps:$4 sm:$0xff]   ;;  %v7744_v34 = vld [vmem:[%s8099_s9 + $0x418] ss:$84 sps:$4 sm:$0xff]  }
 0x168   : > { %v7749_v50 = vld [vmem:[%s8099_s9 + $0x9fc] ss:$84 sps:$4 sm:$0xff]  }
 0x169   : > { %v6360_v56 = vpop.f32.mrb[56].mxu1  ;;  %v6424_v4 = vpop.f32.mrb[56].mxu0 }
 0x16a   : > { %v6361_v57 = vpop.f32.mrb[57].mxu1  ;;  %v6425_v31 = vpop.f32.mrb[57].mxu0 }
 0x16b   : > { %v6362_v62 = vadd.f32 %v6361_v57, %v6360_v56  ;;  %v6426_v23 = vadd.f32 %v6425_v31, %v6424_v4  ;;  %v6363_v39 = vpop.f32.mrb[58].mxu1  ;;  %v6427_v2 = vpop.f32.mrb[58].mxu0 }
 0x16c   : > { %v6364_v40 = vpop.f32.mrb[59].mxu1  ;;  %v6428_v13 = vpop.f32.mrb[59].mxu0 }
 0x16d   : > { %v6365_v61 = vadd.f32 %v6364_v40, %v6363_v39  ;;  %v6429_v15 = vadd.f32 %v6428_v13, %v6427_v2  ;;  %v8799_v27 = vadd.f32 %v6362_v62, %v3677_v17  ;;  %v8802_v25 = vadd.f32 %v6426_v23, %v8621_v45  ;;  %v7753_v2 = vld [vmem:[%s8099_s9 + $0x9f8] ss:$84 sps:$4 sm:$0xff]  }
 0x16e   : > { %4343 = vmatmul.mubr.bf16.gmra.mrb[164].mxu0 %v7737_v52  ;;  %4440 = vmatmul.mubr.bf16.gmra.mrb[164].mxu1 %v7738_v53  ;;  %v3685_v45 = vadd.f32 %v8719_v8, %v8565_v32  ;;  %v7751_v52 = vld [vmem:[%s8099_s9 + $0x4c4] ss:$84 sps:$4 sm:$0xff]   ;;  %v3688_v53 = vadd.f32 %v8733_v20, %v8565_v32 }
 0x16f   : > { %4350 = vmatprep.mubr.bf16.mxu0 %v7739_v24  ;;  %4447 = vmatprep.mubr.bf16.mxu1 %v7741_v11  ;;  %v8804_v28 = vadd.f32 %v6365_v61, %v3680_v12  ;;  %v8807_v46 = vadd.f32 %v6429_v15, %v8625_v60  ;;  %v7754_v24 = vld [vmem:[%s8099_s9 + $0x4c0] ss:$84 sps:$4 sm:$0xff]  }
 0x170   : > { %v7759_v15 = vld [vmem:[%s8099_s9 + $0x34] ss:$84 sps:$4 sm:$0xff]  }
 0x171   : > { %v6366_v9 = vpop.f32.mrb[60].mxu1  ;;  %v6430_v49 = vpop.f32.mrb[60].mxu0 }
 0x172   : > { %v6367_v59 = vpop.f32.mrb[61].mxu1  ;;  %v6431_v29 = vpop.f32.mrb[61].mxu0 }
 0x173   : > { %v6368_v37 = vadd.f32 %v6367_v59, %v6366_v9  ;;  %v6432_v41 = vadd.f32 %v6431_v29, %v6430_v49  ;;  %v6369_v35 = vpop.f32.mrb[62].mxu1  ;;  %v6433_v43 = vpop.f32.mrb[62].mxu0 }
 0x174   : > { %v6370_v60 = vpop.f32.mrb[63].mxu1  ;;  %v6434_v56 = vpop.f32.mrb[63].mxu0 }
 0x175   : > { %v6371_v4 = vadd.f32 %v6370_v60, %v6369_v35  ;;  %v6435_v57 = vadd.f32 %v6434_v56, %v6433_v43  ;;  %v8817_v31 = vadd.f32 %v6368_v37, %v3685_v45  ;;  %v8820_v17 = vadd.f32 %v6432_v41, %v8637_v6  ;;  %v8832_v6 = vld [vmem:[%s9963_s2] ss:$0 sm:$0xff] }
 0x176   : > { %4351 = vmatmul.mubr.bf16.gmra.mrb[168].mxu0 %v7743_v33  ;;  %4448 = vmatmul.mubr.bf16.gmra.mrb[168].mxu1 %v7744_v34  ;;  %v3693_v11 = vadd.f32 %v8832_v6, %v8480_v22  ;;  %v3696_v9 = vadd.f32 %v8832_v6, %v8486_v30 }
 0x177   : > { %4358 = vmatprep.mubr.bf16.mxu0 %v7749_v50  ;;  %4455 = vmatprep.mubr.bf16.mxu1 %v7751_v52  ;;  %v8822_v8 = vadd.f32 %v6371_v4, %v3688_v53  ;;  %v8825_v32 = vadd.f32 %v6435_v57, %v8641_v16  ;;  %v7755_v16 = vld [vmem:[%s8099_s9 + $0x56c] ss:$84 sps:$4 sm:$0xff]   ;;  %v7757_v50 = vld [vmem:[%s8099_s9 + $0x30] ss:$84 sps:$4 sm:$0xff]   ;;  %v7760_v52 = vld [vmem:[%s8099_s9 + $0x568] ss:$84 sps:$4 sm:$0xff]  }
 0x178   : > { %v7764_v57 = vld [vmem:[%s9962_s1 + $0x400] sm:$0xff]  }
 0x179   : > { %v6372_v20 = vpop.f32.mrb[64].mxu1  ;;  %v6436_v62 = vpop.f32.mrb[64].mxu0 }
 0x17a   : > { %v6373_v23 = vpop.f32.mrb[65].mxu1  ;;  %v6437_v39 = vpop.f32.mrb[65].mxu0 }
 0x17b   : > { %v6374_v12 = vadd.f32 %v6373_v23, %v6372_v20  ;;  %v6438_v40 = vadd.f32 %v6437_v39, %v6436_v62  ;;  %v6375_v13 = vpop.f32.mrb[66].mxu1  ;;  %v6439_v61 = vpop.f32.mrb[66].mxu0  ;;  %v3704_v20 = vadd.f32 %v8832_v6, %v8504_v48  ;;  %v7767_v39 = vld [vmem:[%s8099_s9 + $0xdc] ss:$84 sps:$4 sm:$0xff]   ;;  %v7780_v48 = vld [vmem:[%s9962_s1 + $0x408] sm:$0xff]  }
 0x17c   : > { %v6376_v49 = vpop.f32.mrb[67].mxu1  ;;  %v6440_v59 = vpop.f32.mrb[67].mxu0 }
 0x17d   : > { %v6377_v29 = vadd.f32 %v6376_v49, %v6375_v13  ;;  %v6441_v33 = vadd.f32 %v6440_v59, %v6439_v61  ;;  %v8840_v34 = vadd.f32 %v6374_v12, %v3693_v11  ;;  %v8843_v45 = vadd.f32 %v6438_v40, %v8653_v36  ;;  %v7769_v49 = vld [vmem:[%s8099_s9 + $0x610] ss:$84 sps:$4 sm:$0xff]   ;;  %v7770_v59 = vld [vmem:[%s8099_s9 + $0xd8] ss:$84 sps:$4 sm:$0xff]  }
 0x17e   : > { %4359 = vmatmul.mubr.bf16.gmra.mrb[172].mxu0 %v7753_v2  ;;  %4456 = vmatmul.mubr.bf16.gmra.mrb[172].mxu1 %v7754_v24  ;;  %v3701_v36 = vadd.f32 %v8832_v6, %v8492_v38  ;;  %v7779_v2 = vld [vmem:[%s9962_s1 + $0x448] sm:$0xff]  }
 0x17f   : > { %4463 = vmatprep.mubr.bf16.mxu1 %v7755_v16  ;;  %4560 = vmatprep.mubr.bf16.mxu0 %v7759_v15  ;;  %v8845_v22 = vadd.f32 %v6377_v29, %v3696_v9  ;;  %v8848_v30 = vadd.f32 %v6441_v33, %v8657_v44  ;;  %v7765_v44 = vld [vmem:[%s8099_s9 + $0x614] ss:$84 sps:$4 sm:$0xff]   ;;  %v3709_v29 = vadd.f32 %v8832_v6, %v8516_v58  ;;  %v7811_v58 = vld [vmem:[%s9962_s1 + $0x458] sm:$0xff]  }
 0x181   : > { %v6378_v37 = vpop.f32.mrb[68].mxu1  ;;  %v6442_v41 = vpop.f32.mrb[68].mxu0 }
 0x182   : > { %v6379_v35 = vpop.f32.mrb[69].mxu1  ;;  %v6443_v43 = vpop.f32.mrb[69].mxu0 }
 0x183   : > { %v6380_v53 = vadd.f32 %v6379_v35, %v6378_v37  ;;  %v6444_v60 = vadd.f32 %v6443_v43, %v6442_v41  ;;  %v6381_v56 = vpop.f32.mrb[70].mxu1  ;;  %v6445_v4 = vpop.f32.mrb[70].mxu0  ;;  %v7771_v35 = vld [vmem:[%s8099_s9 + $0x6bc] ss:$84 sps:$4 sm:$0xff]   ;;  %v7773_v43 = vld [vmem:[%s8099_s9 + $0x184] ss:$84 sps:$4 sm:$0xff]  }
 0x184   : > { %v6382_v62 = vpop.f32.mrb[71].mxu1  ;;  %v6446_v23 = vpop.f32.mrb[71].mxu0 }
 0x185   : > { %v6383_v38 = vadd.f32 %v6382_v62, %v6381_v56  ;;  %v6447_v24 = vadd.f32 %v6446_v23, %v6445_v4  ;;  %v8864_v11 = vadd.f32 %v6380_v53, %v3701_v36  ;;  %v8867_v12 = vadd.f32 %v6444_v60, %v8675_v1  ;;  %v7795_v1 = vld [vmem:[%s9962_s1 + $0x450] sm:$0xff]   ;;  %v7827_v23 = vld [vmem:[%s9962_s1 + $0x460] sm:$0xff]  }
 0x186   : > { %4464 = vmatmul.mubr.bf16.gmra.mrb[176].mxu1 %v7760_v52  ;;  %4561 = vmatmul.mubr.bf16.vlgmr.msra.gmra.mrb[176].mxu0 %v7757_v50  ;;  %v3712_v50 = vadd.f32 %v8832_v6, %v8525_v3  ;;  %v7796_v53 = vld [vmem:[%s9962_s1 + $0x410] sm:$0xff]  }
 0x187   : > { %7069 = vmatpush3.bf16.msra.mxu0 %v7764_v57  ;;  %4471 = vmatprep.mubr.bf16.mxu1 %v7765_v44  ;;  %v8872_v40 = vadd.f32 %v6383_v38, %v3704_v20  ;;  %v8875_v13 = vadd.f32 %v6447_v24, %v8679_v7  ;;  %v7812_v20 = vld [vmem:[%s9962_s1 + $0x418] sm:$0xff]   ;;  %v7776_v24 = vld [vmem:[%s8099_s9 + $0x180] ss:$84 sps:$4 sm:$0xff]  }
 0x188   : > { %4568 = vmatprep.mubr.bf16.mxu0 %v7767_v39  ;;  %7070 = vmatprep.subr.bf16.mxu0 %v7779_v2  ;;  %v7775_v38 = vld [vmem:[%s8099_s9 + $0x6b8] ss:$84 sps:$4 sm:$0xff]  }
 0x189   : > { %v6384_v61 = vpop.f32.mrb[72].mxu1  ;;  %v6448_v16 = vpop.f32.mrb[72].mxu0 }
 0x18a   : > { %v6385_v15 = vpop.f32.mrb[73].mxu1  ;;  %v6449_v9 = vpop.f32.mrb[73].mxu0 }
 0x18b   : > { %v6386_v33 = vadd.f32 %v6385_v15, %v6384_v61  ;;  %v6450_v37 = vadd.f32 %v6449_v9, %v6448_v16  ;;  %v6387_v7 = vpop.f32.mrb[74].mxu1  ;;  %v6451_v41 = vpop.f32.mrb[74].mxu0  ;;  %7071 = vmatpush3.bf16.msra.mxu0 %v7780_v48  ;;  %v7781_v15 = vld [vmem:[%s8099_s9 + $0x764] ss:$84 sps:$4 sm:$0xff]   ;;  %v7783_v9 = vld [vmem:[%s8099_s9 + $0x22c] ss:$84 sps:$4 sm:$0xff]  }
 0x18c   : > { %v6388_v52 = vpop.f32.mrb[75].mxu1  ;;  %v6452_v36 = vpop.f32.mrb[75].mxu0  ;;  %7072 = vmatprep.subr.bf16.mxu0 %v7795_v1 }
 0x18d   : > { %v6389_v60 = vadd.f32 %v6388_v52, %v6387_v7  ;;  %v6453_v56 = vadd.f32 %v6452_v36, %v6451_v41  ;;  %v8894_v4 = vadd.f32 %v6386_v33, %v3709_v29  ;;  %v8897_v57 = vadd.f32 %v6450_v37, %v8700_v42  ;;  %v7828_v33 = vld [vmem:[%s9962_s1 + $0x420] sm:$0xff]   ;;  %v7859_v52 = vld [vmem:[%s9962_s1 + $0x470] sm:$0xff]  }
 0x18e   : > { %4472 = vmatmul.mubr.bf16.gmra.mrb[180].mxu1 %v7769_v49  ;;  %4569 = vmatmul.mubr.bf16.gmra.mrb[180].mxu0 %v7770_v59  ;;  %v3720_v49 = vadd.f32 %v8832_v6, %v8552_v26  ;;  %v7843_v26 = vld [vmem:[%s9962_s1 + $0x468] sm:$0xff]  }
 0x18f   : > { %4479 = vmatprep.mubr.bf16.mxu1 %v7771_v35  ;;  %4576 = vmatprep.mubr.bf16.mxu0 %v7773_v43  ;;  %v8899_v3 = vadd.f32 %v6389_v60, %v3712_v50  ;;  %v8902_v44 = vadd.f32 %v6453_v56, %v8710_v55  ;;  %v3717_v55 = vadd.f32 %v8832_v6, %v8540_v14  ;;  %v7785_v60 = vld [vmem:[%s8099_s9 + $0x760] ss:$84 sps:$4 sm:$0xff]   ;;  %v7786_v56 = vld [vmem:[%s8099_s9 + $0x228] ss:$84 sps:$4 sm:$0xff]  }
 0x190   : > { %7073 = vmatpush3.bf16.msra.mxu0 %v7796_v53 }
 0x191   : > { %v6390_v62 = vpop.f32.mrb[76].mxu1  ;;  %v6454_v42 = vpop.f32.mrb[76].mxu0  ;;  %7074 = vmatprep.subr.bf16.mxu0 %v7811_v58 }
 0x192   : > { %v6391_v39 = vpop.f32.mrb[77].mxu1  ;;  %v6455_v2 = vpop.f32.mrb[77].mxu0 }
 0x193   : > { %v6392_v48 = vadd.f32 %v6391_v39, %v6390_v62  ;;  %v6456_v1 = vadd.f32 %v6455_v2, %v6454_v42  ;;  %v6393_v61 = vpop.f32.mrb[78].mxu1  ;;  %v6457_v16 = vpop.f32.mrb[78].mxu0  ;;  %v7787_v42 = vld [vmem:[%s8099_s9 + $0x80c] ss:$84 sps:$4 sm:$0xff]  }
 0x194   : > { %v6394_v59 = vpop.f32.mrb[79].mxu1  ;;  %v6458_v29 = vpop.f32.mrb[79].mxu0  ;;  %7075 = vmatpush3.bf16.msra.mxu0 %v7812_v20 }
 0x195   : > { %v6395_v37 = vadd.f32 %v6394_v59, %v6393_v61  ;;  %v6459_v7 = vadd.f32 %v6458_v29, %v6457_v16  ;;  %7076 = vmatprep.subr.bf16.mxu0 %v7827_v23  ;;  %v8921_v14 = vadd.f32 %v6392_v48, %v3717_v55  ;;  %v8924_v41 = vadd.f32 %v6456_v1, %v8731_v18  ;;  %v7844_v18 = vld [vmem:[%s9962_s1 + $0x428] sm:$0xff]   ;;  %v7875_v61 = vld [vmem:[%s9962_s1 + $0x478] sm:$0xff]   ;;  %v7792_v29 = vld [vmem:[%s8099_s9 + $0x2d0] ss:$84 sps:$4 sm:$0xff]  }
 0x196   : > { %4480 = vmatmul.mubr.bf16.gmra.mrb[184].mxu1 %v7775_v38  ;;  %4577 = vmatmul.mubr.bf16.gmra.mrb[184].mxu0 %v7776_v24  ;;  %v7789_v23 = vld [vmem:[%s8099_s9 + $0x2d4] ss:$84 sps:$4 sm:$0xff]  }
 0x197   : > { %4487 = vmatprep.mubr.bf16.mxu1 %v7781_v15  ;;  %4584 = vmatprep.mubr.bf16.mxu0 %v7783_v9  ;;  %v8929_v6 = vadd.f32 %v6395_v37, %v3720_v49  ;;  %v8932_v35 = vadd.f32 %v6459_v7, %v8735_v21  ;;  %v7860_v38 = vld [vmem:[%s9962_s1 + $0x430] sm:$0xff]   ;;  %v7791_v59 = vld [vmem:[%s8099_s9 + $0x808] ss:$84 sps:$4 sm:$0xff]  }
 0x198   : > { %7077 = vmatpush3.bf16.msra.mxu0 %v7828_v33 }
 0x199   : > { %v6460_v43 = vpop.f32.mrb[80].mxu0  ;;  %v6524_v50 = vpop.f32.mrb[80].mxu1  ;;  %7078 = vmatprep.subr.bf16.mxu0 %v7843_v26 }
 0x19a   : > { %v6461_v36 = vpop.f32.mrb[81].mxu0  ;;  %v6525_v53 = vpop.f32.mrb[81].mxu1 }
 0x19b   : > { %v6462_v58 = vadd.f32 %v6461_v36, %v6460_v43  ;;  %v6526_v21 = vadd.f32 %v6525_v53, %v6524_v50  ;;  %v6463_v20 = vpop.f32.mrb[82].mxu0  ;;  %v6527_v62 = vpop.f32.mrb[82].mxu1  ;;  %v7799_v43 = vld [vmem:[%s8099_s9 + $0x37c] ss:$84 sps:$4 sm:$0xff]  }
 0x19c   : > { %v6464_v39 = vpop.f32.mrb[83].mxu0  ;;  %v6528_v2 = vpop.f32.mrb[83].mxu1  ;;  %7079 = vmatpush3.bf16.msra.mxu0 %v7844_v18  ;;  %v7797_v18 = vld [vmem:[%s8099_s9 + $0x8b4] ss:$84 sps:$4 sm:$0xff]  }
 0x19d   : > { %v8948_v24 = vadd.f32 %v6462_v58, %v8754_v63  ;;  %v8951_v55 = vadd.f32 %v6526_v21, %v8757_v0  ;;  %v6465_v48 = vadd.f32 %v6464_v39, %v6463_v20  ;;  %v6529_v1 = vadd.f32 %v6528_v2, %v6527_v62  ;;  %7080 = vmatprep.subr.bf16.mxu0 %v7859_v52  ;;  %v7876_v0 = vld [vmem:[%s9962_s1 + $0x438] sm:$0xff]  }
 0x19e   : > { %4488 = vmatmul.mubr.bf16.gmra.mrb[188].mxu1 %v7785_v60  ;;  %4585 = vmatmul.mubr.bf16.gmra.mrb[188].mxu0 %v7786_v56 }
 0x19f   : > { %v8957_v16 = vadd.f32 %v6465_v48, %v8765_v10  ;;  %v8960_v63 = vadd.f32 %v6529_v1, %v8768_v19  ;;  %4495 = vmatprep.mubr.bf16.mxu1 %v7787_v42  ;;  %4592 = vmatprep.mubr.bf16.mxu0 %v7789_v23  ;;  %v8968_v10 = vld [vmem:[%s9962_s1 + $0x500] sm:$0xff]   ;;  %v7802_v23 = vld [vmem:[%s8099_s9 + $0x378] ss:$84 sps:$4 sm:$0xff]   ;;  %v7803_v1 = vld [vmem:[%s8099_s9 + $0x95c] ss:$84 sps:$4 sm:$0xff]  }
 0x1a0   : > { %7081 = vmatpush3.bf16.msra.mxu0 %v7860_v38  ;;  %v7801_v42 = vld [vmem:[%s8099_s9 + $0x8b0] ss:$84 sps:$4 sm:$0xff]  }
 0x1a1   : > { %v6466_v15 = vpop.f32.mrb[84].mxu0  ;;  %v6530_v9 = vpop.f32.mrb[84].mxu1  ;;  %7082 = vmatprep.subr.bf16.mxu0 %v7875_v61  ;;  %v7805_v61 = vld [vmem:[%s8099_s9 + $0x424] ss:$84 sps:$4 sm:$0xff]  }
 0x1a2   : > { %v6467_v49 = vpop.f32.mrb[85].mxu0  ;;  %v6531_v19 = vpop.f32.mrb[85].mxu1 }
 0x1a3   : > { %v6468_v33 = vadd.f32 %v6467_v49, %v6466_v15  ;;  %v6532_v37 = vadd.f32 %v6531_v19, %v6530_v9  ;;  %v6469_v7 = vpop.f32.mrb[86].mxu0  ;;  %v6533_v26 = vpop.f32.mrb[86].mxu1 }
 0x1a4   : > { %v6470_v50 = vpop.f32.mrb[87].mxu0  ;;  %v6534_v52 = vpop.f32.mrb[87].mxu1  ;;  %7083 = vmatpush3.bf16.msra.mxu0 %v7876_v0 }
 0x1a5   : > { %v8975_v36 = vadd.f32 %v6468_v33, %v8781_v51  ;;  %v8978_v53 = vadd.f32 %v6532_v37, %v8784_v54  ;;  %v6471_v60 = vadd.f32 %v6470_v50, %v6469_v7  ;;  %v6535_v56 = vadd.f32 %v6534_v52, %v6533_v26  ;;  %7310 = vmatprep.subr.bf16.mxu0 %v8968_v10  ;;  %v7808_v7 = vld [vmem:[%s8099_s9 + $0x420] ss:$84 sps:$4 sm:$0xff]   ;;  %v7813_v52 = vld [vmem:[%s8099_s9 + $0xa04] ss:$84 sps:$4 sm:$0xff]  }
 0x1a6   : > { %4496 = vmatmul.mubr.bf16.gmra.mrb[192].mxu1 %v7791_v59  ;;  %4593 = vmatmul.mubr.bf16.gmra.mrb[192].mxu0 %v7792_v29 }
 0x1a7   : > { %v8982_v58 = vadd.f32 %v6471_v60, %v8786_v47  ;;  %v8985_v21 = vadd.f32 %v6535_v56, %v8789_v5  ;;  %4503 = vmatprep.mubr.bf16.mxu1 %v7797_v18  ;;  %4600 = vmatprep.mubr.bf16.mxu0 %v7799_v43  ;;  %v7815_v60 = vld [vmem:[%s8099_s9 + $0x4cc] ss:$84 sps:$4 sm:$0xff]  }
 0x1a9   : > { %v6472_v51 = vpop.f32.mrb[88].mxu0  ;;  %v6536_v20 = vpop.f32.mrb[88].mxu1 }
 0x1aa   : > { %v6473_v54 = vpop.f32.mrb[89].mxu0  ;;  %v6537_v62 = vpop.f32.mrb[89].mxu1 }
 0x1ab   : > { %v6474_v39 = vadd.f32 %v6473_v54, %v6472_v51  ;;  %v6538_v2 = vadd.f32 %v6537_v62, %v6536_v20  ;;  %v6475_v38 = vpop.f32.mrb[90].mxu0  ;;  %v6539_v48 = vpop.f32.mrb[90].mxu1 }
 0x1ac   : > { %v6476_v0 = vpop.f32.mrb[91].mxu0  ;;  %v6540_v47 = vpop.f32.mrb[91].mxu1 }
 0x1ad   : > { %v8992_v5 = vadd.f32 %v6474_v39, %v8799_v27  ;;  %v8995_v15 = vadd.f32 %v6538_v2, %v8802_v25  ;;  %v6477_v9 = vadd.f32 %v6476_v0, %v6475_v38  ;;  %v6541_v49 = vadd.f32 %v6540_v47, %v6539_v48  ;;  %v7807_v25 = vld [vmem:[%s8099_s9 + $0x958] ss:$84 sps:$4 sm:$0xff]   ;;  %v7818_v38 = vld [vmem:[%s8099_s9 + $0x4c8] ss:$84 sps:$4 sm:$0xff]  }
 0x1ae   : > { %4504 = vmatmul.mubr.bf16.gmra.mrb[196].mxu1 %v7801_v42  ;;  %4601 = vmatmul.mubr.bf16.gmra.mrb[196].mxu0 %v7802_v23  ;;  %v7819_v47 = vld [vmem:[%s8099_s9 + $0x574] ss:$84 sps:$4 sm:$0xff]  }
 0x1af   : > { %v8998_v19 = vadd.f32 %v6477_v9, %v8804_v28  ;;  %v9001_v59 = vadd.f32 %v6541_v49, %v8807_v46  ;;  %4511 = vmatprep.mubr.bf16.mxu1 %v7803_v1  ;;  %4608 = vmatprep.mubr.bf16.mxu0 %v7805_v61  ;;  %v7823_v9 = vld [vmem:[%s8099_s9 + $0x3c] ss:$84 sps:$4 sm:$0xff]  }
 0x1b1   : > { %v6478_v29 = vpop.f32.mrb[92].mxu0  ;;  %v6542_v27 = vpop.f32.mrb[92].mxu1 }
 0x1b2   : > { %v6479_v33 = vpop.f32.mrb[93].mxu0  ;;  %v6543_v37 = vpop.f32.mrb[93].mxu1 }
 0x1b3   : > { %v6480_v26 = vadd.f32 %v6479_v33, %v6478_v29  ;;  %v6544_v18 = vadd.f32 %v6543_v37, %v6542_v27  ;;  %v6481_v43 = vpop.f32.mrb[94].mxu0  ;;  %v6545_v50 = vpop.f32.mrb[94].mxu1 }
 0x1b4   : > { %v6482_v56 = vpop.f32.mrb[95].mxu0  ;;  %v6546_v28 = vpop.f32.mrb[95].mxu1 }
 0x1b5   : > { %v9008_v46 = vadd.f32 %v6480_v26, %v8817_v31  ;;  %v9011_v51 = vadd.f32 %v6544_v18, %v8820_v17  ;;  %v6483_v20 = vadd.f32 %v6482_v56, %v6481_v43  ;;  %v6547_v54 = vadd.f32 %v6546_v28, %v6545_v50  ;;  %v7817_v17 = vld [vmem:[%s8099_s9 + $0xa00] ss:$84 sps:$4 sm:$0xff]   ;;  %v7824_v43 = vld [vmem:[%s8099_s9 + $0x570] ss:$84 sps:$4 sm:$0xff]  }
 0x1b6   : > { %4512 = vmatmul.mubr.bf16.gmra.mrb[200].mxu1 %v7807_v25  ;;  %4609 = vmatmul.mubr.bf16.gmra.mrb[200].mxu0 %v7808_v7  ;;  %v7829_v28 = vld [vmem:[%s8099_s9 + $0x61c] ss:$84 sps:$4 sm:$0xff]  }
 0x1b7   : > { %v9014_v62 = vadd.f32 %v6483_v20, %v8822_v8  ;;  %v9017_v42 = vadd.f32 %v6547_v54, %v8825_v32  ;;  %4519 = vmatprep.mubr.bf16.mxu1 %v7813_v52  ;;  %4616 = vmatprep.mubr.bf16.mxu0 %v7815_v60  ;;  %v7831_v54 = vld [vmem:[%s8099_s9 + $0xe4] ss:$84 sps:$4 sm:$0xff]  }
 0x1b9   : > { %v6484_v23 = vpop.f32.mrb[96].mxu0  ;;  %v6548_v31 = vpop.f32.mrb[96].mxu1 }
 0x1ba   : > { %v6485_v39 = vpop.f32.mrb[97].mxu0  ;;  %v6549_v2 = vpop.f32.mrb[97].mxu1 }
 0x1bb   : > { %v6486_v48 = vadd.f32 %v6485_v39, %v6484_v23  ;;  %v6550_v1 = vadd.f32 %v6549_v2, %v6548_v31  ;;  %v6487_v61 = vpop.f32.mrb[98].mxu0  ;;  %v6551_v0 = vpop.f32.mrb[98].mxu1  ;;  %v7841_v23 = vld [vmem:[%s9962_s1 + $0x4c8] sm:$0xff]  }
 0x1bc   : > { %v6488_v49 = vpop.f32.mrb[99].mxu0  ;;  %v6552_v8 = vpop.f32.mrb[99].mxu1 }
 0x1bd   : > { %v9024_v32 = vadd.f32 %v6486_v48, %v8840_v34  ;;  %v9027_v29 = vadd.f32 %v6550_v1, %v8843_v45  ;;  %v6489_v27 = vadd.f32 %v6488_v49, %v6487_v61  ;;  %v6553_v33 = vadd.f32 %v6552_v8, %v6551_v0  ;;  %v7821_v45 = vld [vmem:[%s8099_s9 + $0x38] ss:$84 sps:$4 sm:$0xff]  }
 0x1be   : > { %4520 = vmatmul.mubr.bf16.gmra.mrb[204].mxu1 %v7817_v17  ;;  %4617 = vmatmul.mubr.bf16.gmra.mrb[204].mxu0 %v7818_v38 }
 0x1bf   : > { %v9030_v37 = vadd.f32 %v6489_v27, %v8845_v22  ;;  %v9033_v25 = vadd.f32 %v6553_v33, %v8848_v30  ;;  %4624 = vmatprep.mubr.bf16.mxu0 %v7819_v47  ;;  %4721 = vmatprep.mubr.bf16.mxu1 %v7823_v9  ;;  %v7826_v22 = vld [vmem:[%s9962_s1 + $0x480] sm:$0xff]  }
 0x1c0   : > { %v7834_v47 = vld [vmem:[%s8099_s9 + $0xe0] ss:$84 sps:$4 sm:$0xff]   ;;  %v7835_v33 = vld [vmem:[%s8099_s9 + $0x6c4] ss:$84 sps:$4 sm:$0xff]  }
 0x1c1   : > { %v6490_v7 = vpop.f32.mrb[100].mxu0  ;;  %v6554_v34 = vpop.f32.mrb[100].mxu1 }
 0x1c2   : > { %v6491_v26 = vpop.f32.mrb[101].mxu0  ;;  %v6555_v18 = vpop.f32.mrb[101].mxu1 }
 0x1c3   : > { %v6492_v50 = vadd.f32 %v6491_v26, %v6490_v7  ;;  %v6556_v52 = vadd.f32 %v6555_v18, %v6554_v34  ;;  %v6493_v60 = vpop.f32.mrb[102].mxu0  ;;  %v6557_v56 = vpop.f32.mrb[102].mxu1  ;;  %v7837_v7 = vld [vmem:[%s8099_s9 + $0x18c] ss:$84 sps:$4 sm:$0xff]   ;;  %v7858_v18 = vld [vmem:[%s9962_s1 + $0x490] sm:$0xff]  }
 0x1c4   : > { %v6494_v30 = vpop.f32.mrb[103].mxu0  ;;  %v6558_v20 = vpop.f32.mrb[103].mxu1 }
 0x1c5   : > { %v9046_v31 = vadd.f32 %v6492_v50, %v8864_v11  ;;  %v9049_v39 = vadd.f32 %v6556_v52, %v8867_v12  ;;  %v6495_v2 = vadd.f32 %v6494_v30, %v6493_v60  ;;  %v6559_v17 = vadd.f32 %v6558_v20, %v6557_v56  ;;  %v7842_v11 = vld [vmem:[%s9962_s1 + $0x488] sm:$0xff]   ;;  %v7857_v12 = vld [vmem:[%s9962_s1 + $0x4d0] sm:$0xff]   ;;  %v7873_v60 = vld [vmem:[%s9962_s1 + $0x4d8] sm:$0xff]  }
 0x1c6   : > { %4625 = vmatmul.mubr.bf16.gmra.mrb[208].mxu0 %v7824_v43  ;;  %4722 = vmatmul.mubr.bf16.vlgmr.msra.gmra.mrb[208].mxu1 %v7821_v45 }
 0x1c7   : > { %v9052_v38 = vadd.f32 %v6495_v2, %v8872_v40  ;;  %v9055_v48 = vadd.f32 %v6559_v17, %v8875_v13  ;;  %7181 = vmatpush3.bf16.msra.mxu1 %v7826_v22  ;;  %4632 = vmatprep.mubr.bf16.mxu0 %v7829_v28  ;;  %v7833_v13 = vld [vmem:[%s8099_s9 + $0x618] ss:$84 sps:$4 sm:$0xff]  }
 0x1c8   : > { %4729 = vmatprep.mubr.bf16.mxu1 %v7831_v54  ;;  %7182 = vmatprep.subr.bf16.mxu1 %v7841_v23  ;;  %v7840_v54 = vld [vmem:[%s8099_s9 + $0x188] ss:$84 sps:$4 sm:$0xff]  }
 0x1c9   : > { %v6496_v1 = vpop.f32.mrb[104].mxu0  ;;  %v6560_v40 = vpop.f32.mrb[104].mxu1 }
 0x1ca   : > { %v6497_v61 = vpop.f32.mrb[105].mxu0  ;;  %v6561_v0 = vpop.f32.mrb[105].mxu1 }
 0x1cb   : > { %v6498_v9 = vadd.f32 %v6497_v61, %v6496_v1  ;;  %v6562_v49 = vadd.f32 %v6561_v0, %v6560_v40  ;;  %v6499_v8 = vpop.f32.mrb[106].mxu0  ;;  %v6563_v27 = vpop.f32.mrb[106].mxu1  ;;  %7183 = vmatpush3.bf16.msra.mxu1 %v7842_v11  ;;  %v7847_v1 = vld [vmem:[%s8099_s9 + $0x234] ss:$84 sps:$4 sm:$0xff]   ;;  %v7890_v0 = vld [vmem:[%s9962_s1 + $0x4a0] sm:$0xff]  }
 0x1cc   : > { %v6500_v34 = vpop.f32.mrb[107].mxu0  ;;  %v6564_v26 = vpop.f32.mrb[107].mxu1  ;;  %7184 = vmatprep.subr.bf16.mxu1 %v7857_v12  ;;  %v7845_v12 = vld [vmem:[%s8099_s9 + $0x76c] ss:$84 sps:$4 sm:$0xff]  }
 0x1cd   : > { %v9071_v45 = vadd.f32 %v6498_v9, %v8894_v4  ;;  %v9074_v43 = vadd.f32 %v6562_v49, %v8897_v57  ;;  %v6501_v50 = vadd.f32 %v6500_v34, %v6499_v8  ;;  %v6565_v52 = vadd.f32 %v6564_v26, %v6563_v27  ;;  %v7874_v4 = vld [vmem:[%s9962_s1 + $0x498] sm:$0xff]   ;;  %v7904_v8 = vld [vmem:[%s9962_s1 + $0x4e8] sm:$0xff]  }
 0x1ce   : > { %4633 = vmatmul.mubr.bf16.gmra.mrb[212].mxu0 %v7833_v13  ;;  %4730 = vmatmul.mubr.bf16.gmra.mrb[212].mxu1 %v7834_v47 }
 0x1cf   : > { %v9080_v56 = vadd.f32 %v6501_v50, %v8899_v3  ;;  %v9083_v22 = vadd.f32 %v6565_v52, %v8902_v44  ;;  %4640 = vmatprep.mubr.bf16.mxu0 %v7835_v33  ;;  %4737 = vmatprep.mubr.bf16.mxu1 %v7837_v7  ;;  %v7889_v3 = vld [vmem:[%s9962_s1 + $0x4e0] sm:$0xff]  }
 0x1d0   : > { %7185 = vmatpush3.bf16.msra.mxu1 %v7858_v18  ;;  %v7839_v44 = vld [vmem:[%s8099_s9 + $0x6c0] ss:$84 sps:$4 sm:$0xff]   ;;  %v7850_v18 = vld [vmem:[%s8099_s9 + $0x230] ss:$84 sps:$4 sm:$0xff]  }
 0x1d1   : > { %v6502_v57 = vpop.f32.mrb[108].mxu0  ;;  %v6566_v28 = vpop.f32.mrb[108].mxu1  ;;  %7186 = vmatprep.subr.bf16.mxu1 %v7873_v60 }
 0x1d2   : > { %v6503_v30 = vpop.f32.mrb[109].mxu0  ;;  %v6567_v20 = vpop.f32.mrb[109].mxu1 }
 0x1d3   : > { %v6504_v23 = vadd.f32 %v6503_v30, %v6502_v57  ;;  %v6568_v2 = vadd.f32 %v6567_v20, %v6566_v28  ;;  %v6505_v17 = vpop.f32.mrb[110].mxu0  ;;  %v6569_v11 = vpop.f32.mrb[110].mxu1  ;;  %v7851_v57 = vld [vmem:[%s8099_s9 + $0x814] ss:$84 sps:$4 sm:$0xff]   ;;  %v7853_v28 = vld [vmem:[%s8099_s9 + $0x2dc] ss:$84 sps:$4 sm:$0xff]  }
 0x1d4   : > { %v6506_v40 = vpop.f32.mrb[111].mxu0  ;;  %v6570_v61 = vpop.f32.mrb[111].mxu1  ;;  %7187 = vmatpush3.bf16.msra.mxu1 %v7874_v4  ;;  %v7919_v20 = vld [vmem:[%s9962_s1 + $0x4b0] sm:$0xff]  }
 0x1d5   : > { %v9099_v13 = vadd.f32 %v6504_v23, %v8921_v14  ;;  %v9102_v47 = vadd.f32 %v6568_v2, %v8924_v41  ;;  %v6507_v9 = vadd.f32 %v6506_v40, %v6505_v17  ;;  %v6571_v49 = vadd.f32 %v6570_v61, %v6569_v11  ;;  %7188 = vmatprep.subr.bf16.mxu1 %v7889_v3  ;;  %v7905_v41 = vld [vmem:[%s9962_s1 + $0x4a8] sm:$0xff]   ;;  %v7932_v17 = vld [vmem:[%s9962_s1 + $0x4f8] sm:$0xff]  }
 0x1d6   : > { %4641 = vmatmul.mubr.bf16.gmra.mrb[216].mxu0 %v7839_v44  ;;  %4738 = vmatmul.mubr.bf16.gmra.mrb[216].mxu1 %v7840_v54 }
 0x1d7   : > { %v9108_v27 = vadd.f32 %v6507_v9, %v8929_v6  ;;  %v9111_v14 = vadd.f32 %v6571_v49, %v8932_v35  ;;  %4648 = vmatprep.mubr.bf16.mxu0 %v7845_v12  ;;  %4745 = vmatprep.mubr.bf16.mxu1 %v7847_v1  ;;  %v7918_v6 = vld [vmem:[%s9962_s1 + $0x4f0] sm:$0xff]   ;;  %v7849_v35 = vld [vmem:[%s8099_s9 + $0x768] ss:$84 sps:$4 sm:$0xff]  }
 0x1d8   : > { %7189 = vmatpush3.bf16.msra.mxu1 %v7890_v0  ;;  %v7855_v0 = vld [vmem:[%s8099_s9 + $0x810] ss:$84 sps:$4 sm:$0xff]  }
 0x1d9   : > { %v6572_v33 = vpop.f32.mrb[112].mxu1  ;;  %v6636_v7 = vpop.f32.mrb[112].mxu0  ;;  %7190 = vmatprep.subr.bf16.mxu1 %v7904_v8 }
 0x1da   : > { %v6573_v34 = vpop.f32.mrb[113].mxu1  ;;  %v6637_v26 = vpop.f32.mrb[113].mxu0 }
 0x1db   : > { %v6574_v50 = vadd.f32 %v6573_v34, %v6572_v33  ;;  %v6638_v52 = vadd.f32 %v6637_v26, %v6636_v7  ;;  %v6575_v60 = vpop.f32.mrb[114].mxu1  ;;  %v6639_v4 = vpop.f32.mrb[114].mxu0  ;;  %v7863_v33 = vld [vmem:[%s8099_s9 + $0x384] ss:$84 sps:$4 sm:$0xff]  }
 0x1dc   : > { %v6576_v3 = vpop.f32.mrb[115].mxu1  ;;  %v6640_v30 = vpop.f32.mrb[115].mxu0  ;;  %7191 = vmatpush3.bf16.msra.mxu1 %v7905_v41  ;;  %v7861_v41 = vld [vmem:[%s8099_s9 + $0x8bc] ss:$84 sps:$4 sm:$0xff]  }
 0x1dd   : > { %v9127_v44 = vadd.f32 %v6574_v50, %v8948_v24  ;;  %v9130_v54 = vadd.f32 %v6638_v52, %v8951_v55  ;;  %v6577_v23 = vadd.f32 %v6576_v3, %v6575_v60  ;;  %v6641_v2 = vadd.f32 %v6640_v30, %v6639_v4  ;;  %7192 = vmatprep.subr.bf16.mxu1 %v7918_v6  ;;  %v7933_v55 = vld [vmem:[%s9962_s1 + $0x4b8] sm:$0xff]  }
 0x1de   : > { %4649 = vmatmul.mubr.bf16.gmra.mrb[220].mxu0 %v7849_v35  ;;  %4746 = vmatmul.mubr.bf16.gmra.mrb[220].mxu1 %v7850_v18 }
 0x1df   : > { %v9136_v11 = vadd.f32 %v6577_v23, %v8957_v16  ;;  %v9139_v24 = vadd.f32 %v6641_v2, %v8960_v63  ;;  %4656 = vmatprep.mubr.bf16.mxu0 %v7851_v57  ;;  %4753 = vmatprep.mubr.bf16.mxu1 %v7853_v28  ;;  %v7856_v16 = vld [vmem:[%s8099_s9 + $0x2d8] ss:$84 sps:$4 sm:$0xff]   ;;  %v7866_v28 = vld [vmem:[%s8099_s9 + $0x380] ss:$84 sps:$4 sm:$0xff]  }
 0x1e0   : > { %7193 = vmatpush3.bf16.msra.mxu1 %v7919_v20  ;;  %v7867_v2 = vld [vmem:[%s8099_s9 + $0x964] ss:$84 sps:$4 sm:$0xff]  }
 0x1e1   : > { %v6578_v12 = vpop.f32.mrb[116].mxu1  ;;  %v6642_v1 = vpop.f32.mrb[116].mxu0  ;;  %7194 = vmatprep.subr.bf16.mxu1 %v7932_v17  ;;  %v7869_v17 = vld [vmem:[%s8099_s9 + $0x42c] ss:$84 sps:$4 sm:$0xff]  }
 0x1e2   : > { %v6579_v40 = vpop.f32.mrb[117].mxu1  ;;  %v6643_v61 = vpop.f32.mrb[117].mxu0 }
 0x1e3   : > { %v6580_v9 = vadd.f32 %v6579_v40, %v6578_v12  ;;  %v6644_v49 = vadd.f32 %v6643_v61, %v6642_v1  ;;  %v6581_v63 = vpop.f32.mrb[118].mxu1  ;;  %v6645_v8 = vpop.f32.mrb[118].mxu0 }
 0x1e4   : > { %v6582_v7 = vpop.f32.mrb[119].mxu1  ;;  %v6646_v6 = vpop.f32.mrb[119].mxu0  ;;  %7195 = vmatpush3.bf16.msra.mxu1 %v7933_v55 }
 0x1e5   : > { %v9149_v34 = vadd.f32 %v6580_v9, %v8975_v36  ;;  %v9152_v26 = vadd.f32 %v6644_v49, %v8978_v53  ;;  %v6583_v35 = vadd.f32 %v6582_v7, %v6581_v63  ;;  %v6647_v18 = vadd.f32 %v6646_v6, %v6645_v8  ;;  %v7865_v53 = vld [vmem:[%s8099_s9 + $0x8b8] ss:$84 sps:$4 sm:$0xff]   ;;  %v7872_v63 = vld [vmem:[%s8099_s9 + $0x428] ss:$84 sps:$4 sm:$0xff]  }
 0x1e6   : > { %4657 = vmatmul.mubr.bf16.gmra.mrb[224].mxu0 %v7855_v0  ;;  %4754 = vmatmul.mubr.bf16.gmra.mrb[224].mxu1 %v7856_v16  ;;  %v7877_v6 = vld [vmem:[%s8099_s9 + $0xa0c] ss:$84 sps:$4 sm:$0xff]  }
 0x1e7   : > { %v9155_v50 = vadd.f32 %v6583_v35, %v8982_v58  ;;  %v9158_v52 = vadd.f32 %v6647_v18, %v8985_v21  ;;  %4664 = vmatprep.mubr.bf16.mxu0 %v7861_v41  ;;  %4761 = vmatprep.mubr.bf16.mxu1 %v7863_v33  ;;  %v7879_v35 = vld [vmem:[%s8099_s9 + $0x4d4] ss:$84 sps:$4 sm:$0xff]  }
 0x1e9   : > { %v6584_v60 = vpop.f32.mrb[120].mxu1  ;;  %v6648_v36 = vpop.f32.mrb[120].mxu0 }
 0x1ea   : > { %v6585_v4 = vpop.f32.mrb[121].mxu1  ;;  %v6649_v57 = vpop.f32.mrb[121].mxu0 }
 0x1eb   : > { %v6586_v3 = vadd.f32 %v6585_v4, %v6584_v60  ;;  %v6650_v30 = vadd.f32 %v6649_v57, %v6648_v36  ;;  %v6587_v20 = vpop.f32.mrb[122].mxu1  ;;  %v6651_v23 = vpop.f32.mrb[122].mxu0 }
 0x1ec   : > { %v6588_v55 = vpop.f32.mrb[123].mxu1  ;;  %v6652_v58 = vpop.f32.mrb[123].mxu0 }
 0x1ed   : > { %v9165_v21 = vadd.f32 %v6586_v3, %v8992_v5  ;;  %v9168_v12 = vadd.f32 %v6650_v30, %v8995_v15  ;;  %v6589_v1 = vadd.f32 %v6588_v55, %v6587_v20  ;;  %v6653_v40 = vadd.f32 %v6652_v58, %v6651_v23  ;;  %v7871_v15 = vld [vmem:[%s8099_s9 + $0x960] ss:$84 sps:$4 sm:$0xff]   ;;  %v7882_v20 = vld [vmem:[%s8099_s9 + $0x4d0] ss:$84 sps:$4 sm:$0xff]  }
 0x1ee   : > { %4665 = vmatmul.mubr.bf16.gmra.mrb[228].mxu0 %v7865_v53  ;;  %4762 = vmatmul.mubr.bf16.gmra.mrb[228].mxu1 %v7866_v28  ;;  %v7883_v58 = vld [vmem:[%s8099_s9 + $0x57c] ss:$84 sps:$4 sm:$0xff]  }
 0x1ef   : > { %v9171_v61 = vadd.f32 %v6589_v1, %v8998_v19  ;;  %v9174_v0 = vadd.f32 %v6653_v40, %v9001_v59  ;;  %4672 = vmatprep.mubr.bf16.mxu0 %v7867_v2  ;;  %4769 = vmatprep.mubr.bf16.mxu1 %v7869_v17  ;;  %v7887_v1 = vld [vmem:[%s8099_s9 + $0x44] ss:$84 sps:$4 sm:$0xff]  }
 0x1f1   : > { %v6590_v16 = vpop.f32.mrb[124].mxu1  ;;  %v6654_v5 = vpop.f32.mrb[124].mxu0 }
 0x1f2   : > { %v6591_v9 = vpop.f32.mrb[125].mxu1  ;;  %v6655_v49 = vpop.f32.mrb[125].mxu0 }
 0x1f3   : > { %v6592_v8 = vadd.f32 %v6591_v9, %v6590_v16  ;;  %v6656_v41 = vadd.f32 %v6655_v49, %v6654_v5  ;;  %v6593_v33 = vpop.f32.mrb[126].mxu1  ;;  %v6657_v7 = vpop.f32.mrb[126].mxu0 }
 0x1f4   : > { %v6594_v18 = vpop.f32.mrb[127].mxu1  ;;  %v6658_v19 = vpop.f32.mrb[127].mxu0 }
 0x1f5   : > { %v9181_v59 = vadd.f32 %v6592_v8, %v9008_v46  ;;  %v9184_v60 = vadd.f32 %v6656_v41, %v9011_v51  ;;  %v6595_v36 = vadd.f32 %v6594_v18, %v6593_v33  ;;  %v6659_v4 = vadd.f32 %v6658_v19, %v6657_v7  ;;  %v7881_v51 = vld [vmem:[%s8099_s9 + $0xa08] ss:$84 sps:$4 sm:$0xff]   ;;  %v7888_v33 = vld [vmem:[%s8099_s9 + $0x578] ss:$84 sps:$4 sm:$0xff]  }
 0x1f6   : > { %4673 = vmatmul.mubr.bf16.gmra.mrb[232].mxu0 %v7871_v15  ;;  %4770 = vmatmul.mubr.bf16.gmra.mrb[232].mxu1 %v7872_v63  ;;  %v7892_v19 = vld [vmem:[%s8099_s9 + $0x624] ss:$84 sps:$4 sm:$0xff]  }
 0x1f7   : > { %v9187_v57 = vadd.f32 %v6595_v36, %v9014_v62  ;;  %v9190_v53 = vadd.f32 %v6659_v4, %v9017_v42  ;;  %4680 = vmatprep.mubr.bf16.mxu0 %v7877_v6  ;;  %4777 = vmatprep.mubr.bf16.mxu1 %v7879_v35  ;;  %v7894_v4 = vld [vmem:[%s8099_s9 + $0xec] ss:$84 sps:$4 sm:$0xff]  }
 0x1f9   : > { %v6596_v28 = vpop.f32.mrb[128].mxu1  ;;  %v6660_v46 = vpop.f32.mrb[128].mxu0 }
 0x1fa   : > { %v6597_v3 = vpop.f32.mrb[129].mxu1  ;;  %v6661_v30 = vpop.f32.mrb[129].mxu0 }
 0x1fb   : > { %v6598_v23 = vadd.f32 %v6597_v3, %v6596_v28  ;;  %v6662_v2 = vadd.f32 %v6661_v30, %v6660_v46  ;;  %v6599_v17 = vpop.f32.mrb[130].mxu1  ;;  %v6663_v55 = vpop.f32.mrb[130].mxu0 }
 0x1fc   : > { %v6600_v40 = vpop.f32.mrb[131].mxu1  ;;  %v6664_v62 = vpop.f32.mrb[131].mxu0 }
 0x1fd   : > { %v9197_v42 = vadd.f32 %v6598_v23, %v9024_v32  ;;  %v9200_v16 = vadd.f32 %v6662_v2, %v9027_v29  ;;  %v6601_v5 = vadd.f32 %v6600_v40, %v6599_v17  ;;  %v6665_v9 = vadd.f32 %v6664_v62, %v6663_v55  ;;  %v7885_v29 = vld [vmem:[%s8099_s9 + $0x40] ss:$84 sps:$4 sm:$0xff]   ;;  %v7897_v55 = vld [vmem:[%s8099_s9 + $0xe8] ss:$84 sps:$4 sm:$0xff]  }
 0x1fe   : > { %4681 = vmatmul.mubr.bf16.gmra.mrb[236].mxu0 %v7881_v51  ;;  %4778 = vmatmul.mubr.bf16.gmra.mrb[236].mxu1 %v7882_v20  ;;  %v7896_v17 = vld [vmem:[%s8099_s9 + $0x620] ss:$84 sps:$4 sm:$0xff]  }
 0x1ff   : > { %v9203_v49 = vadd.f32 %v6601_v5, %v9030_v37  ;;  %v9206_v15 = vadd.f32 %v6665_v9, %v9033_v25  ;;  %4785 = vmatprep.mubr.bf16.mxu1 %v7883_v58  ;;  %4882 = vmatprep.mubr.bf16.mxu0 %v7887_v1  ;;  %v7946_v25 = vld [vmem:[%s9962_s1 + $0x508] sm:$0xff]  }
 0x200   : > { %v7898_v62 = vld [vmem:[%s8099_s9 + $0x6cc] ss:$84 sps:$4 sm:$0xff]   ;;  %v7900_v5 = vld [vmem:[%s8099_s9 + $0x194] ss:$84 sps:$4 sm:$0xff]  }
 0x201   : > { %v6602_v63 = vpop.f32.mrb[132].mxu1  ;;  %v6666_v32 = vpop.f32.mrb[132].mxu0 }
 0x202   : > { %v6603_v8 = vpop.f32.mrb[133].mxu1  ;;  %v6667_v41 = vpop.f32.mrb[133].mxu0 }
 0x203   : > { %v6604_v7 = vadd.f32 %v6603_v8, %v6602_v63  ;;  %v6668_v6 = vadd.f32 %v6667_v41, %v6666_v32  ;;  %v6605_v35 = vpop.f32.mrb[134].mxu1  ;;  %v6669_v18 = vpop.f32.mrb[134].mxu0 }
 0x204   : > { %v6606_v36 = vpop.f32.mrb[135].mxu1  ;;  %v6670_v37 = vpop.f32.mrb[135].mxu0 }
 0x205   : > { %v9216_v28 = vadd.f32 %v6604_v7, %v9046_v31  ;;  %v9219_v46 = vadd.f32 %v6668_v6, %v9049_v39  ;;  %v6607_v3 = vadd.f32 %v6606_v36, %v6605_v35  ;;  %v6671_v30 = vadd.f32 %v6670_v37, %v6669_v18  ;;  %v7903_v35 = vld [vmem:[%s8099_s9 + $0x190] ss:$84 sps:$4 sm:$0xff]  }
 0x206   : > { %4786 = vmatmul.mubr.bf16.gmra.mrb[240].mxu1 %v7888_v33  ;;  %4883 = vmatmul.mubr.bf16.vlgmr.msra.gmra.mrb[240].mxu0 %v7885_v29 }
 0x207   : > { %v9222_v51 = vadd.f32 %v6607_v3, %v9052_v38  ;;  %v9225_v20 = vadd.f32 %v6671_v30, %v9055_v48  ;;  %7311 = vmatpush3.bf16.msra.mxu0 %v8968_v10  ;;  %4793 = vmatprep.mubr.bf16.mxu1 %v7892_v19 }
 0x208   : > { %4890 = vmatprep.mubr.bf16.mxu0 %v7894_v4  ;;  %7312 = vmatprep.subr.bf16.mxu0 %v7946_v25  ;;  %v7906_v4 = vld [vmem:[%s8099_s9 + $0x774] ss:$84 sps:$4 sm:$0xff]  }
 0x209   : > { %v6608_v31 = vpop.f32.mrb[136].mxu1  ;;  %v6672_v39 = vpop.f32.mrb[136].mxu0 }
 0x20a   : > { %v6609_v23 = vpop.f32.mrb[137].mxu1  ;;  %v6673_v2 = vpop.f32.mrb[137].mxu0 }
 0x20b   : > { %v6610_v58 = vadd.f32 %v6609_v23, %v6608_v31  ;;  %v6674_v1 = vadd.f32 %v6673_v2, %v6672_v39  ;;  %v6611_v38 = vpop.f32.mrb[138].mxu1  ;;  %v6675_v40 = vpop.f32.mrb[138].mxu0  ;;  %7313 = vmatpush3.bf16.msra.mxu0 %v7946_v25  ;;  %v7908_v25 = vld [vmem:[%s8099_s9 + $0x23c] ss:$84 sps:$4 sm:$0xff]  }
 0x20c   : > { %v6612_v48 = vpop.f32.mrb[139].mxu1  ;;  %v6676_v9 = vpop.f32.mrb[139].mxu0 }
 0x20d   : > { %v9233_v10 = vadd.f32 %v6610_v58, %v9071_v45  ;;  %v9236_v63 = vadd.f32 %v6674_v1, %v9074_v43  ;;  %v6613_v32 = vadd.f32 %v6612_v48, %v6611_v38  ;;  %v6677_v8 = vadd.f32 %v6676_v9, %v6675_v40  ;;  %v7902_v43 = vld [vmem:[%s8099_s9 + $0x6c8] ss:$84 sps:$4 sm:$0xff]   ;;  %v7911_v1 = vld [vmem:[%s8099_s9 + $0x238] ss:$84 sps:$4 sm:$0xff]  }
 0x20e   : > { %4794 = vmatmul.mubr.bf16.gmra.mrb[244].mxu1 %v7896_v17  ;;  %4891 = vmatmul.mubr.bf16.gmra.mrb[244].mxu0 %v7897_v55  ;;  %v7914_v48 = vld [vmem:[%s8099_s9 + $0x81c] ss:$84 sps:$4 sm:$0xff]   ;;  %v7917_v9 = vld [vmem:[%s8099_s9 + $0x2e4] ss:$84 sps:$4 sm:$0xff]  }
 0x20f   : > { %v9239_v41 = vadd.f32 %v6613_v32, %v9080_v56  ;;  %v9242_v29 = vadd.f32 %v6677_v8, %v9083_v22  ;;  %4801 = vmatprep.mubr.bf16.mxu1 %v7898_v62  ;;  %4898 = vmatprep.mubr.bf16.mxu0 %v7900_v5 }
 0x211   : > { %v6614_v33 = vpop.f32.mrb[140].mxu1  ;;  %v6678_v45 = vpop.f32.mrb[140].mxu0 }
 0x212   : > { %v6615_v7 = vpop.f32.mrb[141].mxu1  ;;  %v6679_v6 = vpop.f32.mrb[141].mxu0 }
 0x213   : > { %v6616_v18 = vadd.f32 %v6615_v7, %v6614_v33  ;;  %v6680_v19 = vadd.f32 %v6679_v6, %v6678_v45  ;;  %v6617_v36 = vpop.f32.mrb[142].mxu1  ;;  %v6681_v37 = vpop.f32.mrb[142].mxu0 }
 0x214   : > { %v6618_v3 = vpop.f32.mrb[143].mxu1  ;;  %v6682_v56 = vpop.f32.mrb[143].mxu0 }
 0x215   : > { %v9249_v22 = vadd.f32 %v6616_v18, %v9099_v13  ;;  %v9252_v30 = vadd.f32 %v6680_v19, %v9102_v47  ;;  %v6619_v31 = vadd.f32 %v6618_v3, %v6617_v36  ;;  %v6683_v39 = vadd.f32 %v6682_v56, %v6681_v37  ;;  %v7910_v47 = vld [vmem:[%s8099_s9 + $0x770] ss:$84 sps:$4 sm:$0xff]   ;;  %v7915_v19 = vld [vmem:[%s8099_s9 + $0x2e0] ss:$84 sps:$4 sm:$0xff]  }
 0x216   : > { %4802 = vmatmul.mubr.bf16.gmra.mrb[248].mxu1 %v7902_v43  ;;  %4899 = vmatmul.mubr.bf16.gmra.mrb[248].mxu0 %v7903_v35  ;;  %v7922_v3 = vld [vmem:[%s8099_s9 + $0x8c4] ss:$84 sps:$4 sm:$0xff]   ;;  %v7925_v56 = vld [vmem:[%s8099_s9 + $0x38c] ss:$84 sps:$4 sm:$0xff]  }
 0x217   : > { %v9255_v23 = vadd.f32 %v6619_v31, %v9108_v27  ;;  %v9258_v2 = vadd.f32 %v6683_v39, %v9111_v14  ;;  %4809 = vmatprep.mubr.bf16.mxu1 %v7906_v4  ;;  %4906 = vmatprep.mubr.bf16.mxu0 %v7908_v25 }
 0x219   : > { %v6684_v17 = vpop.f32.mrb[144].mxu0  ;;  %v6748_v13 = vpop.f32.mrb[144].mxu1 }
 0x21a   : > { %v6685_v55 = vpop.f32.mrb[145].mxu0  ;;  %v6749_v58 = vpop.f32.mrb[145].mxu1 }
 0x21b   : > { %v6686_v38 = vadd.f32 %v6685_v55, %v6684_v17  ;;  %v6750_v40 = vadd.f32 %v6749_v58, %v6748_v13  ;;  %v6687_v62 = vpop.f32.mrb[146].mxu0  ;;  %v6751_v5 = vpop.f32.mrb[146].mxu1 }
 0x21c   : > { %v6688_v32 = vpop.f32.mrb[147].mxu0  ;;  %v6752_v27 = vpop.f32.mrb[147].mxu1 }
 0x21d   : > { %v9265_v14 = vadd.f32 %v6686_v38, %v9127_v44  ;;  %v9268_v8 = vadd.f32 %v6750_v40, %v9130_v54  ;;  %v6689_v33 = vadd.f32 %v6688_v32, %v6687_v62  ;;  %v6753_v45 = vadd.f32 %v6752_v27, %v6751_v5  ;;  %v7912_v54 = vld [vmem:[%s8099_s9 + $0x818] ss:$84 sps:$4 sm:$0xff]   ;;  %v7923_v40 = vld [vmem:[%s8099_s9 + $0x388] ss:$84 sps:$4 sm:$0xff]  }
 0x21e   : > { %4810 = vmatmul.mubr.bf16.gmra.mrb[252].mxu1 %v7910_v47  ;;  %4907 = vmatmul.mubr.bf16.gmra.mrb[252].mxu0 %v7911_v1  ;;  %v7928_v32 = vld [vmem:[%s8099_s9 + $0x96c] ss:$84 sps:$4 sm:$0xff]   ;;  %v7931_v27 = vld [vmem:[%s8099_s9 + $0x434] ss:$84 sps:$4 sm:$0xff]  }
 0x21f   : > { %v9271_v7 = vadd.f32 %v6689_v33, %v9136_v11  ;;  %v9274_v6 = vadd.f32 %v6753_v45, %v9139_v24  ;;  %4817 = vmatprep.mubr.bf16.mxu1 %v7914_v48  ;;  %4914 = vmatprep.mubr.bf16.mxu0 %v7917_v9 }
 0x221   : > { %v6690_v43 = vpop.f32.mrb[148].mxu0  ;;  %v6754_v44 = vpop.f32.mrb[148].mxu1 }
 0x222   : > { %v6691_v35 = vpop.f32.mrb[149].mxu0  ;;  %v6755_v18 = vpop.f32.mrb[149].mxu1 }
 0x223   : > { %v6692_v36 = vadd.f32 %v6691_v35, %v6690_v43  ;;  %v6756_v37 = vadd.f32 %v6755_v18, %v6754_v44  ;;  %v6693_v4 = vpop.f32.mrb[150].mxu0  ;;  %v6757_v25 = vpop.f32.mrb[150].mxu1 }
 0x224   : > { %v6694_v31 = vpop.f32.mrb[151].mxu0  ;;  %v6758_v11 = vpop.f32.mrb[151].mxu1 }
 0x225   : > { %v9281_v24 = vadd.f32 %v6692_v36, %v9149_v34  ;;  %v9284_v39 = vadd.f32 %v6756_v37, %v9152_v26  ;;  %v6695_v17 = vadd.f32 %v6694_v31, %v6693_v4  ;;  %v6759_v13 = vadd.f32 %v6758_v11, %v6757_v25  ;;  %v7920_v26 = vld [vmem:[%s8099_s9 + $0x8c0] ss:$84 sps:$4 sm:$0xff]   ;;  %v7929_v37 = vld [vmem:[%s8099_s9 + $0x430] ss:$84 sps:$4 sm:$0xff]  }
 0x226   : > { %4818 = vmatmul.mubr.bf16.gmra.mrb[0].mxu1 %v7912_v54  ;;  %4915 = vmatmul.mubr.bf16.gmra.mrb[0].mxu0 %v7915_v19  ;;  %v7936_v31 = vld [vmem:[%s8099_s9 + $0xa14] ss:$84 sps:$4 sm:$0xff]   ;;  %v7939_v11 = vld [vmem:[%s8099_s9 + $0x4dc] ss:$84 sps:$4 sm:$0xff]  }
 0x227   : > { %v9287_v55 = vadd.f32 %v6695_v17, %v9155_v50  ;;  %v9290_v58 = vadd.f32 %v6759_v13, %v9158_v52  ;;  %4825 = vmatprep.mubr.bf16.mxu1 %v7922_v3  ;;  %4922 = vmatprep.mubr.bf16.mxu0 %v7925_v56 }
 0x229   : > { %v6696_v47 = vpop.f32.mrb[152].mxu0  ;;  %v6760_v34 = vpop.f32.mrb[152].mxu1 }
 0x22a   : > { %v6697_v1 = vpop.f32.mrb[153].mxu0  ;;  %v6761_v38 = vpop.f32.mrb[153].mxu1 }
 0x22b   : > { %v6698_v62 = vadd.f32 %v6697_v1, %v6696_v47  ;;  %v6762_v5 = vadd.f32 %v6761_v38, %v6760_v34  ;;  %v6699_v48 = vpop.f32.mrb[154].mxu0  ;;  %v6763_v9 = vpop.f32.mrb[154].mxu1 }
 0x22c   : > { %v6700_v33 = vpop.f32.mrb[155].mxu0  ;;  %v6764_v50 = vpop.f32.mrb[155].mxu1 }
 0x22d   : > { %v9297_v52 = vadd.f32 %v6698_v62, %v9165_v21  ;;  %v9300_v45 = vadd.f32 %v6762_v5, %v9168_v12  ;;  %v6701_v43 = vadd.f32 %v6700_v33, %v6699_v48  ;;  %v6765_v44 = vadd.f32 %v6764_v50, %v6763_v9  ;;  %v7926_v12 = vld [vmem:[%s8099_s9 + $0x968] ss:$84 sps:$4 sm:$0xff]   ;;  %v7937_v5 = vld [vmem:[%s8099_s9 + $0x4d8] ss:$84 sps:$4 sm:$0xff]  }
 0x22e   : > { %4826 = vmatmul.mubr.bf16.gmra.mrb[4].mxu1 %v7920_v26  ;;  %4923 = vmatmul.mubr.bf16.gmra.mrb[4].mxu0 %v7923_v40  ;;  %v7942_v33 = vld [vmem:[%s8099_s9 + $0x584] ss:$84 sps:$4 sm:$0xff]   ;;  %v7945_v50 = vld [vmem:[%s8099_s9 + $0x4c] ss:$84 sps:$4 sm:$0xff]  }
 0x22f   : > { %v9303_v35 = vadd.f32 %v6701_v43, %v9171_v61  ;;  %v9306_v18 = vadd.f32 %v6765_v44, %v9174_v0  ;;  %4833 = vmatprep.mubr.bf16.mxu1 %v7928_v32  ;;  %4930 = vmatprep.mubr.bf16.mxu0 %v7931_v27 }
 0x231   : > { %v6702_v54 = vpop.f32.mrb[156].mxu0  ;;  %v6766_v21 = vpop.f32.mrb[156].mxu1 }
 0x232   : > { %v6703_v19 = vpop.f32.mrb[157].mxu0  ;;  %v6767_v36 = vpop.f32.mrb[157].mxu1 }
 0x233   : > { %v6704_v4 = vadd.f32 %v6703_v19, %v6702_v54  ;;  %v6768_v25 = vadd.f32 %v6767_v36, %v6766_v21  ;;  %v6705_v3 = vpop.f32.mrb[158].mxu0  ;;  %v6769_v56 = vpop.f32.mrb[158].mxu1 }
 0x234   : > { %v6706_v17 = vpop.f32.mrb[159].mxu0  ;;  %v6770_v61 = vpop.f32.mrb[159].mxu1 }
 0x235   : > { %v9313_v0 = vadd.f32 %v6704_v4, %v9181_v59  ;;  %v9316_v13 = vadd.f32 %v6768_v25, %v9184_v60  ;;  %v6707_v47 = vadd.f32 %v6706_v17, %v6705_v3  ;;  %v6771_v34 = vadd.f32 %v6770_v61, %v6769_v56  ;;  %v7934_v60 = vld [vmem:[%s8099_s9 + $0xa10] ss:$84 sps:$4 sm:$0xff]   ;;  %v7943_v25 = vld [vmem:[%s8099_s9 + $0x48] ss:$84 sps:$4 sm:$0xff]   ;;  %v7949_v17 = vld [vmem:[%s8099_s9 + $0x62c] ss:$84 sps:$4 sm:$0xff]  }
 0x236   : > { %4834 = vmatmul.mubr.bf16.gmra.mrb[8].mxu1 %v7926_v12  ;;  %4931 = vmatmul.mubr.bf16.gmra.mrb[8].mxu0 %v7929_v37  ;;  %v7952_v61 = vld [vmem:[%s8099_s9 + $0xf4] ss:$84 sps:$4 sm:$0xff]  }
 0x237   : > { %v9319_v1 = vadd.f32 %v6707_v47, %v9187_v57  ;;  %v9322_v38 = vadd.f32 %v6771_v34, %v9190_v53  ;;  %4841 = vmatprep.mubr.bf16.mxu1 %v7936_v31  ;;  %4938 = vmatprep.mubr.bf16.mxu0 %v7939_v11 }
 0x239   : > { %v6708_v26 = vpop.f32.mrb[160].mxu0  ;;  %v6772_v59 = vpop.f32.mrb[160].mxu1 }
 0x23a   : > { %v6709_v40 = vpop.f32.mrb[161].mxu0  ;;  %v6773_v62 = vpop.f32.mrb[161].mxu1 }
 0x23b   : > { %v6710_v48 = vadd.f32 %v6709_v40, %v6708_v26  ;;  %v6774_v9 = vadd.f32 %v6773_v62, %v6772_v59  ;;  %v6711_v32 = vpop.f32.mrb[162].mxu0  ;;  %v6775_v27 = vpop.f32.mrb[162].mxu1 }
 0x23c   : > { %v6712_v43 = vpop.f32.mrb[163].mxu0  ;;  %v6776_v57 = vpop.f32.mrb[163].mxu1 }
 0x23d   : > { %v9329_v53 = vadd.f32 %v6710_v48, %v9197_v42  ;;  %v9332_v44 = vadd.f32 %v6774_v9, %v9200_v16  ;;  %v6713_v54 = vadd.f32 %v6712_v43, %v6711_v32  ;;  %v6777_v21 = vadd.f32 %v6776_v57, %v6775_v27  ;;  %v7940_v16 = vld [vmem:[%s8099_s9 + $0x580] ss:$84 sps:$4 sm:$0xff]   ;;  %v7950_v9 = vld [vmem:[%s8099_s9 + $0xf0] ss:$84 sps:$4 sm:$0xff]  }
 0x23e   : > { %4842 = vmatmul.mubr.bf16.gmra.mrb[12].mxu1 %v7934_v60  ;;  %4939 = vmatmul.mubr.bf16.gmra.mrb[12].mxu0 %v7937_v5  ;;  %v7955_v43 = vld [vmem:[%s8099_s9 + $0x6d4] ss:$84 sps:$4 sm:$0xff]   ;;  %v7958_v57 = vld [vmem:[%s8099_s9 + $0x19c] ss:$84 sps:$4 sm:$0xff]  }
 0x23f   : > { %v9335_v19 = vadd.f32 %v6713_v54, %v9203_v49  ;;  %v9338_v36 = vadd.f32 %v6777_v21, %v9206_v15  ;;  %4946 = vmatprep.mubr.bf16.mxu0 %v7942_v33  ;;  %5043 = vmatprep.mubr.bf16.mxu1 %v7945_v50 }
 0x241   : > { %v6714_v12 = vpop.f32.mrb[164].mxu0  ;;  %v6778_v42 = vpop.f32.mrb[164].mxu1 }
 0x242   : > { %v6715_v37 = vpop.f32.mrb[165].mxu0  ;;  %v6779_v4 = vpop.f32.mrb[165].mxu1 }
 0x243   : > { %v6716_v3 = vadd.f32 %v6715_v37, %v6714_v12  ;;  %v6780_v56 = vadd.f32 %v6779_v4, %v6778_v42  ;;  %v6717_v31 = vpop.f32.mrb[166].mxu0  ;;  %v6781_v11 = vpop.f32.mrb[166].mxu1 }
 0x244   : > { %v6718_v47 = vpop.f32.mrb[167].mxu0  ;;  %v6782_v49 = vpop.f32.mrb[167].mxu1 }
 0x245   : > { %v9345_v15 = vadd.f32 %v6716_v3, %v9216_v28  ;;  %v9348_v34 = vadd.f32 %v6780_v56, %v9219_v46  ;;  %v6719_v26 = vadd.f32 %v6718_v47, %v6717_v31  ;;  %v6783_v59 = vadd.f32 %v6782_v49, %v6781_v11  ;;  %v7947_v46 = vld [vmem:[%s8099_s9 + $0x628] ss:$84 sps:$4 sm:$0xff]   ;;  %v7956_v56 = vld [vmem:[%s8099_s9 + $0x198] ss:$84 sps:$4 sm:$0xff]  }
 0x246   : > { %4947 = vmatmul.mubr.bf16.gmra.mrb[16].mxu0 %v7940_v16  ;;  %5044 = vmatmul.mubr.bf16.vlgmr.msra.gmra.mrb[16].mxu1 %v7943_v25  ;;  %v7961_v47 = vld [vmem:[%s8099_s9 + $0x77c] ss:$84 sps:$4 sm:$0xff]   ;;  %v7964_v49 = vld [vmem:[%s8099_s9 + $0x244] ss:$84 sps:$4 sm:$0xff]  }
 0x247   : > { %v9351_v40 = vadd.f32 %v6719_v26, %v9222_v51  ;;  %v9354_v62 = vadd.f32 %v6783_v59, %v9225_v20  ;;  %4954 = vmatprep.mubr.bf16.mxu0 %v7949_v17  ;;  %5051 = vmatprep.mubr.bf16.mxu1 %v7952_v61 }
 0x249   : > { %v6720_v60 = vpop.f32.mrb[168].mxu0  ;;  %v6784_v28 = vpop.f32.mrb[168].mxu1 }
 0x24a   : > { %v6721_v5 = vpop.f32.mrb[169].mxu0  ;;  %v6785_v48 = vpop.f32.mrb[169].mxu1 }
 0x24b   : > { %v6722_v32 = vadd.f32 %v6721_v5, %v6720_v60  ;;  %v6786_v27 = vadd.f32 %v6785_v48, %v6784_v28  ;;  %v6723_v33 = vpop.f32.mrb[170].mxu0  ;;  %v6787_v50 = vpop.f32.mrb[170].mxu1 }
 0x24c   : > { %v6724_v54 = vpop.f32.mrb[171].mxu0  ;;  %v6788_v51 = vpop.f32.mrb[171].mxu1 }
 0x24d   : > { %v9361_v20 = vadd.f32 %v6722_v32, %v9233_v10  ;;  %v9364_v21 = vadd.f32 %v6786_v27, %v9236_v63  ;;  %v6725_v12 = vadd.f32 %v6724_v54, %v6723_v33  ;;  %v6789_v42 = vadd.f32 %v6788_v51, %v6787_v50  ;;  %v7953_v63 = vld [vmem:[%s8099_s9 + $0x6d0] ss:$84 sps:$4 sm:$0xff]   ;;  %v7962_v27 = vld [vmem:[%s8099_s9 + $0x240] ss:$84 sps:$4 sm:$0xff]  }
 0x24e   : > { %4955 = vmatmul.mubr.bf16.gmra.mrb[20].mxu0 %v7947_v46  ;;  %5052 = vmatmul.mubr.bf16.gmra.mrb[20].mxu1 %v7950_v9  ;;  %v7967_v54 = vld [vmem:[%s8099_s9 + $0x824] ss:$84 sps:$4 sm:$0xff]   ;;  %v7970_v51 = vld [vmem:[%s8099_s9 + $0x2ec] ss:$84 sps:$4 sm:$0xff]  }
 0x24f   : > { %v9367_v37 = vadd.f32 %v6725_v12, %v9239_v41  ;;  %v9370_v4 = vadd.f32 %v6789_v42, %v9242_v29  ;;  %4962 = vmatprep.mubr.bf16.mxu0 %v7955_v43  ;;  %5059 = vmatprep.mubr.bf16.mxu1 %v7958_v57 }
 0x251   : > { %v6726_v16 = vpop.f32.mrb[172].mxu0  ;;  %v6790_v10 = vpop.f32.mrb[172].mxu1 }
 0x252   : > { %v6727_v25 = vpop.f32.mrb[173].mxu0  ;;  %v6791_v3 = vpop.f32.mrb[173].mxu1 }
 0x253   : > { %v6728_v31 = vadd.f32 %v6727_v25, %v6726_v16  ;;  %v6792_v11 = vadd.f32 %v6791_v3, %v6790_v10  ;;  %v6729_v17 = vpop.f32.mrb[174].mxu0  ;;  %v6793_v61 = vpop.f32.mrb[174].mxu1 }
 0x254   : > { %v6730_v26 = vpop.f32.mrb[175].mxu0  ;;  %v6794_v41 = vpop.f32.mrb[175].mxu1 }
 0x255   : > { %v9377_v29 = vadd.f32 %v6728_v31, %v9249_v22  ;;  %v9380_v59 = vadd.f32 %v6792_v11, %v9252_v30  ;;  %v6731_v60 = vadd.f32 %v6730_v26, %v6729_v17  ;;  %v6795_v28 = vadd.f32 %v6794_v41, %v6793_v61  ;;  %v7959_v30 = vld [vmem:[%s8099_s9 + $0x778] ss:$84 sps:$4 sm:$0xff]   ;;  %v7968_v11 = vld [vmem:[%s8099_s9 + $0x2e8] ss:$84 sps:$4 sm:$0xff]  }
 0x256   : > { %4963 = vmatmul.mubr.bf16.gmra.mrb[24].mxu0 %v7953_v63  ;;  %5060 = vmatmul.mubr.bf16.gmra.mrb[24].mxu1 %v7956_v56  ;;  %v7973_v26 = vld [vmem:[%s8099_s9 + $0x8cc] ss:$84 sps:$4 sm:$0xff]   ;;  %v7976_v41 = vld [vmem:[%s8099_s9 + $0x394] ss:$84 sps:$4 sm:$0xff]  }
 0x257   : > { %v9383_v5 = vadd.f32 %v6731_v60, %v9255_v23  ;;  %v9386_v48 = vadd.f32 %v6795_v28, %v9258_v2  ;;  %4970 = vmatprep.mubr.bf16.mxu0 %v7961_v47  ;;  %5067 = vmatprep.mubr.bf16.mxu1 %v7964_v49 }
 0x259   : > { %v6796_v46 = vpop.f32.mrb[176].mxu1  ;;  %v6860_v22 = vpop.f32.mrb[176].mxu0 }
 0x25a   : > { %v6797_v9 = vpop.f32.mrb[177].mxu1  ;;  %v6861_v32 = vpop.f32.mrb[177].mxu0 }
 0x25b   : > { %v6798_v33 = vadd.f32 %v6797_v9, %v6796_v46  ;;  %v6862_v50 = vadd.f32 %v6861_v32, %v6860_v22  ;;  %v6799_v43 = vpop.f32.mrb[178].mxu1  ;;  %v6863_v57 = vpop.f32.mrb[178].mxu0 }
 0x25c   : > { %v6800_v12 = vpop.f32.mrb[179].mxu1  ;;  %v6864_v23 = vpop.f32.mrb[179].mxu0 }
 0x25d   : > { %v9393_v2 = vadd.f32 %v6798_v33, %v9265_v14  ;;  %v9396_v42 = vadd.f32 %v6862_v50, %v9268_v8  ;;  %v6801_v16 = vadd.f32 %v6800_v12, %v6799_v43  ;;  %v6865_v10 = vadd.f32 %v6864_v23, %v6863_v57  ;;  %v7965_v8 = vld [vmem:[%s8099_s9 + $0x820] ss:$84 sps:$4 sm:$0xff]   ;;  %v7974_v50 = vld [vmem:[%s8099_s9 + $0x390] ss:$84 sps:$4 sm:$0xff]  }
 0x25e   : > { %4971 = vmatmul.mubr.bf16.gmra.mrb[28].mxu0 %v7959_v30  ;;  %5068 = vmatmul.mubr.bf16.gmra.mrb[28].mxu1 %v7962_v27  ;;  %v7979_v12 = vld [vmem:[%s8099_s9 + $0x974] ss:$84 sps:$4 sm:$0xff]   ;;  %v7982_v23 = vld [vmem:[%s8099_s9 + $0x43c] ss:$84 sps:$4 sm:$0xff]  }
 0x25f   : > { %v9399_v25 = vadd.f32 %v6801_v16, %v9271_v7  ;;  %v9402_v3 = vadd.f32 %v6865_v10, %v9274_v6  ;;  %4978 = vmatprep.mubr.bf16.mxu0 %v7967_v54  ;;  %5075 = vmatprep.mubr.bf16.mxu1 %v7970_v51 }
 0x261   : > { %v6802_v63 = vpop.f32.mrb[180].mxu1  ;;  %v6866_v14 = vpop.f32.mrb[180].mxu0 }
 0x262   : > { %v6803_v56 = vpop.f32.mrb[181].mxu1  ;;  %v6867_v31 = vpop.f32.mrb[181].mxu0 }
 0x263   : > { %v6804_v17 = vadd.f32 %v6803_v56, %v6802_v63  ;;  %v6868_v61 = vadd.f32 %v6867_v31, %v6866_v14  ;;  %v6805_v47 = vpop.f32.mrb[182].mxu1  ;;  %v6869_v49 = vpop.f32.mrb[182].mxu0 }
 0x264   : > { %v6806_v60 = vpop.f32.mrb[183].mxu1  ;;  %v6870_v7 = vpop.f32.mrb[183].mxu0 }
 0x265   : > { %v9409_v6 = vadd.f32 %v6804_v17, %v9281_v24  ;;  %v9412_v28 = vadd.f32 %v6868_v61, %v9284_v39  ;;  %v6807_v46 = vadd.f32 %v6806_v60, %v6805_v47  ;;  %v6871_v22 = vadd.f32 %v6870_v7, %v6869_v49  ;;  %v7971_v39 = vld [vmem:[%s8099_s9 + $0x8c8] ss:$84 sps:$4 sm:$0xff]   ;;  %v7980_v61 = vld [vmem:[%s8099_s9 + $0x438] ss:$84 sps:$4 sm:$0xff]  }
 0x266   : > { %4979 = vmatmul.mubr.bf16.gmra.mrb[32].mxu0 %v7965_v8  ;;  %5076 = vmatmul.mubr.bf16.gmra.mrb[32].mxu1 %v7968_v11  ;;  %v7985_v60 = vld [vmem:[%s8099_s9 + $0xa1c] ss:$84 sps:$4 sm:$0xff]   ;;  %v7988_v7 = vld [vmem:[%s8099_s9 + $0x4e4] ss:$84 sps:$4 sm:$0xff]  }
 0x267   : > { %v9415_v9 = vadd.f32 %v6807_v46, %v9287_v55  ;;  %v9418_v32 = vadd.f32 %v6871_v22, %v9290_v58  ;;  %4986 = vmatprep.mubr.bf16.mxu0 %v7973_v26  ;;  %5083 = vmatprep.mubr.bf16.mxu1 %v7976_v41 }
 0x269   : > { %v6808_v30 = vpop.f32.mrb[184].mxu1  ;;  %v6872_v24 = vpop.f32.mrb[184].mxu0 }
 0x26a   : > { %v6809_v27 = vpop.f32.mrb[185].mxu1  ;;  %v6873_v33 = vpop.f32.mrb[185].mxu0 }
 0x26b   : > { %v6810_v43 = vadd.f32 %v6809_v27, %v6808_v30  ;;  %v6874_v57 = vadd.f32 %v6873_v33, %v6872_v24  ;;  %v6811_v54 = vpop.f32.mrb[186].mxu1  ;;  %v6875_v51 = vpop.f32.mrb[186].mxu0 }
 0x26c   : > { %v6812_v16 = vpop.f32.mrb[187].mxu1  ;;  %v6876_v55 = vpop.f32.mrb[187].mxu0 }
 0x26d   : > { %v9425_v58 = vadd.f32 %v6810_v43, %v9297_v52  ;;  %v9428_v10 = vadd.f32 %v6874_v57, %v9300_v45  ;;  %v6813_v63 = vadd.f32 %v6812_v16, %v6811_v54  ;;  %v6877_v14 = vadd.f32 %v6876_v55, %v6875_v51  ;;  %v7977_v45 = vld [vmem:[%s8099_s9 + $0x970] ss:$84 sps:$4 sm:$0xff]   ;;  %v7986_v57 = vld [vmem:[%s8099_s9 + $0x4e0] ss:$84 sps:$4 sm:$0xff]  }
 0x26e   : > { %4987 = vmatmul.mubr.bf16.gmra.mrb[36].mxu0 %v7971_v39  ;;  %5084 = vmatmul.mubr.bf16.gmra.mrb[36].mxu1 %v7974_v50  ;;  %v7991_v16 = vld [vmem:[%s8099_s9 + $0x58c] ss:$84 sps:$4 sm:$0xff]   ;;  %v7992_v55 = vld [vmem:[%s8099_s9 + $0x50] ss:$84 sps:$4 sm:$0xff]  }
 0x26f   : > { %v9431_v56 = vadd.f32 %v6813_v63, %v9303_v35  ;;  %v9434_v31 = vadd.f32 %v6877_v14, %v9306_v18  ;;  %4994 = vmatprep.mubr.bf16.mxu0 %v7979_v12  ;;  %5091 = vmatprep.mubr.bf16.mxu1 %v7982_v23 }
 0x271   : > { %v6814_v8 = vpop.f32.mrb[188].mxu1  ;;  %v6878_v52 = vpop.f32.mrb[188].mxu0 }
 0x272   : > { %v6815_v11 = vpop.f32.mrb[189].mxu1  ;;  %v6879_v17 = vpop.f32.mrb[189].mxu0 }
 0x273   : > { %v6816_v47 = vadd.f32 %v6815_v11, %v6814_v8  ;;  %v6880_v49 = vadd.f32 %v6879_v17, %v6878_v52  ;;  %v6817_v26 = vpop.f32.mrb[190].mxu1  ;;  %v6881_v41 = vpop.f32.mrb[190].mxu0 }
 0x274   : > { %v6818_v46 = vpop.f32.mrb[191].mxu1  ;;  %v6882_v35 = vpop.f32.mrb[191].mxu0 }
 0x275   : > { %v9441_v18 = vadd.f32 %v6816_v47, %v9313_v0  ;;  %v9444_v22 = vadd.f32 %v6880_v49, %v9316_v13  ;;  %v6819_v30 = vadd.f32 %v6818_v46, %v6817_v26  ;;  %v6883_v24 = vadd.f32 %v6882_v35, %v6881_v41  ;;  %v7983_v13 = vld [vmem:[%s8099_s9 + $0xa18] ss:$84 sps:$4 sm:$0xff]   ;;  %v7989_v47 = vld [vmem:[%s8099_s9 + $0x588] ss:$84 sps:$4 sm:$0xff]   ;;  %v7997_v35 = vld [vmem:[%s8099_s9 + $0x1a0] ss:$84 sps:$4 sm:$0xff]  }
 0x276   : > { %4995 = vmatmul.mubr.bf16.gmra.mrb[40].mxu0 %v7977_v45  ;;  %5092 = vmatmul.mubr.bf16.gmra.mrb[40].mxu1 %v7980_v61  ;;  %v7993_v49 = vld [vmem:[%s8099_s9 + $0xf8] ss:$84 sps:$4 sm:$0xff]   ;;  %v7996_v46 = vld [vmem:[%s8099_s9 + $0x634] ss:$84 sps:$4 sm:$0xff]  }
 0x277   : > { %v9447_v27 = vadd.f32 %v6819_v30, %v9319_v1  ;;  %v9450_v33 = vadd.f32 %v6883_v24, %v9322_v38  ;;  %5002 = vmatprep.mubr.bf16.mxu0 %v7985_v60  ;;  %5099 = vmatprep.mubr.bf16.mxu1 %v7988_v7 }
 0x279   : > { %v6820_v39 = vpop.f32.mrb[192].mxu1  ;;  %v6884_v0 = vpop.f32.mrb[192].mxu0 }
 0x27a   : > { %v6821_v50 = vpop.f32.mrb[193].mxu1  ;;  %v6885_v43 = vpop.f32.mrb[193].mxu0 }
 0x27b   : > { %v6822_v54 = vadd.f32 %v6821_v50, %v6820_v39  ;;  %v6886_v51 = vadd.f32 %v6885_v43, %v6884_v0  ;;  %v6823_v12 = vpop.f32.mrb[194].mxu1  ;;  %v6887_v23 = vpop.f32.mrb[194].mxu0 }
 0x27c   : > { %v6824_v63 = vpop.f32.mrb[195].mxu1  ;;  %v6888_v1 = vpop.f32.mrb[195].mxu0 }
 0x27d   : > { %v9457_v38 = vadd.f32 %v6822_v54, %v9329_v53  ;;  %v9460_v14 = vadd.f32 %v6886_v51, %v9332_v44  ;;  %v6825_v8 = vadd.f32 %v6824_v63, %v6823_v12  ;;  %v6889_v52 = vadd.f32 %v6888_v1, %v6887_v23  ;;  %v7994_v54 = vld [vmem:[%s8099_s9 + $0x630] ss:$84 sps:$4 sm:$0xff]   ;;  %v7998_v51 = vld [vmem:[%s8099_s9 + $0x248] ss:$84 sps:$4 sm:$0xff]  }
 0x27e   : > { %5003 = vmatmul.mubr.bf16.gmra.mrb[44].mxu0 %v7983_v13  ;;  %5100 = vmatmul.mubr.bf16.gmra.mrb[44].mxu1 %v7986_v57  ;;  %v8001_v63 = vld [vmem:[%s8099_s9 + $0x6dc] ss:$84 sps:$4 sm:$0xff]  }
 0x27f   : > { %v9463_v11 = vadd.f32 %v6825_v8, %v9335_v19  ;;  %v9466_v17 = vadd.f32 %v6889_v52, %v9338_v36  ;;  %5107 = vmatprep.mubr.bf16.mxu1 %v7991_v16  ;;  %7314 = vmatprep.mubr.msk.bf16.mxu0 %vm3513_vm0, %v7992_v55  ;;  %v8002_v1 = vld [vmem:[%s8099_s9 + $0x2f0] ss:$84 sps:$4 sm:$0xff]  }
 0x281   : > { %v6826_v53 = vpop.f32.mrb[196].mxu1  ;;  %v6890_v45 = vpop.f32.mrb[196].mxu0 }
 0x282   : > { %v6827_v61 = vpop.f32.mrb[197].mxu1  ;;  %v6891_v44 = vpop.f32.mrb[197].mxu0 }
 0x283   : > { %v6828_v26 = vadd.f32 %v6827_v61, %v6826_v53  ;;  %v6892_v41 = vadd.f32 %v6891_v44, %v6890_v45  ;;  %v6829_v60 = vpop.f32.mrb[198].mxu1  ;;  %v6893_v7 = vpop.f32.mrb[198].mxu0 }
 0x284   : > { %v6830_v19 = vpop.f32.mrb[199].mxu1  ;;  %v6894_v30 = vpop.f32.mrb[199].mxu0 }
 0x285   : > { %v9474_v36 = vadd.f32 %v6828_v26, %v9345_v15  ;;  %v9477_v24 = vadd.f32 %v6892_v41, %v9348_v34  ;;  %v6831_v39 = vadd.f32 %v6830_v19, %v6829_v60  ;;  %v6895_v0 = vadd.f32 %v6894_v30, %v6893_v7  ;;  %v7999_v26 = vld [vmem:[%s8099_s9 + $0x6d8] ss:$84 sps:$4 sm:$0xff]   ;;  %v8007_v30 = vld [vmem:[%s8099_s9 + $0x440] ss:$84 sps:$4 sm:$0xff]  }
 0x286   : > { %5108 = vmatmul.mubr.bf16.gmra.mrb[48].mxu1 %v7989_v47  ;;  %7315 = vmatmul.mubr.msk.bf16.vlgmr.msra.gmra.mrb[48].mxu0 %vm3513_vm0, %v7993_v49  ;;  %v8003_v41 = vld [vmem:[%s8099_s9 + $0x398] ss:$84 sps:$4 sm:$0xff]  }
 0x287   : > { %v9481_v50 = vadd.f32 %v6831_v39, %v9351_v40  ;;  %v9484_v43 = vadd.f32 %v6895_v0, %v9354_v62  ;;  %5115 = vmatprep.mubr.bf16.mxu1 %v7996_v46  ;;  %7318 = vmatprep.mubr.msk.bf16.mxu0 %vm3513_vm0, %v7997_v35  ;;  %v8006_v19 = vld [vmem:[%s8099_s9 + $0x784] ss:$84 sps:$4 sm:$0xff]  }
 0x289   : > { %v6832_v15 = vpop.f32.mrb[200].mxu1  ;;  %v6896_v13 = vpop.f32.mrb[200].mxu0 }
 0x28a   : > { %v6833_v34 = vpop.f32.mrb[201].mxu1  ;;  %v6897_v57 = vpop.f32.mrb[201].mxu0 }
 0x28b   : > { %v6834_v12 = vadd.f32 %v6833_v34, %v6832_v15  ;;  %v6898_v23 = vadd.f32 %v6897_v57, %v6896_v13  ;;  %v6835_v16 = vpop.f32.mrb[202].mxu1  ;;  %v6899_v55 = vpop.f32.mrb[202].mxu0 }
 0x28c   : > { %v6836_v40 = vpop.f32.mrb[203].mxu1  ;;  %v6900_v8 = vpop.f32.mrb[203].mxu0 }
 0x28d   : > { %v9492_v62 = vadd.f32 %v6834_v12, %v9361_v20  ;;  %v9495_v52 = vadd.f32 %v6898_v23, %v9364_v21  ;;  %v6837_v53 = vadd.f32 %v6836_v40, %v6835_v16  ;;  %v6901_v45 = vadd.f32 %v6900_v8, %v6899_v55  ;;  %v8004_v12 = vld [vmem:[%s8099_s9 + $0x780] ss:$84 sps:$4 sm:$0xff]   ;;  %v8008_v23 = vld [vmem:[%s8099_s9 + $0x4e8] ss:$84 sps:$4 sm:$0xff]   ;;  %v8012_v8 = vld [vmem:[%s8099_s9 + $0x590] ss:$84 sps:$4 sm:$0xff]  }
 0x28e   : > { %5116 = vmatmul.mubr.bf16.gmra.mrb[52].mxu1 %v7994_v54  ;;  %7319 = vmatmul.mubr.msk.bf16.gmra.mrb[52].mxu0 %vm3513_vm0, %v7998_v51  ;;  %v8011_v40 = vld [vmem:[%s8099_s9 + $0x82c] ss:$84 sps:$4 sm:$0xff]  }
 0x28f   : > { %v9499_v61 = vadd.f32 %v6837_v53, %v9367_v37  ;;  %v9502_v44 = vadd.f32 %v6901_v45, %v9370_v4  ;;  %5123 = vmatprep.mubr.bf16.mxu1 %v8001_v63  ;;  %7322 = vmatprep.mubr.msk.bf16.mxu0 %vm3513_vm0, %v8002_v1 }
 0x291   : > { %v6838_v20 = vpop.f32.mrb[204].mxu1  ;;  %v6902_v47 = vpop.f32.mrb[204].mxu0 }
 0x292   : > { %v6839_v21 = vpop.f32.mrb[205].mxu1  ;;  %v6903_v49 = vpop.f32.mrb[205].mxu0 }
 0x293   : > { %v6840_v60 = vadd.f32 %v6839_v21, %v6838_v20  ;;  %v6904_v7 = vadd.f32 %v6903_v49, %v6902_v47  ;;  %v6841_v46 = vpop.f32.mrb[206].mxu1  ;;  %v6905_v35 = vpop.f32.mrb[206].mxu0 }
 0x294   : > { %v6842_v37 = vpop.f32.mrb[207].mxu1  ;;  %v6906_v39 = vpop.f32.mrb[207].mxu0 }
 0x295   : > { %v9510_v4 = vadd.f32 %v6840_v60, %v9377_v29  ;;  %v9513_v0 = vadd.f32 %v6904_v7, %v9380_v59  ;;  %v6843_v15 = vadd.f32 %v6842_v37, %v6841_v46  ;;  %v6907_v13 = vadd.f32 %v6906_v39, %v6905_v35  ;;  %v8009_v60 = vld [vmem:[%s8099_s9 + $0x828] ss:$84 sps:$4 sm:$0xff]   ;;  %v8013_v7 = vld [vmem:[%s8099_s9 + $0x638] ss:$84 sps:$4 sm:$0xff]   ;;  %v8017_v39 = vld [vmem:[%s8099_s9 + $0x6e0] ss:$84 sps:$4 sm:$0xff]  }
 0x296   : > { %5124 = vmatmul.mubr.bf16.gmra.mrb[56].mxu1 %v7999_v26  ;;  %7323 = vmatmul.mubr.msk.bf16.gmra.mrb[56].mxu0 %vm3513_vm0, %v8003_v41  ;;  %v8016_v37 = vld [vmem:[%s8099_s9 + $0x8d4] ss:$84 sps:$4 sm:$0xff]  }
 0x297   : > { %v9517_v34 = vadd.f32 %v6843_v15, %v9383_v5  ;;  %v9520_v57 = vadd.f32 %v6907_v13, %v9386_v48  ;;  %5131 = vmatprep.mubr.bf16.mxu1 %v8006_v19  ;;  %7326 = vmatprep.mubr.msk.bf16.mxu0 %vm3513_vm0, %v8007_v30 }
 0x299   : > { %v6908_v29 = vpop.f32.mrb[208].mxu0  ;;  %v6972_v54 = vpop.f32.mrb[208].mxu1 }
 0x29a   : > { %v6909_v59 = vpop.f32.mrb[209].mxu0  ;;  %v6973_v51 = vpop.f32.mrb[209].mxu1 }
 0x29b   : > { %v6910_v16 = vadd.f32 %v6909_v59, %v6908_v29  ;;  %v6974_v55 = vadd.f32 %v6973_v51, %v6972_v54  ;;  %v6911_v63 = vpop.f32.mrb[210].mxu0  ;;  %v6975_v1 = vpop.f32.mrb[210].mxu1 }
 0x29c   : > { %v6912_v5 = vpop.f32.mrb[211].mxu0  ;;  %v6976_v53 = vpop.f32.mrb[211].mxu1 }
 0x29d   : > { %v9528_v48 = vadd.f32 %v6910_v16, %v9393_v2  ;;  %v9531_v45 = vadd.f32 %v6974_v55, %v9396_v42  ;;  %v6913_v20 = vadd.f32 %v6912_v5, %v6911_v63  ;;  %v6977_v47 = vadd.f32 %v6976_v53, %v6975_v1  ;;  %v8014_v16 = vld [vmem:[%s8099_s9 + $0x8d0] ss:$84 sps:$4 sm:$0xff]   ;;  %v8018_v55 = vld [vmem:[%s8099_s9 + $0x788] ss:$84 sps:$4 sm:$0xff]  }
 0x29e   : > { %5132 = vmatmul.mubr.bf16.gmra.mrb[60].mxu1 %v8004_v12  ;;  %7327 = vmatmul.mubr.msk.bf16.gmra.mrb[60].mxu0 %vm3513_vm0, %v8008_v23  ;;  %v8021_v5 = vld [vmem:[%s8099_s9 + $0x97c] ss:$84 sps:$4 sm:$0xff]  }
 0x29f   : > { %v9535_v21 = vadd.f32 %v6913_v20, %v9399_v25  ;;  %v9538_v49 = vadd.f32 %v6977_v47, %v9402_v3  ;;  %5139 = vmatprep.mubr.bf16.mxu1 %v8011_v40  ;;  %7330 = vmatprep.mubr.msk.bf16.mxu0 %vm3513_vm0, %v8012_v8  ;;  %v8022_v53 = vld [vmem:[%s8099_s9 + $0x830] ss:$84 sps:$4 sm:$0xff]  }
 0x2a1   : > { %v6914_v2 = vpop.f32.mrb[212].mxu0  ;;  %v6978_v26 = vpop.f32.mrb[212].mxu1 }
 0x2a2   : > { %v6915_v42 = vpop.f32.mrb[213].mxu0  ;;  %v6979_v41 = vpop.f32.mrb[213].mxu1 }
 0x2a3   : > { %v6916_v46 = vadd.f32 %v6915_v42, %v6914_v2  ;;  %v6980_v35 = vadd.f32 %v6979_v41, %v6978_v26  ;;  %v6917_v19 = vpop.f32.mrb[214].mxu0  ;;  %v6981_v30 = vpop.f32.mrb[214].mxu1 }
 0x2a4   : > { %v6918_v25 = vpop.f32.mrb[215].mxu0  ;;  %v6982_v15 = vpop.f32.mrb[215].mxu1 }
 0x2a5   : > { %v9546_v3 = vadd.f32 %v6916_v46, %v9409_v6  ;;  %v9549_v13 = vadd.f32 %v6980_v35, %v9412_v28  ;;  %v6919_v29 = vadd.f32 %v6918_v25, %v6917_v19  ;;  %v6983_v54 = vadd.f32 %v6982_v15, %v6981_v30  ;;  %v8019_v46 = vld [vmem:[%s8099_s9 + $0x978] ss:$84 sps:$4 sm:$0xff]   ;;  %v8027_v15 = vld [vmem:[%s8099_s9 + $0x980] ss:$84 sps:$4 sm:$0xff]  }
 0x2a6   : > { %5140 = vmatmul.mubr.bf16.gmra.mrb[64].mxu1 %v8009_v60  ;;  %7331 = vmatmul.mubr.msk.bf16.gmra.mrb[64].mxu0 %vm3513_vm0, %v8013_v7  ;;  %v8023_v35 = vld [vmem:[%s8099_s9 + $0x8d8] ss:$84 sps:$4 sm:$0xff]  }
 0x2a7   : > { %v9553_v59 = vadd.f32 %v6919_v29, %v9415_v9  ;;  %v9556_v51 = vadd.f32 %v6983_v54, %v9418_v32  ;;  %5147 = vmatprep.mubr.bf16.mxu1 %v8016_v37  ;;  %7334 = vmatprep.mubr.msk.bf16.mxu0 %vm3513_vm0, %v8017_v39  ;;  %v8026_v25 = vld [vmem:[%s8099_s9 + $0xa24] ss:$84 sps:$4 sm:$0xff]  }
 0x2a9   : > { %v6920_v6 = vpop.f32.mrb[216].mxu0  ;;  %v6984_v12 = vpop.f32.mrb[216].mxu1 }
 0x2aa   : > { %v6921_v28 = vpop.f32.mrb[217].mxu0  ;;  %v6985_v23 = vpop.f32.mrb[217].mxu1 }
 0x2ab   : > { %v6922_v63 = vadd.f32 %v6921_v28, %v6920_v6  ;;  %v6986_v1 = vadd.f32 %v6985_v23, %v6984_v12  ;;  %v6923_v40 = vpop.f32.mrb[218].mxu0  ;;  %v6987_v8 = vpop.f32.mrb[218].mxu1 }
 0x2ac   : > { %v6924_v9 = vpop.f32.mrb[219].mxu0  ;;  %v6988_v20 = vpop.f32.mrb[219].mxu1 }
 0x2ad   : > { %v9564_v32 = vadd.f32 %v6922_v63, %v9425_v58  ;;  %v9567_v47 = vadd.f32 %v6986_v1, %v9428_v10  ;;  %v6925_v2 = vadd.f32 %v6924_v9, %v6923_v40  ;;  %v6989_v26 = vadd.f32 %v6988_v20, %v6987_v8  ;;  %v8028_v1 = vld [vmem:[%s8099_s9 + $0xa28] ss:$84 sps:$4 sm:$0xff]  }
 0x2ae   : > { %5148 = vmatmul.mubr.bf16.gmra.mrb[68].mxu1 %v8014_v16  ;;  %7335 = vmatmul.mubr.msk.bf16.gmra.mrb[68].mxu0 %vm3513_vm0, %v8018_v55 }
 0x2af   : > { %v9571_v42 = vadd.f32 %v6925_v2, %v9431_v56  ;;  %v9574_v41 = vadd.f32 %v6989_v26, %v9434_v31  ;;  %5155 = vmatprep.mubr.bf16.mxu1 %v8021_v5  ;;  %7338 = vmatprep.mubr.msk.bf16.mxu0 %vm3513_vm0, %v8022_v53 }
 0x2b1   : > { %v6926_v58 = vpop.f32.mrb[220].mxu0  ;;  %v6990_v60 = vpop.f32.mrb[220].mxu1 }
 0x2b2   : > { %v6927_v10 = vpop.f32.mrb[221].mxu0  ;;  %v6991_v7 = vpop.f32.mrb[221].mxu1 }
 0x2b3   : > { %v6928_v19 = vadd.f32 %v6927_v10, %v6926_v58  ;;  %v6992_v30 = vadd.f32 %v6991_v7, %v6990_v60  ;;  %v6929_v37 = vpop.f32.mrb[222].mxu0  ;;  %v6993_v39 = vpop.f32.mrb[222].mxu1 }
 0x2b4   : > { %v6930_v56 = vpop.f32.mrb[223].mxu0  ;;  %v6994_v29 = vpop.f32.mrb[223].mxu1 }
 0x2b5   : > { %v9582_v31 = vadd.f32 %v6928_v19, %v9441_v18  ;;  %v9585_v54 = vadd.f32 %v6992_v30, %v9444_v22  ;;  %v6931_v6 = vadd.f32 %v6930_v56, %v6929_v37  ;;  %v6995_v12 = vadd.f32 %v6994_v29, %v6993_v39  ;;  %v8024_v22 = vld [vmem:[%s8099_s9 + $0xa20] ss:$84 sps:$4 sm:$0xff]   ;;  %s5590_s9 = sshll.u32 %s9966_s16, 2 }
 0x2b6   : > { %5156 = vmatmul.mubr.bf16.gmra.mrb[72].mxu1 %v8019_v46  ;;  %7339 = vmatmul.mubr.msk.bf16.gmra.mrb[72].mxu0 %vm3513_vm0, %v8023_v35  ;;  %s9845_s10 = scalar_lea.vmem %s9964_s3, %s5590_s9 }
 0x2b7   : > { %v9589_v28 = vadd.f32 %v6931_v6, %v9447_v27  ;;  %v9592_v23 = vadd.f32 %v6995_v12, %v9450_v33  ;;  %5163 = vmatprep.mubr.bf16.mxu1 %v8026_v25  ;;  %7342 = vmatprep.mubr.msk.bf16.mxu0 %vm3513_vm0, %v8027_v15 }
 0x2b9   : > { %v6932_v16 = vpop.f32.mrb[224].mxu0  ;;  %v6996_v18 = vpop.f32.mrb[224].mxu1 }
 0x2ba   : > { %v6933_v55 = vpop.f32.mrb[225].mxu0  ;;  %v6997_v63 = vpop.f32.mrb[225].mxu1 }
 0x2bb   : > { %v6934_v40 = vadd.f32 %v6933_v55, %v6932_v16  ;;  %v6998_v8 = vadd.f32 %v6997_v63, %v6996_v18  ;;  %v6935_v5 = vpop.f32.mrb[226].mxu0  ;;  %v6999_v53 = vpop.f32.mrb[226].mxu1 }
 0x2bc   : > { %v6936_v9 = vpop.f32.mrb[227].mxu0  ;;  %v7000_v20 = vpop.f32.mrb[227].mxu1 }
 0x2bd   : > { %v9598_v27 = vadd.f32 %v6934_v40, %v9457_v38  ;;  %v9601_v33 = vadd.f32 %v6998_v8, %v9460_v14  ;;  %v6937_v2 = vadd.f32 %v6936_v9, %v6935_v5  ;;  %v7001_v26 = vadd.f32 %v7000_v20, %v6999_v53 }
 0x2be   : > { %5164 = vmatmul.mubr.bf16.gmra.mrb[76].mxu1 %v8024_v22  ;;  %7343 = vmatmul.mubr.msk.bf16.gmra.mrb[76].mxu0 %vm3513_vm0, %v8028_v1 }
 0x2bf   : > { %v9605_v58 = vadd.f32 %v6937_v2, %v9463_v11  ;;  %v9608_v60 = vadd.f32 %v7001_v26, %v9466_v17 }
 0x2c1   : > { %v6938_v10 = vpop.f32.mrb[228].mxu0  ;;  %v7002_v7 = vpop.f32.mrb[228].mxu1 }
 0x2c2   : > { %v6939_v46 = vpop.f32.mrb[229].mxu0  ;;  %v7003_v35 = vpop.f32.mrb[229].mxu1 }
 0x2c3   : > { %v6940_v38 = vadd.f32 %v6939_v46, %v6938_v10  ;;  %v7004_v19 = vadd.f32 %v7003_v35, %v7002_v7  ;;  %v6941_v30 = vpop.f32.mrb[230].mxu0  ;;  %v7005_v14 = vpop.f32.mrb[230].mxu1 }
 0x2c4   : > { %v6942_v37 = vpop.f32.mrb[231].mxu0  ;;  %v7006_v39 = vpop.f32.mrb[231].mxu1 }
 0x2c5   : > { %v9611_v25 = vadd.f32 %v6940_v38, %v9474_v36  ;;  %v9614_v15 = vadd.f32 %v7004_v19, %v9477_v24  ;;  %v6943_v11 = vadd.f32 %v6942_v37, %v6941_v30  ;;  %v7007_v56 = vadd.f32 %v7006_v39, %v7005_v14 }
 0x2c7   : > { %v9617_v17 = vadd.f32 %v6943_v11, %v9481_v50  ;;  %v9620_v29 = vadd.f32 %v7007_v56, %v9484_v43 }
 0x2c9   : > { %v6944_v6 = vpop.f32.mrb[232].mxu0  ;;  %v7008_v12 = vpop.f32.mrb[232].mxu1 }
 0x2ca   : > { %v6945_v16 = vpop.f32.mrb[233].mxu0  ;;  %v7009_v18 = vpop.f32.mrb[233].mxu1 }
 0x2cb   : > { %v6946_v55 = vadd.f32 %v6945_v16, %v6944_v6  ;;  %v7010_v63 = vadd.f32 %v7009_v18, %v7008_v12  ;;  %v6947_v22 = vpop.f32.mrb[234].mxu0  ;;  %v7011_v36 = vpop.f32.mrb[234].mxu1 }
 0x2cc   : > { %v6948_v1 = vpop.f32.mrb[235].mxu0  ;;  %v7012_v40 = vpop.f32.mrb[235].mxu1 }
 0x2cd   : > { %v9623_v24 = vadd.f32 %v6946_v55, %v9492_v62  ;;  %v9626_v8 = vadd.f32 %v7010_v63, %v9495_v52  ;;  %v6949_v50 = vadd.f32 %v6948_v1, %v6947_v22  ;;  %v7013_v5 = vadd.f32 %v7012_v40, %v7011_v36 }
 0x2cf   : > { %v9629_v43 = vadd.f32 %v6949_v50, %v9499_v61  ;;  %v9632_v53 = vadd.f32 %v7013_v5, %v9502_v44 }
 0x2d1   : > { %v6950_v9 = vpop.f32.mrb[236].mxu0  ;;  %v7014_v20 = vpop.f32.mrb[236].mxu1 }
 0x2d2   : > { %v6951_v2 = vpop.f32.mrb[237].mxu0  ;;  %v7015_v26 = vpop.f32.mrb[237].mxu1 }
 0x2d3   : > { %v6952_v10 = vadd.f32 %v6951_v2, %v6950_v9  ;;  %v7016_v7 = vadd.f32 %v7015_v26, %v7014_v20  ;;  %v6953_v46 = vpop.f32.mrb[238].mxu0  ;;  %v7017_v62 = vpop.f32.mrb[238].mxu1 }
 0x2d4   : > { %v6954_v35 = vpop.f32.mrb[239].mxu0  ;;  %v7018_v38 = vpop.f32.mrb[239].mxu1 }
 0x2d5   : > { %v9635_v52 = vadd.f32 %v6952_v10, %v9510_v4  ;;  %v9638_v19 = vadd.f32 %v7016_v7, %v9513_v0  ;;  %v6955_v61 = vadd.f32 %v6954_v35, %v6953_v46  ;;  %v7019_v30 = vadd.f32 %v7018_v38, %v7017_v62 }
 0x2d7   : > { %v9641_v44 = vadd.f32 %v6955_v61, %v9517_v34  ;;  %v9644_v14 = vadd.f32 %v7019_v30, %v9520_v57 }
 0x2d9   : > { %v7020_v37 = vpop.f32.mrb[240].mxu1  ;;  %v7084_v39 = vpop.f32.mrb[240].mxu0 }
 0x2da   : > { %v7021_v11 = vpop.f32.mrb[241].mxu1  ;;  %v7085_v56 = vpop.f32.mrb[241].mxu0 }
 0x2db   : > { %v7022_v6 = vadd.f32 %v7021_v11, %v7020_v37  ;;  %v7086_v12 = vadd.f32 %v7085_v56, %v7084_v39  ;;  %v7023_v16 = vpop.f32.mrb[242].mxu1  ;;  %v7087_v4 = vpop.f32.mrb[242].mxu0 }
 0x2dc   : > { %v7024_v18 = vpop.f32.mrb[243].mxu1  ;;  %v7088_v55 = vpop.f32.mrb[243].mxu0 }
 0x2dd   : > { %v9647_v0 = vadd.f32 %v7022_v6, %v9528_v48  ;;  %v9650_v63 = vadd.f32 %v7086_v12, %v9531_v45  ;;  %v7025_v34 = vadd.f32 %v7024_v18, %v7023_v16  ;;  %v7089_v22 = vadd.f32 %v7088_v55, %v7087_v4 }
 0x2df   : > { %v9653_v57 = vadd.f32 %v7025_v34, %v9535_v21  ;;  %v9656_v36 = vadd.f32 %v7089_v22, %v9538_v49 }
 0x2e1   : > { %v7026_v1 = vpop.f32.mrb[244].mxu1  ;;  %v7090_v40 = vpop.f32.mrb[244].mxu0 }
 0x2e2   : > { %v7027_v50 = vpop.f32.mrb[245].mxu1  ;;  %v7091_v5 = vpop.f32.mrb[245].mxu0 }
 0x2e3   : > { %v7028_v9 = vadd.f32 %v7027_v50, %v7026_v1  ;;  %v7092_v20 = vadd.f32 %v7091_v5, %v7090_v40  ;;  %v7029_v2 = vpop.f32.mrb[246].mxu1  ;;  %v7093_v48 = vpop.f32.mrb[246].mxu0 }
 0x2e4   : > { %v7030_v26 = vpop.f32.mrb[247].mxu1  ;;  %v7094_v10 = vpop.f32.mrb[247].mxu0 }
 0x2e5   : > { %v9659_v45 = vadd.f32 %v7028_v9, %v9546_v3  ;;  %v9662_v7 = vadd.f32 %v7092_v20, %v9549_v13  ;;  %v7031_v21 = vadd.f32 %v7030_v26, %v7029_v2  ;;  %v7095_v46 = vadd.f32 %v7094_v10, %v7093_v48 }
 0x2e7   : > { %v9665_v49 = vadd.f32 %v7031_v21, %v9553_v59  ;;  %v9668_v62 = vadd.f32 %v7095_v46, %v9556_v51 }
 0x2e9   : > { %v7032_v35 = vpop.f32.mrb[248].mxu1  ;;  %v7096_v38 = vpop.f32.mrb[248].mxu0 }
 0x2ea   : > { %v7033_v61 = vpop.f32.mrb[249].mxu1  ;;  %v7097_v30 = vpop.f32.mrb[249].mxu0 }
 0x2eb   : > { %v7034_v37 = vadd.f32 %v7033_v61, %v7032_v35  ;;  %v7098_v39 = vadd.f32 %v7097_v30, %v7096_v38  ;;  %v7035_v11 = vpop.f32.mrb[250].mxu1  ;;  %v7099_v3 = vpop.f32.mrb[250].mxu0 }
 0x2ec   : > { %v7036_v56 = vpop.f32.mrb[251].mxu1  ;;  %v7100_v6 = vpop.f32.mrb[251].mxu0 }
 0x2ed   : > { %v9671_v13 = vadd.f32 %v7034_v37, %v9564_v32  ;;  %v9674_v12 = vadd.f32 %v7098_v39, %v9567_v47  ;;  %v7037_v59 = vadd.f32 %v7036_v56, %v7035_v11  ;;  %v7101_v16 = vadd.f32 %v7100_v6, %v7099_v3 }
 0x2ef   : > { %v9677_v51 = vadd.f32 %v7037_v59, %v9571_v42  ;;  %v9680_v4 = vadd.f32 %v7101_v16, %v9574_v41 }
 0x2f1   : > { %v7038_v18 = vpop.f32.mrb[252].mxu1  ;;  %v7102_v55 = vpop.f32.mrb[252].mxu0 }
 0x2f2   : > { %v7039_v34 = vpop.f32.mrb[253].mxu1  ;;  %v7103_v22 = vpop.f32.mrb[253].mxu0 }
 0x2f3   : > { %v7040_v1 = vadd.f32 %v7039_v34, %v7038_v18  ;;  %v7104_v40 = vadd.f32 %v7103_v22, %v7102_v55  ;;  %v7041_v50 = vpop.f32.mrb[254].mxu1  ;;  %v7105_v32 = vpop.f32.mrb[254].mxu0 }
 0x2f4   : > { %v7042_v5 = vpop.f32.mrb[255].mxu1  ;;  %v7106_v9 = vpop.f32.mrb[255].mxu0 }
 0x2f5   : > { %v9683_v47 = vadd.f32 %v7040_v1, %v9582_v31  ;;  %v9686_v20 = vadd.f32 %v7104_v40, %v9585_v54  ;;  %v7043_v42 = vadd.f32 %v7042_v5, %v7041_v50  ;;  %v7107_v2 = vadd.f32 %v7106_v9, %v7105_v32 }
 0x2f7   : > { %v9689_v41 = vadd.f32 %v7043_v42, %v9589_v28  ;;  %v9692_v48 = vadd.f32 %v7107_v2, %v9592_v23 }
 0x2f9   : > { %v7044_v26 = vpop.f32.mrb[0].mxu1  ;;  %v7108_v10 = vpop.f32.mrb[0].mxu0 }
 0x2fa   : > { %v7045_v21 = vpop.f32.mrb[1].mxu1  ;;  %v7109_v46 = vpop.f32.mrb[1].mxu0 }
 0x2fb   : > { %v7046_v35 = vadd.f32 %v7045_v21, %v7044_v26  ;;  %v7110_v38 = vadd.f32 %v7109_v46, %v7108_v10  ;;  %v7047_v61 = vpop.f32.mrb[2].mxu1  ;;  %v7111_v31 = vpop.f32.mrb[2].mxu0 }
 0x2fc   : > { %v7048_v30 = vpop.f32.mrb[3].mxu1  ;;  %v7112_v37 = vpop.f32.mrb[3].mxu0 }
 0x2fd   : > { %v9695_v54 = vadd.f32 %v7046_v35, %v9598_v27  ;;  %v9698_v39 = vadd.f32 %v7110_v38, %v9601_v33  ;;  %v7049_v28 = vadd.f32 %v7048_v30, %v7047_v61  ;;  %v7113_v11 = vadd.f32 %v7112_v37, %v7111_v31 }
 0x2ff   : > { %v9701_v23 = vadd.f32 %v7049_v28, %v9605_v58  ;;  %v9704_v3 = vadd.f32 %v7113_v11, %v9608_v60 }
 0x301   : > { %v7050_v56 = vpop.f32.mrb[4].mxu1  ;;  %v7114_v6 = vpop.f32.mrb[4].mxu0 }
 0x302   : > { %v7051_v59 = vpop.f32.mrb[5].mxu1  ;;  %v7115_v16 = vpop.f32.mrb[5].mxu0 }
 0x303   : > { %v7052_v18 = vadd.f32 %v7051_v59, %v7050_v56  ;;  %v7116_v55 = vadd.f32 %v7115_v16, %v7114_v6  ;;  %v7053_v34 = vpop.f32.mrb[6].mxu1  ;;  %v7117_v27 = vpop.f32.mrb[6].mxu0 }
 0x304   : > { %v7054_v22 = vpop.f32.mrb[7].mxu1  ;;  %v7118_v1 = vpop.f32.mrb[7].mxu0 }
 0x305   : > { %v9707_v33 = vadd.f32 %v7052_v18, %v9611_v25  ;;  %v9710_v40 = vadd.f32 %v7116_v55, %v9614_v15  ;;  %v7055_v58 = vadd.f32 %v7054_v22, %v7053_v34  ;;  %v7119_v50 = vadd.f32 %v7118_v1, %v7117_v27 }
 0x307   : > { %v9713_v60 = vadd.f32 %v7055_v58, %v9617_v17  ;;  %v9716_v32 = vadd.f32 %v7119_v50, %v9620_v29 }
 0x309   : > { %v7056_v5 = vpop.f32.mrb[8].mxu1  ;;  %v7120_v9 = vpop.f32.mrb[8].mxu0 }
 0x30a   : > { %v7057_v42 = vpop.f32.mrb[9].mxu1  ;;  %v7121_v2 = vpop.f32.mrb[9].mxu0 }
 0x30b   : > { %v7058_v26 = vadd.f32 %v7057_v42, %v7056_v5  ;;  %v7122_v10 = vadd.f32 %v7121_v2, %v7120_v9  ;;  %v7059_v21 = vpop.f32.mrb[10].mxu1  ;;  %v7123_v25 = vpop.f32.mrb[10].mxu0 }
 0x30c   : > { %v7060_v46 = vpop.f32.mrb[11].mxu1  ;;  %v7124_v35 = vpop.f32.mrb[11].mxu0 }
 0x30d   : > { %v9719_v15 = vadd.f32 %v7058_v26, %v9623_v24  ;;  %v9722_v38 = vadd.f32 %v7122_v10, %v9626_v8  ;;  %v7061_v17 = vadd.f32 %v7060_v46, %v7059_v21  ;;  %v7125_v61 = vadd.f32 %v7124_v35, %v7123_v25 }
 0x30f   : > { %v9725_v29 = vadd.f32 %v7061_v17, %v9629_v43  ;;  %v9728_v31 = vadd.f32 %v7125_v61, %v9632_v53 }
 0x311   : > { %v7062_v30 = vpop.f32.mrb[12].mxu1  ;;  %v7126_v37 = vpop.f32.mrb[12].mxu0 }
 0x312   : > { %v7063_v28 = vpop.f32.mrb[13].mxu1  ;;  %v7127_v11 = vpop.f32.mrb[13].mxu0 }
 0x313   : > { %v7064_v56 = vadd.f32 %v7063_v28, %v7062_v30  ;;  %v7128_v6 = vadd.f32 %v7127_v11, %v7126_v37  ;;  %v7065_v59 = vpop.f32.mrb[14].mxu1  ;;  %v7129_v24 = vpop.f32.mrb[14].mxu0 }
 0x314   : > { %v7066_v16 = vpop.f32.mrb[15].mxu1  ;;  %v7130_v18 = vpop.f32.mrb[15].mxu0 }
 0x315   : > { %v9731_v8 = vadd.f32 %v7064_v56, %v9635_v52  ;;  %v9734_v55 = vadd.f32 %v7128_v6, %v9638_v19  ;;  %v7067_v43 = vadd.f32 %v7066_v16, %v7065_v59  ;;  %v7131_v34 = vadd.f32 %v7130_v18, %v7129_v24 }
 0x317   : > { %v9737_v53 = vadd.f32 %v7067_v43, %v9641_v44  ;;  %v9740_v27 = vadd.f32 %v7131_v34, %v9644_v14 }
 0x319   : > { %v7132_v22 = vpop.f32.mrb[16].mxu0  ;;  %v7196_v1 = vpop.f32.mrb[16].mxu1 }
 0x31a   : > { %v7133_v58 = vpop.f32.mrb[17].mxu0  ;;  %v7197_v50 = vpop.f32.mrb[17].mxu1 }
 0x31b   : > { %v7134_v5 = vadd.f32 %v7133_v58, %v7132_v22  ;;  %v7198_v9 = vadd.f32 %v7197_v50, %v7196_v1  ;;  %v7135_v42 = vpop.f32.mrb[18].mxu0  ;;  %v7199_v52 = vpop.f32.mrb[18].mxu1 }
 0x31c   : > { %v7136_v2 = vpop.f32.mrb[19].mxu0  ;;  %v7200_v26 = vpop.f32.mrb[19].mxu1 }
 0x31d   : > { %v9743_v19 = vadd.f32 %v7134_v5, %v9647_v0  ;;  %v7137_v10 = vadd.f32 %v7136_v2, %v7135_v42  ;;  %v7201_v21 = vadd.f32 %v7200_v26, %v7199_v52  ;;  %v9746_v44 = vadd.f32 %v7198_v9, %v9650_v63 }
 0x31f   : > { %v9749_v14 = vadd.f32 %v7137_v10, %v9653_v57  ;;  %v9752_v25 = vadd.f32 %v7201_v21, %v9656_v36 }
 0x321   : > { %v7138_v46 = vpop.f32.mrb[20].mxu0  ;;  %v7202_v35 = vpop.f32.mrb[20].mxu1 }
 0x322   : > { %v7139_v17 = vpop.f32.mrb[21].mxu0  ;;  %v7203_v61 = vpop.f32.mrb[21].mxu1 }
 0x323   : > { %v7140_v30 = vadd.f32 %v7139_v17, %v7138_v46  ;;  %v7204_v37 = vadd.f32 %v7203_v61, %v7202_v35  ;;  %v7141_v28 = vpop.f32.mrb[22].mxu0  ;;  %v7205_v0 = vpop.f32.mrb[22].mxu1 }
 0x324   : > { %v7142_v11 = vpop.f32.mrb[23].mxu0  ;;  %v7206_v56 = vpop.f32.mrb[23].mxu1 }
 0x325   : > { %v9755_v6 = vadd.f32 %v7140_v30, %v9659_v45  ;;  %v7143_v63 = vadd.f32 %v7142_v11, %v7141_v28  ;;  %v7207_v59 = vadd.f32 %v7206_v56, %v7205_v0  ;;  %v9758_v57 = vadd.f32 %v7204_v37, %v9662_v7 }
 0x327   : > { %v9761_v36 = vadd.f32 %v7143_v63, %v9665_v49  ;;  %v9764_v24 = vadd.f32 %v7207_v59, %v9668_v62 }
 0x329   : > { %v7144_v16 = vpop.f32.mrb[24].mxu0  ;;  %v7208_v18 = vpop.f32.mrb[24].mxu1 }
 0x32a   : > { %v7145_v43 = vpop.f32.mrb[25].mxu0  ;;  %v7209_v34 = vpop.f32.mrb[25].mxu1 }
 0x32b   : > { %v7146_v22 = vadd.f32 %v7145_v43, %v7144_v16  ;;  %v7210_v1 = vadd.f32 %v7209_v34, %v7208_v18  ;;  %v7147_v58 = vpop.f32.mrb[26].mxu0  ;;  %v7211_v45 = vpop.f32.mrb[26].mxu1 }
 0x32c   : > { %v7148_v50 = vpop.f32.mrb[27].mxu0  ;;  %v7212_v5 = vpop.f32.mrb[27].mxu1 }
 0x32d   : > { %v9767_v9 = vadd.f32 %v7146_v22, %v9671_v13  ;;  %v7149_v7 = vadd.f32 %v7148_v50, %v7147_v58  ;;  %v7213_v42 = vadd.f32 %v7212_v5, %v7211_v45  ;;  %v9770_v49 = vadd.f32 %v7210_v1, %v9674_v12 }
 0x32f   : > { %v9773_v62 = vadd.f32 %v7149_v7, %v9677_v51  ;;  %v9776_v52 = vadd.f32 %v7213_v42, %v9680_v4 }
 0x331   : > { %v7150_v2 = vpop.f32.mrb[28].mxu0  ;;  %v7214_v26 = vpop.f32.mrb[28].mxu1 }
 0x332   : > { %v7151_v10 = vpop.f32.mrb[29].mxu0  ;;  %v7215_v21 = vpop.f32.mrb[29].mxu1 }
 0x333   : > { %v7152_v46 = vadd.f32 %v7151_v10, %v7150_v2  ;;  %v7216_v35 = vadd.f32 %v7215_v21, %v7214_v26  ;;  %v7153_v17 = vpop.f32.mrb[30].mxu0  ;;  %v7217_v13 = vpop.f32.mrb[30].mxu1 }
 0x334   : > { %v7154_v61 = vpop.f32.mrb[31].mxu0  ;;  %v7218_v30 = vpop.f32.mrb[31].mxu1 }
 0x335   : > { %v9779_v37 = vadd.f32 %v7152_v46, %v9683_v47  ;;  %v7155_v12 = vadd.f32 %v7154_v61, %v7153_v17  ;;  %v7219_v28 = vadd.f32 %v7218_v30, %v7217_v13  ;;  %v9782_v51 = vadd.f32 %v7216_v35, %v9686_v20 }
 0x337   : > { %v9785_v4 = vadd.f32 %v7155_v12, %v9689_v41  ;;  %v9788_v0 = vadd.f32 %v7219_v28, %v9692_v48 }
 0x339   : > { %v7156_v11 = vpop.f32.mrb[32].mxu0  ;;  %v7220_v56 = vpop.f32.mrb[32].mxu1 }
 0x33a   : > { %v7157_v63 = vpop.f32.mrb[33].mxu0  ;;  %v7221_v59 = vpop.f32.mrb[33].mxu1 }
 0x33b   : > { %v7158_v16 = vadd.f32 %v7157_v63, %v7156_v11  ;;  %v7222_v18 = vadd.f32 %v7221_v59, %v7220_v56  ;;  %v7159_v43 = vpop.f32.mrb[34].mxu0  ;;  %v7223_v47 = vpop.f32.mrb[34].mxu1 }
 0x33c   : > { %v7160_v34 = vpop.f32.mrb[35].mxu0  ;;  %v7224_v22 = vpop.f32.mrb[35].mxu1 }
 0x33d   : > { %v9791_v1 = vadd.f32 %v7158_v16, %v9695_v54  ;;  %v7161_v20 = vadd.f32 %v7160_v34, %v7159_v43  ;;  %v7225_v58 = vadd.f32 %v7224_v22, %v7223_v47  ;;  %v9794_v41 = vadd.f32 %v7222_v18, %v9698_v39 }
 0x33f   : > { %v9797_v48 = vadd.f32 %v7161_v20, %v9701_v23  ;;  %v9800_v45 = vadd.f32 %v7225_v58, %v9704_v3 }
 0x341   : > { %v7162_v50 = vpop.f32.mrb[36].mxu0  ;;  %v7226_v5 = vpop.f32.mrb[36].mxu1 }
 0x342   : > { %v7163_v7 = vpop.f32.mrb[37].mxu0  ;;  %v7227_v42 = vpop.f32.mrb[37].mxu1 }
 0x343   : > { %v7164_v2 = vadd.f32 %v7163_v7, %v7162_v50  ;;  %v7228_v26 = vadd.f32 %v7227_v42, %v7226_v5  ;;  %v7165_v10 = vpop.f32.mrb[38].mxu0  ;;  %v7229_v54 = vpop.f32.mrb[38].mxu1 }
 0x344   : > { %v7166_v21 = vpop.f32.mrb[39].mxu0  ;;  %v7230_v46 = vpop.f32.mrb[39].mxu1 }
 0x345   : > { %v9803_v35 = vadd.f32 %v7164_v2, %v9707_v33  ;;  %v7167_v39 = vadd.f32 %v7166_v21, %v7165_v10  ;;  %v7231_v17 = vadd.f32 %v7230_v46, %v7229_v54  ;;  %v9806_v23 = vadd.f32 %v7228_v26, %v9710_v40 }
 0x347   : > { %v9809_v3 = vadd.f32 %v7167_v39, %v9713_v60  ;;  %v9812_v13 = vadd.f32 %v7231_v17, %v9716_v32 }
 0x349   : > { %v7168_v61 = vpop.f32.mrb[40].mxu0  ;;  %v7232_v30 = vpop.f32.mrb[40].mxu1 }
 0x34a   : > { %v7169_v12 = vpop.f32.mrb[41].mxu0  ;;  %v7233_v28 = vpop.f32.mrb[41].mxu1 }
 0x34b   : > { %v7170_v11 = vadd.f32 %v7169_v12, %v7168_v61  ;;  %v7234_v56 = vadd.f32 %v7233_v28, %v7232_v30  ;;  %v7171_v63 = vpop.f32.mrb[42].mxu0  ;;  %v7235_v33 = vpop.f32.mrb[42].mxu1 }
 0x34c   : > { %v7172_v59 = vpop.f32.mrb[43].mxu0  ;;  %v7236_v16 = vpop.f32.mrb[43].mxu1 }
 0x34d   : > { %v9815_v18 = vadd.f32 %v7170_v11, %v9719_v15  ;;  %v7173_v40 = vadd.f32 %v7172_v59, %v7171_v63  ;;  %v7237_v43 = vadd.f32 %v7236_v16, %v7235_v33  ;;  %v9818_v60 = vadd.f32 %v7234_v56, %v9722_v38 }
 0x34f   : > { %v9821_v32 = vadd.f32 %v7173_v40, %v9725_v29  ;;  %v9824_v47 = vadd.f32 %v7237_v43, %v9728_v31 }
 0x351   : > { %v7174_v34 = vpop.f32.mrb[44].mxu0  ;;  %v7238_v22 = vpop.f32.mrb[44].mxu1 }
 0x352   : > { %v7175_v20 = vpop.f32.mrb[45].mxu0  ;;  %v7239_v58 = vpop.f32.mrb[45].mxu1 }
 0x353   : > { %v7176_v50 = vadd.f32 %v7175_v20, %v7174_v34  ;;  %v7240_v5 = vadd.f32 %v7239_v58, %v7238_v22  ;;  %v7177_v15 = vpop.f32.mrb[46].mxu0  ;;  %v7241_v7 = vpop.f32.mrb[46].mxu1 }
 0x354   : > { %v7178_v42 = vpop.f32.mrb[47].mxu0  ;;  %v7242_v2 = vpop.f32.mrb[47].mxu1 }
 0x355   : > { %v9827_v38 = vadd.f32 %v7176_v50, %v9731_v8  ;;  %v7179_v26 = vadd.f32 %v7178_v42, %v7177_v15  ;;  %v7243_v29 = vadd.f32 %v7242_v2, %v7241_v7  ;;  %v9830_v10 = vadd.f32 %v7240_v5, %v9734_v55 }
 0x357   : > { %v9833_v31 = vadd.f32 %v7179_v26, %v9737_v53  ;;  %v9836_v54 = vadd.f32 %v7243_v29, %v9740_v27 }
 0x359   : > { %v7244_v21 = vpop.f32.mrb[48].mxu1  ;;  %v7316_v46 = vpop.f32.mrb[48].mxu0 }
 0x35a   : > { %v5215_v39 = vadd.f32 %v7316_v46, %v9758_v57  ;;  %v7245_v17 = vpop.f32.mrb[49].mxu1  ;;  %v5206_v61 = vpop.f32.mrb[49].mxu0 }
 0x35b   : > { %v7246_v8 = vadd.f32 %v7245_v17, %v7244_v21  ;;  %v5207_v30 = vadd.f32 %v5206_v61, %v9746_v44  ;;  %v7247_v12 = vpop.f32.mrb[50].mxu1  ;;  %v7317_v28 = vpop.f32.mrb[50].mxu0 }
 0x35c   : > { %v5335_v55 = vmax.f32 %v5215_v39, 0.0  ;;  %v5218_v53 = vadd.f32 %v7317_v28, %v9764_v24  ;;  %v7248_v11 = vpop.f32.mrb[51].mxu1  ;;  %v5209_v56 = vpop.f32.mrb[51].mxu0 }
 0x35d   : > { %v5333_v27 = vmax.f32 %v5207_v30, 0.0  ;;  %v7249_v57 = vadd.f32 %v7248_v11, %v7247_v12  ;;  %v5210_v44 = vadd.f32 %v5209_v56, %v9752_v25  ;;  %v9849_v63 = vadd.f32 %v7246_v8, %v9743_v19 }
 0x35e   : > { %v6142_v33 = vpack.c.bf16 %v5335_v55, %v5335_v55  ;;  %v5336_v24 = vmax.f32 %v5218_v53, 0.0 }
 0x35f   : > { %v6140_v59 = vpack.c.bf16 %v5333_v27, %v5333_v27  ;;  %v5334_v16 = vmax.f32 %v5210_v44, 0.0  ;;  %v9852_v40 = vadd.f32 %v7249_v57, %v9749_v14 }
 0x360   : > { %5496 = vst.msk [vmem:[%s9845_s10 + $0x8] sm:$0xf] %vm5493_vm1, %v6142_v33  ;;  %v6143_v43 = vpack.c.bf16 %v5336_v24, %v5336_v24 }
 0x361   : > { %5494 = vst.msk [vmem:[%s9845_s10] sm:$0xf] %vm5493_vm1, %v6140_v59  ;;  %v6141_v34 = vpack.c.bf16 %v5334_v16, %v5334_v16  ;;  %v7250_v22 = vpop.f32.mrb[52].mxu1  ;;  %v7320_v20 = vpop.f32.mrb[52].mxu0 }
 0x362   : > { %5497 = vst.msk [vmem:[%s9845_s10 + $0xc] sm:$0xf] %vm5493_vm1, %v6143_v43  ;;  %v5231_v19 = vadd.f32 %v7320_v20, %v9782_v51  ;;  %v7251_v25 = vpop.f32.mrb[53].mxu1  ;;  %v5222_v58 = vpop.f32.mrb[53].mxu0 }
 0x363   : > { %5495 = vst.msk [vmem:[%s9845_s10 + $0x4] sm:$0xf] %vm5493_vm1, %v6141_v34  ;;  %v7252_v50 = vadd.f32 %v7251_v25, %v7250_v22  ;;  %v5223_v14 = vadd.f32 %v5222_v58, %v9770_v49  ;;  %v7253_v5 = vpop.f32.mrb[54].mxu1  ;;  %v7321_v15 = vpop.f32.mrb[54].mxu0 }
 0x364   : > { %v5339_v7 = vmax.f32 %v5231_v19, 0.0  ;;  %v5234_v42 = vadd.f32 %v7321_v15, %v9788_v0  ;;  %v7254_v2 = vpop.f32.mrb[55].mxu1  ;;  %v5225_v26 = vpop.f32.mrb[55].mxu0 }
 0x365   : > { %v5337_v29 = vmax.f32 %v5223_v14, 0.0  ;;  %v7255_v21 = vadd.f32 %v7254_v2, %v7253_v5  ;;  %v5226_v51 = vadd.f32 %v5225_v26, %v9776_v52  ;;  %v9867_v46 = vadd.f32 %v7252_v50, %v9755_v6 }
 0x366   : > { %v6146_v39 = vpack.c.bf16 %v5339_v7, %v5339_v7  ;;  %v5340_v49 = vmax.f32 %v5234_v42, 0.0 }
 0x367   : > { %v6144_v17 = vpack.c.bf16 %v5337_v29, %v5337_v29  ;;  %v5338_v61 = vmax.f32 %v5226_v51, 0.0  ;;  %v9870_v8 = vadd.f32 %v7255_v21, %v9761_v36 }
 0x368   : > { %5500 = vst.msk [vmem:[%s9845_s10 + $0x18] sm:$0xf] %vm5493_vm1, %v6146_v39  ;;  %v6147_v0 = vpack.c.bf16 %v5340_v49, %v5340_v49 }
 0x369   : > { %5498 = vst.msk [vmem:[%s9845_s10 + $0x10] sm:$0xf] %vm5493_vm1, %v6144_v17  ;;  %v6145_v30 = vpack.c.bf16 %v5338_v61, %v5338_v61  ;;  %v7256_v12 = vpop.f32.mrb[56].mxu1  ;;  %v7324_v28 = vpop.f32.mrb[56].mxu0 }
 0x36a   : > { %5501 = vst.msk [vmem:[%s9845_s10 + $0x1c] sm:$0xf] %vm5493_vm1, %v6147_v0  ;;  %v5247_v6 = vadd.f32 %v7324_v28, %v9806_v23  ;;  %v7257_v52 = vpop.f32.mrb[57].mxu1  ;;  %v5238_v55 = vpop.f32.mrb[57].mxu0 }
 0x36b   : > { %5499 = vst.msk [vmem:[%s9845_s10 + $0x14] sm:$0xf] %vm5493_vm1, %v6145_v30  ;;  %v7258_v53 = vadd.f32 %v7257_v52, %v7256_v12  ;;  %v5239_v36 = vadd.f32 %v5238_v55, %v9794_v41  ;;  %v7259_v11 = vpop.f32.mrb[58].mxu1  ;;  %v7325_v56 = vpop.f32.mrb[58].mxu0 }
 0x36c   : > { %v5343_v27 = vmax.f32 %v5247_v6, 0.0  ;;  %v5250_v57 = vadd.f32 %v7325_v56, %v9812_v13  ;;  %v7260_v44 = vpop.f32.mrb[59].mxu1  ;;  %v5241_v33 = vpop.f32.mrb[59].mxu0 }
 0x36d   : > { %v5341_v24 = vmax.f32 %v5239_v36, 0.0  ;;  %v7261_v59 = vadd.f32 %v7260_v44, %v7259_v11  ;;  %v5242_v23 = vadd.f32 %v5241_v33, %v9800_v45  ;;  %v9885_v16 = vadd.f32 %v7258_v53, %v9767_v9 }
 0x36e   : > { %v6150_v43 = vpack.c.bf16 %v5343_v27, %v5343_v27  ;;  %v5344_v41 = vmax.f32 %v5250_v57, 0.0 }
 0x36f   : > { %v6148_v34 = vpack.c.bf16 %v5341_v24, %v5341_v24  ;;  %v5342_v22 = vmax.f32 %v5242_v23, 0.0  ;;  %v9888_v20 = vadd.f32 %v7261_v59, %v9773_v62 }
 0x370   : > { %5504 = vst.msk [vmem:[%s9845_s10 + $0x28] sm:$0xf] %vm5493_vm1, %v6150_v43  ;;  %v6151_v13 = vpack.c.bf16 %v5344_v41, %v5344_v41 }
 0x371   : > { %5502 = vst.msk [vmem:[%s9845_s10 + $0x20] sm:$0xf] %vm5493_vm1, %v6148_v34  ;;  %v6149_v19 = vpack.c.bf16 %v5342_v22, %v5342_v22  ;;  %v7262_v25 = vpop.f32.mrb[60].mxu1  ;;  %v7328_v58 = vpop.f32.mrb[60].mxu0 }
 0x372   : > { %5505 = vst.msk [vmem:[%s9845_s10 + $0x2c] sm:$0xf] %vm5493_vm1, %v6151_v13  ;;  %v5263_v9 = vadd.f32 %v7328_v58, %v9830_v10  ;;  %v7263_v45 = vpop.f32.mrb[61].mxu1  ;;  %v5254_v50 = vpop.f32.mrb[61].mxu0 }
 0x373   : > { %5503 = vst.msk [vmem:[%s9845_s10 + $0x24] sm:$0xf] %vm5493_vm1, %v6149_v19  ;;  %v7264_v14 = vadd.f32 %v7263_v45, %v7262_v25  ;;  %v5255_v62 = vadd.f32 %v5254_v50, %v9818_v60  ;;  %v7265_v5 = vpop.f32.mrb[62].mxu1  ;;  %v7329_v15 = vpop.f32.mrb[62].mxu0 }
 0x374   : > { %v5347_v7 = vmax.f32 %v5263_v9, 0.0  ;;  %v5266_v42 = vadd.f32 %v7329_v15, %v9836_v54  ;;  %v7266_v2 = vpop.f32.mrb[63].mxu1  ;;  %v5257_v26 = vpop.f32.mrb[63].mxu0 }
 0x375   : > { %v5345_v29 = vmax.f32 %v5255_v62, 0.0  ;;  %v7267_v21 = vadd.f32 %v7266_v2, %v7265_v5  ;;  %v5258_v10 = vadd.f32 %v5257_v26, %v9824_v47  ;;  %v5134_v51 = vadd.f32 %v7264_v14, %v9779_v37 }
 0x376   : > { %v6154_v39 = vpack.c.bf16 %v5347_v7, %v5347_v7  ;;  %v5348_v49 = vmax.f32 %v5266_v42, 0.0 }
 0x377   : > { %v6152_v60 = vpack.c.bf16 %v5345_v29, %v5345_v29  ;;  %v5346_v17 = vmax.f32 %v5258_v10, 0.0  ;;  %v5137_v61 = vadd.f32 %v7267_v21, %v9785_v4 }
 0x378   : > { %5508 = vst.msk [vmem:[%s9845_s10 + $0x38] sm:$0xf] %vm5493_vm1, %v6154_v39  ;;  %v6155_v0 = vpack.c.bf16 %v5348_v49, %v5348_v49 }
 0x379   : > { %5506 = vst.msk [vmem:[%s9845_s10 + $0x30] sm:$0xf] %vm5493_vm1, %v6152_v60  ;;  %v6153_v54 = vpack.c.bf16 %v5346_v17, %v5346_v17  ;;  %v7268_v30 = vpop.f32.mrb[64].mxu1  ;;  %v7332_v12 = vpop.f32.mrb[64].mxu0 }
 0x37a   : > { %5509 = vst.msk [vmem:[%s9845_s10 + $0x3c] sm:$0xf] %vm5493_vm1, %v6155_v0  ;;  %v5279_v47 = vadd.f32 %v7332_v12, %v9867_v46  ;;  %v7269_v37 = vpop.f32.mrb[65].mxu1  ;;  %v5270_v28 = vpop.f32.mrb[65].mxu0 }
 0x37b   : > { %5507 = vst.msk [vmem:[%s9845_s10 + $0x34] sm:$0xf] %vm5493_vm1, %v6153_v54  ;;  %v7270_v6 = vadd.f32 %v7269_v37, %v7268_v30  ;;  %v5271_v52 = vadd.f32 %v5270_v28, %v9849_v63  ;;  %v7271_v4 = vpop.f32.mrb[66].mxu1  ;;  %v7333_v55 = vpop.f32.mrb[66].mxu0 }
 0x37c   : > { %v5351_v53 = vmax.f32 %v5279_v47, 0.0  ;;  %v5282_v36 = vadd.f32 %v7333_v55, %v9870_v8  ;;  %v7272_v11 = vpop.f32.mrb[67].mxu1  ;;  %v5273_v56 = vpop.f32.mrb[67].mxu0 }
 0x37d   : > { %v5349_v27 = vmax.f32 %v5271_v52, 0.0  ;;  %v7273_v57 = vadd.f32 %v7272_v11, %v7271_v4  ;;  %v5274_v46 = vadd.f32 %v5273_v56, %v9852_v40  ;;  %v5142_v44 = vadd.f32 %v7270_v6, %v9791_v1 }
 0x37e   : > { %v6158_v33 = vpack.c.bf16 %v5351_v53, %v5351_v53  ;;  %v5352_v24 = vmax.f32 %v5282_v36, 0.0 }
 0x37f   : > { %v6156_v63 = vpack.c.bf16 %v5349_v27, %v5349_v27  ;;  %v5350_v59 = vmax.f32 %v5274_v46, 0.0  ;;  %v5145_v23 = vadd.f32 %v7273_v57, %v9797_v48 }
 0x380   : > { %5512 = vst.msk [vmem:[%s9845_s10 + $0x48] sm:$0xf] %vm5493_vm1, %v6158_v33  ;;  %v6159_v43 = vpack.c.bf16 %v5352_v24, %v5352_v24 }
 0x381   : > { %5510 = vst.msk [vmem:[%s9845_s10 + $0x40] sm:$0xf] %vm5493_vm1, %v6156_v63  ;;  %v6157_v8 = vpack.c.bf16 %v5350_v59, %v5350_v59  ;;  %v7274_v41 = vpop.f32.mrb[68].mxu1  ;;  %v7336_v34 = vpop.f32.mrb[68].mxu0 }
 0x382   : > { %5513 = vst.msk [vmem:[%s9845_s10 + $0x4c] sm:$0xf] %vm5493_vm1, %v6159_v43  ;;  %v5295_v40 = vadd.f32 %v7336_v34, %v5134_v51  ;;  %v7275_v22 = vpop.f32.mrb[69].mxu1  ;;  %v5286_v1 = vpop.f32.mrb[69].mxu0 }
 0x383   : > { %5511 = vst.msk [vmem:[%s9845_s10 + $0x44] sm:$0xf] %vm5493_vm1, %v6157_v8  ;;  %v7276_v13 = vadd.f32 %v7275_v22, %v7274_v41  ;;  %v5287_v19 = vadd.f32 %v5286_v1, %v9885_v16  ;;  %v7277_v48 = vpop.f32.mrb[70].mxu1  ;;  %v7337_v25 = vpop.f32.mrb[70].mxu0 }
 0x384   : > { %v5355_v58 = vmax.f32 %v5295_v40, 0.0  ;;  %v5298_v9 = vadd.f32 %v7337_v25, %v5137_v61  ;;  %v7278_v45 = vpop.f32.mrb[71].mxu1  ;;  %v5289_v50 = vpop.f32.mrb[71].mxu0 }
 0x385   : > { %v5353_v14 = vmax.f32 %v5287_v19, 0.0  ;;  %v7279_v62 = vadd.f32 %v7278_v45, %v7277_v48  ;;  %v5290_v5 = vadd.f32 %v5289_v50, %v9888_v20  ;;  %v5150_v15 = vadd.f32 %v7276_v13, %v9803_v35 }
 0x386   : > { %v6162_v7 = vpack.c.bf16 %v5355_v58, %v5355_v58  ;;  %v5356_v42 = vmax.f32 %v5298_v9, 0.0 }
 0x387   : > { %v6160_v2 = vpack.c.bf16 %v5353_v14, %v5353_v14  ;;  %v5354_v16 = vmax.f32 %v5290_v5, 0.0  ;;  %v5153_v26 = vadd.f32 %v7279_v62, %v9809_v3 }
 0x388   : > { %5516 = vst.msk [vmem:[%s9845_s10 + $0x58] sm:$0xf] %vm5493_vm1, %v6162_v7  ;;  %v6163_v29 = vpack.c.bf16 %v5356_v42, %v5356_v42 }
 0x389   : > { %5514 = vst.msk [vmem:[%s9845_s10 + $0x50] sm:$0xf] %vm5493_vm1, %v6160_v2  ;;  %v6161_v21 = vpack.c.bf16 %v5354_v16, %v5354_v16  ;;  %v7280_v10 = vpop.f32.mrb[72].mxu1  ;;  %v7340_v51 = vpop.f32.mrb[72].mxu0 }
 0x38a   : > { %5517 = vst.msk [vmem:[%s9845_s10 + $0x5c] sm:$0xf] %vm5493_vm1, %v6163_v29  ;;  %v5311_v20 = vadd.f32 %v7340_v51, %v5150_v15  ;;  %v7281_v39 = vpop.f32.mrb[73].mxu1  ;;  %v5302_v35 = vpop.f32.mrb[73].mxu0 }
 0x38b   : > { %5515 = vst.msk [vmem:[%s9845_s10 + $0x54] sm:$0xf] %vm5493_vm1, %v6161_v21  ;;  %v7282_v49 = vadd.f32 %v7281_v39, %v7280_v10  ;;  %v5303_v60 = vadd.f32 %v5302_v35, %v5142_v44  ;;  %v7283_v17 = vpop.f32.mrb[74].mxu1  ;;  %v7341_v3 = vpop.f32.mrb[74].mxu0 }
 0x38c   : > { %v5359_v61 = vmax.f32 %v5311_v20, 0.0  ;;  %v5314_v0 = vadd.f32 %v7341_v3, %v5153_v26  ;;  %v7284_v54 = vpop.f32.mrb[75].mxu1  ;;  %v5305_v30 = vpop.f32.mrb[75].mxu0 }
 0x38d   : > { %v5357_v12 = vmax.f32 %v5303_v60, 0.0  ;;  %v7285_v47 = vadd.f32 %v7284_v54, %v7283_v17  ;;  %v5306_v37 = vadd.f32 %v5305_v30, %v5145_v23  ;;  %v5158_v28 = vadd.f32 %v7282_v49, %v9815_v18 }
 0x38e   : > { %v6166_v6 = vpack.c.bf16 %v5359_v61, %v5359_v61  ;;  %v5360_v52 = vmax.f32 %v5314_v0, 0.0 }
 0x38f   : > { %v6164_v4 = vpack.c.bf16 %v5357_v12, %v5357_v12  ;;  %v5358_v55 = vmax.f32 %v5306_v37, 0.0  ;;  %v5161_v53 = vadd.f32 %v7285_v47, %v9821_v32 }
 0x390   : > { %5520 = vst.msk [vmem:[%s9845_s10 + $0x68] sm:$0xf] %vm5493_vm1, %v6166_v6  ;;  %v6167_v36 = vpack.c.bf16 %v5360_v52, %v5360_v52 }
 0x391   : > { %5518 = vst.msk [vmem:[%s9845_s10 + $0x60] sm:$0xf] %vm5493_vm1, %v6164_v4  ;;  %v6165_v11 = vpack.c.bf16 %v5358_v55, %v5358_v55  ;;  %v7286_v56 = vpop.f32.mrb[76].mxu1  ;;  %v7344_v27 = vpop.f32.mrb[76].mxu0 }
 0x392   : > { %5521 = vst.msk [vmem:[%s9845_s10 + $0x6c] sm:$0xf] %vm5493_vm1, %v6167_v36  ;;  %v7287_v57 = vpop.f32.mrb[77].mxu1  ;;  %v5318_v46 = vpop.f32.mrb[77].mxu0 }
 0x393   : > { %5519 = vst.msk [vmem:[%s9845_s10 + $0x64] sm:$0xf] %vm5493_vm1, %v6165_v11  ;;  %v7288_v18 = vadd.f32 %v7287_v57, %v7286_v56  ;;  %v5319_v44 = vadd.f32 %v5318_v46, %v5158_v28  ;;  %v7289_v33 = vpop.f32.mrb[78].mxu1  ;;  %v7345_v24 = vpop.f32.mrb[78].mxu0 }
 0x394   : > { %v7290_v32 = vpop.f32.mrb[79].mxu1  ;;  %v5321_v63 = vpop.f32.mrb[79].mxu0 }
 0x395   : > { %v5166_v59 = vadd.f32 %v7288_v18, %v9827_v38  ;;  %v5361_v23 = vmax.f32 %v5319_v44, 0.0  ;;  %v7291_v43 = vadd.f32 %v7290_v32, %v7289_v33  ;;  %v5322_v8 = vadd.f32 %v5321_v63, %v5161_v53 }
 0x397   : > { %v5327_v41 = vadd.f32 %v7344_v27, %v5166_v59  ;;  %v6168_v34 = vpack.c.bf16 %v5361_v23, %v5361_v23  ;;  %v5169_v40 = vadd.f32 %v7291_v43, %v9833_v31  ;;  %v5362_v22 = vmax.f32 %v5322_v8, 0.0 }
 0x399   : > { %v5363_v1 = vmax.f32 %v5327_v41, 0.0  ;;  %5522 = vst.msk [vmem:[%s9845_s10 + $0x70] sm:$0xf] %vm5493_vm1, %v6168_v34  ;;  %v5330_v13 = vadd.f32 %v7345_v24, %v5169_v40  ;;  %v6169_v19 = vpack.c.bf16 %v5362_v22, %v5362_v22 }
 0x39b   : > { %v6170_v48 = vpack.c.bf16 %v5363_v1, %v5363_v1  ;;  %v5364_v25 = vmax.f32 %v5330_v13, 0.0  ;;  %5523 = vst.msk [vmem:[%s9845_s10 + $0x74] sm:$0xf] %vm5493_vm1, %v6169_v19 }
 0x39d   : > { %5524 = vst.msk [vmem:[%s9845_s10 + $0x78] sm:$0xf] %vm5493_vm1, %v6170_v48  ;;  %v6171_v38 = vpack.c.bf16 %v5364_v25, %v5364_v25 }
 0x39f   : > { %5525 = vst.msk [vmem:[%s9845_s10 + $0x7c] sm:$0xf] %vm5493_vm1, %v6171_v38 }
 0x3a0 PF: > { %s13_s12 = sadd.s32 1, %s8036_s12  }
 0x3a1   : > { %p10_p4 = scmp.ge.s32.totalorder %s13_s12, 4  }
 0x3a3   :  { %12 = sbr.rel (!%p10_p4) target bundleno = 1 (0x1), region = 62 }

// kernel: gobang_forward.5
= control target key start
LH: loop header
LB: loop body
LE: loop exit
PB: predicated region body
PF: predicated region fallthrough
CT: control target
= control target key end

     0   :  { %s6707_s20 = smov 0   ;;  %s7456_s0 = inlined_call_operand.vmem [shape: bf16[2,14592], index: 0, kind: input, shape index: {}]   ;;  %s7457_s1 = inlined_call_operand.vmem [shape: bf16[14592,512], index: 1, kind: input, shape index: {}]   ;;  %s7458_s2 = inlined_call_operand.vmem [shape: f32[1,512], index: 2, kind: input, shape index: {}]   ;;  %s7459_s3 = inlined_call_operand.vmem [shape: f32[1,512], index: 3, kind: input, shape index: {}]   ;;  %s7460_s4 = inlined_call_operand.<no memory space> [shape: f32[1,1], index: 4, kind: input, shape index: {}]   ;;  %s7461_s5 = inlined_call_operand.vmem [shape: f32[2,1], index: 5, kind: output, shape index: {}]  }
   0x1   :  { %v10_v0 = vstv %s7460_s4 }
   0x2   :  { %11 = vst [vmem:[#allocation3] sm:$0x1] %v10_v0 }
   0x3 LB: > { %s6713_s21 = sadd.s32 4294967295, %s6668_s20   ;;  %p5044_p0 = scmp.ge.s32.totalorder %s6668_s20, 1  ;;  %s6668_s20 = sphi %s6707_s20, %s17_s20  }
   0x4   : > { %p196_p1 = scmp.lt.s32.totalorder %s6668_s20, 7 }
   0x6   : > { %p197_p2 = pnand %p5044_p0, %p196_p1 }
   0x7   : > { %s224_s4 = smul.u32 (!%p197_p2), 19, %s6713_s21  ;;  %p5047_p5 = scmp.ne.s32.totalorder (!%p197_p2), %s6713_s21, 0 }
   0x8   : > { %200 = sbr.rel (%p197_p2) target bundleno = 1035 (0x40b), region = 40 }
   0x9   : > { %s229_s22 = smul.u32 (!%p197_p2), 304, %s6713_s21  ;;  %p225_p3 = scmp.lt.s32.totalorder (!%p197_p2), %s224_s4, 113 }
   0xb   : > { %p230_p4 = scmp.lt.s32.totalorder (!%p197_p2), %s229_s22, 1823 }
   0xf   : > { %s7463_s4 = smov (!%p225_p3, %s224_s4), 113  ;;  %s7465_s22 = smov (!%p230_p4, %s229_s22), 1823 }
  0x10   : > { %s6722_s25 = scalar_lea.vmem %s7456_s0, %s7463_s4  ;;  %s5661_s26 = sshll.u32 %s7465_s22, 4  ;;  %v6670_v1 = vmov (!%p5047_p5), 0.0  }
  0x11   : > { %s6727_s29 = scalar_lea.vmem %s7457_s1, %s5661_s26  ;;  %240 = sbr.rel (%p5047_p5) target bundleno = 24 (0x18), region = 44  ;;  %241 = vst [vmem:[#allocation2] sm:$0xff] (!%p5047_p5), %v6670_v1 }
  0x18 PF: > { %v5746_v2 = vld [vmem:[%s6727_s29 + $0x4] ss:$16 sps:$4 sm:$0xff]   ;;  %v5748_v3 = vld [vmem:[%s6727_s29 + $0xc] ss:$16 sps:$4 sm:$0xff]   ;;  %v5750_v4 = vld [vmem:[%s6727_s29] ss:$16 sps:$4 sm:$0xff]   ;;  %v861_v40 = vlaneseq }
  0x19   : > { %4037 = vmatprep.subr.bf16.mxu0 %v5746_v2  ;;  %v5751_v5 = vld [vmem:[%s6727_s29 + $0x8] ss:$16 sps:$4 sm:$0xff]   ;;  %4447 = vmatprep.subr.bf16.mxu1 %v5748_v3  ;;  %v5752_v6 = vld [vmem:[%s6727_s29 + $0x24] ss:$16 sps:$4 sm:$0xff]   ;;  %v5754_v7 = vld [vmem:[%s6727_s29 + $0x2c] ss:$16 sps:$4 sm:$0xff]  }
  0x1a   : > { %4038 = vmatpush1.bf16.msra.mxu0 %v5750_v4  ;;  %4448 = vmatpush1.bf16.msra.mxu1 %v5751_v5  ;;  %v5756_v8 = vld [vmem:[%s6727_s29 + $0x20] ss:$16 sps:$4 sm:$0xff]   ;;  %v5757_v9 = vld [vmem:[%s6727_s29 + $0x28] ss:$16 sps:$4 sm:$0xff]   ;;  %v5758_v10 = vld [vmem:[%s6727_s29 + $0x44] ss:$16 sps:$4 sm:$0xff]  }
  0x1b   : > { %4039 = vmatprep.subr.bf16.mxu0 %v5752_v6  ;;  %4449 = vmatprep.subr.bf16.mxu1 %v5754_v7  ;;  %v5760_v11 = vld [vmem:[%s6727_s29 + $0x4c] ss:$16 sps:$4 sm:$0xff]   ;;  %v5762_v12 = vld [vmem:[%s6727_s29 + $0x40] ss:$16 sps:$4 sm:$0xff]   ;;  %v5763_v13 = vld [vmem:[%s6727_s29 + $0x48] ss:$16 sps:$4 sm:$0xff]  }
  0x1c   : > { %v5764_v14 = vld [vmem:[%s6727_s29 + $0x64] ss:$16 sps:$4 sm:$0xff]   ;;  %v5766_v15 = vld [vmem:[%s6727_s29 + $0x6c] ss:$16 sps:$4 sm:$0xff]   ;;  %v5768_v16 = vld [vmem:[%s6727_s29 + $0x60] ss:$16 sps:$4 sm:$0xff]  }
  0x1d   : > { %v5769_v17 = vld [vmem:[%s6727_s29 + $0x68] ss:$16 sps:$4 sm:$0xff]   ;;  %v5770_v18 = vld [vmem:[%s6727_s29 + $0x84] ss:$16 sps:$4 sm:$0xff]   ;;  %v5772_v19 = vld [vmem:[%s6727_s29 + $0x8c] ss:$16 sps:$4 sm:$0xff]  }
  0x1e   : > { %4040 = vmatpush1.bf16.msra.mxu0 %v5756_v8  ;;  %4450 = vmatpush1.bf16.msra.mxu1 %v5757_v9  ;;  %v5774_v20 = vld [vmem:[%s6727_s29 + $0x80] ss:$16 sps:$4 sm:$0xff]   ;;  %v5775_v21 = vld [vmem:[%s6727_s29 + $0x88] ss:$16 sps:$4 sm:$0xff]   ;;  %v5776_v22 = vld [vmem:[%s6727_s29 + $0xa4] ss:$16 sps:$4 sm:$0xff]  }
  0x1f   : > { %4041 = vmatprep.subr.bf16.mxu0 %v5758_v10  ;;  %4451 = vmatprep.subr.bf16.mxu1 %v5760_v11  ;;  %v5778_v23 = vld [vmem:[%s6727_s29 + $0xac] ss:$16 sps:$4 sm:$0xff]   ;;  %v5780_v24 = vld [vmem:[%s6727_s29 + $0xa0] ss:$16 sps:$4 sm:$0xff]   ;;  %v5781_v25 = vld [vmem:[%s6727_s29 + $0xa8] ss:$16 sps:$4 sm:$0xff]  }
  0x20   : > { %v5782_v26 = vld [vmem:[%s6727_s29 + $0xc4] ss:$16 sps:$4 sm:$0xff]   ;;  %v5784_v27 = vld [vmem:[%s6727_s29 + $0xcc] ss:$16 sps:$4 sm:$0xff]   ;;  %v5786_v28 = vld [vmem:[%s6727_s29 + $0xc0] ss:$16 sps:$4 sm:$0xff]  }
  0x21   : > { %v5787_v29 = vld [vmem:[%s6727_s29 + $0xc8] ss:$16 sps:$4 sm:$0xff]   ;;  %v5788_v30 = vld [vmem:[%s6727_s29 + $0xe4] ss:$16 sps:$4 sm:$0xff]   ;;  %v5790_v31 = vld [vmem:[%s6727_s29 + $0xec] ss:$16 sps:$4 sm:$0xff]  }
  0x22   : > { %4042 = vmatpush1.bf16.msra.mxu0 %v5762_v12  ;;  %4452 = vmatpush1.bf16.msra.mxu1 %v5763_v13  ;;  %v5792_v32 = vld [vmem:[%s6727_s29 + $0xe0] ss:$16 sps:$4 sm:$0xff]   ;;  %v5793_v33 = vld [vmem:[%s6727_s29 + $0xe8] ss:$16 sps:$4 sm:$0xff]   ;;  %v5794_v34 = vld [vmem:[%s6727_s29 + $0x104] ss:$16 sps:$4 sm:$0xff]  }
  0x23   : > { %4043 = vmatprep.subr.bf16.mxu0 %v5764_v14  ;;  %4453 = vmatprep.subr.bf16.mxu1 %v5766_v15  ;;  %v5796_v35 = vld [vmem:[%s6727_s29 + $0x10c] ss:$16 sps:$4 sm:$0xff]   ;;  %v5798_v36 = vld [vmem:[%s6727_s29 + $0x100] ss:$16 sps:$4 sm:$0xff]   ;;  %v5799_v37 = vld [vmem:[%s6727_s29 + $0x108] ss:$16 sps:$4 sm:$0xff]  }
  0x24   : > { %v6671_v38 = vmov 1966171168   ;;  %v5800_v41 = vld [vmem:[%s6727_s29 + $0x124] ss:$16 sps:$4 sm:$0xff]   ;;  %v5802_v42 = vld [vmem:[%s6727_s29 + $0x12c] ss:$16 sps:$4 sm:$0xff]  }
  0x25   : > { %v859_v39 = vunpack.c.l.s4 %v6671_v38  ;;  %v5804_v43 = vld [vmem:[%s6727_s29 + $0x120] ss:$16 sps:$4 sm:$0xff]   ;;  %v6769_v45 = vshrl.u32 %v861_v40, 7  ;;  %v5805_v46 = vld [vmem:[%s6727_s29 + $0x128] ss:$16 sps:$4 sm:$0xff]   ;;  %p5657_p6 = scmp.ne.s32.totalorder %s6713_s21, 5 }
  0x26   : > { %4044 = vmatpush1.bf16.msra.mxu0 %v5768_v16  ;;  %4454 = vmatpush1.bf16.msra.mxu1 %v5769_v17  ;;  %v5806_v47 = vld [vmem:[%s6727_s29 + $0x144] ss:$16 sps:$4 sm:$0xff]   ;;  %v5808_v48 = vld [vmem:[%s6727_s29 + $0x14c] ss:$16 sps:$4 sm:$0xff]   ;;  %v5810_v49 = vld [vmem:[%s6727_s29 + $0x140] ss:$16 sps:$4 sm:$0xff]  }
  0x27   : > { %4045 = vmatprep.subr.bf16.mxu0 %v5770_v18  ;;  %4455 = vmatprep.subr.bf16.mxu1 %v5772_v19  ;;  %v860_v44 = vunpack.c.0.s8 %v859_v39  ;;  %v5811_v50 = vld [vmem:[%s6727_s29 + $0x148] ss:$16 sps:$4 sm:$0xff]   ;;  %v5812_v52 = vld [vmem:[%s6727_s29 + $0x164] ss:$16 sps:$4 sm:$0xff]   ;;  %v5814_v53 = vld [vmem:[%s6727_s29 + $0x16c] ss:$16 sps:$4 sm:$0xff]  }
  0x28   : > { %v6782_v54 = vld [vmem:[%s6722_s25] sm:$0xff]  ;;  %v5817_v57 = vld [vmem:[%s6727_s29 + $0x168] ss:$16 sps:$4 sm:$0xff]   ;;  %v5820_v59 = vld [vmem:[%s6727_s29 + $0x18c] ss:$16 sps:$4 sm:$0xff]   ;;  %vm4983_vm0 = vcmask (!%p5657_p6), 1041408  }
  0x29   : > { %v6777_v51 = vsub.s32 %v860_v44, %v6769_v45  ;;  %v5816_v55 = vld [vmem:[%s6727_s29 + $0x160] ss:$16 sps:$4 sm:$0xff]   ;;  %v5818_v58 = vld [vmem:[%s6727_s29 + $0x184] ss:$16 sps:$4 sm:$0xff]   ;;  %v5823_v63 = vld [vmem:[%s6727_s29 + $0x188] ss:$16 sps:$4 sm:$0xff]  }
  0x2a   : > { %4046 = vmatpush1.bf16.msra.mxu0 %v5774_v20  ;;  %4456 = vmatpush1.bf16.msra.mxu1 %v5775_v21  ;;  %v5822_v61 = vld [vmem:[%s6727_s29 + $0x180] ss:$16 sps:$4 sm:$0xff]   ;;  %v5824_v0 = vld [vmem:[%s6727_s29 + $0x1a4] ss:$16 sps:$4 sm:$0xff]   ;;  %v5826_v1 = vld [vmem:[%s6727_s29 + $0x1ac] ss:$16 sps:$4 sm:$0xff]  }
  0x2b   : > { %4047 = vmatprep.subr.bf16.mxu0 %v5776_v22  ;;  %4457 = vmatprep.subr.bf16.mxu1 %v5778_v23  ;;  %v864_v56 = vrot.slane %v6782_v54, %v6777_v51  ;;  %v5828_v2 = vld [vmem:[%s6727_s29 + $0x1a0] ss:$16 sps:$4 sm:$0xff]   ;;  %v5829_v3 = vld [vmem:[%s6727_s29 + $0x1a8] ss:$16 sps:$4 sm:$0xff]   ;;  %v5830_v4 = vld [vmem:[%s6727_s29 + $0x1c4] ss:$16 sps:$4 sm:$0xff]  }
  0x2c   : > { %v5832_v5 = vld [vmem:[%s6727_s29 + $0x1cc] ss:$16 sps:$4 sm:$0xff]   ;;  %v5834_v6 = vld [vmem:[%s6727_s29 + $0x1c0] ss:$16 sps:$4 sm:$0xff]   ;;  %v5835_v7 = vld [vmem:[%s6727_s29 + $0x1c8] ss:$16 sps:$4 sm:$0xff]  }
  0x2d   : > { %v872_v60 = vcombine.high %v864_v56, %v864_v56  ;;  %v5836_v8 = vld [vmem:[%s6727_s29 + $0x1e4] ss:$16 sps:$4 sm:$0xff]   ;;  %v5838_v9 = vld [vmem:[%s6727_s29 + $0x1ec] ss:$16 sps:$4 sm:$0xff]   ;;  %v5840_v10 = vld [vmem:[%s6727_s29 + $0x1e0] ss:$16 sps:$4 sm:$0xff]   ;;  %v6809_v15 = vrot.slane %v864_v56, %v6777_v51 }
  0x2e   : > { %4048 = vmatpush1.bf16.msra.mxu0 %v5780_v24  ;;  %4458 = vmatpush1.bf16.msra.mxu1 %v5781_v25  ;;  %v5841_v11 = vld [vmem:[%s6727_s29 + $0x1e8] ss:$16 sps:$4 sm:$0xff]   ;;  %v5844_v12 = vld [vmem:[%s6727_s29 + $0x204] ss:$16 sps:$4 sm:$0xff]   ;;  %v5847_v13 = vld [vmem:[%s6727_s29 + $0x20c] ss:$16 sps:$4 sm:$0xff]  }
  0x2f   : > { %4049 = vmatprep.subr.bf16.mxu0 %v5782_v26  ;;  %4459 = vmatprep.subr.bf16.mxu1 %v5784_v27  ;;  %v894_v62 = vrot.slane %v872_v60, %v6777_v51  ;;  %v5842_v14 = vld [vmem:[%s6727_s29 + $0x200] ss:$16 sps:$4 sm:$0xff]   ;;  %v5845_v16 = vld [vmem:[%s6727_s29 + $0x208] ss:$16 sps:$4 sm:$0xff]   ;;  %v5850_v17 = vld [vmem:[%s6727_s29 + $0x224] ss:$16 sps:$4 sm:$0xff]  }
  0x30   : > { %v5853_v18 = vld [vmem:[%s6727_s29 + $0x22c] ss:$16 sps:$4 sm:$0xff]   ;;  %v5848_v20 = vld [vmem:[%s6727_s29 + $0x220] ss:$16 sps:$4 sm:$0xff]   ;;  %v5851_v21 = vld [vmem:[%s6727_s29 + $0x228] ss:$16 sps:$4 sm:$0xff]  }
  0x31   : > { %4069 = vmatprep.mubr.bf16.mxu0 %v894_v62  ;;  %4479 = vmatprep.mubr.bf16.mxu1 %v894_v62  ;;  %v904_v19 = vcombine.high %v894_v62, %v894_v62  ;;  %v5856_v22 = vld [vmem:[%s6727_s29 + $0x244] ss:$16 sps:$4 sm:$0xff]   ;;  %v5859_v23 = vld [vmem:[%s6727_s29 + $0x24c] ss:$16 sps:$4 sm:$0xff]   ;;  %v5854_v24 = vld [vmem:[%s6727_s29 + $0x240] ss:$16 sps:$4 sm:$0xff]  }
  0x32   : > { %4050 = vmatpush1.bf16.msra.mxu0 %v5786_v28  ;;  %4460 = vmatpush1.bf16.msra.mxu1 %v5787_v29  ;;  %v5857_v25 = vld [vmem:[%s6727_s29 + $0x248] ss:$16 sps:$4 sm:$0xff]   ;;  %v5862_v26 = vld [vmem:[%s6727_s29 + $0x264] ss:$16 sps:$4 sm:$0xff]   ;;  %v5865_v27 = vld [vmem:[%s6727_s29 + $0x26c] ss:$16 sps:$4 sm:$0xff]  }
  0x33   : > { %4051 = vmatprep.subr.bf16.mxu0 %v5788_v30  ;;  %4461 = vmatprep.subr.bf16.mxu1 %v5790_v31  ;;  %v5860_v28 = vld [vmem:[%s6727_s29 + $0x260] ss:$16 sps:$4 sm:$0xff]   ;;  %v5863_v29 = vld [vmem:[%s6727_s29 + $0x268] ss:$16 sps:$4 sm:$0xff]   ;;  %v5868_v30 = vld [vmem:[%s6727_s29 + $0x284] ss:$16 sps:$4 sm:$0xff]  }
  0x34   : > { %v5871_v31 = vld [vmem:[%s6727_s29 + $0x28c] ss:$16 sps:$4 sm:$0xff]   ;;  %v5880_v38 = vld [vmem:[%s6727_s29 + $0x2c4] ss:$16 sps:$4 sm:$0xff]   ;;  %v5878_v40 = vld [vmem:[%s6727_s29 + $0x2c0] ss:$16 sps:$4 sm:$0xff]  }
  0x35   : > { %v5883_v39 = vld [vmem:[%s6727_s29 + $0x2cc] ss:$16 sps:$4 sm:$0xff]   ;;  %v5884_v44 = vld [vmem:[%s6727_s29 + $0x2e0] ss:$16 sps:$4 sm:$0xff]   ;;  %v5899_v56 = vld [vmem:[%s6727_s29 + $0x328] ss:$16 sps:$4 sm:$0xff]  }
  0x36   : > { %4052 = vmatpush1.bf16.msra.mxu0 %v5792_v32  ;;  %4462 = vmatpush1.bf16.msra.mxu1 %v5793_v33  ;;  %v5866_v32 = vld [vmem:[%s6727_s29 + $0x280] ss:$16 sps:$4 sm:$0xff]   ;;  %v5869_v33 = vld [vmem:[%s6727_s29 + $0x288] ss:$16 sps:$4 sm:$0xff]   ;;  %v5913_v62 = vld [vmem:[%s6727_s29 + $0x36c] ss:$16 sps:$4 sm:$0xff]  }
  0x37   : > { %4053 = vmatprep.subr.bf16.mxu0 %v5794_v34  ;;  %4463 = vmatprep.subr.bf16.mxu1 %v5796_v35  ;;  %v5874_v34 = vld [vmem:[%s6727_s29 + $0x2a4] ss:$16 sps:$4 sm:$0xff]   ;;  %v5877_v35 = vld [vmem:[%s6727_s29 + $0x2ac] ss:$16 sps:$4 sm:$0xff]   ;;  %v5905_v60 = vld [vmem:[%s6727_s29 + $0x348] ss:$16 sps:$4 sm:$0xff]  }
  0x38   : > { %vm5002_vm1 = vcmask (!%p5657_p6), 1024  }
  0x3a   : > { %4054 = vmatpush1.bf16.msra.mxu0 %v5798_v36  ;;  %4464 = vmatpush1.bf16.msra.mxu1 %v5799_v37  ;;  %v5872_v36 = vld [vmem:[%s6727_s29 + $0x2a0] ss:$16 sps:$4 sm:$0xff]   ;;  %v5875_v37 = vld [vmem:[%s6727_s29 + $0x2a8] ss:$16 sps:$4 sm:$0xff]  }
  0x3b   : > { %4055 = vmatprep.subr.bf16.mxu0 %v5800_v41  ;;  %4465 = vmatprep.subr.bf16.mxu1 %v5802_v42  ;;  %v5881_v41 = vld [vmem:[%s6727_s29 + $0x2c8] ss:$16 sps:$4 sm:$0xff]   ;;  %v5886_v42 = vld [vmem:[%s6727_s29 + $0x2e4] ss:$16 sps:$4 sm:$0xff]  }
  0x3e   : > { %4056 = vmatpush1.bf16.msra.mxu0 %v5804_v43  ;;  %4466 = vmatpush1.bf16.msra.mxu1 %v5805_v46  ;;  %v5889_v43 = vld [vmem:[%s6727_s29 + $0x2ec] ss:$16 sps:$4 sm:$0xff]   ;;  %v5887_v46 = vld [vmem:[%s6727_s29 + $0x2e8] ss:$16 sps:$4 sm:$0xff]  }
  0x3f   : > { %4057 = vmatprep.subr.bf16.mxu0 %v5806_v47  ;;  %4467 = vmatprep.subr.bf16.mxu1 %v5808_v48  ;;  %v5892_v47 = vld [vmem:[%s6727_s29 + $0x304] ss:$16 sps:$4 sm:$0xff]   ;;  %v5895_v48 = vld [vmem:[%s6727_s29 + $0x30c] ss:$16 sps:$4 sm:$0xff]  }
  0x42   : > { %4058 = vmatpush1.bf16.msra.mxu0 %v5810_v49  ;;  %4468 = vmatpush1.bf16.msra.mxu1 %v5811_v50  ;;  %v5890_v49 = vld [vmem:[%s6727_s29 + $0x300] ss:$16 sps:$4 sm:$0xff]   ;;  %v5893_v50 = vld [vmem:[%s6727_s29 + $0x308] ss:$16 sps:$4 sm:$0xff]  }
  0x43   : > { %4059 = vmatprep.subr.bf16.mxu0 %v5812_v52  ;;  %4469 = vmatprep.subr.bf16.mxu1 %v5814_v53  ;;  %v5898_v52 = vld [vmem:[%s6727_s29 + $0x324] ss:$16 sps:$4 sm:$0xff]   ;;  %v5901_v53 = vld [vmem:[%s6727_s29 + $0x32c] ss:$16 sps:$4 sm:$0xff]  }
  0x46   : > { %4060 = vmatpush1.bf16.msra.mxu0 %v5816_v55  ;;  %4470 = vmatpush1.bf16.msra.mxu1 %v5817_v57  ;;  %v5896_v55 = vld [vmem:[%s6727_s29 + $0x320] ss:$16 sps:$4 sm:$0xff]   ;;  %v5904_v57 = vld [vmem:[%s6727_s29 + $0x344] ss:$16 sps:$4 sm:$0xff]  }
  0x47   : > { %4061 = vmatprep.subr.bf16.mxu0 %v5818_v58  ;;  %4471 = vmatprep.subr.bf16.mxu1 %v5820_v59  ;;  %v5907_v58 = vld [vmem:[%s6727_s29 + $0x34c] ss:$16 sps:$4 sm:$0xff]   ;;  %v5902_v59 = vld [vmem:[%s6727_s29 + $0x340] ss:$16 sps:$4 sm:$0xff]  }
  0x4a   : > { %4062 = vmatpush1.bf16.msra.mxu0 %v5822_v61  ;;  %4472 = vmatpush1.bf16.msra.mxu1 %v5823_v63  ;;  %v5910_v61 = vld [vmem:[%s6727_s29 + $0x364] ss:$16 sps:$4 sm:$0xff]   ;;  %v5908_v63 = vld [vmem:[%s6727_s29 + $0x360] ss:$16 sps:$4 sm:$0xff]  }
  0x4b   : > { %4063 = vmatprep.subr.bf16.mxu0 %v5824_v0  ;;  %4473 = vmatprep.subr.bf16.mxu1 %v5826_v1  ;;  %v5911_v0 = vld [vmem:[%s6727_s29 + $0x368] ss:$16 sps:$4 sm:$0xff]   ;;  %v5916_v1 = vld [vmem:[%s6727_s29 + $0x384] ss:$16 sps:$4 sm:$0xff]  }
  0x4e   : > { %4064 = vmatpush1.bf16.msra.mxu0 %v5828_v2  ;;  %4474 = vmatpush1.bf16.msra.mxu1 %v5829_v3  ;;  %v5919_v2 = vld [vmem:[%s6727_s29 + $0x38c] ss:$16 sps:$4 sm:$0xff]   ;;  %v5914_v3 = vld [vmem:[%s6727_s29 + $0x380] ss:$16 sps:$4 sm:$0xff]  }
  0x4f   : > { %4065 = vmatprep.subr.bf16.mxu0 %v5830_v4  ;;  %4475 = vmatprep.subr.bf16.mxu1 %v5832_v5  ;;  %v5917_v4 = vld [vmem:[%s6727_s29 + $0x388] ss:$16 sps:$4 sm:$0xff]   ;;  %v5922_v5 = vld [vmem:[%s6727_s29 + $0x3a4] ss:$16 sps:$4 sm:$0xff]  }
  0x52   : > { %4066 = vmatpush1.bf16.msra.mxu0 %v5834_v6  ;;  %4476 = vmatpush1.bf16.msra.mxu1 %v5835_v7  ;;  %v5925_v6 = vld [vmem:[%s6727_s29 + $0x3ac] ss:$16 sps:$4 sm:$0xff]   ;;  %v5920_v7 = vld [vmem:[%s6727_s29 + $0x3a0] ss:$16 sps:$4 sm:$0xff]  }
  0x53   : > { %4067 = vmatprep.subr.bf16.mxu0 %v5836_v8  ;;  %4477 = vmatprep.subr.bf16.mxu1 %v5838_v9  ;;  %v5923_v8 = vld [vmem:[%s6727_s29 + $0x3a8] ss:$16 sps:$4 sm:$0xff]   ;;  %v5928_v9 = vld [vmem:[%s6727_s29 + $0x3c4] ss:$16 sps:$4 sm:$0xff]  }
  0x56   : > { %4068 = vmatpush1.bf16.msra.mxu0 %v5840_v10  ;;  %4478 = vmatpush1.bf16.msra.mxu1 %v5841_v11  ;;  %v5931_v10 = vld [vmem:[%s6727_s29 + $0x3cc] ss:$16 sps:$4 sm:$0xff]   ;;  %v857_v11 = vcombine.high %v6782_v54, %v6782_v54  ;;  %v5935_v54 = vld [vmem:[%s6727_s29 + $0x3e8] ss:$16 sps:$4 sm:$0xff]  }
  0x57   : > { %4078 = vmatprep.subr.bf16.mxu0 %v5844_v12  ;;  %4488 = vmatprep.subr.bf16.mxu1 %v5847_v13  ;;  %v5926_v12 = vld [vmem:[%s6727_s29 + $0x3c0] ss:$16 sps:$4 sm:$0xff]   ;;  %v5929_v13 = vld [vmem:[%s6727_s29 + $0x3c8] ss:$16 sps:$4 sm:$0xff]  }
  0x59   : > { %4070 = vmatmul.mubr.bf16.vlgmr.msra.gmra.mrb[0].mxu0 %v6809_v15  ;;  %4480 = vmatmul.mubr.bf16.vlgmr.msra.gmra.mrb[0].mxu1 %v6809_v15 }
  0x5a   : > { %4079 = vmatpush1.bf16.msra.mxu0 %v5842_v14  ;;  %4489 = vmatpush1.bf16.msra.mxu1 %v5845_v16  ;;  %v5934_v14 = vld [vmem:[%s6727_s29 + $0x3e4] ss:$16 sps:$4 sm:$0xff]   ;;  %v5937_v16 = vld [vmem:[%s6727_s29 + $0x3ec] ss:$16 sps:$4 sm:$0xff]  }
  0x5b   : > { %4080 = vmatprep.subr.bf16.mxu0 %v5850_v17  ;;  %4490 = vmatprep.subr.bf16.mxu1 %v5853_v18  ;;  %v6875_v17 = vrot.slane %v857_v11, %v6777_v51  ;;  %v5932_v18 = vld [vmem:[%s6727_s29 + $0x3e0] ss:$16 sps:$4 sm:$0xff]   ;;  %v6013_v11 = vld [vmem:[%s6727_s29 + $0x588] ss:$16 sps:$4 sm:$0xff]  }
  0x5c   : > { %4110 = vmatprep.mubr.bf16.mxu0 %v904_v19  ;;  %4520 = vmatprep.mubr.bf16.mxu1 %v904_v19  ;;  %v5940_v19 = vld [vmem:[%s6727_s29 + $0x404] ss:$16 sps:$4 sm:$0xff]  }
  0x5e   : > { %4081 = vmatpush1.bf16.msra.mxu0 %v5848_v20  ;;  %4491 = vmatpush1.bf16.msra.mxu1 %v5851_v21  ;;  %v5943_v20 = vld [vmem:[%s6727_s29 + $0x40c] ss:$16 sps:$4 sm:$0xff]   ;;  %v873_v21 = vcombine.high %v6875_v17, %v6875_v17 }
  0x5f   : > { %4082 = vmatprep.subr.bf16.mxu0 %v5856_v22  ;;  %4492 = vmatprep.subr.bf16.mxu1 %v5859_v23  ;;  %v5938_v22 = vld [vmem:[%s6727_s29 + $0x400] ss:$16 sps:$4 sm:$0xff]   ;;  %v902_v23 = vcombine.high %v6809_v15, %v6809_v15  ;;  %v5947_v15 = vld [vmem:[%s6727_s29 + $0x428] ss:$16 sps:$4 sm:$0xff]  }
  0x62   : > { %4083 = vmatpush1.bf16.msra.mxu0 %v5854_v24  ;;  %4493 = vmatpush1.bf16.msra.mxu1 %v5857_v25  ;;  %v5941_v24 = vld [vmem:[%s6727_s29 + $0x408] ss:$16 sps:$4 sm:$0xff]   ;;  %v5946_v25 = vld [vmem:[%s6727_s29 + $0x424] ss:$16 sps:$4 sm:$0xff]  }
  0x63   : > { %4084 = vmatprep.subr.bf16.mxu0 %v5862_v26  ;;  %4494 = vmatprep.subr.bf16.mxu1 %v5865_v27  ;;  %v5949_v26 = vld [vmem:[%s6727_s29 + $0x42c] ss:$16 sps:$4 sm:$0xff]   ;;  %v6890_v27 = vrot.slane %v873_v21, %v6777_v51  ;;  %v6030_v21 = vld [vmem:[%s6727_s29 + $0x5e4] ss:$16 sps:$4 sm:$0xff]  }
  0x66   : > { %4085 = vmatpush1.bf16.msra.mxu0 %v5860_v28  ;;  %4495 = vmatpush1.bf16.msra.mxu1 %v5863_v29  ;;  %v5944_v28 = vld [vmem:[%s6727_s29 + $0x420] ss:$16 sps:$4 sm:$0xff]   ;;  %v5952_v29 = vld [vmem:[%s6727_s29 + $0x444] ss:$16 sps:$4 sm:$0xff]  }
  0x67   : > { %4086 = vmatprep.subr.bf16.mxu0 %v5868_v30  ;;  %4496 = vmatprep.subr.bf16.mxu1 %v5871_v31  ;;  %v5955_v30 = vld [vmem:[%s6727_s29 + $0x44c] ss:$16 sps:$4 sm:$0xff]   ;;  %v5950_v31 = vld [vmem:[%s6727_s29 + $0x440] ss:$16 sps:$4 sm:$0xff]  }
  0x6a   : > { %4087 = vmatpush1.bf16.msra.mxu0 %v5866_v32  ;;  %4497 = vmatpush1.bf16.msra.mxu1 %v5869_v33  ;;  %v5953_v32 = vld [vmem:[%s6727_s29 + $0x448] ss:$16 sps:$4 sm:$0xff]   ;;  %v5958_v33 = vld [vmem:[%s6727_s29 + $0x464] ss:$16 sps:$4 sm:$0xff]  }
  0x6b   : > { %4088 = vmatprep.subr.bf16.mxu0 %v5874_v34  ;;  %4498 = vmatprep.subr.bf16.mxu1 %v5877_v35  ;;  %v5961_v34 = vld [vmem:[%s6727_s29 + $0x46c] ss:$16 sps:$4 sm:$0xff]   ;;  %v5956_v35 = vld [vmem:[%s6727_s29 + $0x460] ss:$16 sps:$4 sm:$0xff]  }
  0x6e   : > { %4089 = vmatpush1.bf16.msra.mxu0 %v5872_v36  ;;  %4499 = vmatpush1.bf16.msra.mxu1 %v5875_v37  ;;  %v5959_v36 = vld [vmem:[%s6727_s29 + $0x468] ss:$16 sps:$4 sm:$0xff]   ;;  %v5964_v37 = vld [vmem:[%s6727_s29 + $0x484] ss:$16 sps:$4 sm:$0xff]  }
  0x6f   : > { %4090 = vmatprep.subr.bf16.mxu0 %v5880_v38  ;;  %4500 = vmatprep.subr.bf16.mxu1 %v5883_v39  ;;  %v5967_v38 = vld [vmem:[%s6727_s29 + $0x48c] ss:$16 sps:$4 sm:$0xff]   ;;  %v5962_v39 = vld [vmem:[%s6727_s29 + $0x480] ss:$16 sps:$4 sm:$0xff]  }
  0x72   : > { %4091 = vmatpush1.bf16.msra.mxu0 %v5878_v40  ;;  %4501 = vmatpush1.bf16.msra.mxu1 %v5881_v41  ;;  %v5965_v40 = vld [vmem:[%s6727_s29 + $0x488] ss:$16 sps:$4 sm:$0xff]   ;;  %v5970_v41 = vld [vmem:[%s6727_s29 + $0x4a4] ss:$16 sps:$4 sm:$0xff]  }
  0x73   : > { %4092 = vmatprep.subr.bf16.mxu0 %v5886_v42  ;;  %4502 = vmatprep.subr.bf16.mxu1 %v5889_v43  ;;  %v5973_v42 = vld [vmem:[%s6727_s29 + $0x4ac] ss:$16 sps:$4 sm:$0xff]   ;;  %v5968_v43 = vld [vmem:[%s6727_s29 + $0x4a0] ss:$16 sps:$4 sm:$0xff]  }
  0x76   : > { %4093 = vmatpush1.bf16.msra.mxu0 %v5884_v44  ;;  %4503 = vmatpush1.bf16.msra.mxu1 %v5887_v46  ;;  %v5971_v44 = vld [vmem:[%s6727_s29 + $0x4a8] ss:$16 sps:$4 sm:$0xff]   ;;  %v5976_v46 = vld [vmem:[%s6727_s29 + $0x4c4] ss:$16 sps:$4 sm:$0xff]  }
  0x77   : > { %4094 = vmatprep.subr.bf16.mxu0 %v5892_v47  ;;  %4504 = vmatprep.subr.bf16.mxu1 %v5895_v48  ;;  %v5979_v47 = vld [vmem:[%s6727_s29 + $0x4cc] ss:$16 sps:$4 sm:$0xff]   ;;  %v5974_v48 = vld [vmem:[%s6727_s29 + $0x4c0] ss:$16 sps:$4 sm:$0xff]  }
  0x7a   : > { %4095 = vmatpush1.bf16.msra.mxu0 %v5890_v49  ;;  %4505 = vmatpush1.bf16.msra.mxu1 %v5893_v50  ;;  %v5977_v49 = vld [vmem:[%s6727_s29 + $0x4c8] ss:$16 sps:$4 sm:$0xff]   ;;  %v5982_v50 = vld [vmem:[%s6727_s29 + $0x4e4] ss:$16 sps:$4 sm:$0xff]  }
  0x7b   : > { %4096 = vmatprep.subr.bf16.mxu0 %v5898_v52  ;;  %4506 = vmatprep.subr.bf16.mxu1 %v5901_v53  ;;  %v5985_v52 = vld [vmem:[%s6727_s29 + $0x4ec] ss:$16 sps:$4 sm:$0xff]   ;;  %v5980_v53 = vld [vmem:[%s6727_s29 + $0x4e0] ss:$16 sps:$4 sm:$0xff]  }
  0x7e   : > { %4097 = vmatpush1.bf16.msra.mxu0 %v5896_v55  ;;  %4507 = vmatpush1.bf16.msra.mxu1 %v5899_v56  ;;  %v5983_v55 = vld [vmem:[%s6727_s29 + $0x4e8] ss:$16 sps:$4 sm:$0xff]   ;;  %v5988_v56 = vld [vmem:[%s6727_s29 + $0x504] ss:$16 sps:$4 sm:$0xff]  }
  0x7f   : > { %4098 = vmatprep.subr.bf16.mxu0 %v5904_v57  ;;  %4508 = vmatprep.subr.bf16.mxu1 %v5907_v58  ;;  %v5991_v57 = vld [vmem:[%s6727_s29 + $0x50c] ss:$16 sps:$4 sm:$0xff]   ;;  %v5986_v58 = vld [vmem:[%s6727_s29 + $0x500] ss:$16 sps:$4 sm:$0xff]  }
  0x82   : > { %4099 = vmatpush1.bf16.msra.mxu0 %v5902_v59  ;;  %4509 = vmatpush1.bf16.msra.mxu1 %v5905_v60  ;;  %v5989_v59 = vld [vmem:[%s6727_s29 + $0x508] ss:$16 sps:$4 sm:$0xff]   ;;  %v5994_v60 = vld [vmem:[%s6727_s29 + $0x524] ss:$16 sps:$4 sm:$0xff]  }
  0x83   : > { %4100 = vmatprep.subr.bf16.mxu0 %v5910_v61  ;;  %4510 = vmatprep.subr.bf16.mxu1 %v5913_v62  ;;  %v5997_v61 = vld [vmem:[%s6727_s29 + $0x52c] ss:$16 sps:$4 sm:$0xff]   ;;  %v5992_v62 = vld [vmem:[%s6727_s29 + $0x520] ss:$16 sps:$4 sm:$0xff]  }
  0x86   : > { %4101 = vmatpush1.bf16.msra.mxu0 %v5908_v63  ;;  %4511 = vmatpush1.bf16.msra.mxu1 %v5911_v0  ;;  %v5995_v63 = vld [vmem:[%s6727_s29 + $0x528] ss:$16 sps:$4 sm:$0xff]   ;;  %v6000_v0 = vld [vmem:[%s6727_s29 + $0x544] ss:$16 sps:$4 sm:$0xff]  }
  0x87   : > { %4102 = vmatprep.subr.bf16.mxu0 %v5916_v1  ;;  %4512 = vmatprep.subr.bf16.mxu1 %v5919_v2  ;;  %v6003_v1 = vld [vmem:[%s6727_s29 + $0x54c] ss:$16 sps:$4 sm:$0xff]   ;;  %v5998_v2 = vld [vmem:[%s6727_s29 + $0x540] ss:$16 sps:$4 sm:$0xff]  }
  0x8a   : > { %4103 = vmatpush1.bf16.msra.mxu0 %v5914_v3  ;;  %4513 = vmatpush1.bf16.msra.mxu1 %v5917_v4  ;;  %v6001_v3 = vld [vmem:[%s6727_s29 + $0x548] ss:$16 sps:$4 sm:$0xff]   ;;  %v6006_v4 = vld [vmem:[%s6727_s29 + $0x564] ss:$16 sps:$4 sm:$0xff]  }
  0x8b   : > { %4104 = vmatprep.subr.bf16.mxu0 %v5922_v5  ;;  %4514 = vmatprep.subr.bf16.mxu1 %v5925_v6  ;;  %v6009_v5 = vld [vmem:[%s6727_s29 + $0x56c] ss:$16 sps:$4 sm:$0xff]   ;;  %v6004_v6 = vld [vmem:[%s6727_s29 + $0x560] ss:$16 sps:$4 sm:$0xff]  }
  0x8e   : > { %4105 = vmatpush1.bf16.msra.mxu0 %v5920_v7  ;;  %4515 = vmatpush1.bf16.msra.mxu1 %v5923_v8  ;;  %v6007_v7 = vld [vmem:[%s6727_s29 + $0x568] ss:$16 sps:$4 sm:$0xff]   ;;  %v6012_v8 = vld [vmem:[%s6727_s29 + $0x584] ss:$16 sps:$4 sm:$0xff]  }
  0x8f   : > { %4106 = vmatprep.subr.bf16.mxu0 %v5928_v9  ;;  %4516 = vmatprep.subr.bf16.mxu1 %v5931_v10  ;;  %v6015_v9 = vld [vmem:[%s6727_s29 + $0x58c] ss:$16 sps:$4 sm:$0xff]   ;;  %v6010_v10 = vld [vmem:[%s6727_s29 + $0x580] ss:$16 sps:$4 sm:$0xff]  }
  0x92   : > { %4107 = vmatpush1.bf16.msra.mxu0 %v5926_v12  ;;  %4517 = vmatpush1.bf16.msra.mxu1 %v5929_v13  ;;  %v6018_v12 = vld [vmem:[%s6727_s29 + $0x5a4] ss:$16 sps:$4 sm:$0xff]   ;;  %v6021_v13 = vld [vmem:[%s6727_s29 + $0x5ac] ss:$16 sps:$4 sm:$0xff]  }
  0x93   : > { %4108 = vmatprep.subr.bf16.mxu0 %v5934_v14  ;;  %4518 = vmatprep.subr.bf16.mxu1 %v5937_v16  ;;  %v6016_v14 = vld [vmem:[%s6727_s29 + $0x5a0] ss:$16 sps:$4 sm:$0xff]   ;;  %v6019_v16 = vld [vmem:[%s6727_s29 + $0x5a8] ss:$16 sps:$4 sm:$0xff]  }
  0x96   : > { %4109 = vmatpush1.bf16.msra.mxu0 %v5932_v18  ;;  %4519 = vmatpush1.bf16.msra.mxu1 %v5935_v54  ;;  %v6024_v18 = vld [vmem:[%s6727_s29 + $0x5c4] ss:$16 sps:$4 sm:$0xff]   ;;  %v6027_v54 = vld [vmem:[%s6727_s29 + $0x5cc] ss:$16 sps:$4 sm:$0xff]  }
  0x97   : > { %4119 = vmatprep.subr.bf16.mxu0 %v5940_v19  ;;  %4529 = vmatprep.subr.bf16.mxu1 %v5943_v20  ;;  %v6022_v19 = vld [vmem:[%s6727_s29 + $0x5c0] ss:$16 sps:$4 sm:$0xff]   ;;  %v6025_v20 = vld [vmem:[%s6727_s29 + $0x5c8] ss:$16 sps:$4 sm:$0xff]  }
  0x99   : > { %4111 = vmatmul.mubr.bf16.vlgmr.msra.gmra.mrb[0].mxu0 %v902_v23  ;;  %4521 = vmatmul.mubr.bf16.vlgmr.msra.gmra.mrb[0].mxu1 %v902_v23  ;;  %v6028_v23 = vld [vmem:[%s6727_s29 + $0x5e0] ss:$16 sps:$4 sm:$0xff]  }
  0x9a   : > { %4120 = vmatpush1.bf16.msra.mxu0 %v5938_v22  ;;  %4530 = vmatpush1.bf16.msra.mxu1 %v5941_v24  ;;  %v6033_v22 = vld [vmem:[%s6727_s29 + $0x5ec] ss:$16 sps:$4 sm:$0xff]   ;;  %v6031_v24 = vld [vmem:[%s6727_s29 + $0x5e8] ss:$16 sps:$4 sm:$0xff]  }
  0x9b   : > { %4121 = vmatprep.subr.bf16.mxu0 %v5946_v25  ;;  %4531 = vmatprep.subr.bf16.mxu1 %v5949_v26  ;;  %v6037_v25 = vld [vmem:[%s6727_s29 + $0x604] ss:$16 sps:$4 sm:$0xff]   ;;  %v6040_v26 = vld [vmem:[%s6727_s29 + $0x60c] ss:$16 sps:$4 sm:$0xff]  }
  0x9c   : > { %4151 = vmatprep.mubr.bf16.mxu0 %v6890_v27  ;;  %4561 = vmatprep.mubr.bf16.mxu1 %v6890_v27 }
  0x9e   : > { %4122 = vmatpush1.bf16.msra.mxu0 %v5944_v28  ;;  %4532 = vmatpush1.bf16.msra.mxu1 %v5947_v15  ;;  %v6035_v28 = vld [vmem:[%s6727_s29 + $0x600] ss:$16 sps:$4 sm:$0xff]   ;;  %v6957_v15 = vrot.slane %v6875_v17, %v6777_v51 }
  0x9f   : > { %4123 = vmatprep.subr.bf16.mxu0 %v5952_v29  ;;  %4533 = vmatprep.subr.bf16.mxu1 %v5955_v30  ;;  %v6038_v29 = vld [vmem:[%s6727_s29 + $0x608] ss:$16 sps:$4 sm:$0xff]   ;;  %v6043_v30 = vld [vmem:[%s6727_s29 + $0x624] ss:$16 sps:$4 sm:$0xff]   ;;  %v6041_v17 = vld [vmem:[%s6727_s29 + $0x620] ss:$16 sps:$4 sm:$0xff]  }
  0xa2   : > { %4124 = vmatpush1.bf16.msra.mxu0 %v5950_v31  ;;  %4534 = vmatpush1.bf16.msra.mxu1 %v5953_v32  ;;  %v6046_v31 = vld [vmem:[%s6727_s29 + $0x62c] ss:$16 sps:$4 sm:$0xff]   ;;  %v905_v32 = vcombine.high %v6890_v27, %v6890_v27  ;;  %v6047_v27 = vld [vmem:[%s6727_s29 + $0x640] ss:$16 sps:$4 sm:$0xff]  }
  0xa3   : > { %4125 = vmatprep.subr.bf16.mxu0 %v5958_v33  ;;  %4535 = vmatprep.subr.bf16.mxu1 %v5961_v34  ;;  %v6044_v33 = vld [vmem:[%s6727_s29 + $0x628] ss:$16 sps:$4 sm:$0xff]   ;;  %v6049_v34 = vld [vmem:[%s6727_s29 + $0x644] ss:$16 sps:$4 sm:$0xff]  }
  0xa6   : > { %4126 = vmatpush1.bf16.msra.mxu0 %v5956_v35  ;;  %4536 = vmatpush1.bf16.msra.mxu1 %v5959_v36  ;;  %v6052_v35 = vld [vmem:[%s6727_s29 + $0x64c] ss:$16 sps:$4 sm:$0xff]   ;;  %v6050_v36 = vld [vmem:[%s6727_s29 + $0x648] ss:$16 sps:$4 sm:$0xff]  }
  0xa7   : > { %4127 = vmatprep.subr.bf16.mxu0 %v5964_v37  ;;  %4537 = vmatprep.subr.bf16.mxu1 %v5967_v38  ;;  %v6055_v37 = vld [vmem:[%s6727_s29 + $0x664] ss:$16 sps:$4 sm:$0xff]   ;;  %v6058_v38 = vld [vmem:[%s6727_s29 + $0x66c] ss:$16 sps:$4 sm:$0xff]  }
  0xaa   : > { %4128 = vmatpush1.bf16.msra.mxu0 %v5962_v39  ;;  %4538 = vmatpush1.bf16.msra.mxu1 %v5965_v40  ;;  %v6053_v39 = vld [vmem:[%s6727_s29 + $0x660] ss:$16 sps:$4 sm:$0xff]   ;;  %v6056_v40 = vld [vmem:[%s6727_s29 + $0x668] ss:$16 sps:$4 sm:$0xff]  }
  0xab   : > { %4129 = vmatprep.subr.bf16.mxu0 %v5970_v41  ;;  %4539 = vmatprep.subr.bf16.mxu1 %v5973_v42  ;;  %v6061_v41 = vld [vmem:[%s6727_s29 + $0x684] ss:$16 sps:$4 sm:$0xff]   ;;  %v6064_v42 = vld [vmem:[%s6727_s29 + $0x68c] ss:$16 sps:$4 sm:$0xff]  }
  0xae   : > { %4130 = vmatpush1.bf16.msra.mxu0 %v5968_v43  ;;  %4540 = vmatpush1.bf16.msra.mxu1 %v5971_v44  ;;  %v6059_v43 = vld [vmem:[%s6727_s29 + $0x680] ss:$16 sps:$4 sm:$0xff]   ;;  %v6062_v44 = vld [vmem:[%s6727_s29 + $0x688] ss:$16 sps:$4 sm:$0xff]  }
  0xaf   : > { %4131 = vmatprep.subr.bf16.mxu0 %v5976_v46  ;;  %4541 = vmatprep.subr.bf16.mxu1 %v5979_v47  ;;  %v6067_v46 = vld [vmem:[%s6727_s29 + $0x6a4] ss:$16 sps:$4 sm:$0xff]   ;;  %v6070_v47 = vld [vmem:[%s6727_s29 + $0x6ac] ss:$16 sps:$4 sm:$0xff]  }
  0xb2   : > { %4132 = vmatpush1.bf16.msra.mxu0 %v5974_v48  ;;  %4542 = vmatpush1.bf16.msra.mxu1 %v5977_v49  ;;  %v6065_v48 = vld [vmem:[%s6727_s29 + $0x6a0] ss:$16 sps:$4 sm:$0xff]   ;;  %v6068_v49 = vld [vmem:[%s6727_s29 + $0x6a8] ss:$16 sps:$4 sm:$0xff]  }
  0xb3   : > { %4133 = vmatprep.subr.bf16.mxu0 %v5982_v50  ;;  %4543 = vmatprep.subr.bf16.mxu1 %v5985_v52  ;;  %v6073_v50 = vld [vmem:[%s6727_s29 + $0x6c4] ss:$16 sps:$4 sm:$0xff]   ;;  %v6076_v52 = vld [vmem:[%s6727_s29 + $0x6cc] ss:$16 sps:$4 sm:$0xff]  }
  0xb6   : > { %4134 = vmatpush1.bf16.msra.mxu0 %v5980_v53  ;;  %4544 = vmatpush1.bf16.msra.mxu1 %v5983_v55  ;;  %v6071_v53 = vld [vmem:[%s6727_s29 + $0x6c0] ss:$16 sps:$4 sm:$0xff]   ;;  %v6074_v55 = vld [vmem:[%s6727_s29 + $0x6c8] ss:$16 sps:$4 sm:$0xff]  }
  0xb7   : > { %4135 = vmatprep.subr.bf16.mxu0 %v5988_v56  ;;  %4545 = vmatprep.subr.bf16.mxu1 %v5991_v57  ;;  %v6079_v56 = vld [vmem:[%s6727_s29 + $0x6e4] ss:$16 sps:$4 sm:$0xff]   ;;  %v6082_v57 = vld [vmem:[%s6727_s29 + $0x6ec] ss:$16 sps:$4 sm:$0xff]  }
  0xba   : > { %4136 = vmatpush1.bf16.msra.mxu0 %v5986_v58  ;;  %4546 = vmatpush1.bf16.msra.mxu1 %v5989_v59  ;;  %v6077_v58 = vld [vmem:[%s6727_s29 + $0x6e0] ss:$16 sps:$4 sm:$0xff]   ;;  %v6080_v59 = vld [vmem:[%s6727_s29 + $0x6e8] ss:$16 sps:$4 sm:$0xff]  }
  0xbb   : > { %4137 = vmatprep.subr.bf16.mxu0 %v5994_v60  ;;  %4547 = vmatprep.subr.bf16.mxu1 %v5997_v61  ;;  %v6085_v60 = vld [vmem:[%s6727_s29 + $0x704] ss:$16 sps:$4 sm:$0xff]   ;;  %v6088_v61 = vld [vmem:[%s6727_s29 + $0x70c] ss:$16 sps:$4 sm:$0xff]  }
  0xbe   : > { %4138 = vmatpush1.bf16.msra.mxu0 %v5992_v62  ;;  %4548 = vmatpush1.bf16.msra.mxu1 %v5995_v63  ;;  %v6083_v62 = vld [vmem:[%s6727_s29 + $0x700] ss:$16 sps:$4 sm:$0xff]   ;;  %v6086_v63 = vld [vmem:[%s6727_s29 + $0x708] ss:$16 sps:$4 sm:$0xff]  }
  0xbf   : > { %4139 = vmatprep.subr.bf16.mxu0 %v6000_v0  ;;  %4549 = vmatprep.subr.bf16.mxu1 %v6003_v1  ;;  %v6091_v0 = vld [vmem:[%s6727_s29 + $0x724] ss:$16 sps:$4 sm:$0xff]   ;;  %v6094_v1 = vld [vmem:[%s6727_s29 + $0x72c] ss:$16 sps:$4 sm:$0xff]  }
  0xc2   : > { %4140 = vmatpush1.bf16.msra.mxu0 %v5998_v2  ;;  %4550 = vmatpush1.bf16.msra.mxu1 %v6001_v3  ;;  %v6089_v2 = vld [vmem:[%s6727_s29 + $0x720] ss:$16 sps:$4 sm:$0xff]   ;;  %v6092_v3 = vld [vmem:[%s6727_s29 + $0x728] ss:$16 sps:$4 sm:$0xff]  }
  0xc3   : > { %4141 = vmatprep.subr.bf16.mxu0 %v6006_v4  ;;  %4551 = vmatprep.subr.bf16.mxu1 %v6009_v5  ;;  %v6097_v4 = vld [vmem:[%s6727_s29 + $0x744] ss:$16 sps:$4 sm:$0xff]   ;;  %v6100_v5 = vld [vmem:[%s6727_s29 + $0x74c] ss:$16 sps:$4 sm:$0xff]  }
  0xc6   : > { %4142 = vmatpush1.bf16.msra.mxu0 %v6004_v6  ;;  %4552 = vmatpush1.bf16.msra.mxu1 %v6007_v7  ;;  %v6095_v6 = vld [vmem:[%s6727_s29 + $0x740] ss:$16 sps:$4 sm:$0xff]   ;;  %v6098_v7 = vld [vmem:[%s6727_s29 + $0x748] ss:$16 sps:$4 sm:$0xff]  }
  0xc7   : > { %4143 = vmatprep.subr.bf16.mxu0 %v6012_v8  ;;  %4553 = vmatprep.subr.bf16.mxu1 %v6015_v9  ;;  %v6103_v8 = vld [vmem:[%s6727_s29 + $0x764] ss:$16 sps:$4 sm:$0xff]   ;;  %v6106_v9 = vld [vmem:[%s6727_s29 + $0x76c] ss:$16 sps:$4 sm:$0xff]  }
  0xca   : > { %4144 = vmatpush1.bf16.msra.mxu0 %v6010_v10  ;;  %4554 = vmatpush1.bf16.msra.mxu1 %v6013_v11  ;;  %v6101_v10 = vld [vmem:[%s6727_s29 + $0x760] ss:$16 sps:$4 sm:$0xff]   ;;  %v6104_v11 = vld [vmem:[%s6727_s29 + $0x768] ss:$16 sps:$4 sm:$0xff]  }
  0xcb   : > { %4145 = vmatprep.subr.bf16.mxu0 %v6018_v12  ;;  %4555 = vmatprep.subr.bf16.mxu1 %v6021_v13  ;;  %v6109_v12 = vld [vmem:[%s6727_s29 + $0x784] ss:$16 sps:$4 sm:$0xff]   ;;  %v6112_v13 = vld [vmem:[%s6727_s29 + $0x78c] ss:$16 sps:$4 sm:$0xff]  }
  0xce   : > { %4146 = vmatpush1.bf16.msra.mxu0 %v6016_v14  ;;  %4556 = vmatpush1.bf16.msra.mxu1 %v6019_v16  ;;  %v6107_v14 = vld [vmem:[%s6727_s29 + $0x780] ss:$16 sps:$4 sm:$0xff]   ;;  %v6110_v16 = vld [vmem:[%s6727_s29 + $0x788] ss:$16 sps:$4 sm:$0xff]  }
  0xcf   : > { %4147 = vmatprep.subr.bf16.mxu0 %v6024_v18  ;;  %4557 = vmatprep.subr.bf16.mxu1 %v6027_v54  ;;  %v6115_v18 = vld [vmem:[%s6727_s29 + $0x7a4] ss:$16 sps:$4 sm:$0xff]   ;;  %v6118_v54 = vld [vmem:[%s6727_s29 + $0x7ac] ss:$16 sps:$4 sm:$0xff]  }
  0xd2   : > { %4148 = vmatpush1.bf16.msra.mxu0 %v6022_v19  ;;  %4558 = vmatpush1.bf16.msra.mxu1 %v6025_v20  ;;  %v6113_v19 = vld [vmem:[%s6727_s29 + $0x7a0] ss:$16 sps:$4 sm:$0xff]   ;;  %v6116_v20 = vld [vmem:[%s6727_s29 + $0x7a8] ss:$16 sps:$4 sm:$0xff]  }
  0xd3   : > { %4149 = vmatprep.subr.bf16.mxu0 %v6030_v21  ;;  %4559 = vmatprep.subr.bf16.mxu1 %v6033_v22  ;;  %v6121_v21 = vld [vmem:[%s6727_s29 + $0x7c4] ss:$16 sps:$4 sm:$0xff]   ;;  %v6124_v22 = vld [vmem:[%s6727_s29 + $0x7cc] ss:$16 sps:$4 sm:$0xff]  }
  0xd6   : > { %4150 = vmatpush1.bf16.msra.mxu0 %v6028_v23  ;;  %4560 = vmatpush1.bf16.msra.mxu1 %v6031_v24  ;;  %v7019_v23 = vld [vmem:[%s6722_s25 + $0x8] sm:$0xff]  ;;  %v6119_v24 = vld [vmem:[%s6727_s29 + $0x7c0] ss:$16 sps:$4 sm:$0xff]  }
  0xd7   : > { %4160 = vmatprep.subr.bf16.mxu0 %v6037_v25  ;;  %4570 = vmatprep.subr.bf16.mxu1 %v6040_v26  ;;  %v6122_v25 = vld [vmem:[%s6727_s29 + $0x7c8] ss:$16 sps:$4 sm:$0xff]   ;;  %v6127_v26 = vld [vmem:[%s6727_s29 + $0x7e4] ss:$16 sps:$4 sm:$0xff]  }
  0xd9   : > { %4152 = vmatmul.mubr.bf16.vlgmr.msra.gmra.mrb[0].mxu0 %v6957_v15  ;;  %4562 = vmatmul.mubr.bf16.vlgmr.msra.gmra.mrb[0].mxu1 %v6957_v15 }
  0xda   : > { %4161 = vmatpush1.bf16.msra.mxu0 %v6035_v28  ;;  %4571 = vmatpush1.bf16.msra.mxu1 %v6038_v29  ;;  %v6130_v28 = vld [vmem:[%s6727_s29 + $0x7ec] ss:$16 sps:$4 sm:$0xff]   ;;  %v7027_v29 = vrot.slane %v7019_v23, %v6777_v51 }
  0xdb   : > { %4162 = vmatprep.subr.bf16.mxu0 %v6043_v30  ;;  %4572 = vmatprep.subr.bf16.mxu1 %v6046_v31  ;;  %v6125_v30 = vld [vmem:[%s6727_s29 + $0x7e0] ss:$16 sps:$4 sm:$0xff]   ;;  %v6128_v31 = vld [vmem:[%s6727_s29 + $0x7e8] ss:$16 sps:$4 sm:$0xff]  }
  0xdc   : > { %4192 = vmatprep.mubr.bf16.mxu0 %v905_v32  ;;  %4602 = vmatprep.mubr.bf16.mxu1 %v905_v32  ;;  %v6133_v32 = vld [vmem:[%s6727_s29 + $0x804] ss:$16 sps:$4 sm:$0xff]  }
  0xde   : > { %4163 = vmatpush1.bf16.msra.mxu0 %v6041_v17  ;;  %4573 = vmatpush1.bf16.msra.mxu1 %v6044_v33  ;;  %v6136_v17 = vld [vmem:[%s6727_s29 + $0x80c] ss:$16 sps:$4 sm:$0xff]   ;;  %v921_v33 = vcombine.high %v7027_v29, %v7027_v29 }
  0xdf   : > { %4164 = vmatprep.subr.bf16.mxu0 %v6049_v34  ;;  %4574 = vmatprep.subr.bf16.mxu1 %v6052_v35  ;;  %v903_v34 = vcombine.high %v6957_v15, %v6957_v15  ;;  %v6131_v35 = vld [vmem:[%s6727_s29 + $0x800] ss:$16 sps:$4 sm:$0xff]  }
  0xe0   : > { %v6137_v15 = vld [vmem:[%s6727_s29 + $0x820] ss:$16 sps:$4 sm:$0xff]  }
  0xe2   : > { %4165 = vmatpush1.bf16.msra.mxu0 %v6047_v27  ;;  %4575 = vmatpush1.bf16.msra.mxu1 %v6050_v36  ;;  %v6134_v27 = vld [vmem:[%s6727_s29 + $0x808] ss:$16 sps:$4 sm:$0xff]   ;;  %v6139_v36 = vld [vmem:[%s6727_s29 + $0x824] ss:$16 sps:$4 sm:$0xff]  }
  0xe3   : > { %4166 = vmatprep.subr.bf16.mxu0 %v6055_v37  ;;  %4576 = vmatprep.subr.bf16.mxu1 %v6058_v38  ;;  %v6142_v37 = vld [vmem:[%s6727_s29 + $0x82c] ss:$16 sps:$4 sm:$0xff]   ;;  %v7042_v38 = vrot.slane %v921_v33, %v6777_v51  ;;  %v6218_v33 = vld [vmem:[%s6727_s29 + $0x9c8] ss:$16 sps:$4 sm:$0xff]  }
  0xe6   : > { %4167 = vmatpush1.bf16.msra.mxu0 %v6053_v39  ;;  %4577 = vmatpush1.bf16.msra.mxu1 %v6056_v40  ;;  %v6140_v39 = vld [vmem:[%s6727_s29 + $0x828] ss:$16 sps:$4 sm:$0xff]   ;;  %v6145_v40 = vld [vmem:[%s6727_s29 + $0x844] ss:$16 sps:$4 sm:$0xff]  }
  0xe7   : > { %4168 = vmatprep.subr.bf16.mxu0 %v6061_v41  ;;  %4578 = vmatprep.subr.bf16.mxu1 %v6064_v42  ;;  %v6148_v41 = vld [vmem:[%s6727_s29 + $0x84c] ss:$16 sps:$4 sm:$0xff]   ;;  %v6143_v42 = vld [vmem:[%s6727_s29 + $0x840] ss:$16 sps:$4 sm:$0xff]  }
  0xea   : > { %4169 = vmatpush1.bf16.msra.mxu0 %v6059_v43  ;;  %4579 = vmatpush1.bf16.msra.mxu1 %v6062_v44  ;;  %v6146_v43 = vld [vmem:[%s6727_s29 + $0x848] ss:$16 sps:$4 sm:$0xff]   ;;  %v6151_v44 = vld [vmem:[%s6727_s29 + $0x864] ss:$16 sps:$4 sm:$0xff]  }
  0xeb   : > { %4170 = vmatprep.subr.bf16.mxu0 %v6067_v46  ;;  %4580 = vmatprep.subr.bf16.mxu1 %v6070_v47  ;;  %v6154_v46 = vld [vmem:[%s6727_s29 + $0x86c] ss:$16 sps:$4 sm:$0xff]   ;;  %v6149_v47 = vld [vmem:[%s6727_s29 + $0x860] ss:$16 sps:$4 sm:$0xff]  }
  0xee   : > { %4171 = vmatpush1.bf16.msra.mxu0 %v6065_v48  ;;  %4581 = vmatpush1.bf16.msra.mxu1 %v6068_v49  ;;  %v6152_v48 = vld [vmem:[%s6727_s29 + $0x868] ss:$16 sps:$4 sm:$0xff]   ;;  %v6157_v49 = vld [vmem:[%s6727_s29 + $0x884] ss:$16 sps:$4 sm:$0xff]  }
  0xef   : > { %4172 = vmatprep.subr.bf16.mxu0 %v6073_v50  ;;  %4582 = vmatprep.subr.bf16.mxu1 %v6076_v52  ;;  %v6160_v50 = vld [vmem:[%s6727_s29 + $0x88c] ss:$16 sps:$4 sm:$0xff]   ;;  %v6155_v52 = vld [vmem:[%s6727_s29 + $0x880] ss:$16 sps:$4 sm:$0xff]  }
  0xf2   : > { %4173 = vmatpush1.bf16.msra.mxu0 %v6071_v53  ;;  %4583 = vmatpush1.bf16.msra.mxu1 %v6074_v55  ;;  %v6158_v53 = vld [vmem:[%s6727_s29 + $0x888] ss:$16 sps:$4 sm:$0xff]   ;;  %v6163_v55 = vld [vmem:[%s6727_s29 + $0x8a4] ss:$16 sps:$4 sm:$0xff]  }
  0xf3   : > { %4174 = vmatprep.subr.bf16.mxu0 %v6079_v56  ;;  %4584 = vmatprep.subr.bf16.mxu1 %v6082_v57  ;;  %v6166_v56 = vld [vmem:[%s6727_s29 + $0x8ac] ss:$16 sps:$4 sm:$0xff]   ;;  %v6161_v57 = vld [vmem:[%s6727_s29 + $0x8a0] ss:$16 sps:$4 sm:$0xff]  }
  0xf6   : > { %4175 = vmatpush1.bf16.msra.mxu0 %v6077_v58  ;;  %4585 = vmatpush1.bf16.msra.mxu1 %v6080_v59  ;;  %v6164_v58 = vld [vmem:[%s6727_s29 + $0x8a8] ss:$16 sps:$4 sm:$0xff]   ;;  %v6169_v59 = vld [vmem:[%s6727_s29 + $0x8c4] ss:$16 sps:$4 sm:$0xff]  }
  0xf7   : > { %4176 = vmatprep.subr.bf16.mxu0 %v6085_v60  ;;  %4586 = vmatprep.subr.bf16.mxu1 %v6088_v61  ;;  %v6172_v60 = vld [vmem:[%s6727_s29 + $0x8cc] ss:$16 sps:$4 sm:$0xff]   ;;  %v6167_v61 = vld [vmem:[%s6727_s29 + $0x8c0] ss:$16 sps:$4 sm:$0xff]  }
  0xfa   : > { %4177 = vmatpush1.bf16.msra.mxu0 %v6083_v62  ;;  %4587 = vmatpush1.bf16.msra.mxu1 %v6086_v63  ;;  %v6170_v62 = vld [vmem:[%s6727_s29 + $0x8c8] ss:$16 sps:$4 sm:$0xff]   ;;  %v6175_v63 = vld [vmem:[%s6727_s29 + $0x8e4] ss:$16 sps:$4 sm:$0xff]  }
  0xfb   : > { %4178 = vmatprep.subr.bf16.mxu0 %v6091_v0  ;;  %4588 = vmatprep.subr.bf16.mxu1 %v6094_v1  ;;  %v6178_v0 = vld [vmem:[%s6727_s29 + $0x8ec] ss:$16 sps:$4 sm:$0xff]   ;;  %v6173_v1 = vld [vmem:[%s6727_s29 + $0x8e0] ss:$16 sps:$4 sm:$0xff]  }
  0xfe   : > { %4179 = vmatpush1.bf16.msra.mxu0 %v6089_v2  ;;  %4589 = vmatpush1.bf16.msra.mxu1 %v6092_v3  ;;  %v6176_v2 = vld [vmem:[%s6727_s29 + $0x8e8] ss:$16 sps:$4 sm:$0xff]   ;;  %v6181_v3 = vld [vmem:[%s6727_s29 + $0x904] ss:$16 sps:$4 sm:$0xff]  }
  0xff   : > { %4180 = vmatprep.subr.bf16.mxu0 %v6097_v4  ;;  %4590 = vmatprep.subr.bf16.mxu1 %v6100_v5  ;;  %v6184_v4 = vld [vmem:[%s6727_s29 + $0x90c] ss:$16 sps:$4 sm:$0xff]   ;;  %v6179_v5 = vld [vmem:[%s6727_s29 + $0x900] ss:$16 sps:$4 sm:$0xff]  }
 0x102   : > { %4181 = vmatpush1.bf16.msra.mxu0 %v6095_v6  ;;  %4591 = vmatpush1.bf16.msra.mxu1 %v6098_v7  ;;  %v6182_v6 = vld [vmem:[%s6727_s29 + $0x908] ss:$16 sps:$4 sm:$0xff]   ;;  %v6187_v7 = vld [vmem:[%s6727_s29 + $0x924] ss:$16 sps:$4 sm:$0xff]  }
 0x103   : > { %4182 = vmatprep.subr.bf16.mxu0 %v6103_v8  ;;  %4592 = vmatprep.subr.bf16.mxu1 %v6106_v9  ;;  %v6190_v8 = vld [vmem:[%s6727_s29 + $0x92c] ss:$16 sps:$4 sm:$0xff]   ;;  %v6185_v9 = vld [vmem:[%s6727_s29 + $0x920] ss:$16 sps:$4 sm:$0xff]  }
 0x106   : > { %4183 = vmatpush1.bf16.msra.mxu0 %v6101_v10  ;;  %4593 = vmatpush1.bf16.msra.mxu1 %v6104_v11  ;;  %v6188_v10 = vld [vmem:[%s6727_s29 + $0x928] ss:$16 sps:$4 sm:$0xff]   ;;  %v6193_v11 = vld [vmem:[%s6727_s29 + $0x944] ss:$16 sps:$4 sm:$0xff]  }
 0x107   : > { %4184 = vmatprep.subr.bf16.mxu0 %v6109_v12  ;;  %4594 = vmatprep.subr.bf16.mxu1 %v6112_v13  ;;  %v6196_v12 = vld [vmem:[%s6727_s29 + $0x94c] ss:$16 sps:$4 sm:$0xff]   ;;  %v6191_v13 = vld [vmem:[%s6727_s29 + $0x940] ss:$16 sps:$4 sm:$0xff]  }
 0x10a   : > { %4185 = vmatpush1.bf16.msra.mxu0 %v6107_v14  ;;  %4595 = vmatpush1.bf16.msra.mxu1 %v6110_v16  ;;  %v6194_v14 = vld [vmem:[%s6727_s29 + $0x948] ss:$16 sps:$4 sm:$0xff]   ;;  %v6199_v16 = vld [vmem:[%s6727_s29 + $0x964] ss:$16 sps:$4 sm:$0xff]  }
 0x10b   : > { %4186 = vmatprep.subr.bf16.mxu0 %v6115_v18  ;;  %4596 = vmatprep.subr.bf16.mxu1 %v6118_v54  ;;  %v6202_v18 = vld [vmem:[%s6727_s29 + $0x96c] ss:$16 sps:$4 sm:$0xff]   ;;  %v6197_v54 = vld [vmem:[%s6727_s29 + $0x960] ss:$16 sps:$4 sm:$0xff]  }
 0x10e   : > { %4187 = vmatpush1.bf16.msra.mxu0 %v6113_v19  ;;  %4597 = vmatpush1.bf16.msra.mxu1 %v6116_v20  ;;  %v6200_v19 = vld [vmem:[%s6727_s29 + $0x968] ss:$16 sps:$4 sm:$0xff]   ;;  %v6205_v20 = vld [vmem:[%s6727_s29 + $0x984] ss:$16 sps:$4 sm:$0xff]  }
 0x10f   : > { %4188 = vmatprep.subr.bf16.mxu0 %v6121_v21  ;;  %4598 = vmatprep.subr.bf16.mxu1 %v6124_v22  ;;  %v6208_v21 = vld [vmem:[%s6727_s29 + $0x98c] ss:$16 sps:$4 sm:$0xff]   ;;  %v6203_v22 = vld [vmem:[%s6727_s29 + $0x980] ss:$16 sps:$4 sm:$0xff]  }
 0x112   : > { %4189 = vmatpush1.bf16.msra.mxu0 %v6119_v24  ;;  %4599 = vmatpush1.bf16.msra.mxu1 %v6122_v25  ;;  %v6206_v24 = vld [vmem:[%s6727_s29 + $0x988] ss:$16 sps:$4 sm:$0xff]   ;;  %v6211_v25 = vld [vmem:[%s6727_s29 + $0x9a4] ss:$16 sps:$4 sm:$0xff]  }
 0x113   : > { %4190 = vmatprep.subr.bf16.mxu0 %v6127_v26  ;;  %4600 = vmatprep.subr.bf16.mxu1 %v6130_v28  ;;  %v6214_v26 = vld [vmem:[%s6727_s29 + $0x9ac] ss:$16 sps:$4 sm:$0xff]   ;;  %v6209_v28 = vld [vmem:[%s6727_s29 + $0x9a0] ss:$16 sps:$4 sm:$0xff]  }
 0x116   : > { %4191 = vmatpush1.bf16.msra.mxu0 %v6125_v30  ;;  %4601 = vmatpush1.bf16.msra.mxu1 %v6128_v31  ;;  %v6212_v30 = vld [vmem:[%s6727_s29 + $0x9a8] ss:$16 sps:$4 sm:$0xff]   ;;  %v6217_v31 = vld [vmem:[%s6727_s29 + $0x9c4] ss:$16 sps:$4 sm:$0xff]  }
 0x117   : > { %4201 = vmatprep.subr.bf16.mxu0 %v6133_v32  ;;  %4611 = vmatprep.subr.bf16.mxu1 %v6136_v17  ;;  %v6220_v32 = vld [vmem:[%s6727_s29 + $0x9cc] ss:$16 sps:$4 sm:$0xff]   ;;  %v6215_v17 = vld [vmem:[%s6727_s29 + $0x9c0] ss:$16 sps:$4 sm:$0xff]  }
 0x119   : > { %4193 = vmatmul.mubr.bf16.vlgmr.msra.gmra.mrb[0].mxu0 %v903_v34  ;;  %4603 = vmatmul.mubr.bf16.vlgmr.msra.gmra.mrb[0].mxu1 %v903_v34  ;;  %v6223_v34 = vld [vmem:[%s6727_s29 + $0x9e4] ss:$16 sps:$4 sm:$0xff]  }
 0x11a   : > { %4202 = vmatpush1.bf16.msra.mxu0 %v6131_v35  ;;  %4612 = vmatpush1.bf16.msra.mxu1 %v6134_v27  ;;  %v6226_v35 = vld [vmem:[%s6727_s29 + $0x9ec] ss:$16 sps:$4 sm:$0xff]   ;;  %v6221_v27 = vld [vmem:[%s6727_s29 + $0x9e0] ss:$16 sps:$4 sm:$0xff]  }
 0x11b   : > { %4203 = vmatprep.subr.bf16.mxu0 %v6139_v36  ;;  %4613 = vmatprep.subr.bf16.mxu1 %v6142_v37  ;;  %v6224_v36 = vld [vmem:[%s6727_s29 + $0x9e8] ss:$16 sps:$4 sm:$0xff]   ;;  %v6229_v37 = vld [vmem:[%s6727_s29 + $0xa04] ss:$16 sps:$4 sm:$0xff]  }
 0x11c   : > { %4233 = vmatprep.mubr.bf16.mxu0 %v7042_v38  ;;  %4643 = vmatprep.mubr.bf16.mxu1 %v7042_v38 }
 0x11e   : > { %4204 = vmatpush1.bf16.msra.mxu0 %v6137_v15  ;;  %4614 = vmatpush1.bf16.msra.mxu1 %v6140_v39  ;;  %v6232_v15 = vld [vmem:[%s6727_s29 + $0xa0c] ss:$16 sps:$4 sm:$0xff]   ;;  %v7108_v39 = vrot.slane %v7027_v29, %v6777_v51  ;;  %v6233_v29 = vld [vmem:[%s6727_s29 + $0xa20] ss:$16 sps:$4 sm:$0xff]  }
 0x11f   : > { %4205 = vmatprep.subr.bf16.mxu0 %v6145_v40  ;;  %4615 = vmatprep.subr.bf16.mxu1 %v6148_v41  ;;  %v6227_v40 = vld [vmem:[%s6727_s29 + $0xa00] ss:$16 sps:$4 sm:$0xff]   ;;  %v6230_v41 = vld [vmem:[%s6727_s29 + $0xa08] ss:$16 sps:$4 sm:$0xff]  }
 0x122   : > { %4206 = vmatpush1.bf16.msra.mxu0 %v6143_v42  ;;  %4616 = vmatpush1.bf16.msra.mxu1 %v6146_v43  ;;  %v6235_v42 = vld [vmem:[%s6727_s29 + $0xa24] ss:$16 sps:$4 sm:$0xff]   ;;  %v6238_v43 = vld [vmem:[%s6727_s29 + $0xa2c] ss:$16 sps:$4 sm:$0xff]  }
 0x123   : > { %4207 = vmatprep.subr.bf16.mxu0 %v6151_v44  ;;  %4617 = vmatprep.subr.bf16.mxu1 %v6154_v46  ;;  %v953_v44 = vcombine.high %v7042_v38, %v7042_v38  ;;  %v6236_v46 = vld [vmem:[%s6727_s29 + $0xa28] ss:$16 sps:$4 sm:$0xff]   ;;  %v6239_v38 = vld [vmem:[%s6727_s29 + $0xa40] ss:$16 sps:$4 sm:$0xff]  }
 0x126   : > { %4208 = vmatpush1.bf16.msra.mxu0 %v6149_v47  ;;  %4618 = vmatpush1.bf16.msra.mxu1 %v6152_v48  ;;  %v6241_v47 = vld [vmem:[%s6727_s29 + $0xa44] ss:$16 sps:$4 sm:$0xff]   ;;  %v6244_v48 = vld [vmem:[%s6727_s29 + $0xa4c] ss:$16 sps:$4 sm:$0xff]  }
 0x127   : > { %4209 = vmatprep.subr.bf16.mxu0 %v6157_v49  ;;  %4619 = vmatprep.subr.bf16.mxu1 %v6160_v50  ;;  %v6242_v49 = vld [vmem:[%s6727_s29 + $0xa48] ss:$16 sps:$4 sm:$0xff]   ;;  %v6247_v50 = vld [vmem:[%s6727_s29 + $0xa64] ss:$16 sps:$4 sm:$0xff]  }
 0x12a   : > { %4210 = vmatpush1.bf16.msra.mxu0 %v6155_v52  ;;  %4620 = vmatpush1.bf16.msra.mxu1 %v6158_v53  ;;  %v6250_v52 = vld [vmem:[%s6727_s29 + $0xa6c] ss:$16 sps:$4 sm:$0xff]   ;;  %v6245_v53 = vld [vmem:[%s6727_s29 + $0xa60] ss:$16 sps:$4 sm:$0xff]  }
 0x12b   : > { %4211 = vmatprep.subr.bf16.mxu0 %v6163_v55  ;;  %4621 = vmatprep.subr.bf16.mxu1 %v6166_v56  ;;  %v6248_v55 = vld [vmem:[%s6727_s29 + $0xa68] ss:$16 sps:$4 sm:$0xff]   ;;  %v6253_v56 = vld [vmem:[%s6727_s29 + $0xa84] ss:$16 sps:$4 sm:$0xff]  }
 0x12e   : > { %4212 = vmatpush1.bf16.msra.mxu0 %v6161_v57  ;;  %4622 = vmatpush1.bf16.msra.mxu1 %v6164_v58  ;;  %v6256_v57 = vld [vmem:[%s6727_s29 + $0xa8c] ss:$16 sps:$4 sm:$0xff]   ;;  %v6251_v58 = vld [vmem:[%s6727_s29 + $0xa80] ss:$16 sps:$4 sm:$0xff]  }
 0x12f   : > { %4213 = vmatprep.subr.bf16.mxu0 %v6169_v59  ;;  %4623 = vmatprep.subr.bf16.mxu1 %v6172_v60  ;;  %v6254_v59 = vld [vmem:[%s6727_s29 + $0xa88] ss:$16 sps:$4 sm:$0xff]   ;;  %v6259_v60 = vld [vmem:[%s6727_s29 + $0xaa4] ss:$16 sps:$4 sm:$0xff]  }
 0x132   : > { %4214 = vmatpush1.bf16.msra.mxu0 %v6167_v61  ;;  %4624 = vmatpush1.bf16.msra.mxu1 %v6170_v62  ;;  %v6262_v61 = vld [vmem:[%s6727_s29 + $0xaac] ss:$16 sps:$4 sm:$0xff]   ;;  %v6257_v62 = vld [vmem:[%s6727_s29 + $0xaa0] ss:$16 sps:$4 sm:$0xff]  }
 0x133   : > { %4215 = vmatprep.subr.bf16.mxu0 %v6175_v63  ;;  %4625 = vmatprep.subr.bf16.mxu1 %v6178_v0  ;;  %v6260_v63 = vld [vmem:[%s6727_s29 + $0xaa8] ss:$16 sps:$4 sm:$0xff]   ;;  %v6265_v0 = vld [vmem:[%s6727_s29 + $0xac4] ss:$16 sps:$4 sm:$0xff]  }
 0x136   : > { %4216 = vmatpush1.bf16.msra.mxu0 %v6173_v1  ;;  %4626 = vmatpush1.bf16.msra.mxu1 %v6176_v2  ;;  %v6268_v1 = vld [vmem:[%s6727_s29 + $0xacc] ss:$16 sps:$4 sm:$0xff]   ;;  %v6263_v2 = vld [vmem:[%s6727_s29 + $0xac0] ss:$16 sps:$4 sm:$0xff]  }
 0x137   : > { %4217 = vmatprep.subr.bf16.mxu0 %v6181_v3  ;;  %4627 = vmatprep.subr.bf16.mxu1 %v6184_v4  ;;  %v6266_v3 = vld [vmem:[%s6727_s29 + $0xac8] ss:$16 sps:$4 sm:$0xff]   ;;  %v6271_v4 = vld [vmem:[%s6727_s29 + $0xae4] ss:$16 sps:$4 sm:$0xff]  }
 0x13a   : > { %4218 = vmatpush1.bf16.msra.mxu0 %v6179_v5  ;;  %4628 = vmatpush1.bf16.msra.mxu1 %v6182_v6  ;;  %v6274_v5 = vld [vmem:[%s6727_s29 + $0xaec] ss:$16 sps:$4 sm:$0xff]   ;;  %v6269_v6 = vld [vmem:[%s6727_s29 + $0xae0] ss:$16 sps:$4 sm:$0xff]  }
 0x13b   : > { %4219 = vmatprep.subr.bf16.mxu0 %v6187_v7  ;;  %4629 = vmatprep.subr.bf16.mxu1 %v6190_v8  ;;  %v6272_v7 = vld [vmem:[%s6727_s29 + $0xae8] ss:$16 sps:$4 sm:$0xff]   ;;  %v6277_v8 = vld [vmem:[%s6727_s29 + $0xb04] ss:$16 sps:$4 sm:$0xff]  }
 0x13e   : > { %4220 = vmatpush1.bf16.msra.mxu0 %v6185_v9  ;;  %4630 = vmatpush1.bf16.msra.mxu1 %v6188_v10  ;;  %v6280_v9 = vld [vmem:[%s6727_s29 + $0xb0c] ss:$16 sps:$4 sm:$0xff]   ;;  %v6275_v10 = vld [vmem:[%s6727_s29 + $0xb00] ss:$16 sps:$4 sm:$0xff]  }
 0x13f   : > { %4221 = vmatprep.subr.bf16.mxu0 %v6193_v11  ;;  %4631 = vmatprep.subr.bf16.mxu1 %v6196_v12  ;;  %v6278_v11 = vld [vmem:[%s6727_s29 + $0xb08] ss:$16 sps:$4 sm:$0xff]   ;;  %v6283_v12 = vld [vmem:[%s6727_s29 + $0xb24] ss:$16 sps:$4 sm:$0xff]  }
 0x142   : > { %4222 = vmatpush1.bf16.msra.mxu0 %v6191_v13  ;;  %4632 = vmatpush1.bf16.msra.mxu1 %v6194_v14  ;;  %v6286_v13 = vld [vmem:[%s6727_s29 + $0xb2c] ss:$16 sps:$4 sm:$0xff]   ;;  %v6281_v14 = vld [vmem:[%s6727_s29 + $0xb20] ss:$16 sps:$4 sm:$0xff]  }
 0x143   : > { %4223 = vmatprep.subr.bf16.mxu0 %v6199_v16  ;;  %4633 = vmatprep.subr.bf16.mxu1 %v6202_v18  ;;  %v6284_v16 = vld [vmem:[%s6727_s29 + $0xb28] ss:$16 sps:$4 sm:$0xff]   ;;  %v6289_v18 = vld [vmem:[%s6727_s29 + $0xb44] ss:$16 sps:$4 sm:$0xff]  }
 0x146   : > { %4224 = vmatpush1.bf16.msra.mxu0 %v6197_v54  ;;  %4634 = vmatpush1.bf16.msra.mxu1 %v6200_v19  ;;  %v6292_v54 = vld [vmem:[%s6727_s29 + $0xb4c] ss:$16 sps:$4 sm:$0xff]   ;;  %v6287_v19 = vld [vmem:[%s6727_s29 + $0xb40] ss:$16 sps:$4 sm:$0xff]  }
 0x147   : > { %4225 = vmatprep.subr.bf16.mxu0 %v6205_v20  ;;  %4635 = vmatprep.subr.bf16.mxu1 %v6208_v21  ;;  %v6290_v20 = vld [vmem:[%s6727_s29 + $0xb48] ss:$16 sps:$4 sm:$0xff]   ;;  %v6295_v21 = vld [vmem:[%s6727_s29 + $0xb64] ss:$16 sps:$4 sm:$0xff]  }
 0x14a   : > { %4226 = vmatpush1.bf16.msra.mxu0 %v6203_v22  ;;  %4636 = vmatpush1.bf16.msra.mxu1 %v6206_v24  ;;  %v6298_v22 = vld [vmem:[%s6727_s29 + $0xb6c] ss:$16 sps:$4 sm:$0xff]   ;;  %v6293_v24 = vld [vmem:[%s6727_s29 + $0xb60] ss:$16 sps:$4 sm:$0xff]  }
 0x14b   : > { %4227 = vmatprep.subr.bf16.mxu0 %v6211_v25  ;;  %4637 = vmatprep.subr.bf16.mxu1 %v6214_v26  ;;  %v6296_v25 = vld [vmem:[%s6727_s29 + $0xb68] ss:$16 sps:$4 sm:$0xff]   ;;  %v6301_v26 = vld [vmem:[%s6727_s29 + $0xb84] ss:$16 sps:$4 sm:$0xff]  }
 0x14e   : > { %4228 = vmatpush1.bf16.msra.mxu0 %v6209_v28  ;;  %4638 = vmatpush1.bf16.msra.mxu1 %v6212_v30  ;;  %v6304_v28 = vld [vmem:[%s6727_s29 + $0xb8c] ss:$16 sps:$4 sm:$0xff]   ;;  %v6299_v30 = vld [vmem:[%s6727_s29 + $0xb80] ss:$16 sps:$4 sm:$0xff]  }
 0x14f   : > { %4229 = vmatprep.subr.bf16.mxu0 %v6217_v31  ;;  %4639 = vmatprep.subr.bf16.mxu1 %v6220_v32  ;;  %v6302_v31 = vld [vmem:[%s6727_s29 + $0xb88] ss:$16 sps:$4 sm:$0xff]   ;;  %v6307_v32 = vld [vmem:[%s6727_s29 + $0xba4] ss:$16 sps:$4 sm:$0xff]  }
 0x152   : > { %4230 = vmatpush1.bf16.msra.mxu0 %v6215_v17  ;;  %4640 = vmatpush1.bf16.msra.mxu1 %v6218_v33  ;;  %v6310_v17 = vld [vmem:[%s6727_s29 + $0xbac] ss:$16 sps:$4 sm:$0xff]   ;;  %v6305_v33 = vld [vmem:[%s6727_s29 + $0xba0] ss:$16 sps:$4 sm:$0xff]  }
 0x153   : > { %4231 = vmatprep.subr.bf16.mxu0 %v6223_v34  ;;  %4641 = vmatprep.subr.bf16.mxu1 %v6226_v35  ;;  %v6308_v34 = vld [vmem:[%s6727_s29 + $0xba8] ss:$16 sps:$4 sm:$0xff]   ;;  %v6313_v35 = vld [vmem:[%s6727_s29 + $0xbc4] ss:$16 sps:$4 sm:$0xff]  }
 0x156   : > { %4232 = vmatpush1.bf16.msra.mxu0 %v6221_v27  ;;  %4642 = vmatpush1.bf16.msra.mxu1 %v6224_v36  ;;  %v6316_v27 = vld [vmem:[%s6727_s29 + $0xbcc] ss:$16 sps:$4 sm:$0xff]   ;;  %v906_v36 = vcombine.high %v7019_v23, %v7019_v23  ;;  %v6317_v23 = vld [vmem:[%s6727_s29 + $0xbe0] ss:$16 sps:$4 sm:$0xff]  }
 0x157   : > { %4242 = vmatprep.subr.bf16.mxu0 %v6229_v37  ;;  %4652 = vmatprep.subr.bf16.mxu1 %v6232_v15  ;;  %v6311_v37 = vld [vmem:[%s6727_s29 + $0xbc0] ss:$16 sps:$4 sm:$0xff]   ;;  %v6314_v15 = vld [vmem:[%s6727_s29 + $0xbc8] ss:$16 sps:$4 sm:$0xff]  }
 0x159   : > { %4234 = vmatmul.mubr.bf16.vlgmr.msra.gmra.mrb[0].mxu0 %v7108_v39  ;;  %4644 = vmatmul.mubr.bf16.vlgmr.msra.gmra.mrb[0].mxu1 %v7108_v39 }
 0x15a   : > { %4243 = vmatpush1.bf16.msra.mxu0 %v6227_v40  ;;  %4653 = vmatpush1.bf16.msra.mxu1 %v6230_v41  ;;  %v6319_v40 = vld [vmem:[%s6727_s29 + $0xbe4] ss:$16 sps:$4 sm:$0xff]   ;;  %v6322_v41 = vld [vmem:[%s6727_s29 + $0xbec] ss:$16 sps:$4 sm:$0xff]  }
 0x15b   : > { %4244 = vmatprep.subr.bf16.mxu0 %v6235_v42  ;;  %4654 = vmatprep.subr.bf16.mxu1 %v6238_v43  ;;  %v7177_v42 = vrot.slane %v906_v36, %v6777_v51  ;;  %v6320_v43 = vld [vmem:[%s6727_s29 + $0xbe8] ss:$16 sps:$4 sm:$0xff]  }
 0x15c   : > { %4274 = vmatprep.mubr.bf16.mxu0 %v953_v44  ;;  %4684 = vmatprep.mubr.bf16.mxu1 %v953_v44  ;;  %v6325_v44 = vld [vmem:[%s6727_s29 + $0xc04] ss:$16 sps:$4 sm:$0xff]   ;;  %v6398_v36 = vld [vmem:[%s6727_s29 + $0xd88] ss:$16 sps:$4 sm:$0xff]  }
 0x15e   : > { %4245 = vmatpush1.bf16.msra.mxu0 %v6233_v29  ;;  %4655 = vmatpush1.bf16.msra.mxu1 %v6236_v46  ;;  %v6328_v29 = vld [vmem:[%s6727_s29 + $0xc0c] ss:$16 sps:$4 sm:$0xff]   ;;  %v922_v46 = vcombine.high %v7177_v42, %v7177_v42 }
 0x15f   : > { %4246 = vmatprep.subr.bf16.mxu0 %v6241_v47  ;;  %4656 = vmatprep.subr.bf16.mxu1 %v6244_v48  ;;  %v951_v47 = vcombine.high %v7108_v39, %v7108_v39  ;;  %v6323_v48 = vld [vmem:[%s6727_s29 + $0xc00] ss:$16 sps:$4 sm:$0xff]  }
 0x160   : > { %v6329_v39 = vld [vmem:[%s6727_s29 + $0xc20] ss:$16 sps:$4 sm:$0xff]  }
 0x162   : > { %4247 = vmatpush1.bf16.msra.mxu0 %v6239_v38  ;;  %4657 = vmatpush1.bf16.msra.mxu1 %v6242_v49  ;;  %v6326_v38 = vld [vmem:[%s6727_s29 + $0xc08] ss:$16 sps:$4 sm:$0xff]   ;;  %v6331_v49 = vld [vmem:[%s6727_s29 + $0xc24] ss:$16 sps:$4 sm:$0xff]  }
 0x163   : > { %4248 = vmatprep.subr.bf16.mxu0 %v6247_v50  ;;  %4658 = vmatprep.subr.bf16.mxu1 %v6250_v52  ;;  %v6334_v50 = vld [vmem:[%s6727_s29 + $0xc2c] ss:$16 sps:$4 sm:$0xff]   ;;  %v7192_v52 = vrot.slane %v922_v46, %v6777_v51  ;;  %v6415_v46 = vld [vmem:[%s6727_s29 + $0xde4] ss:$16 sps:$4 sm:$0xff]  }
 0x166   : > { %4249 = vmatpush1.bf16.msra.mxu0 %v6245_v53  ;;  %4659 = vmatpush1.bf16.msra.mxu1 %v6248_v55  ;;  %v6332_v53 = vld [vmem:[%s6727_s29 + $0xc28] ss:$16 sps:$4 sm:$0xff]   ;;  %v6337_v55 = vld [vmem:[%s6727_s29 + $0xc44] ss:$16 sps:$4 sm:$0xff]  }
 0x167   : > { %4250 = vmatprep.subr.bf16.mxu0 %v6253_v56  ;;  %4660 = vmatprep.subr.bf16.mxu1 %v6256_v57  ;;  %v6340_v56 = vld [vmem:[%s6727_s29 + $0xc4c] ss:$16 sps:$4 sm:$0xff]   ;;  %v6335_v57 = vld [vmem:[%s6727_s29 + $0xc40] ss:$16 sps:$4 sm:$0xff]  }
 0x16a   : > { %4251 = vmatpush1.bf16.msra.mxu0 %v6251_v58  ;;  %4661 = vmatpush1.bf16.msra.mxu1 %v6254_v59  ;;  %v6338_v58 = vld [vmem:[%s6727_s29 + $0xc48] ss:$16 sps:$4 sm:$0xff]   ;;  %v6343_v59 = vld [vmem:[%s6727_s29 + $0xc64] ss:$16 sps:$4 sm:$0xff]  }
 0x16b   : > { %4252 = vmatprep.subr.bf16.mxu0 %v6259_v60  ;;  %4662 = vmatprep.subr.bf16.mxu1 %v6262_v61  ;;  %v6346_v60 = vld [vmem:[%s6727_s29 + $0xc6c] ss:$16 sps:$4 sm:$0xff]   ;;  %v6341_v61 = vld [vmem:[%s6727_s29 + $0xc60] ss:$16 sps:$4 sm:$0xff]  }
 0x16e   : > { %4253 = vmatpush1.bf16.msra.mxu0 %v6257_v62  ;;  %4663 = vmatpush1.bf16.msra.mxu1 %v6260_v63  ;;  %v6344_v62 = vld [vmem:[%s6727_s29 + $0xc68] ss:$16 sps:$4 sm:$0xff]   ;;  %v6349_v63 = vld [vmem:[%s6727_s29 + $0xc84] ss:$16 sps:$4 sm:$0xff]  }
 0x16f   : > { %4254 = vmatprep.subr.bf16.mxu0 %v6265_v0  ;;  %4664 = vmatprep.subr.bf16.mxu1 %v6268_v1  ;;  %v6352_v0 = vld [vmem:[%s6727_s29 + $0xc8c] ss:$16 sps:$4 sm:$0xff]   ;;  %v6347_v1 = vld [vmem:[%s6727_s29 + $0xc80] ss:$16 sps:$4 sm:$0xff]  }
 0x172   : > { %4255 = vmatpush1.bf16.msra.mxu0 %v6263_v2  ;;  %4665 = vmatpush1.bf16.msra.mxu1 %v6266_v3  ;;  %v6350_v2 = vld [vmem:[%s6727_s29 + $0xc88] ss:$16 sps:$4 sm:$0xff]   ;;  %v6355_v3 = vld [vmem:[%s6727_s29 + $0xca4] ss:$16 sps:$4 sm:$0xff]  }
 0x173   : > { %4256 = vmatprep.subr.bf16.mxu0 %v6271_v4  ;;  %4666 = vmatprep.subr.bf16.mxu1 %v6274_v5  ;;  %v6358_v4 = vld [vmem:[%s6727_s29 + $0xcac] ss:$16 sps:$4 sm:$0xff]   ;;  %v6353_v5 = vld [vmem:[%s6727_s29 + $0xca0] ss:$16 sps:$4 sm:$0xff]  }
 0x176   : > { %4257 = vmatpush1.bf16.msra.mxu0 %v6269_v6  ;;  %4667 = vmatpush1.bf16.msra.mxu1 %v6272_v7  ;;  %v6356_v6 = vld [vmem:[%s6727_s29 + $0xca8] ss:$16 sps:$4 sm:$0xff]   ;;  %v6361_v7 = vld [vmem:[%s6727_s29 + $0xcc4] ss:$16 sps:$4 sm:$0xff]  }
 0x177   : > { %4258 = vmatprep.subr.bf16.mxu0 %v6277_v8  ;;  %4668 = vmatprep.subr.bf16.mxu1 %v6280_v9  ;;  %v6364_v8 = vld [vmem:[%s6727_s29 + $0xccc] ss:$16 sps:$4 sm:$0xff]   ;;  %v6359_v9 = vld [vmem:[%s6727_s29 + $0xcc0] ss:$16 sps:$4 sm:$0xff]  }
 0x17a   : > { %4259 = vmatpush1.bf16.msra.mxu0 %v6275_v10  ;;  %4669 = vmatpush1.bf16.msra.mxu1 %v6278_v11  ;;  %v6362_v10 = vld [vmem:[%s6727_s29 + $0xcc8] ss:$16 sps:$4 sm:$0xff]   ;;  %v6367_v11 = vld [vmem:[%s6727_s29 + $0xce4] ss:$16 sps:$4 sm:$0xff]  }
 0x17b   : > { %4260 = vmatprep.subr.bf16.mxu0 %v6283_v12  ;;  %4670 = vmatprep.subr.bf16.mxu1 %v6286_v13  ;;  %v6370_v12 = vld [vmem:[%s6727_s29 + $0xcec] ss:$16 sps:$4 sm:$0xff]   ;;  %v6365_v13 = vld [vmem:[%s6727_s29 + $0xce0] ss:$16 sps:$4 sm:$0xff]  }
 0x17e   : > { %4261 = vmatpush1.bf16.msra.mxu0 %v6281_v14  ;;  %4671 = vmatpush1.bf16.msra.mxu1 %v6284_v16  ;;  %v6368_v14 = vld [vmem:[%s6727_s29 + $0xce8] ss:$16 sps:$4 sm:$0xff]   ;;  %v6373_v16 = vld [vmem:[%s6727_s29 + $0xd04] ss:$16 sps:$4 sm:$0xff]  }
 0x17f   : > { %4262 = vmatprep.subr.bf16.mxu0 %v6289_v18  ;;  %4672 = vmatprep.subr.bf16.mxu1 %v6292_v54  ;;  %v6376_v18 = vld [vmem:[%s6727_s29 + $0xd0c] ss:$16 sps:$4 sm:$0xff]   ;;  %v6371_v54 = vld [vmem:[%s6727_s29 + $0xd00] ss:$16 sps:$4 sm:$0xff]  }
 0x182   : > { %4263 = vmatpush1.bf16.msra.mxu0 %v6287_v19  ;;  %4673 = vmatpush1.bf16.msra.mxu1 %v6290_v20  ;;  %v6374_v19 = vld [vmem:[%s6727_s29 + $0xd08] ss:$16 sps:$4 sm:$0xff]   ;;  %v6379_v20 = vld [vmem:[%s6727_s29 + $0xd24] ss:$16 sps:$4 sm:$0xff]  }
 0x183   : > { %4264 = vmatprep.subr.bf16.mxu0 %v6295_v21  ;;  %4674 = vmatprep.subr.bf16.mxu1 %v6298_v22  ;;  %v6382_v21 = vld [vmem:[%s6727_s29 + $0xd2c] ss:$16 sps:$4 sm:$0xff]   ;;  %v6377_v22 = vld [vmem:[%s6727_s29 + $0xd20] ss:$16 sps:$4 sm:$0xff]  }
 0x186   : > { %4265 = vmatpush1.bf16.msra.mxu0 %v6293_v24  ;;  %4675 = vmatpush1.bf16.msra.mxu1 %v6296_v25  ;;  %v6380_v24 = vld [vmem:[%s6727_s29 + $0xd28] ss:$16 sps:$4 sm:$0xff]   ;;  %v6385_v25 = vld [vmem:[%s6727_s29 + $0xd44] ss:$16 sps:$4 sm:$0xff]  }
 0x187   : > { %4266 = vmatprep.subr.bf16.mxu0 %v6301_v26  ;;  %4676 = vmatprep.subr.bf16.mxu1 %v6304_v28  ;;  %v6388_v26 = vld [vmem:[%s6727_s29 + $0xd4c] ss:$16 sps:$4 sm:$0xff]   ;;  %v6383_v28 = vld [vmem:[%s6727_s29 + $0xd40] ss:$16 sps:$4 sm:$0xff]  }
 0x18a   : > { %4267 = vmatpush1.bf16.msra.mxu0 %v6299_v30  ;;  %4677 = vmatpush1.bf16.msra.mxu1 %v6302_v31  ;;  %v6386_v30 = vld [vmem:[%s6727_s29 + $0xd48] ss:$16 sps:$4 sm:$0xff]   ;;  %v6391_v31 = vld [vmem:[%s6727_s29 + $0xd64] ss:$16 sps:$4 sm:$0xff]  }
 0x18b   : > { %4268 = vmatprep.subr.bf16.mxu0 %v6307_v32  ;;  %4678 = vmatprep.subr.bf16.mxu1 %v6310_v17  ;;  %v6394_v32 = vld [vmem:[%s6727_s29 + $0xd6c] ss:$16 sps:$4 sm:$0xff]   ;;  %v6389_v17 = vld [vmem:[%s6727_s29 + $0xd60] ss:$16 sps:$4 sm:$0xff]  }
 0x18e   : > { %4269 = vmatpush1.bf16.msra.mxu0 %v6305_v33  ;;  %4679 = vmatpush1.bf16.msra.mxu1 %v6308_v34  ;;  %v6392_v33 = vld [vmem:[%s6727_s29 + $0xd68] ss:$16 sps:$4 sm:$0xff]   ;;  %v6397_v34 = vld [vmem:[%s6727_s29 + $0xd84] ss:$16 sps:$4 sm:$0xff]  }
 0x18f   : > { %4270 = vmatprep.subr.bf16.mxu0 %v6313_v35  ;;  %4680 = vmatprep.subr.bf16.mxu1 %v6316_v27  ;;  %v6400_v35 = vld [vmem:[%s6727_s29 + $0xd8c] ss:$16 sps:$4 sm:$0xff]   ;;  %v6395_v27 = vld [vmem:[%s6727_s29 + $0xd80] ss:$16 sps:$4 sm:$0xff]  }
 0x192   : > { %4271 = vmatpush1.bf16.msra.mxu0 %v6311_v37  ;;  %4681 = vmatpush1.bf16.msra.mxu1 %v6314_v15  ;;  %v6403_v37 = vld [vmem:[%s6727_s29 + $0xda4] ss:$16 sps:$4 sm:$0xff]   ;;  %v6406_v15 = vld [vmem:[%s6727_s29 + $0xdac] ss:$16 sps:$4 sm:$0xff]  }
 0x193   : > { %4272 = vmatprep.subr.bf16.mxu0 %v6319_v40  ;;  %4682 = vmatprep.subr.bf16.mxu1 %v6322_v41  ;;  %v6401_v40 = vld [vmem:[%s6727_s29 + $0xda0] ss:$16 sps:$4 sm:$0xff]   ;;  %v6404_v41 = vld [vmem:[%s6727_s29 + $0xda8] ss:$16 sps:$4 sm:$0xff]  }
 0x196   : > { %4273 = vmatpush1.bf16.msra.mxu0 %v6317_v23  ;;  %4683 = vmatpush1.bf16.msra.mxu1 %v6320_v43  ;;  %v6409_v23 = vld [vmem:[%s6727_s29 + $0xdc4] ss:$16 sps:$4 sm:$0xff]   ;;  %v6412_v43 = vld [vmem:[%s6727_s29 + $0xdcc] ss:$16 sps:$4 sm:$0xff]  }
 0x197   : > { %4283 = vmatprep.subr.bf16.mxu0 %v6325_v44  ;;  %4693 = vmatprep.subr.bf16.mxu1 %v6328_v29  ;;  %v6407_v44 = vld [vmem:[%s6727_s29 + $0xdc0] ss:$16 sps:$4 sm:$0xff]   ;;  %v6410_v29 = vld [vmem:[%s6727_s29 + $0xdc8] ss:$16 sps:$4 sm:$0xff]  }
 0x199   : > { %4275 = vmatmul.mubr.bf16.vlgmr.msra.gmra.mrb[0].mxu0 %v951_v47  ;;  %4685 = vmatmul.mubr.bf16.vlgmr.msra.gmra.mrb[0].mxu1 %v951_v47  ;;  %v6418_v47 = vld [vmem:[%s6727_s29 + $0xdec] ss:$16 sps:$4 sm:$0xff]  }
 0x19a   : > { %4284 = vmatpush1.bf16.msra.mxu0 %v6323_v48  ;;  %4694 = vmatpush1.bf16.msra.mxu1 %v6326_v38  ;;  %v6413_v48 = vld [vmem:[%s6727_s29 + $0xde0] ss:$16 sps:$4 sm:$0xff]   ;;  %v6416_v38 = vld [vmem:[%s6727_s29 + $0xde8] ss:$16 sps:$4 sm:$0xff]  }
 0x19b   : > { %4285 = vmatprep.subr.bf16.mxu0 %v6331_v49  ;;  %4695 = vmatprep.subr.bf16.mxu1 %v6334_v50  ;;  %v6422_v49 = vld [vmem:[%s6727_s29 + $0xe04] ss:$16 sps:$4 sm:$0xff]   ;;  %v6425_v50 = vld [vmem:[%s6727_s29 + $0xe0c] ss:$16 sps:$4 sm:$0xff]  }
 0x19c   : > { %4315 = vmatprep.mubr.bf16.mxu0 %v7192_v52  ;;  %4725 = vmatprep.mubr.bf16.mxu1 %v7192_v52 }
 0x19e   : > { %4286 = vmatpush1.bf16.msra.mxu0 %v6329_v39  ;;  %4696 = vmatpush1.bf16.msra.mxu1 %v6332_v53  ;;  %v7258_v39 = vrot.slane %v7177_v42, %v6777_v51  ;;  %v6420_v53 = vld [vmem:[%s6727_s29 + $0xe00] ss:$16 sps:$4 sm:$0xff]  }
 0x19f   : > { %4287 = vmatprep.subr.bf16.mxu0 %v6337_v55  ;;  %4697 = vmatprep.subr.bf16.mxu1 %v6340_v56  ;;  %v6423_v55 = vld [vmem:[%s6727_s29 + $0xe08] ss:$16 sps:$4 sm:$0xff]   ;;  %v6428_v56 = vld [vmem:[%s6727_s29 + $0xe24] ss:$16 sps:$4 sm:$0xff]   ;;  %v6426_v42 = vld [vmem:[%s6727_s29 + $0xe20] ss:$16 sps:$4 sm:$0xff]  }
 0x1a2   : > { %4288 = vmatpush1.bf16.msra.mxu0 %v6335_v57  ;;  %4698 = vmatpush1.bf16.msra.mxu1 %v6338_v58  ;;  %v6431_v57 = vld [vmem:[%s6727_s29 + $0xe2c] ss:$16 sps:$4 sm:$0xff]   ;;  %v954_v58 = vcombine.high %v7192_v52, %v7192_v52  ;;  %v6432_v52 = vld [vmem:[%s6727_s29 + $0xe40] ss:$16 sps:$4 sm:$0xff]  }
 0x1a3   : > { %4289 = vmatprep.subr.bf16.mxu0 %v6343_v59  ;;  %4699 = vmatprep.subr.bf16.mxu1 %v6346_v60  ;;  %v6429_v59 = vld [vmem:[%s6727_s29 + $0xe28] ss:$16 sps:$4 sm:$0xff]   ;;  %v6434_v60 = vld [vmem:[%s6727_s29 + $0xe44] ss:$16 sps:$4 sm:$0xff]  }
 0x1a6   : > { %4290 = vmatpush1.bf16.msra.mxu0 %v6341_v61  ;;  %4700 = vmatpush1.bf16.msra.mxu1 %v6344_v62  ;;  %v6437_v61 = vld [vmem:[%s6727_s29 + $0xe4c] ss:$16 sps:$4 sm:$0xff]   ;;  %v6435_v62 = vld [vmem:[%s6727_s29 + $0xe48] ss:$16 sps:$4 sm:$0xff]  }
 0x1a7   : > { %4291 = vmatprep.subr.bf16.mxu0 %v6349_v63  ;;  %4701 = vmatprep.subr.bf16.mxu1 %v6352_v0  ;;  %v6440_v63 = vld [vmem:[%s6727_s29 + $0xe64] ss:$16 sps:$4 sm:$0xff]   ;;  %v6443_v0 = vld [vmem:[%s6727_s29 + $0xe6c] ss:$16 sps:$4 sm:$0xff]  }
 0x1aa   : > { %4292 = vmatpush1.bf16.msra.mxu0 %v6347_v1  ;;  %4702 = vmatpush1.bf16.msra.mxu1 %v6350_v2  ;;  %v6438_v1 = vld [vmem:[%s6727_s29 + $0xe60] ss:$16 sps:$4 sm:$0xff]   ;;  %v6441_v2 = vld [vmem:[%s6727_s29 + $0xe68] ss:$16 sps:$4 sm:$0xff]  }
 0x1ab   : > { %4293 = vmatprep.subr.bf16.mxu0 %v6355_v3  ;;  %4703 = vmatprep.subr.bf16.mxu1 %v6358_v4  ;;  %v6446_v3 = vld [vmem:[%s6727_s29 + $0xe84] ss:$16 sps:$4 sm:$0xff]   ;;  %v6449_v4 = vld [vmem:[%s6727_s29 + $0xe8c] ss:$16 sps:$4 sm:$0xff]  }
 0x1ae   : > { %4294 = vmatpush1.bf16.msra.mxu0 %v6353_v5  ;;  %4704 = vmatpush1.bf16.msra.mxu1 %v6356_v6  ;;  %v6444_v5 = vld [vmem:[%s6727_s29 + $0xe80] ss:$16 sps:$4 sm:$0xff]   ;;  %v6447_v6 = vld [vmem:[%s6727_s29 + $0xe88] ss:$16 sps:$4 sm:$0xff]  }
 0x1af   : > { %4295 = vmatprep.subr.bf16.mxu0 %v6361_v7  ;;  %4705 = vmatprep.subr.bf16.mxu1 %v6364_v8  ;;  %v6452_v7 = vld [vmem:[%s6727_s29 + $0xea4] ss:$16 sps:$4 sm:$0xff]   ;;  %v6455_v8 = vld [vmem:[%s6727_s29 + $0xeac] ss:$16 sps:$4 sm:$0xff]  }
 0x1b2   : > { %4296 = vmatpush1.bf16.msra.mxu0 %v6359_v9  ;;  %4706 = vmatpush1.bf16.msra.mxu1 %v6362_v10  ;;  %v6450_v9 = vld [vmem:[%s6727_s29 + $0xea0] ss:$16 sps:$4 sm:$0xff]   ;;  %v6453_v10 = vld [vmem:[%s6727_s29 + $0xea8] ss:$16 sps:$4 sm:$0xff]  }
 0x1b3   : > { %4297 = vmatprep.subr.bf16.mxu0 %v6367_v11  ;;  %4707 = vmatprep.subr.bf16.mxu1 %v6370_v12  ;;  %v6458_v11 = vld [vmem:[%s6727_s29 + $0xec4] ss:$16 sps:$4 sm:$0xff]   ;;  %v6461_v12 = vld [vmem:[%s6727_s29 + $0xecc] ss:$16 sps:$4 sm:$0xff]  }
 0x1b6   : > { %4298 = vmatpush1.bf16.msra.mxu0 %v6365_v13  ;;  %4708 = vmatpush1.bf16.msra.mxu1 %v6368_v14  ;;  %v6456_v13 = vld [vmem:[%s6727_s29 + $0xec0] ss:$16 sps:$4 sm:$0xff]   ;;  %v6459_v14 = vld [vmem:[%s6727_s29 + $0xec8] ss:$16 sps:$4 sm:$0xff]  }
 0x1b7   : > { %4299 = vmatprep.subr.bf16.mxu0 %v6373_v16  ;;  %4709 = vmatprep.subr.bf16.mxu1 %v6376_v18  ;;  %v6464_v16 = vld [vmem:[%s6727_s29 + $0xee4] ss:$16 sps:$4 sm:$0xff]   ;;  %v6467_v18 = vld [vmem:[%s6727_s29 + $0xeec] ss:$16 sps:$4 sm:$0xff]  }
 0x1ba   : > { %4300 = vmatpush1.bf16.msra.mxu0 %v6371_v54  ;;  %4710 = vmatpush1.bf16.msra.mxu1 %v6374_v19  ;;  %v6462_v54 = vld [vmem:[%s6727_s29 + $0xee0] ss:$16 sps:$4 sm:$0xff]   ;;  %v6465_v19 = vld [vmem:[%s6727_s29 + $0xee8] ss:$16 sps:$4 sm:$0xff]  }
 0x1bb   : > { %4301 = vmatprep.subr.bf16.mxu0 %v6379_v20  ;;  %4711 = vmatprep.subr.bf16.mxu1 %v6382_v21  ;;  %v6470_v20 = vld [vmem:[%s6727_s29 + $0xf04] ss:$16 sps:$4 sm:$0xff]   ;;  %v6473_v21 = vld [vmem:[%s6727_s29 + $0xf0c] ss:$16 sps:$4 sm:$0xff]  }
 0x1be   : > { %4302 = vmatpush1.bf16.msra.mxu0 %v6377_v22  ;;  %4712 = vmatpush1.bf16.msra.mxu1 %v6380_v24  ;;  %v6468_v22 = vld [vmem:[%s6727_s29 + $0xf00] ss:$16 sps:$4 sm:$0xff]   ;;  %v6471_v24 = vld [vmem:[%s6727_s29 + $0xf08] ss:$16 sps:$4 sm:$0xff]  }
 0x1bf   : > { %4303 = vmatprep.subr.bf16.mxu0 %v6385_v25  ;;  %4713 = vmatprep.subr.bf16.mxu1 %v6388_v26  ;;  %v6476_v25 = vld [vmem:[%s6727_s29 + $0xf24] ss:$16 sps:$4 sm:$0xff]   ;;  %v6479_v26 = vld [vmem:[%s6727_s29 + $0xf2c] ss:$16 sps:$4 sm:$0xff]  }
 0x1c2   : > { %4304 = vmatpush1.bf16.msra.mxu0 %v6383_v28  ;;  %4714 = vmatpush1.bf16.msra.mxu1 %v6386_v30  ;;  %v6474_v28 = vld [vmem:[%s6727_s29 + $0xf20] ss:$16 sps:$4 sm:$0xff]   ;;  %v6477_v30 = vld [vmem:[%s6727_s29 + $0xf28] ss:$16 sps:$4 sm:$0xff]  }
 0x1c3   : > { %4305 = vmatprep.subr.bf16.mxu0 %v6391_v31  ;;  %4715 = vmatprep.subr.bf16.mxu1 %v6394_v32  ;;  %v6482_v31 = vld [vmem:[%s6727_s29 + $0xf44] ss:$16 sps:$4 sm:$0xff]   ;;  %v6485_v32 = vld [vmem:[%s6727_s29 + $0xf4c] ss:$16 sps:$4 sm:$0xff]  }
 0x1c6   : > { %4306 = vmatpush1.bf16.msra.mxu0 %v6389_v17  ;;  %4716 = vmatpush1.bf16.msra.mxu1 %v6392_v33  ;;  %v6480_v17 = vld [vmem:[%s6727_s29 + $0xf40] ss:$16 sps:$4 sm:$0xff]   ;;  %v6483_v33 = vld [vmem:[%s6727_s29 + $0xf48] ss:$16 sps:$4 sm:$0xff]  }
 0x1c7   : > { %4307 = vmatprep.subr.bf16.mxu0 %v6397_v34  ;;  %4717 = vmatprep.subr.bf16.mxu1 %v6400_v35  ;;  %v6488_v34 = vld [vmem:[%s6727_s29 + $0xf64] ss:$16 sps:$4 sm:$0xff]   ;;  %v6491_v35 = vld [vmem:[%s6727_s29 + $0xf6c] ss:$16 sps:$4 sm:$0xff]  }
 0x1ca   : > { %4308 = vmatpush1.bf16.msra.mxu0 %v6395_v27  ;;  %4718 = vmatpush1.bf16.msra.mxu1 %v6398_v36  ;;  %v6486_v27 = vld [vmem:[%s6727_s29 + $0xf60] ss:$16 sps:$4 sm:$0xff]   ;;  %v6489_v36 = vld [vmem:[%s6727_s29 + $0xf68] ss:$16 sps:$4 sm:$0xff]  }
 0x1cb   : > { %4309 = vmatprep.subr.bf16.mxu0 %v6403_v37  ;;  %4719 = vmatprep.subr.bf16.mxu1 %v6406_v15  ;;  %v6494_v37 = vld [vmem:[%s6727_s29 + $0xf84] ss:$16 sps:$4 sm:$0xff]   ;;  %v6497_v15 = vld [vmem:[%s6727_s29 + $0xf8c] ss:$16 sps:$4 sm:$0xff]  }
 0x1ce   : > { %4310 = vmatpush1.bf16.msra.mxu0 %v6401_v40  ;;  %4720 = vmatpush1.bf16.msra.mxu1 %v6404_v41  ;;  %v6492_v40 = vld [vmem:[%s6727_s29 + $0xf80] ss:$16 sps:$4 sm:$0xff]   ;;  %v6495_v41 = vld [vmem:[%s6727_s29 + $0xf88] ss:$16 sps:$4 sm:$0xff]  }
 0x1cf   : > { %4311 = vmatprep.subr.bf16.mxu0 %v6409_v23  ;;  %4721 = vmatprep.subr.bf16.mxu1 %v6412_v43  ;;  %v6500_v23 = vld [vmem:[%s6727_s29 + $0xfa4] ss:$16 sps:$4 sm:$0xff]   ;;  %v6503_v43 = vld [vmem:[%s6727_s29 + $0xfac] ss:$16 sps:$4 sm:$0xff]  }
 0x1d2   : > { %4312 = vmatpush1.bf16.msra.mxu0 %v6407_v44  ;;  %4722 = vmatpush1.bf16.msra.mxu1 %v6410_v29  ;;  %v6498_v44 = vld [vmem:[%s6727_s29 + $0xfa0] ss:$16 sps:$4 sm:$0xff]   ;;  %v6501_v29 = vld [vmem:[%s6727_s29 + $0xfa8] ss:$16 sps:$4 sm:$0xff]  }
 0x1d3   : > { %4313 = vmatprep.subr.bf16.mxu0 %v6415_v46  ;;  %4723 = vmatprep.subr.bf16.mxu1 %v6418_v47  ;;  %v6506_v46 = vld [vmem:[%s6727_s29 + $0xfc4] ss:$16 sps:$4 sm:$0xff]   ;;  %v6509_v47 = vld [vmem:[%s6727_s29 + $0xfcc] ss:$16 sps:$4 sm:$0xff]  }
 0x1d6   : > { %4314 = vmatpush1.bf16.msra.mxu0 %v6413_v48  ;;  %4724 = vmatpush1.bf16.msra.mxu1 %v6416_v38  ;;  %v6504_v48 = vld [vmem:[%s6727_s29 + $0xfc0] ss:$16 sps:$4 sm:$0xff]   ;;  %v6507_v38 = vld [vmem:[%s6727_s29 + $0xfc8] ss:$16 sps:$4 sm:$0xff]  }
 0x1d7   : > { %4324 = vmatprep.subr.bf16.mxu0 %v6422_v49  ;;  %4734 = vmatprep.subr.bf16.mxu1 %v6425_v50  ;;  %v6512_v49 = vld [vmem:[%s6727_s29 + $0xfe4] ss:$16 sps:$4 sm:$0xff]   ;;  %v6515_v50 = vld [vmem:[%s6727_s29 + $0xfec] ss:$16 sps:$4 sm:$0xff]  }
 0x1d9   : > { %4316 = vmatmul.mubr.bf16.vlgmr.msra.gmra.mrb[0].mxu0 %v7258_v39  ;;  %4726 = vmatmul.mubr.bf16.vlgmr.msra.gmra.mrb[0].mxu1 %v7258_v39 }
 0x1da   : > { %4325 = vmatpush1.bf16.msra.mxu0 %v6420_v53  ;;  %4735 = vmatpush1.bf16.msra.mxu1 %v6423_v55  ;;  %v7325_v53 = vld.sshfl [vmem:[%s6722_s25 + $0x10] sm:$0x13 pattern:$0x75316420] }
 0x1db   : > { %4326 = vmatprep.subr.bf16.mxu0 %v6428_v56  ;;  %4736 = vmatprep.subr.bf16.mxu1 %v6431_v57  ;;  %v6510_v55 = vld [vmem:[%s6727_s29 + $0xfe0] ss:$16 sps:$4 sm:$0xff]   ;;  %v6513_v56 = vld [vmem:[%s6727_s29 + $0xfe8] ss:$16 sps:$4 sm:$0xff]   ;;  %v6518_v57 = vld [vmem:[%s6727_s29 + $0x1004] ss:$16 sps:$4 sm:$0xff]  }
 0x1dc   : > { %4356 = vmatprep.mubr.bf16.mxu0 %v954_v58  ;;  %4766 = vmatprep.mubr.bf16.mxu1 %v954_v58  ;;  %v6521_v58 = vld [vmem:[%s6727_s29 + $0x100c] ss:$16 sps:$4 sm:$0xff]  }
 0x1de   : > { %4327 = vmatpush1.bf16.msra.mxu0 %v6426_v42  ;;  %4737 = vmatpush1.bf16.msra.mxu1 %v6429_v59  ;;  %v962_v42 = vcombine.high %v7325_v53, %v7325_v53  ;;  %v952_v59 = vcombine.high %v7258_v39, %v7258_v39  ;;  %v6522_v39 = vld [vmem:[%s6727_s29 + $0x1020] ss:$16 sps:$4 sm:$0xff]  }
 0x1df   : > { %4328 = vmatprep.subr.bf16.mxu0 %v6434_v60  ;;  %4738 = vmatprep.subr.bf16.mxu1 %v6437_v61  ;;  %v6516_v60 = vld [vmem:[%s6727_s29 + $0x1000] ss:$16 sps:$4 sm:$0xff]   ;;  %v6519_v61 = vld [vmem:[%s6727_s29 + $0x1008] ss:$16 sps:$4 sm:$0xff]  }
 0x1e2   : > { %4329 = vmatpush1.bf16.msra.mxu0 %v6432_v52  ;;  %4739 = vmatpush1.bf16.msra.mxu1 %v6435_v62  ;;  %v6524_v52 = vld [vmem:[%s6727_s29 + $0x1024] ss:$16 sps:$4 sm:$0xff]   ;;  %v6527_v62 = vld [vmem:[%s6727_s29 + $0x102c] ss:$16 sps:$4 sm:$0xff]  }
 0x1e3   : > { %4330 = vmatprep.subr.bf16.mxu0 %v6440_v63  ;;  %4740 = vmatprep.subr.bf16.mxu1 %v6443_v0  ;;  %v976_v63 = vrot.slane %v962_v42, %v6777_v51  ;;  %v6525_v0 = vld [vmem:[%s6727_s29 + $0x1028] ss:$16 sps:$4 sm:$0xff]   ;;  %v6608_v42 = vld [vmem:[%s6727_s29 + $0x11e4] ss:$16 sps:$4 sm:$0xff]  }
 0x1e6   : > { %4331 = vmatpush1.bf16.msra.mxu0 %v6438_v1  ;;  %4741 = vmatpush1.bf16.msra.mxu1 %v6441_v2  ;;  %v6530_v1 = vld [vmem:[%s6727_s29 + $0x1044] ss:$16 sps:$4 sm:$0xff]   ;;  %v6533_v2 = vld [vmem:[%s6727_s29 + $0x104c] ss:$16 sps:$4 sm:$0xff]  }
 0x1e7   : > { %4332 = vmatprep.subr.bf16.mxu0 %v6446_v3  ;;  %4742 = vmatprep.subr.bf16.mxu1 %v6449_v4  ;;  %v6528_v3 = vld [vmem:[%s6727_s29 + $0x1040] ss:$16 sps:$4 sm:$0xff]   ;;  %v6531_v4 = vld [vmem:[%s6727_s29 + $0x1048] ss:$16 sps:$4 sm:$0xff]  }
 0x1ea   : > { %4333 = vmatpush1.bf16.msra.mxu0 %v6444_v5  ;;  %4743 = vmatpush1.bf16.msra.mxu1 %v6447_v6  ;;  %v6536_v5 = vld [vmem:[%s6727_s29 + $0x1064] ss:$16 sps:$4 sm:$0xff]   ;;  %v6539_v6 = vld [vmem:[%s6727_s29 + $0x106c] ss:$16 sps:$4 sm:$0xff]  }
 0x1eb   : > { %4334 = vmatprep.subr.bf16.mxu0 %v6452_v7  ;;  %4744 = vmatprep.subr.bf16.mxu1 %v6455_v8  ;;  %v6534_v7 = vld [vmem:[%s6727_s29 + $0x1060] ss:$16 sps:$4 sm:$0xff]   ;;  %v6537_v8 = vld [vmem:[%s6727_s29 + $0x1068] ss:$16 sps:$4 sm:$0xff]  }
 0x1ee   : > { %4335 = vmatpush1.bf16.msra.mxu0 %v6450_v9  ;;  %4745 = vmatpush1.bf16.msra.mxu1 %v6453_v10  ;;  %v6542_v9 = vld [vmem:[%s6727_s29 + $0x1084] ss:$16 sps:$4 sm:$0xff]   ;;  %v6545_v10 = vld [vmem:[%s6727_s29 + $0x108c] ss:$16 sps:$4 sm:$0xff]  }
 0x1ef   : > { %4336 = vmatprep.subr.bf16.mxu0 %v6458_v11  ;;  %4746 = vmatprep.subr.bf16.mxu1 %v6461_v12  ;;  %v6540_v11 = vld [vmem:[%s6727_s29 + $0x1080] ss:$16 sps:$4 sm:$0xff]   ;;  %v6543_v12 = vld [vmem:[%s6727_s29 + $0x1088] ss:$16 sps:$4 sm:$0xff]  }
 0x1f2   : > { %4337 = vmatpush1.bf16.msra.mxu0 %v6456_v13  ;;  %4747 = vmatpush1.bf16.msra.mxu1 %v6459_v14  ;;  %v6548_v13 = vld [vmem:[%s6727_s29 + $0x10a4] ss:$16 sps:$4 sm:$0xff]   ;;  %v6551_v14 = vld [vmem:[%s6727_s29 + $0x10ac] ss:$16 sps:$4 sm:$0xff]  }
 0x1f3   : > { %4338 = vmatprep.subr.bf16.mxu0 %v6464_v16  ;;  %4748 = vmatprep.subr.bf16.mxu1 %v6467_v18  ;;  %v6546_v16 = vld [vmem:[%s6727_s29 + $0x10a0] ss:$16 sps:$4 sm:$0xff]   ;;  %v6549_v18 = vld [vmem:[%s6727_s29 + $0x10a8] ss:$16 sps:$4 sm:$0xff]  }
 0x1f6   : > { %4339 = vmatpush1.bf16.msra.mxu0 %v6462_v54  ;;  %4749 = vmatpush1.bf16.msra.mxu1 %v6465_v19  ;;  %v6554_v54 = vld [vmem:[%s6727_s29 + $0x10c4] ss:$16 sps:$4 sm:$0xff]   ;;  %v6557_v19 = vld [vmem:[%s6727_s29 + $0x10cc] ss:$16 sps:$4 sm:$0xff]  }
 0x1f7   : > { %4340 = vmatprep.subr.bf16.mxu0 %v6470_v20  ;;  %4750 = vmatprep.subr.bf16.mxu1 %v6473_v21  ;;  %v6552_v20 = vld [vmem:[%s6727_s29 + $0x10c0] ss:$16 sps:$4 sm:$0xff]   ;;  %v6555_v21 = vld [vmem:[%s6727_s29 + $0x10c8] ss:$16 sps:$4 sm:$0xff]  }
 0x1fa   : > { %4341 = vmatpush1.bf16.msra.mxu0 %v6468_v22  ;;  %4751 = vmatpush1.bf16.msra.mxu1 %v6471_v24  ;;  %v6560_v22 = vld [vmem:[%s6727_s29 + $0x10e4] ss:$16 sps:$4 sm:$0xff]   ;;  %v6563_v24 = vld [vmem:[%s6727_s29 + $0x10ec] ss:$16 sps:$4 sm:$0xff]  }
 0x1fb   : > { %4342 = vmatprep.subr.bf16.mxu0 %v6476_v25  ;;  %4752 = vmatprep.subr.bf16.mxu1 %v6479_v26  ;;  %v6558_v25 = vld [vmem:[%s6727_s29 + $0x10e0] ss:$16 sps:$4 sm:$0xff]   ;;  %v6561_v26 = vld [vmem:[%s6727_s29 + $0x10e8] ss:$16 sps:$4 sm:$0xff]  }
 0x1fe   : > { %4343 = vmatpush1.bf16.msra.mxu0 %v6474_v28  ;;  %4753 = vmatpush1.bf16.msra.mxu1 %v6477_v30  ;;  %v6566_v28 = vld [vmem:[%s6727_s29 + $0x1104] ss:$16 sps:$4 sm:$0xff]   ;;  %v6569_v30 = vld [vmem:[%s6727_s29 + $0x110c] ss:$16 sps:$4 sm:$0xff]  }
 0x1ff   : > { %4344 = vmatprep.subr.bf16.mxu0 %v6482_v31  ;;  %4754 = vmatprep.subr.bf16.mxu1 %v6485_v32  ;;  %v6564_v31 = vld [vmem:[%s6727_s29 + $0x1100] ss:$16 sps:$4 sm:$0xff]   ;;  %v6567_v32 = vld [vmem:[%s6727_s29 + $0x1108] ss:$16 sps:$4 sm:$0xff]  }
 0x202   : > { %4345 = vmatpush1.bf16.msra.mxu0 %v6480_v17  ;;  %4755 = vmatpush1.bf16.msra.mxu1 %v6483_v33  ;;  %v6572_v17 = vld [vmem:[%s6727_s29 + $0x1124] ss:$16 sps:$4 sm:$0xff]   ;;  %v6575_v33 = vld [vmem:[%s6727_s29 + $0x112c] ss:$16 sps:$4 sm:$0xff]  }
 0x203   : > { %4346 = vmatprep.subr.bf16.mxu0 %v6488_v34  ;;  %4756 = vmatprep.subr.bf16.mxu1 %v6491_v35  ;;  %v6570_v34 = vld [vmem:[%s6727_s29 + $0x1120] ss:$16 sps:$4 sm:$0xff]   ;;  %v6573_v35 = vld [vmem:[%s6727_s29 + $0x1128] ss:$16 sps:$4 sm:$0xff]  }
 0x206   : > { %4347 = vmatpush1.bf16.msra.mxu0 %v6486_v27  ;;  %4757 = vmatpush1.bf16.msra.mxu1 %v6489_v36  ;;  %v6578_v27 = vld [vmem:[%s6727_s29 + $0x1144] ss:$16 sps:$4 sm:$0xff]   ;;  %v6581_v36 = vld [vmem:[%s6727_s29 + $0x114c] ss:$16 sps:$4 sm:$0xff]  }
 0x207   : > { %4348 = vmatprep.subr.bf16.mxu0 %v6494_v37  ;;  %4758 = vmatprep.subr.bf16.mxu1 %v6497_v15  ;;  %v6576_v37 = vld [vmem:[%s6727_s29 + $0x1140] ss:$16 sps:$4 sm:$0xff]   ;;  %v6579_v15 = vld [vmem:[%s6727_s29 + $0x1148] ss:$16 sps:$4 sm:$0xff]  }
 0x20a   : > { %4349 = vmatpush1.bf16.msra.mxu0 %v6492_v40  ;;  %4759 = vmatpush1.bf16.msra.mxu1 %v6495_v41  ;;  %v6584_v40 = vld [vmem:[%s6727_s29 + $0x1164] ss:$16 sps:$4 sm:$0xff]   ;;  %v6587_v41 = vld [vmem:[%s6727_s29 + $0x116c] ss:$16 sps:$4 sm:$0xff]  }
 0x20b   : > { %4350 = vmatprep.subr.bf16.mxu0 %v6500_v23  ;;  %4760 = vmatprep.subr.bf16.mxu1 %v6503_v43  ;;  %v6582_v23 = vld [vmem:[%s6727_s29 + $0x1160] ss:$16 sps:$4 sm:$0xff]   ;;  %v6585_v43 = vld [vmem:[%s6727_s29 + $0x1168] ss:$16 sps:$4 sm:$0xff]  }
 0x20e   : > { %4351 = vmatpush1.bf16.msra.mxu0 %v6498_v44  ;;  %4761 = vmatpush1.bf16.msra.mxu1 %v6501_v29  ;;  %v6590_v44 = vld [vmem:[%s6727_s29 + $0x1184] ss:$16 sps:$4 sm:$0xff]   ;;  %v6593_v29 = vld [vmem:[%s6727_s29 + $0x118c] ss:$16 sps:$4 sm:$0xff]  }
 0x20f   : > { %4352 = vmatprep.subr.bf16.mxu0 %v6506_v46  ;;  %4762 = vmatprep.subr.bf16.mxu1 %v6509_v47  ;;  %v6588_v46 = vld [vmem:[%s6727_s29 + $0x1180] ss:$16 sps:$4 sm:$0xff]   ;;  %v6591_v47 = vld [vmem:[%s6727_s29 + $0x1188] ss:$16 sps:$4 sm:$0xff]  }
 0x212   : > { %4353 = vmatpush1.bf16.msra.mxu0 %v6504_v48  ;;  %4763 = vmatpush1.bf16.msra.mxu1 %v6507_v38  ;;  %v6596_v48 = vld [vmem:[%s6727_s29 + $0x11a4] ss:$16 sps:$4 sm:$0xff]   ;;  %v6599_v38 = vld [vmem:[%s6727_s29 + $0x11ac] ss:$16 sps:$4 sm:$0xff]  }
 0x213   : > { %4354 = vmatprep.subr.bf16.mxu0 %v6512_v49  ;;  %4764 = vmatprep.subr.bf16.mxu1 %v6515_v50  ;;  %v6594_v49 = vld [vmem:[%s6727_s29 + $0x11a0] ss:$16 sps:$4 sm:$0xff]   ;;  %v6597_v50 = vld [vmem:[%s6727_s29 + $0x11a8] ss:$16 sps:$4 sm:$0xff]  }
 0x216   : > { %4355 = vmatpush1.bf16.msra.mxu0 %v6510_v55  ;;  %4765 = vmatpush1.bf16.msra.mxu1 %v6513_v56  ;;  %v6602_v55 = vld [vmem:[%s6727_s29 + $0x11c4] ss:$16 sps:$4 sm:$0xff]   ;;  %v6605_v56 = vld [vmem:[%s6727_s29 + $0x11cc] ss:$16 sps:$4 sm:$0xff]  }
 0x217   : > { %4365 = vmatprep.subr.bf16.mxu0 %v6518_v57  ;;  %4775 = vmatprep.subr.bf16.mxu1 %v6521_v58  ;;  %v6600_v57 = vld [vmem:[%s6727_s29 + $0x11c0] ss:$16 sps:$4 sm:$0xff]   ;;  %v6603_v58 = vld [vmem:[%s6727_s29 + $0x11c8] ss:$16 sps:$4 sm:$0xff]  }
 0x219   : > { %4357 = vmatmul.mubr.bf16.vlgmr.msra.gmra.mrb[0].mxu0 %v952_v59  ;;  %4767 = vmatmul.mubr.bf16.vlgmr.msra.gmra.mrb[0].mxu1 %v952_v59  ;;  %v6611_v59 = vld [vmem:[%s6727_s29 + $0x11ec] ss:$16 sps:$4 sm:$0xff]  }
 0x21a   : > { %4366 = vmatpush1.bf16.msra.mxu0 %v6516_v60  ;;  %4776 = vmatpush1.bf16.msra.mxu1 %v6519_v61  ;;  %v6606_v60 = vld [vmem:[%s6727_s29 + $0x11e0] ss:$16 sps:$4 sm:$0xff]   ;;  %v6609_v61 = vld [vmem:[%s6727_s29 + $0x11e8] ss:$16 sps:$4 sm:$0xff]  }
 0x21b   : > { %4367 = vmatprep.subr.bf16.mxu0 %v6524_v52  ;;  %4777 = vmatprep.subr.bf16.mxu1 %v6527_v62  ;;  %v6614_v52 = vld [vmem:[%s6727_s29 + $0x1204] ss:$16 sps:$4 sm:$0xff]   ;;  %v6617_v62 = vld [vmem:[%s6727_s29 + $0x120c] ss:$16 sps:$4 sm:$0xff]  }
 0x21c   : > { %4397 = vmatprep.mubr.bf16.mxu0 %v976_v63  ;;  %4807 = vmatprep.mubr.bf16.mxu1 %v976_v63  ;;  %v7402_v63 = vrot.slane %v7325_v53, %v6777_v51  ;;  %v6618_v51 = vld [vmem:[%s6727_s29 + $0x1220] ss:$16 sps:$4 sm:$0xff]   ;;  %v6621_v53 = vld [vmem:[%s6727_s29 + $0x1228] ss:$16 sps:$4 sm:$0xff]  }
 0x21e   : > { %4368 = vmatpush1.bf16.msra.mxu0 %v6522_v39  ;;  %4778 = vmatpush1.bf16.msra.mxu1 %v6525_v0  ;;  %v6612_v39 = vld [vmem:[%s6727_s29 + $0x1200] ss:$16 sps:$4 sm:$0xff]   ;;  %v6615_v0 = vld [vmem:[%s6727_s29 + $0x1208] ss:$16 sps:$4 sm:$0xff]  }
 0x21f   : > { %4369 = vmatprep.subr.bf16.mxu0 %v6530_v1  ;;  %4779 = vmatprep.subr.bf16.mxu1 %v6533_v2  ;;  %v6620_v1 = vld [vmem:[%s6727_s29 + $0x1224] ss:$16 sps:$4 sm:$0xff]   ;;  %v6623_v2 = vld [vmem:[%s6727_s29 + $0x122c] ss:$16 sps:$4 sm:$0xff]  }
 0x222   : > { %4370 = vmatpush1.bf16.msra.mxu0 %v6528_v3  ;;  %4780 = vmatpush1.bf16.msra.mxu1 %v6531_v4  ;;  %v6626_v3 = vld [vmem:[%s6727_s29 + $0x1244] ss:$16 sps:$4 sm:$0xff]   ;;  %v6629_v4 = vld [vmem:[%s6727_s29 + $0x124c] ss:$16 sps:$4 sm:$0xff]  }
 0x223   : > { %4371 = vmatprep.subr.bf16.mxu0 %v6536_v5  ;;  %4781 = vmatprep.subr.bf16.mxu1 %v6539_v6  ;;  %v6672_v5 = vmov 0   ;;  %v6624_v6 = vld [vmem:[%s6727_s29 + $0x1240] ss:$16 sps:$4 sm:$0xff]  }
 0x226   : > { %4372 = vmatpush1.bf16.msra.mxu0 %v6534_v7  ;;  %4782 = vmatpush1.bf16.msra.mxu1 %v6537_v8  ;;  %v6627_v7 = vld [vmem:[%s6727_s29 + $0x1248] ss:$16 sps:$4 sm:$0xff]   ;;  %v6632_v8 = vld [vmem:[%s6727_s29 + $0x1264] ss:$16 sps:$4 sm:$0xff]  }
 0x227   : > { %4373 = vmatprep.subr.bf16.mxu0 %v6542_v9  ;;  %4783 = vmatprep.subr.bf16.mxu1 %v6545_v10  ;;  %v6635_v9 = vld [vmem:[%s6727_s29 + $0x126c] ss:$16 sps:$4 sm:$0xff]   ;;  %v6630_v10 = vld [vmem:[%s6727_s29 + $0x1260] ss:$16 sps:$4 sm:$0xff]  }
 0x22a   : > { %4374 = vmatpush1.bf16.msra.mxu0 %v6540_v11  ;;  %4784 = vmatpush1.bf16.msra.mxu1 %v6543_v12  ;;  %v6633_v11 = vld [vmem:[%s6727_s29 + $0x1268] ss:$16 sps:$4 sm:$0xff]   ;;  %v6638_v12 = vld [vmem:[%s6727_s29 + $0x1284] ss:$16 sps:$4 sm:$0xff]  }
 0x22b   : > { %4375 = vmatprep.subr.bf16.mxu0 %v6548_v13  ;;  %4785 = vmatprep.subr.bf16.mxu1 %v6551_v14  ;;  %v6641_v13 = vld [vmem:[%s6727_s29 + $0x128c] ss:$16 sps:$4 sm:$0xff]   ;;  %v6636_v14 = vld [vmem:[%s6727_s29 + $0x1280] ss:$16 sps:$4 sm:$0xff]  }
 0x22e   : > { %4376 = vmatpush1.bf16.msra.mxu0 %v6546_v16  ;;  %4786 = vmatpush1.bf16.msra.mxu1 %v6549_v18  ;;  %v6639_v16 = vld [vmem:[%s6727_s29 + $0x1288] ss:$16 sps:$4 sm:$0xff]   ;;  %v6644_v18 = vld [vmem:[%s6727_s29 + $0x12a4] ss:$16 sps:$4 sm:$0xff]  }
 0x22f   : > { %4377 = vmatprep.subr.bf16.mxu0 %v6554_v54  ;;  %4787 = vmatprep.subr.bf16.mxu1 %v6557_v19  ;;  %v6647_v54 = vld [vmem:[%s6727_s29 + $0x12ac] ss:$16 sps:$4 sm:$0xff]   ;;  %v6642_v19 = vld [vmem:[%s6727_s29 + $0x12a0] ss:$16 sps:$4 sm:$0xff]  }
 0x232   : > { %4378 = vmatpush1.bf16.msra.mxu0 %v6552_v20  ;;  %4788 = vmatpush1.bf16.msra.mxu1 %v6555_v21  ;;  %v6645_v20 = vld [vmem:[%s6727_s29 + $0x12a8] ss:$16 sps:$4 sm:$0xff]   ;;  %v6650_v21 = vld [vmem:[%s6727_s29 + $0x12c4] ss:$16 sps:$4 sm:$0xff]  }
 0x233   : > { %4379 = vmatprep.subr.bf16.mxu0 %v6560_v22  ;;  %4789 = vmatprep.subr.bf16.mxu1 %v6563_v24  ;;  %v6653_v22 = vld [vmem:[%s6727_s29 + $0x12cc] ss:$16 sps:$4 sm:$0xff]   ;;  %v6648_v24 = vld [vmem:[%s6727_s29 + $0x12c0] ss:$16 sps:$4 sm:$0xff]  }
 0x236   : > { %4380 = vmatpush1.bf16.msra.mxu0 %v6558_v25  ;;  %4790 = vmatpush1.bf16.msra.mxu1 %v6561_v26  ;;  %v6651_v25 = vld [vmem:[%s6727_s29 + $0x12c8] ss:$16 sps:$4 sm:$0xff]   ;;  %v6656_v26 = vld [vmem:[%s6727_s29 + $0x12e4] ss:$16 sps:$4 sm:$0xff]  }
 0x237   : > { %4381 = vmatprep.subr.bf16.mxu0 %v6566_v28  ;;  %4791 = vmatprep.subr.bf16.mxu1 %v6569_v30  ;;  %v6659_v28 = vld [vmem:[%s6727_s29 + $0x12ec] ss:$16 sps:$4 sm:$0xff]   ;;  %v6654_v30 = vld [vmem:[%s6727_s29 + $0x12e0] ss:$16 sps:$4 sm:$0xff]  }
 0x23a   : > { %4382 = vmatpush1.bf16.msra.mxu0 %v6564_v31  ;;  %4792 = vmatpush1.bf16.msra.mxu1 %v6567_v32  ;;  %v6657_v31 = vld [vmem:[%s6727_s29 + $0x12e8] ss:$16 sps:$4 sm:$0xff]   ;;  %v977_v32 = vcombine.high %v7402_v63, %v7402_v63 }
 0x23b   : > { %4383 = vmatprep.subr.bf16.mxu0 %v6572_v17  ;;  %4793 = vmatprep.subr.bf16.mxu1 %v6575_v33  ;;  %v6673_v17 = vmov 1983009808  }
 0x23c   : > { %v4864_v33 = vunpack.c.l.s4 %v6673_v17 }
 0x23e   : > { %4384 = vmatpush1.bf16.msra.mxu0 %v6570_v34  ;;  %4794 = vmatpush1.bf16.msra.mxu1 %v6573_v35  ;;  %v4865_v34 = vunpack.c.0.s8 %v4864_v33 }
 0x23f   : > { %4385 = vmatprep.subr.bf16.mxu0 %v6578_v27  ;;  %4795 = vmatprep.subr.bf16.mxu1 %v6581_v36 }
 0x240   : > { %v4868_v36 = vsub.s32 %v4865_v34, %v6769_v45 }
 0x242   : > { %4386 = vmatpush1.bf16.msra.mxu0 %v6576_v37  ;;  %4796 = vmatpush1.bf16.msra.mxu1 %v6579_v15 }
 0x243   : > { %4387 = vmatprep.subr.bf16.mxu0 %v6584_v40  ;;  %4797 = vmatprep.subr.bf16.mxu1 %v6587_v41 }
 0x246   : > { %4388 = vmatpush1.bf16.msra.mxu0 %v6582_v23  ;;  %4798 = vmatpush1.bf16.msra.mxu1 %v6585_v43 }
 0x247   : > { %4389 = vmatprep.subr.bf16.mxu0 %v6590_v44  ;;  %4799 = vmatprep.subr.bf16.mxu1 %v6593_v29 }
 0x24a   : > { %4390 = vmatpush1.bf16.msra.mxu0 %v6588_v46  ;;  %4800 = vmatpush1.bf16.msra.mxu1 %v6591_v47 }
 0x24b   : > { %4391 = vmatprep.subr.bf16.mxu0 %v6596_v48  ;;  %4801 = vmatprep.subr.bf16.mxu1 %v6599_v38  ;;  %v242_v48 = vld [vmem:[#allocation2] sm:$0xff] }
 0x24e   : > { %4392 = vmatpush1.bf16.msra.mxu0 %v6594_v49  ;;  %4802 = vmatpush1.bf16.msra.mxu1 %v6597_v50  ;;  %v4886_v50 = vld [vmem:[%s7458_s2] sm:$0xf] (!%p5657_p6) }
 0x24f   : > { %4393 = vmatprep.subr.bf16.mxu0 %v6602_v55  ;;  %4803 = vmatprep.subr.bf16.mxu1 %v6605_v56  ;;  %v4890_v55 = vsub.s32 (!%p5657_p6), 0, %v6769_v45  ;;  %v4894_v56 = vsub.s32 (!%p5657_p6), 1, %v6769_v45 }
 0x252   : > { %4394 = vmatpush1.bf16.msra.mxu0 %v6600_v57  ;;  %4804 = vmatpush1.bf16.msra.mxu1 %v6603_v58  ;;  %v4898_v57 = vsub.s32 (!%p5657_p6), 2, %v6769_v45  ;;  %v4902_v58 = vsub.s32 (!%p5657_p6), 3, %v6769_v45 }
 0x253   : > { %4395 = vmatprep.subr.bf16.mxu0 %v6608_v42  ;;  %4805 = vmatprep.subr.bf16.mxu1 %v6611_v59  ;;  %v4924_v42 = vld [vmem:[%s7459_s3] sm:$0xf] (!%p5657_p6)  ;;  %v4891_v59 = vrot.slane (!%p5657_p6), %v4886_v50, %v4890_v55 }
 0x256   : > { %4396 = vmatpush1.bf16.msra.mxu0 %v6606_v60  ;;  %4806 = vmatpush1.bf16.msra.mxu1 %v6609_v61  ;;  %v4895_v60 = vrot.slane (!%p5657_p6), %v4886_v50, %v4894_v56  ;;  %v4899_v61 = vrot.slane (!%p5657_p6), %v4886_v50, %v4898_v57 }
 0x257   : > { %4406 = vmatprep.subr.bf16.mxu0 %v6614_v52  ;;  %4816 = vmatprep.subr.bf16.mxu1 %v6617_v62  ;;  %v4929_v52 = vrot.slane (!%p5657_p6), %v4924_v42, %v4890_v55  ;;  %v4903_v62 = vrot.slane (!%p5657_p6), %v4886_v50, %v4902_v58 }
 0x259   : > { %4398 = vmatmul.mubr.bf16.vlgmr.msra.gmra.mrb[0].mxu0 %v7402_v63  ;;  %4808 = vmatmul.mubr.bf16.vlgmr.msra.gmra.mrb[0].mxu1 %v7402_v63  ;;  %v4933_v63 = vrot.slane (!%p5657_p6), %v4924_v42, %v4894_v56 }
 0x25a   : > { %4407 = vmatpush1.bf16.msra.mxu0 %v6612_v39  ;;  %4817 = vmatpush1.bf16.msra.mxu1 %v6615_v0  ;;  %v4937_v39 = vrot.slane (!%p5657_p6), %v4924_v42, %v4898_v57  ;;  %v4941_v0 = vrot.slane (!%p5657_p6), %v4924_v42, %v4902_v58 }
 0x25b   : > { %4408 = vmatprep.subr.bf16.mxu0 %v6620_v1  ;;  %4818 = vmatprep.subr.bf16.mxu1 %v6623_v2  ;;  %v4904_v1 = vcombine.low (!%p5657_p6), %v4891_v59, %v4895_v60  ;;  %v4905_v2 = vcombine.low (!%p5657_p6), %v4899_v61, %v4903_v62 }
 0x25c   : > { %4438 = vmatprep.mubr.bf16.mxu0 %v6672_v5  ;;  %4848 = vmatprep.mubr.bf16.mxu1 %v6672_v5 }
 0x25e   : > { %4409 = vmatpush1.bf16.msra.mxu0 %v6618_v51  ;;  %4819 = vmatpush1.bf16.msra.mxu1 %v6621_v53  ;;  %v4942_v51 = vcombine.low (!%p5657_p6), %v4929_v52, %v4933_v63  ;;  %v4943_v53 = vcombine.low (!%p5657_p6), %v4937_v39, %v4941_v0 }
 0x25f   : > { %4410 = vmatprep.subr.bf16.mxu0 %v6626_v3  ;;  %4820 = vmatprep.subr.bf16.mxu1 %v6629_v4  ;;  %v4912_v3 = vrot.slane (!%p5657_p6), %v4904_v1, %v4868_v36  ;;  %v4919_v4 = vrot.slane (!%p5657_p6), %v4905_v2, %v4868_v36 }
 0x260   : > { %v4950_v5 = vrot.slane (!%p5657_p6), %v4942_v51, %v4868_v36  ;;  %v4957_v45 = vrot.slane (!%p5657_p6), %v4943_v53, %v4868_v36 }
 0x262   : > { %4411 = vmatpush1.bf16.msra.mxu0 %v6624_v6  ;;  %4821 = vmatpush1.bf16.msra.mxu1 %v6627_v7  ;;  %v4920_v7 = vcombine.low (!%p5657_p6), %v4912_v3, %v4919_v4 }
 0x263   : > { %4412 = vmatprep.subr.bf16.mxu0 %v6632_v8  ;;  %4822 = vmatprep.subr.bf16.mxu1 %v6635_v9  ;;  %v4958_v9 = vcombine.low (!%p5657_p6), %v4950_v5, %v4957_v45 }
 0x266   : > { %4413 = vmatpush1.bf16.msra.mxu0 %v6630_v10  ;;  %4823 = vmatpush1.bf16.msra.mxu1 %v6633_v11 }
 0x267   : > { %4414 = vmatprep.subr.bf16.mxu0 %v6638_v12  ;;  %4824 = vmatprep.subr.bf16.mxu1 %v6641_v13 }
 0x26a   : > { %4415 = vmatpush1.bf16.msra.mxu0 %v6636_v14  ;;  %4825 = vmatpush1.bf16.msra.mxu1 %v6639_v16 }
 0x26b   : > { %4416 = vmatprep.subr.bf16.mxu0 %v6644_v18  ;;  %4826 = vmatprep.subr.bf16.mxu1 %v6647_v54 }
 0x26e   : > { %4417 = vmatpush1.bf16.msra.mxu0 %v6642_v19  ;;  %4827 = vmatpush1.bf16.msra.mxu1 %v6645_v20 }
 0x26f   : > { %4418 = vmatprep.subr.bf16.mxu0 %v6650_v21  ;;  %4828 = vmatprep.subr.bf16.mxu1 %v6653_v22 }
 0x272   : > { %4419 = vmatpush1.bf16.msra.mxu0 %v6648_v24  ;;  %4829 = vmatpush1.bf16.msra.mxu1 %v6651_v25 }
 0x273   : > { %4420 = vmatprep.subr.bf16.mxu0 %v6656_v26  ;;  %4830 = vmatprep.subr.bf16.mxu1 %v6659_v28  ;;  %v5658_v26 = vld [vmem:[#allocation3] ss:$0 sm:$0xff] (!%p5657_p6) }
 0x276   : > { %4421 = vmatpush1.bf16.msra.mxu0 %v6654_v30  ;;  %4831 = vmatpush1.bf16.msra.mxu1 %v6657_v31 }
 0x279   : > { %4439 = vmatmul.mubr.bf16.vlgmr.msra.gmra.mrb[0].mxu0 %v977_v32  ;;  %4849 = vmatmul.mubr.bf16.vlgmr.msra.gmra.mrb[0].mxu1 %v977_v32 }
 0x34c   : > { %v4440_v35 = vpop.f32.mrb[0].mxu0  ;;  %v4850_v27 = vpop.f32.mrb[0].mxu1 }
 0x34d   : > { %v4442_v37 = vpop.f32.mrb[1].mxu0  ;;  %v4852_v15 = vpop.f32.mrb[1].mxu1 }
 0x34e   : > { %v4861_v40 = vcombine.low %v4440_v35, %v4442_v37  ;;  %v4862_v41 = vcombine.low %v4850_v27, %v4852_v15  ;;  %v4444_v23 = vpop.f32.mrb[2].mxu0  ;;  %v4854_v43 = vpop.f32.mrb[2].mxu1 }
 0x34f   : > { %v4445_v44 = vpop.f32.mrb[3].mxu0  ;;  %v4855_v29 = vpop.f32.mrb[3].mxu1 }
 0x350   : > { %v4869_v46 = vrot.slane %v4861_v40, %v4868_v36  ;;  %v4876_v47 = vrot.slane %v4862_v41, %v4868_v36  ;;  %4884 = sbr.rel (%p5657_p6) target bundleno = 1035 (0x40b), region = 48 }
 0x352   : > { %v4877_v38 = vcombine.low %v4869_v46, %v4876_v47 }
 0x354   : > { %v4879_v49 = vadd.f32 %v4877_v38, %v242_v48 }
 0x356   : > { %4880 = vst [vmem:[#allocation2] sm:$0xff] %v4879_v49 }
 0x35d   : > { %v4885_v6 = vld [vmem:[#allocation2] sm:$0xff] }
 0x35e   : > { %v4922_v8 = vadd.f32 %v4920_v7, %v4885_v6 }
 0x360   : > { %v4923_v10 = vmax.f32 %v4922_v8, 0.0 }
 0x362   : > { %v4960_v11 = vmul.f32 %v4958_v9, %v4923_v10 }
 0x364   : > { %v4962_v12 = vcombine.high %v4960_v11, %v4960_v11  ;;  %v4969_v13 = vrot.slane %v4960_v11, %v4868_v36 }
 0x366   : > { %v4976_v14 = vrot.slane %v4962_v12, %v4868_v36  ;;  %v4977_v16 = vcombine.high %v4969_v13, %v4969_v13  ;;  %v4984_v18 = vsel %vm4983_vm0, %v4969_v13, 0.0 }
 0x368   : > { %v4978_v54 = vcombine.high %v4976_v14, %v4976_v14  ;;  %v4985_v19 = vsel %vm4983_vm0, %v4977_v16, 0.0  ;;  %v4987_v20 = vsel %vm4983_vm0, %v4976_v14, 0.0 }
 0x369   : > { %v4986_v21 = vadd.f32 %v4985_v19, %v4984_v18 }
 0x36a   : > { %v4989_v22 = vsel %vm4983_vm0, %v4978_v54, 0.0 }
 0x36b   : > { %v4988_v24 = vadd.f32 %v4987_v20, %v4986_v21 }
 0x36d   : > { %v4990_v25 = vadd.f32 %v4989_v22, %v4988_v24 }
 0x36f   : > { %4991 = vadd.xlane.f32.xlu0 %v4990_v25 }
 0x3fc   : > { %v4992_v28 = vpop.xlane.xlu0 %4991 }
 0x3fd   : > { %v5000_v30 = vadd.f32 %v5658_v26, %v4992_v28 }
 0x3ff   : > { %6660 = vtanh.f32 %v5000_v30 }
 0x409   : > { %v6661_v31 = vpop.eup %6660 }
 0x40a   : > { %5003 = vst.msk [vmem:[%s7461_s5] sm:$0x3] %vm5002_vm1, %v6661_v31 }
 0x40b PF: > { %s17_s20 = sadd.s32 1, %s6668_s20  }
 0x40c   : > { %p14_p7 = scmp.ge.s32.totalorder %s17_s20, 8  }
 0x40e   :  { %16 = sbr.rel (!%p14_p7) target bundleno = 3 (0x3), region = 77 }

</bundles_post_ra>
